<compile_context>
chip_gen: v7x
topology: tpu7x:2x2x1
jax: 0.10.0
libtpu: 0.0.40
codegen_flags: <defaults>
</compile_context>

<pallas_src>
import jax
import jax.numpy as jnp
import numpy as np
from jax.experimental import pallas as pl
from jax.experimental.pallas import tpu as pltpu


# ------------------------------ host-side helpers ------------------------------
def _make_tap_masks_and_offsets(D, H, W, kD, kH, kW, pd, ph, pw):
    """Per-tap validity masks (flattened DHW) and flat-index offsets for the shift trick."""
    d = np.arange(D)[:, None, None]
    h = np.arange(H)[None, :, None]
    w = np.arange(W)[None, None, :]
    masks, offsets = [], []
    for kd in range(kD):
        for kh in range(kH):
            for kw in range(kW):
                dd, dh, dw = kd - pd, kh - ph, kw - pw
                valid = ((d + dd >= 0) & (d + dd < D) &
                         (h + dh >= 0) & (h + dh < H) &
                         (w + dw >= 0) & (w + dw < W))
                masks.append(valid.reshape(-1).astype(np.float32))
                offsets.append(dd * H * W + dh * W + dw)
    return np.stack(masks, axis=0), offsets


# --------------------------------- fused kernel ---------------------------------
def _make_block_kernel(conv_num, offsets, pad_flat):
    def kernel(*args):
        x_ref = args[0]                                    # [1, Cin0, DHW]
        layer_args = args[1:1 + 3 * conv_num]              # (w_taps, scale, bias) per layer
        m_ref = args[1 + 3 * conv_num]                     # [n_taps, DHW] tap masks
        sw1t_ref, sb1_ref, sw2_ref, sb2_ref = args[2 + 3 * conv_num:6 + 3 * conv_num]
        out_ref = args[6 + 3 * conv_num]                   # [1, Cout, DHW]
        stage_ref = args[7 + 3 * conv_num]                 # VMEM [max_cin, DHW + 2*pad_flat]

        dhw = x_ref.shape[2]

        # Zero ONLY the two halo regions (interior is fully overwritten each layer).  The
        # halos must be finite so masked-out partial-matmul columns can't turn into NaN.
        if pad_flat > 0:
            halo = jnp.zeros((stage_ref.shape[0], pad_flat), stage_ref.dtype)
            stage_ref[:, :pad_flat] = halo
            stage_ref[:, pad_flat + dhw:] = halo

        x0 = x_ref[0].astype(jnp.float32)                  # [Cin0, DHW] residual / layer-0 input
        cur = x0
        for l in range(conv_num):
            w_ref = layer_args[3 * l]                      # [n_taps*Cout, Cin]
            s_ref = layer_args[3 * l + 1]                  # [Cout, 1] folded BN scale
            b_ref = layer_args[3 * l + 2]                  # [Cout, 1] folded BN bias
            cin = cur.shape[0]
            cout = s_ref.shape[0]

            # Stage the activation with a zero halo; tap t reads a lane-shifted window and the
            # partial [Cout, DHW] result is masked per spatial position (== masking the input).
            stage_ref[:cin, pad_flat:pad_flat + dhw] = cur
            acc = None
            for t, off in enumerate(offsets):
                w_tap = w_ref[t * cout:(t + 1) * cout, :]                  # [Cout, Cin]
                piece = stage_ref[:cin, pad_flat + off:pad_flat + off + dhw]
                part = jnp.dot(w_tap, piece, preferred_element_type=jnp.float32)
                if off != 0:
                    part = part * m_ref[t:t + 1, :]
                acc = part if acc is None else acc + part                  # [Cout, DHW]

            y = acc * s_ref[...] + b_ref[...]              # BatchNorm (inference, folded)
            cur = jnp.where(y > 0, y, 0.1 * y)             # LeakyReLU(0.1)

        # ---- SE block: global-avg-pool FIRST, then two tiny 1x1x1 convs ----
        p = jnp.mean(cur, axis=1, keepdims=True)                               # [C, 1]
        h = jnp.sum(sw1t_ref[...] * p, axis=0, keepdims=True) + sb1_ref[...]   # [1, Cr]
        h = jnp.where(h > 0, h, 0.1 * h)                                       # LeakyReLU(0.1)
        g = jax.nn.sigmoid(
            jnp.sum(sw2_ref[...] * h, axis=1, keepdims=True) + sb2_ref[...])   # [C, 1]

        out_ref[0] = (cur * g + x0).astype(out_ref.dtype)                      # SE gate + residual

    return kernel


# --------------------------------- module glue ----------------------------------
def basic_block3d_forward(x, params):
    """x: [N, C, D, H, W] float32 (PyTorch NCDHW layout)."""
    N, cin0, D, H, W = x.shape
    dhw = D * H * W
    layers = params["layers"]
    conv_num = len(layers)
    planes = layers[0]["scale"].shape[0]
    size = params["size"]
    kD, kH, kW = 3, 3, size
    pw = size // 2
    assert cin0 == planes, "residual path requires inplanes == planes (stride=1, no downsample)"

    masks_np, offsets = _make_tap_masks_and_offsets(D, H, W, kD, kH, kW, 1, 1, pw)
    masks = jnp.asarray(masks_np)
    max_off = max(abs(o) for o in offsets)
    pad_flat = int(np.ceil(max_off / 128.0)) * 128 if max_off > 0 else 0
    max_cin = max(cin0, planes)

    x_flat = x.reshape(N, cin0, dhw)                       # lane-dense activation layout

    inputs = [x_flat]
    in_specs = [pl.BlockSpec((1, cin0, dhw), lambda n: (n, 0, 0))]
    for lyr in layers:
        for arr in (lyr["w_taps"], lyr["scale"], lyr["bias"]):
            inputs.append(arr)
            in_specs.append(pl.BlockSpec(arr.shape, lambda n: (0, 0)))
    se = params["se"]
    se_kernel_args = (masks, se["w1"].T, se["b1"].reshape(1, -1), se["w2"], se["b2"])
    for arr in se_kernel_args:
        inputs.append(arr)
        in_specs.append(pl.BlockSpec(arr.shape, lambda n: (0, 0)))

    kernel = _make_block_kernel(conv_num, offsets, pad_flat)
    out_flat = pl.pallas_call(
        kernel,
        out_shape=jax.ShapeDtypeStruct((N, planes, dhw), x.dtype),
        grid=(N,),
        in_specs=in_specs,
        out_specs=pl.BlockSpec((1, planes, dhw), lambda n: (n, 0, 0)),
        scratch_shapes=[
            pltpu.VMEM((max_cin, dhw + 2 * pad_flat), jnp.float32),   # flat-padded staging buffer
        ],
        compiler_params=pltpu.CompilerParams(
            dimension_semantics=("parallel",),
        ),
    )(*inputs)
    return out_flat.reshape(N, planes, D, H, W)


def init_params(key, inplanes, planes, size, conv_num=3, eps=1e-5):
    kD, kH, kW = 3, 3, size
    n_taps = kD * kH * kW
    layers = []
    for i in range(conv_num):
        cin = inplanes if i == 0 else planes
        key, kw_, kg, kb, km, kv = jax.random.split(key, 6)
        fan_in = cin * kD * kH * kW
        w_t = jax.random.normal(kw_, (planes, cin, kD, kH, kW), jnp.float32) / np.sqrt(fan_in)
        gamma = 1.0 + 0.1 * jax.random.normal(kg, (planes,), jnp.float32)
        beta = 0.1 * jax.random.normal(kb, (planes,), jnp.float32)
        rmean = 0.1 * jax.random.normal(km, (planes,), jnp.float32)
        rvar = 1.0 + 0.1 * jax.random.uniform(kv, (planes,), jnp.float32)
        scale = gamma / jnp.sqrt(rvar + eps)
        bias = beta - rmean * scale
        # per-tap kernel layout: row block t (= ((kd*kH+kh)*kW+kw)) holds w[:, :, kd, kh, kw]
        w_taps = jnp.transpose(w_t, (2, 3, 4, 0, 1)).reshape(n_taps * planes, cin)
        layers.append(dict(w_torch=w_t, w_taps=w_taps,
                           scale=scale.reshape(planes, 1), bias=bias.reshape(planes, 1)))
    cr = planes // 4
    key, k1, k1b, k2, k2b = jax.random.split(key, 5)
    w1 = jax.random.normal(k1, (cr, planes), jnp.float32) / np.sqrt(planes)   # SE conv1 (1x1x1)
    b1 = 0.1 * jax.random.normal(k1b, (cr, 1), jnp.float32)
    w2 = jax.random.normal(k2, (planes, cr), jnp.float32) / np.sqrt(cr)       # SE conv2 (1x1x1)
    b2 = 0.1 * jax.random.normal(k2b, (planes, 1), jnp.float32)
    return dict(layers=layers, se=dict(w1=w1, b1=b1, w2=w2, b2=b2), size=size)


# ------------------------------- pure-JAX reference ------------------------------
def reference_forward(x, params):
    pw = params["size"] // 2
    out = x
    for lyr in params["layers"]:
        out = jax.lax.conv_general_dilated(
            out, lyr["w_torch"], window_strides=(1, 1, 1),
            padding=((1, 1), (1, 1), (pw, pw)),
            dimension_numbers=("NCDHW", "OIDHW", "NCDHW"),
            precision=jax.lax.Precision.HIGHEST)
        out = out * lyr["scale"].reshape(1, -1, 1, 1, 1) + lyr["bias"].reshape(1, -1, 1, 1, 1)
        out = jnp.where(out > 0, out, 0.1 * out)
    se = params["se"]
    pooled = jnp.mean(out, axis=(2, 3, 4))                       # [N, C]
    h = pooled @ se["w1"].T + se["b1"][:, 0]                     # [N, Cr]
    h = jnp.where(h > 0, h, 0.1 * h)
    g = jax.nn.sigmoid(h @ se["w2"].T + se["b2"][:, 0])          # [N, C]
    return out * g[:, :, None, None, None] + x


if __name__ == "__main__":
    key = jax.random.PRNGKey(0)
    # inplanes = planes = 8, size = 3, stride = 1, conv_num = 3
    N, C, D, H, W = 2, 8, 8, 8, 8
    size = 3
    kx, kp = jax.random.split(key)
    x = jax.random.normal(kx, (N, C, D, H, W), jnp.float32)      # PyTorch NCDHW layout
    params = init_params(kp, C, C, size)

    out = basic_block3d_forward(x, params)
    out = jax.block_until_ready(out)

    ref = reference_forward(x, params)
    np.testing.assert_allclose(np.asarray(out), np.asarray(ref), rtol=2e-2, atol=2e-2)
    print("KERNEL_OK")
</pallas_src>

<mosaic_0001>
module attributes {stable_mosaic.version = 11 : i64} {
  func.func @kernel(%arg0: i32, %arg1: memref<1x8x512xf32, #tpu.memory_space<vmem>>, %arg2: memref<216x8xf32, #tpu.memory_space<vmem>>, %arg3: memref<8x1xf32, #tpu.memory_space<vmem>>, %arg4: memref<8x1xf32, #tpu.memory_space<vmem>>, %arg5: memref<216x8xf32, #tpu.memory_space<vmem>>, %arg6: memref<8x1xf32, #tpu.memory_space<vmem>>, %arg7: memref<8x1xf32, #tpu.memory_space<vmem>>, %arg8: memref<216x8xf32, #tpu.memory_space<vmem>>, %arg9: memref<8x1xf32, #tpu.memory_space<vmem>>, %arg10: memref<8x1xf32, #tpu.memory_space<vmem>>, %arg11: memref<27x512xf32, #tpu.memory_space<vmem>>, %arg12: memref<8x2xf32, #tpu.memory_space<vmem>>, %arg13: memref<1x2xf32, #tpu.memory_space<vmem>>, %arg14: memref<8x2xf32, #tpu.memory_space<vmem>>, %arg15: memref<8x1xf32, #tpu.memory_space<vmem>>, %arg16: memref<1x8x512xf32, #tpu.memory_space<vmem>>, %arg17: memref<8x768xf32, #tpu.memory_space<vmem>>) attributes {dimension_semantics = [#tpu.dimension_semantics<parallel>], iteration_bounds = array<i64: 2>, scalar_prefetch = 0 : i64, scratch_operands = 1 : i64, tpu.core_type = #tpu.core_type<tc>, window_params = [{transform_indices = @transform_0, window_bounds = array<i64: 1, 8, 512>}, {pipeline_mode = #tpu.pipeline_mode<synchronous>, transform_indices = @transform_1, window_bounds = array<i64: 216, 8>}, {pipeline_mode = #tpu.pipeline_mode<synchronous>, transform_indices = @transform_2, window_bounds = array<i64: 8, 1>}, {pipeline_mode = #tpu.pipeline_mode<synchronous>, transform_indices = @transform_3, window_bounds = array<i64: 8, 1>}, {pipeline_mode = #tpu.pipeline_mode<synchronous>, transform_indices = @transform_4, window_bounds = array<i64: 216, 8>}, {pipeline_mode = #tpu.pipeline_mode<synchronous>, transform_indices = @transform_5, window_bounds = array<i64: 8, 1>}, {pipeline_mode = #tpu.pipeline_mode<synchronous>, transform_indices = @transform_6, window_bounds = array<i64: 8, 1>}, {pipeline_mode = #tpu.pipeline_mode<synchronous>, transform_indices = @transform_7, window_bounds = array<i64: 216, 8>}, {pipeline_mode = #tpu.pipeline_mode<synchronous>, transform_indices = @transform_8, window_bounds = array<i64: 8, 1>}, {pipeline_mode = #tpu.pipeline_mode<synchronous>, transform_indices = @transform_9, window_bounds = array<i64: 8, 1>}, {pipeline_mode = #tpu.pipeline_mode<synchronous>, transform_indices = @transform_10, window_bounds = array<i64: 27, 512>}, {pipeline_mode = #tpu.pipeline_mode<synchronous>, transform_indices = @transform_11, window_bounds = array<i64: 8, 2>}, {pipeline_mode = #tpu.pipeline_mode<synchronous>, transform_indices = @transform_12, window_bounds = array<i64: 1, 2>}, {pipeline_mode = #tpu.pipeline_mode<synchronous>, transform_indices = @transform_13, window_bounds = array<i64: 8, 2>}, {pipeline_mode = #tpu.pipeline_mode<synchronous>, transform_indices = @transform_14, window_bounds = array<i64: 8, 1>}, {transform_indices = @transform_15, window_bounds = array<i64: 1, 8, 512>}]} {
    %cst = arith.constant 0.000000e+00 : f32
    %0 = vector.broadcast %cst : f32 to vector<8x128xf32>
    %c0 = arith.constant 0 : index
    %c0_0 = arith.constant 0 : index
    %1 = vector.load %arg17[%c0, %c0_0] : memref<8x768xf32, #tpu.memory_space<vmem>>, vector<8x128xf32>
    tpu.vector_store %arg17[%c0, %c0_0], %0 {strides = array<i32>} : memref<8x768xf32, #tpu.memory_space<vmem>>, vector<8x128xf32>,
    %c0_1 = arith.constant 0 : index
    %c640 = arith.constant 640 : index
    %2 = vector.load %arg17[%c0_1, %c640] : memref<8x768xf32, #tpu.memory_space<vmem>>, vector<8x128xf32>
    tpu.vector_store %arg17[%c0_1, %c640], %0 {strides = array<i32>} : memref<8x768xf32, #tpu.memory_space<vmem>>, vector<8x128xf32>,
    %c0_2 = arith.constant 0 : index
    %c0_3 = arith.constant 0 : index
    %c0_4 = arith.constant 0 : index
    %3 = vector.load %arg1[%c0_2, %c0_3, %c0_4] : memref<1x8x512xf32, #tpu.memory_space<vmem>>, vector<1x8x512xf32>
    %4 = vector.shape_cast %3 : vector<1x8x512xf32> to vector<8x512xf32>
    %c0_5 = arith.constant 0 : index
    %c128 = arith.constant 128 : index
    %5 = vector.load %arg17[%c0_5, %c128] : memref<8x768xf32, #tpu.memory_space<vmem>>, vector<8x512xf32>
    tpu.vector_store %arg17[%c0_5, %c128], %4 {strides = array<i32>} : memref<8x768xf32, #tpu.memory_space<vmem>>, vector<8x512xf32>,
    %c0_6 = arith.constant 0 : index
    %c0_7 = arith.constant 0 : index
    %6 = vector.load %arg2[%c0_6, %c0_7] : memref<216x8xf32, #tpu.memory_space<vmem>>, vector<8x8xf32>
    %c0_8 = arith.constant 0 : index
    %c55 = arith.constant 55 : index
    %7 = vector.load %arg17[%c0_8, %c55] : memref<8x768xf32, #tpu.memory_space<vmem>>, vector<8x512xf32>
    %cst_9 = arith.constant dense<0.000000e+00> : vector<8x512xf32>
    %8 = tpu.matmul %6, %7, %cst_9 {dimension_numbers = #tpu.dot_dimension_numbers<[1], [0], [0], [1], [0, 0, 1, 1], [], []>} : vector<8x8xf32>, vector<8x512xf32>, vector<8x512xf32> -> vector<8x512xf32>
    %c0_10 = arith.constant 0 : index
    %c0_11 = arith.constant 0 : index
    %9 = vector.load %arg11[%c0_10, %c0_11] : memref<27x512xf32, #tpu.memory_space<vmem>>, vector<1x512xf32>
    %10 = vector.broadcast %9 : vector<1x512xf32> to vector<8x512xf32>
    %11 = arith.mulf %8, %10 : vector<8x512xf32>
    %c8 = arith.constant 8 : index
    %c0_12 = arith.constant 0 : index
    %12 = vector.load %arg2[%c8, %c0_12] : memref<216x8xf32, #tpu.memory_space<vmem>>, vector<8x8xf32>
    %c0_13 = arith.constant 0 : index
    %c56 = arith.constant 56 : index
    %13 = vector.load %arg17[%c0_13, %c56] : memref<8x768xf32, #tpu.memory_space<vmem>>, vector<8x512xf32>
    %cst_14 = arith.constant dense<0.000000e+00> : vector<8x512xf32>
    %14 = tpu.matmul %12, %13, %cst_14 {dimension_numbers = #tpu.dot_dimension_numbers<[1], [0], [0], [1], [0, 0, 1, 1], [], []>} : vector<8x8xf32>, vector<8x512xf32>, vector<8x512xf32> -> vector<8x512xf32>
    %c1 = arith.constant 1 : index
    %c0_15 = arith.constant 0 : index
    %15 = vector.load %arg11[%c1, %c0_15] : memref<27x512xf32, #tpu.memory_space<vmem>>, vector<1x512xf32>
    %16 = vector.broadcast %15 : vector<1x512xf32> to vector<8x512xf32>
    %17 = arith.mulf %14, %16 : vector<8x512xf32>
    %18 = arith.addf %11, %17 : vector<8x512xf32>
    %c16 = arith.constant 16 : index
    %c0_16 = arith.constant 0 : index
    %19 = vector.load %arg2[%c16, %c0_16] : memref<216x8xf32, #tpu.memory_space<vmem>>, vector<8x8xf32>
    %c0_17 = arith.constant 0 : index
    %c57 = arith.constant 57 : index
    %20 = vector.load %arg17[%c0_17, %c57] : memref<8x768xf32, #tpu.memory_space<vmem>>, vector<8x512xf32>
    %cst_18 = arith.constant dense<0.000000e+00> : vector<8x512xf32>
    %21 = tpu.matmul %19, %20, %cst_18 {dimension_numbers = #tpu.dot_dimension_numbers<[1], [0], [0], [1], [0, 0, 1, 1], [], []>} : vector<8x8xf32>, vector<8x512xf32>, vector<8x512xf32> -> vector<8x512xf32>
    %c2 = arith.constant 2 : index
    %c0_19 = arith.constant 0 : index
    %22 = vector.load %arg11[%c2, %c0_19] : memref<27x512xf32, #tpu.memory_space<vmem>>, vector<1x512xf32>
    %23 = vector.broadcast %22 : vector<1x512xf32> to vector<8x512xf32>
    %24 = arith.mulf %21, %23 : vector<8x512xf32>
    %25 = arith.addf %18, %24 : vector<8x512xf32>
    %c24 = arith.constant 24 : index
    %c0_20 = arith.constant 0 : index
    %26 = vector.load %arg2[%c24, %c0_20] : memref<216x8xf32, #tpu.memory_space<vmem>>, vector<8x8xf32>
    %c0_21 = arith.constant 0 : index
    %c63 = arith.constant 63 : index
    %27 = vector.load %arg17[%c0_21, %c63] : memref<8x768xf32, #tpu.memory_space<vmem>>, vector<8x512xf32>
    %cst_22 = arith.constant dense<0.000000e+00> : vector<8x512xf32>
    %28 = tpu.matmul %26, %27, %cst_22 {dimension_numbers = #tpu.dot_dimension_numbers<[1], [0], [0], [1], [0, 0, 1, 1], [], []>} : vector<8x8xf32>, vector<8x512xf32>, vector<8x512xf32> -> vector<8x512xf32>
    %c3 = arith.constant 3 : index
    %c0_23 = arith.constant 0 : index
    %29 = vector.load %arg11[%c3, %c0_23] : memref<27x512xf32, #tpu.memory_space<vmem>>, vector<1x512xf32>
    %30 = vector.broadcast %29 : vector<1x512xf32> to vector<8x512xf32>
    %31 = arith.mulf %28, %30 : vector<8x512xf32>
    %32 = arith.addf %25, %31 : vector<8x512xf32>
    %c32 = arith.constant 32 : index
    %c0_24 = arith.constant 0 : index
    %33 = vector.load %arg2[%c32, %c0_24] : memref<216x8xf32, #tpu.memory_space<vmem>>, vector<8x8xf32>
    %c0_25 = arith.constant 0 : index
    %c64 = arith.constant 64 : index
    %34 = vector.load %arg17[%c0_25, %c64] : memref<8x768xf32, #tpu.memory_space<vmem>>, vector<8x512xf32>
    %cst_26 = arith.constant dense<0.000000e+00> : vector<8x512xf32>
    %35 = tpu.matmul %33, %34, %cst_26 {dimension_numbers = #tpu.dot_dimension_numbers<[1], [0], [0], [1], [0, 0, 1, 1], [], []>} : vector<8x8xf32>, vector<8x512xf32>, vector<8x512xf32> -> vector<8x512xf32>
    %c4 = arith.constant 4 : index
    %c0_27 = arith.constant 0 : index
    %36 = vector.load %arg11[%c4, %c0_27] : memref<27x512xf32, #tpu.memory_space<vmem>>, vector<1x512xf32>
    %37 = vector.broadcast %36 : vector<1x512xf32> to vector<8x512xf32>
    %38 = arith.mulf %35, %37 : vector<8x512xf32>
    %39 = arith.addf %32, %38 : vector<8x512xf32>
    %c40 = arith.constant 40 : index
    %c0_28 = arith.constant 0 : index
    %40 = vector.load %arg2[%c40, %c0_28] : memref<216x8xf32, #tpu.memory_space<vmem>>, vector<8x8xf32>
    %c0_29 = arith.constant 0 : index
    %c65 = arith.constant 65 : index
    %41 = vector.load %arg17[%c0_29, %c65] : memref<8x768xf32, #tpu.memory_space<vmem>>, vector<8x512xf32>
    %cst_30 = arith.constant dense<0.000000e+00> : vector<8x512xf32>
    %42 = tpu.matmul %40, %41, %cst_30 {dimension_numbers = #tpu.dot_dimension_numbers<[1], [0], [0], [1], [0, 0, 1, 1], [], []>} : vector<8x8xf32>, vector<8x512xf32>, vector<8x512xf32> -> vector<8x512xf32>
    %c5 = arith.constant 5 : index
    %c0_31 = arith.constant 0 : index
    %43 = vector.load %arg11[%c5, %c0_31] : memref<27x512xf32, #tpu.memory_space<vmem>>, vector<1x512xf32>
    %44 = vector.broadcast %43 : vector<1x512xf32> to vector<8x512xf32>
    %45 = arith.mulf %42, %44 : vector<8x512xf32>
    %46 = arith.addf %39, %45 : vector<8x512xf32>
    %c48 = arith.constant 48 : index
    %c0_32 = arith.constant 0 : index
    %47 = vector.load %arg2[%c48, %c0_32] : memref<216x8xf32, #tpu.memory_space<vmem>>, vector<8x8xf32>
    %c0_33 = arith.constant 0 : index
    %c71 = arith.constant 71 : index
    %48 = vector.load %arg17[%c0_33, %c71] : memref<8x768xf32, #tpu.memory_space<vmem>>, vector<8x512xf32>
    %cst_34 = arith.constant dense<0.000000e+00> : vector<8x512xf32>
    %49 = tpu.matmul %47, %48, %cst_34 {dimension_numbers = #tpu.dot_dimension_numbers<[1], [0], [0], [1], [0, 0, 1, 1], [], []>} : vector<8x8xf32>, vector<8x512xf32>, vector<8x512xf32> -> vector<8x512xf32>
    %c6 = arith.constant 6 : index
    %c0_35 = arith.constant 0 : index
    %50 = vector.load %arg11[%c6, %c0_35] : memref<27x512xf32, #tpu.memory_space<vmem>>, vector<1x512xf32>
    %51 = vector.broadcast %50 : vector<1x512xf32> to vector<8x512xf32>
    %52 = arith.mulf %49, %51 : vector<8x512xf32>
    %53 = arith.addf %46, %52 : vector<8x512xf32>
    %c56_36 = arith.constant 56 : index
    %c0_37 = arith.constant 0 : index
    %54 = vector.load %arg2[%c56_36, %c0_37] : memref<216x8xf32, #tpu.memory_space<vmem>>, vector<8x8xf32>
    %c0_38 = arith.constant 0 : index
    %c72 = arith.constant 72 : index
    %55 = vector.load %arg17[%c0_38, %c72] : memref<8x768xf32, #tpu.memory_space<vmem>>, vector<8x512xf32>
    %cst_39 = arith.constant dense<0.000000e+00> : vector<8x512xf32>
    %56 = tpu.matmul %54, %55, %cst_39 {dimension_numbers = #tpu.dot_dimension_numbers<[1], [0], [0], [1], [0, 0, 1, 1], [], []>} : vector<8x8xf32>, vector<8x512xf32>, vector<8x512xf32> -> vector<8x512xf32>
    %c7 = arith.constant 7 : index
    %c0_40 = arith.constant 0 : index
    %57 = vector.load %arg11[%c7, %c0_40] : memref<27x512xf32, #tpu.memory_space<vmem>>, vector<1x512xf32>
    %58 = vector.broadcast %57 : vector<1x512xf32> to vector<8x512xf32>
    %59 = arith.mulf %56, %58 : vector<8x512xf32>
    %60 = arith.addf %53, %59 : vector<8x512xf32>
    %c64_41 = arith.constant 64 : index
    %c0_42 = arith.constant 0 : index
    %61 = vector.load %arg2[%c64_41, %c0_42] : memref<216x8xf32, #tpu.memory_space<vmem>>, vector<8x8xf32>
    %c0_43 = arith.constant 0 : index
    %c73 = arith.constant 73 : index
    %62 = vector.load %arg17[%c0_43, %c73] : memref<8x768xf32, #tpu.memory_space<vmem>>, vector<8x512xf32>
    %cst_44 = arith.constant dense<0.000000e+00> : vector<8x512xf32>
    %63 = tpu.matmul %61, %62, %cst_44 {dimension_numbers = #tpu.dot_dimension_numbers<[1], [0], [0], [1], [0, 0, 1, 1], [], []>} : vector<8x8xf32>, vector<8x512xf32>, vector<8x512xf32> -> vector<8x512xf32>
    %c8_45 = arith.constant 8 : index
    %c0_46 = arith.constant 0 : index
    %64 = vector.load %arg11[%c8_45, %c0_46] : memref<27x512xf32, #tpu.memory_space<vmem>>, vector<1x512xf32>
    %65 = vector.broadcast %64 : vector<1x512xf32> to vector<8x512xf32>
    %66 = arith.mulf %63, %65 : vector<8x512xf32>
    %67 = arith.addf %60, %66 : vector<8x512xf32>
    %c72_47 = arith.constant 72 : index
    %c0_48 = arith.constant 0 : index
    %68 = vector.load %arg2[%c72_47, %c0_48] : memref<216x8xf32, #tpu.memory_space<vmem>>, vector<8x8xf32>
    %c0_49 = arith.constant 0 : index
    %c119 = arith.constant 119 : index
    %69 = vector.load %arg17[%c0_49, %c119] : memref<8x768xf32, #tpu.memory_space<vmem>>, vector<8x512xf32>
    %cst_50 = arith.constant dense<0.000000e+00> : vector<8x512xf32>
    %70 = tpu.matmul %68, %69, %cst_50 {dimension_numbers = #tpu.dot_dimension_numbers<[1], [0], [0], [1], [0, 0, 1, 1], [], []>} : vector<8x8xf32>, vector<8x512xf32>, vector<8x512xf32> -> vector<8x512xf32>
    %c9 = arith.constant 9 : index
    %c0_51 = arith.constant 0 : index
    %71 = vector.load %arg11[%c9, %c0_51] : memref<27x512xf32, #tpu.memory_space<vmem>>, vector<1x512xf32>
    %72 = vector.broadcast %71 : vector<1x512xf32> to vector<8x512xf32>
    %73 = arith.mulf %70, %72 : vector<8x512xf32>
    %74 = arith.addf %67, %73 : vector<8x512xf32>
    %c80 = arith.constant 80 : index
    %c0_52 = arith.constant 0 : index
    %75 = vector.load %arg2[%c80, %c0_52] : memref<216x8xf32, #tpu.memory_space<vmem>>, vector<8x8xf32>
    %c0_53 = arith.constant 0 : index
    %c120 = arith.constant 120 : index
    %76 = vector.load %arg17[%c0_53, %c120] : memref<8x768xf32, #tpu.memory_space<vmem>>, vector<8x512xf32>
    %cst_54 = arith.constant dense<0.000000e+00> : vector<8x512xf32>
    %77 = tpu.matmul %75, %76, %cst_54 {dimension_numbers = #tpu.dot_dimension_numbers<[1], [0], [0], [1], [0, 0, 1, 1], [], []>} : vector<8x8xf32>, vector<8x512xf32>, vector<8x512xf32> -> vector<8x512xf32>
    %c10 = arith.constant 10 : index
    %c0_55 = arith.constant 0 : index
    %78 = vector.load %arg11[%c10, %c0_55] : memref<27x512xf32, #tpu.memory_space<vmem>>, vector<1x512xf32>
    %79 = vector.broadcast %78 : vector<1x512xf32> to vector<8x512xf32>
    %80 = arith.mulf %77, %79 : vector<8x512xf32>
    %81 = arith.addf %74, %80 : vector<8x512xf32>
    %c88 = arith.constant 88 : index
    %c0_56 = arith.constant 0 : index
    %82 = vector.load %arg2[%c88, %c0_56] : memref<216x8xf32, #tpu.memory_space<vmem>>, vector<8x8xf32>
    %c0_57 = arith.constant 0 : index
    %c121 = arith.constant 121 : index
    %83 = vector.load %arg17[%c0_57, %c121] : memref<8x768xf32, #tpu.memory_space<vmem>>, vector<8x512xf32>
    %cst_58 = arith.constant dense<0.000000e+00> : vector<8x512xf32>
    %84 = tpu.matmul %82, %83, %cst_58 {dimension_numbers = #tpu.dot_dimension_numbers<[1], [0], [0], [1], [0, 0, 1, 1], [], []>} : vector<8x8xf32>, vector<8x512xf32>, vector<8x512xf32> -> vector<8x512xf32>
    %c11 = arith.constant 11 : index
    %c0_59 = arith.constant 0 : index
    %85 = vector.load %arg11[%c11, %c0_59] : memref<27x512xf32, #tpu.memory_space<vmem>>, vector<1x512xf32>
    %86 = vector.broadcast %85 : vector<1x512xf32> to vector<8x512xf32>
    %87 = arith.mulf %84, %86 : vector<8x512xf32>
    %88 = arith.addf %81, %87 : vector<8x512xf32>
    %c96 = arith.constant 96 : index
    %c0_60 = arith.constant 0 : index
    %89 = vector.load %arg2[%c96, %c0_60] : memref<216x8xf32, #tpu.memory_space<vmem>>, vector<8x8xf32>
    %c0_61 = arith.constant 0 : index
    %c127 = arith.constant 127 : index
    %90 = vector.load %arg17[%c0_61, %c127] : memref<8x768xf32, #tpu.memory_space<vmem>>, vector<8x512xf32>
    %cst_62 = arith.constant dense<0.000000e+00> : vector<8x512xf32>
    %91 = tpu.matmul %89, %90, %cst_62 {dimension_numbers = #tpu.dot_dimension_numbers<[1], [0], [0], [1], [0, 0, 1, 1], [], []>} : vector<8x8xf32>, vector<8x512xf32>, vector<8x512xf32> -> vector<8x512xf32>
    %c12 = arith.constant 12 : index
    %c0_63 = arith.constant 0 : index
    %92 = vector.load %arg11[%c12, %c0_63] : memref<27x512xf32, #tpu.memory_space<vmem>>, vector<1x512xf32>
    %93 = vector.broadcast %92 : vector<1x512xf32> to vector<8x512xf32>
    %94 = arith.mulf %91, %93 : vector<8x512xf32>
    %95 = arith.addf %88, %94 : vector<8x512xf32>
    %c104 = arith.constant 104 : index
    %c0_64 = arith.constant 0 : index
    %96 = vector.load %arg2[%c104, %c0_64] : memref<216x8xf32, #tpu.memory_space<vmem>>, vector<8x8xf32>
    %c0_65 = arith.constant 0 : index
    %c128_66 = arith.constant 128 : index
    %97 = vector.load %arg17[%c0_65, %c128_66] : memref<8x768xf32, #tpu.memory_space<vmem>>, vector<8x512xf32>
    %cst_67 = arith.constant dense<0.000000e+00> : vector<8x512xf32>
    %98 = tpu.matmul %96, %97, %cst_67 {dimension_numbers = #tpu.dot_dimension_numbers<[1], [0], [0], [1], [0, 0, 1, 1], [], []>} : vector<8x8xf32>, vector<8x512xf32>, vector<8x512xf32> -> vector<8x512xf32>
    %99 = arith.addf %95, %98 : vector<8x512xf32>
    %c112 = arith.constant 112 : index
    %c0_68 = arith.constant 0 : index
    %100 = vector.load %arg2[%c112, %c0_68] : memref<216x8xf32, #tpu.memory_space<vmem>>, vector<8x8xf32>
    %c0_69 = arith.constant 0 : index
    %c129 = arith.constant 129 : index
    %101 = vector.load %arg17[%c0_69, %c129] : memref<8x768xf32, #tpu.memory_space<vmem>>, vector<8x512xf32>
    %cst_70 = arith.constant dense<0.000000e+00> : vector<8x512xf32>
    %102 = tpu.matmul %100, %101, %cst_70 {dimension_numbers = #tpu.dot_dimension_numbers<[1], [0], [0], [1], [0, 0, 1, 1], [], []>} : vector<8x8xf32>, vector<8x512xf32>, vector<8x512xf32> -> vector<8x512xf32>
    %c14 = arith.constant 14 : index
    %c0_71 = arith.constant 0 : index
    %103 = vector.load %arg11[%c14, %c0_71] : memref<27x512xf32, #tpu.memory_space<vmem>>, vector<1x512xf32>
    %104 = vector.broadcast %103 : vector<1x512xf32> to vector<8x512xf32>
    %105 = arith.mulf %102, %104 : vector<8x512xf32>
    %106 = arith.addf %99, %105 : vector<8x512xf32>
    %c120_72 = arith.constant 120 : index
    %c0_73 = arith.constant 0 : index
    %107 = vector.load %arg2[%c120_72, %c0_73] : memref<216x8xf32, #tpu.memory_space<vmem>>, vector<8x8xf32>
    %c0_74 = arith.constant 0 : index
    %c135 = arith.constant 135 : index
    %108 = vector.load %arg17[%c0_74, %c135] : memref<8x768xf32, #tpu.memory_space<vmem>>, vector<8x512xf32>
    %cst_75 = arith.constant dense<0.000000e+00> : vector<8x512xf32>
    %109 = tpu.matmul %107, %108, %cst_75 {dimension_numbers = #tpu.dot_dimension_numbers<[1], [0], [0], [1], [0, 0, 1, 1], [], []>} : vector<8x8xf32>, vector<8x512xf32>, vector<8x512xf32> -> vector<8x512xf32>
    %c15 = arith.constant 15 : index
    %c0_76 = arith.constant 0 : index
    %110 = vector.load %arg11[%c15, %c0_76] : memref<27x512xf32, #tpu.memory_space<vmem>>, vector<1x512xf32>
    %111 = vector.broadcast %110 : vector<1x512xf32> to vector<8x512xf32>
    %112 = arith.mulf %109, %111 : vector<8x512xf32>
    %113 = arith.addf %106, %112 : vector<8x512xf32>
    %c128_77 = arith.constant 128 : index
    %c0_78 = arith.constant 0 : index
    %114 = vector.load %arg2[%c128_77, %c0_78] : memref<216x8xf32, #tpu.memory_space<vmem>>, vector<8x8xf32>
    %c0_79 = arith.constant 0 : index
    %c136 = arith.constant 136 : index
    %115 = vector.load %arg17[%c0_79, %c136] : memref<8x768xf32, #tpu.memory_space<vmem>>, vector<8x512xf32>
    %cst_80 = arith.constant dense<0.000000e+00> : vector<8x512xf32>
    %116 = tpu.matmul %114, %115, %cst_80 {dimension_numbers = #tpu.dot_dimension_numbers<[1], [0], [0], [1], [0, 0, 1, 1], [], []>} : vector<8x8xf32>, vector<8x512xf32>, vector<8x512xf32> -> vector<8x512xf32>
    %c16_81 = arith.constant 16 : index
    %c0_82 = arith.constant 0 : index
    %117 = vector.load %arg11[%c16_81, %c0_82] : memref<27x512xf32, #tpu.memory_space<vmem>>, vector<1x512xf32>
    %118 = vector.broadcast %117 : vector<1x512xf32> to vector<8x512xf32>
    %119 = arith.mulf %116, %118 : vector<8x512xf32>
    %120 = arith.addf %113, %119 : vector<8x512xf32>
    %c136_83 = arith.constant 136 : index
    %c0_84 = arith.constant 0 : index
    %121 = vector.load %arg2[%c136_83, %c0_84] : memref<216x8xf32, #tpu.memory_space<vmem>>, vector<8x8xf32>
    %c0_85 = arith.constant 0 : index
    %c137 = arith.constant 137 : index
    %122 = vector.load %arg17[%c0_85, %c137] : memref<8x768xf32, #tpu.memory_space<vmem>>, vector<8x512xf32>
    %cst_86 = arith.constant dense<0.000000e+00> : vector<8x512xf32>
    %123 = tpu.matmul %121, %122, %cst_86 {dimension_numbers = #tpu.dot_dimension_numbers<[1], [0], [0], [1], [0, 0, 1, 1], [], []>} : vector<8x8xf32>, vector<8x512xf32>, vector<8x512xf32> -> vector<8x512xf32>
    %c17 = arith.constant 17 : index
    %c0_87 = arith.constant 0 : index
    %124 = vector.load %arg11[%c17, %c0_87] : memref<27x512xf32, #tpu.memory_space<vmem>>, vector<1x512xf32>
    %125 = vector.broadcast %124 : vector<1x512xf32> to vector<8x512xf32>
    %126 = arith.mulf %123, %125 : vector<8x512xf32>
    %127 = arith.addf %120, %126 : vector<8x512xf32>
    %c144 = arith.constant 144 : index
    %c0_88 = arith.constant 0 : index
    %128 = vector.load %arg2[%c144, %c0_88] : memref<216x8xf32, #tpu.memory_space<vmem>>, vector<8x8xf32>
    %c0_89 = arith.constant 0 : index
    %c183 = arith.constant 183 : index
    %129 = vector.load %arg17[%c0_89, %c183] : memref<8x768xf32, #tpu.memory_space<vmem>>, vector<8x512xf32>
    %cst_90 = arith.constant dense<0.000000e+00> : vector<8x512xf32>
    %130 = tpu.matmul %128, %129, %cst_90 {dimension_numbers = #tpu.dot_dimension_numbers<[1], [0], [0], [1], [0, 0, 1, 1], [], []>} : vector<8x8xf32>, vector<8x512xf32>, vector<8x512xf32> -> vector<8x512xf32>
    %c18 = arith.constant 18 : index
    %c0_91 = arith.constant 0 : index
    %131 = vector.load %arg11[%c18, %c0_91] : memref<27x512xf32, #tpu.memory_space<vmem>>, vector<1x512xf32>
    %132 = vector.broadcast %131 : vector<1x512xf32> to vector<8x512xf32>
    %133 = arith.mulf %130, %132 : vector<8x512xf32>
    %134 = arith.addf %127, %133 : vector<8x512xf32>
    %c152 = arith.constant 152 : index
    %c0_92 = arith.constant 0 : index
    %135 = vector.load %arg2[%c152, %c0_92] : memref<216x8xf32, #tpu.memory_space<vmem>>, vector<8x8xf32>
    %c0_93 = arith.constant 0 : index
    %c184 = arith.constant 184 : index
    %136 = vector.load %arg17[%c0_93, %c184] : memref<8x768xf32, #tpu.memory_space<vmem>>, vector<8x512xf32>
    %cst_94 = arith.constant dense<0.000000e+00> : vector<8x512xf32>
    %137 = tpu.matmul %135, %136, %cst_94 {dimension_numbers = #tpu.dot_dimension_numbers<[1], [0], [0], [1], [0, 0, 1, 1], [], []>} : vector<8x8xf32>, vector<8x512xf32>, vector<8x512xf32> -> vector<8x512xf32>
    %c19 = arith.constant 19 : index
    %c0_95 = arith.constant 0 : index
    %138 = vector.load %arg11[%c19, %c0_95] : memref<27x512xf32, #tpu.memory_space<vmem>>, vector<1x512xf32>
    %139 = vector.broadcast %138 : vector<1x512xf32> to vector<8x512xf32>
    %140 = arith.mulf %137, %139 : vector<8x512xf32>
    %141 = arith.addf %134, %140 : vector<8x512xf32>
    %c160 = arith.constant 160 : index
    %c0_96 = arith.constant 0 : index
    %142 = vector.load %arg2[%c160, %c0_96] : memref<216x8xf32, #tpu.memory_space<vmem>>, vector<8x8xf32>
    %c0_97 = arith.constant 0 : index
    %c185 = arith.constant 185 : index
    %143 = vector.load %arg17[%c0_97, %c185] : memref<8x768xf32, #tpu.memory_space<vmem>>, vector<8x512xf32>
    %cst_98 = arith.constant dense<0.000000e+00> : vector<8x512xf32>
    %144 = tpu.matmul %142, %143, %cst_98 {dimension_numbers = #tpu.dot_dimension_numbers<[1], [0], [0], [1], [0, 0, 1, 1], [], []>} : vector<8x8xf32>, vector<8x512xf32>, vector<8x512xf32> -> vector<8x512xf32>
    %c20 = arith.constant 20 : index
    %c0_99 = arith.constant 0 : index
    %145 = vector.load %arg11[%c20, %c0_99] : memref<27x512xf32, #tpu.memory_space<vmem>>, vector<1x512xf32>
    %146 = vector.broadcast %145 : vector<1x512xf32> to vector<8x512xf32>
    %147 = arith.mulf %144, %146 : vector<8x512xf32>
    %148 = arith.addf %141, %147 : vector<8x512xf32>
    %c168 = arith.constant 168 : index
    %c0_100 = arith.constant 0 : index
    %149 = vector.load %arg2[%c168, %c0_100] : memref<216x8xf32, #tpu.memory_space<vmem>>, vector<8x8xf32>
    %c0_101 = arith.constant 0 : index
    %c191 = arith.constant 191 : index
    %150 = vector.load %arg17[%c0_101, %c191] : memref<8x768xf32, #tpu.memory_space<vmem>>, vector<8x512xf32>
    %cst_102 = arith.constant dense<0.000000e+00> : vector<8x512xf32>
    %151 = tpu.matmul %149, %150, %cst_102 {dimension_numbers = #tpu.dot_dimension_numbers<[1], [0], [0], [1], [0, 0, 1, 1], [], []>} : vector<8x8xf32>, vector<8x512xf32>, vector<8x512xf32> -> vector<8x512xf32>
    %c21 = arith.constant 21 : index
    %c0_103 = arith.constant 0 : index
    %152 = vector.load %arg11[%c21, %c0_103] : memref<27x512xf32, #tpu.memory_space<vmem>>, vector<1x512xf32>
    %153 = vector.broadcast %152 : vector<1x512xf32> to vector<8x512xf32>
    %154 = arith.mulf %151, %153 : vector<8x512xf32>
    %155 = arith.addf %148, %154 : vector<8x512xf32>
    %c176 = arith.constant 176 : index
    %c0_104 = arith.constant 0 : index
    %156 = vector.load %arg2[%c176, %c0_104] : memref<216x8xf32, #tpu.memory_space<vmem>>, vector<8x8xf32>
    %c0_105 = arith.constant 0 : index
    %c192 = arith.constant 192 : index
    %157 = vector.load %arg17[%c0_105, %c192] : memref<8x768xf32, #tpu.memory_space<vmem>>, vector<8x512xf32>
    %cst_106 = arith.constant dense<0.000000e+00> : vector<8x512xf32>
    %158 = tpu.matmul %156, %157, %cst_106 {dimension_numbers = #tpu.dot_dimension_numbers<[1], [0], [0], [1], [0, 0, 1, 1], [], []>} : vector<8x8xf32>, vector<8x512xf32>, vector<8x512xf32> -> vector<8x512xf32>
    %c22 = arith.constant 22 : index
    %c0_107 = arith.constant 0 : index
    %159 = vector.load %arg11[%c22, %c0_107] : memref<27x512xf32, #tpu.memory_space<vmem>>, vector<1x512xf32>
    %160 = vector.broadcast %159 : vector<1x512xf32> to vector<8x512xf32>
    %161 = arith.mulf %158, %160 : vector<8x512xf32>
    %162 = arith.addf %155, %161 : vector<8x512xf32>
    %c184_108 = arith.constant 184 : index
    %c0_109 = arith.constant 0 : index
    %163 = vector.load %arg2[%c184_108, %c0_109] : memref<216x8xf32, #tpu.memory_space<vmem>>, vector<8x8xf32>
    %c0_110 = arith.constant 0 : index
    %c193 = arith.constant 193 : index
    %164 = vector.load %arg17[%c0_110, %c193] : memref<8x768xf32, #tpu.memory_space<vmem>>, vector<8x512xf32>
    %cst_111 = arith.constant dense<0.000000e+00> : vector<8x512xf32>
    %165 = tpu.matmul %163, %164, %cst_111 {dimension_numbers = #tpu.dot_dimension_numbers<[1], [0], [0], [1], [0, 0, 1, 1], [], []>} : vector<8x8xf32>, vector<8x512xf32>, vector<8x512xf32> -> vector<8x512xf32>
    %c23 = arith.constant 23 : index
    %c0_112 = arith.constant 0 : index
    %166 = vector.load %arg11[%c23, %c0_112] : memref<27x512xf32, #tpu.memory_space<vmem>>, vector<1x512xf32>
    %167 = vector.broadcast %166 : vector<1x512xf32> to vector<8x512xf32>
    %168 = arith.mulf %165, %167 : vector<8x512xf32>
    %169 = arith.addf %162, %168 : vector<8x512xf32>
    %c192_113 = arith.constant 192 : index
    %c0_114 = arith.constant 0 : index
    %170 = vector.load %arg2[%c192_113, %c0_114] : memref<216x8xf32, #tpu.memory_space<vmem>>, vector<8x8xf32>
    %c0_115 = arith.constant 0 : index
    %c199 = arith.constant 199 : index
    %171 = vector.load %arg17[%c0_115, %c199] : memref<8x768xf32, #tpu.memory_space<vmem>>, vector<8x512xf32>
    %cst_116 = arith.constant dense<0.000000e+00> : vector<8x512xf32>
    %172 = tpu.matmul %170, %171, %cst_116 {dimension_numbers = #tpu.dot_dimension_numbers<[1], [0], [0], [1], [0, 0, 1, 1], [], []>} : vector<8x8xf32>, vector<8x512xf32>, vector<8x512xf32> -> vector<8x512xf32>
    %c24_117 = arith.constant 24 : index
    %c0_118 = arith.constant 0 : index
    %173 = vector.load %arg11[%c24_117, %c0_118] : memref<27x512xf32, #tpu.memory_space<vmem>>, vector<1x512xf32>
    %174 = vector.broadcast %173 : vector<1x512xf32> to vector<8x512xf32>
    %175 = arith.mulf %172, %174 : vector<8x512xf32>
    %176 = arith.addf %169, %175 : vector<8x512xf32>
    %c200 = arith.constant 200 : index
    %c0_119 = arith.constant 0 : index
    %177 = vector.load %arg2[%c200, %c0_119] : memref<216x8xf32, #tpu.memory_space<vmem>>, vector<8x8xf32>
    %c0_120 = arith.constant 0 : index
    %c200_121 = arith.constant 200 : index
    %178 = vector.load %arg17[%c0_120, %c200_121] : memref<8x768xf32, #tpu.memory_space<vmem>>, vector<8x512xf32>
    %cst_122 = arith.constant dense<0.000000e+00> : vector<8x512xf32>
    %179 = tpu.matmul %177, %178, %cst_122 {dimension_numbers = #tpu.dot_dimension_numbers<[1], [0], [0], [1], [0, 0, 1, 1], [], []>} : vector<8x8xf32>, vector<8x512xf32>, vector<8x512xf32> -> vector<8x512xf32>
    %c25 = arith.constant 25 : index
    %c0_123 = arith.constant 0 : index
    %180 = vector.load %arg11[%c25, %c0_123] : memref<27x512xf32, #tpu.memory_space<vmem>>, vector<1x512xf32>
    %181 = vector.broadcast %180 : vector<1x512xf32> to vector<8x512xf32>
    %182 = arith.mulf %179, %181 : vector<8x512xf32>
    %183 = arith.addf %176, %182 : vector<8x512xf32>
    %c208 = arith.constant 208 : index
    %c0_124 = arith.constant 0 : index
    %184 = vector.load %arg2[%c208, %c0_124] : memref<216x8xf32, #tpu.memory_space<vmem>>, vector<8x8xf32>
    %c0_125 = arith.constant 0 : index
    %c201 = arith.constant 201 : index
    %185 = vector.load %arg17[%c0_125, %c201] : memref<8x768xf32, #tpu.memory_space<vmem>>, vector<8x512xf32>
    %cst_126 = arith.constant dense<0.000000e+00> : vector<8x512xf32>
    %186 = tpu.matmul %184, %185, %cst_126 {dimension_numbers = #tpu.dot_dimension_numbers<[1], [0], [0], [1], [0, 0, 1, 1], [], []>} : vector<8x8xf32>, vector<8x512xf32>, vector<8x512xf32> -> vector<8x512xf32>
    %c26 = arith.constant 26 : index
    %c0_127 = arith.constant 0 : index
    %187 = vector.load %arg11[%c26, %c0_127] : memref<27x512xf32, #tpu.memory_space<vmem>>, vector<1x512xf32>
    %188 = vector.broadcast %187 : vector<1x512xf32> to vector<8x512xf32>
    %189 = arith.mulf %186, %188 : vector<8x512xf32>
    %190 = arith.addf %183, %189 : vector<8x512xf32>
    %c0_128 = arith.constant 0 : index
    %c0_129 = arith.constant 0 : index
    %191 = vector.load %arg3[%c0_128, %c0_129] : memref<8x1xf32, #tpu.memory_space<vmem>>, vector<8x1xf32>
    %192 = vector.broadcast %191 : vector<8x1xf32> to vector<8x512xf32>
    %193 = arith.mulf %190, %192 : vector<8x512xf32>
    %c0_130 = arith.constant 0 : index
    %c0_131 = arith.constant 0 : index
    %194 = vector.load %arg4[%c0_130, %c0_131] : memref<8x1xf32, #tpu.memory_space<vmem>>, vector<8x1xf32>
    %195 = vector.broadcast %194 : vector<8x1xf32> to vector<8x512xf32>
    %196 = arith.addf %193, %195 : vector<8x512xf32>
    %cst_132 = arith.constant 0.000000e+00 : f32
    %197 = vector.broadcast %cst_132 : f32 to vector<8x512xf32>
    %198 = arith.cmpf ogt, %196, %197 : vector<8x512xf32>
    %cst_133 = arith.constant 1.000000e-01 : f32
    %199 = vector.broadcast %cst_133 : f32 to vector<8x512xf32>
    %200 = arith.mulf %199, %196 : vector<8x512xf32>
    %201 = arith.select %198, %196, %200 : vector<8x512xi1>, vector<8x512xf32>
    %c0_134 = arith.constant 0 : index
    %c128_135 = arith.constant 128 : index
    %202 = vector.load %arg17[%c0_134, %c128_135] : memref<8x768xf32, #tpu.memory_space<vmem>>, vector<8x512xf32>
    tpu.vector_store %arg17[%c0_134, %c128_135], %201 {strides = array<i32>} : memref<8x768xf32, #tpu.memory_space<vmem>>, vector<8x512xf32>,
    %c0_136 = arith.constant 0 : index
    %c0_137 = arith.constant 0 : index
    %203 = vector.load %arg5[%c0_136, %c0_137] : memref<216x8xf32, #tpu.memory_space<vmem>>, vector<8x8xf32>
    %c0_138 = arith.constant 0 : index
    %c55_139 = arith.constant 55 : index
    %204 = vector.load %arg17[%c0_138, %c55_139] : memref<8x768xf32, #tpu.memory_space<vmem>>, vector<8x512xf32>
    %cst_140 = arith.constant dense<0.000000e+00> : vector<8x512xf32>
    %205 = tpu.matmul %203, %204, %cst_140 {dimension_numbers = #tpu.dot_dimension_numbers<[1], [0], [0], [1], [0, 0, 1, 1], [], []>} : vector<8x8xf32>, vector<8x512xf32>, vector<8x512xf32> -> vector<8x512xf32>
    %c0_141 = arith.constant 0 : index
    %c0_142 = arith.constant 0 : index
    %206 = vector.load %arg11[%c0_141, %c0_142] : memref<27x512xf32, #tpu.memory_space<vmem>>, vector<1x512xf32>
    %207 = vector.broadcast %206 : vector<1x512xf32> to vector<8x512xf32>
    %208 = arith.mulf %205, %207 : vector<8x512xf32>
    %c8_143 = arith.constant 8 : index
    %c0_144 = arith.constant 0 : index
    %209 = vector.load %arg5[%c8_143, %c0_144] : memref<216x8xf32, #tpu.memory_space<vmem>>, vector<8x8xf32>
    %c0_145 = arith.constant 0 : index
    %c56_146 = arith.constant 56 : index
    %210 = vector.load %arg17[%c0_145, %c56_146] : memref<8x768xf32, #tpu.memory_space<vmem>>, vector<8x512xf32>
    %cst_147 = arith.constant dense<0.000000e+00> : vector<8x512xf32>
    %211 = tpu.matmul %209, %210, %cst_147 {dimension_numbers = #tpu.dot_dimension_numbers<[1], [0], [0], [1], [0, 0, 1, 1], [], []>} : vector<8x8xf32>, vector<8x512xf32>, vector<8x512xf32> -> vector<8x512xf32>
    %c1_148 = arith.constant 1 : index
    %c0_149 = arith.constant 0 : index
    %212 = vector.load %arg11[%c1_148, %c0_149] : memref<27x512xf32, #tpu.memory_space<vmem>>, vector<1x512xf32>
    %213 = vector.broadcast %212 : vector<1x512xf32> to vector<8x512xf32>
    %214 = arith.mulf %211, %213 : vector<8x512xf32>
    %215 = arith.addf %208, %214 : vector<8x512xf32>
    %c16_150 = arith.constant 16 : index
    %c0_151 = arith.constant 0 : index
    %216 = vector.load %arg5[%c16_150, %c0_151] : memref<216x8xf32, #tpu.memory_space<vmem>>, vector<8x8xf32>
    %c0_152 = arith.constant 0 : index
    %c57_153 = arith.constant 57 : index
    %217 = vector.load %arg17[%c0_152, %c57_153] : memref<8x768xf32, #tpu.memory_space<vmem>>, vector<8x512xf32>
    %cst_154 = arith.constant dense<0.000000e+00> : vector<8x512xf32>
    %218 = tpu.matmul %216, %217, %cst_154 {dimension_numbers = #tpu.dot_dimension_numbers<[1], [0], [0], [1], [0, 0, 1, 1], [], []>} : vector<8x8xf32>, vector<8x512xf32>, vector<8x512xf32> -> vector<8x512xf32>
    %c2_155 = arith.constant 2 : index
    %c0_156 = arith.constant 0 : index
    %219 = vector.load %arg11[%c2_155, %c0_156] : memref<27x512xf32, #tpu.memory_space<vmem>>, vector<1x512xf32>
    %220 = vector.broadcast %219 : vector<1x512xf32> to vector<8x512xf32>
    %221 = arith.mulf %218, %220 : vector<8x512xf32>
    %222 = arith.addf %215, %221 : vector<8x512xf32>
    %c24_157 = arith.constant 24 : index
    %c0_158 = arith.constant 0 : index
    %223 = vector.load %arg5[%c24_157, %c0_158] : memref<216x8xf32, #tpu.memory_space<vmem>>, vector<8x8xf32>
    %c0_159 = arith.constant 0 : index
    %c63_160 = arith.constant 63 : index
    %224 = vector.load %arg17[%c0_159, %c63_160] : memref<8x768xf32, #tpu.memory_space<vmem>>, vector<8x512xf32>
    %cst_161 = arith.constant dense<0.000000e+00> : vector<8x512xf32>
    %225 = tpu.matmul %223, %224, %cst_161 {dimension_numbers = #tpu.dot_dimension_numbers<[1], [0], [0], [1], [0, 0, 1, 1], [], []>} : vector<8x8xf32>, vector<8x512xf32>, vector<8x512xf32> -> vector<8x512xf32>
    %c3_162 = arith.constant 3 : index
    %c0_163 = arith.constant 0 : index
    %226 = vector.load %arg11[%c3_162, %c0_163] : memref<27x512xf32, #tpu.memory_space<vmem>>, vector<1x512xf32>
    %227 = vector.broadcast %226 : vector<1x512xf32> to vector<8x512xf32>
    %228 = arith.mulf %225, %227 : vector<8x512xf32>
    %229 = arith.addf %222, %228 : vector<8x512xf32>
    %c32_164 = arith.constant 32 : index
    %c0_165 = arith.constant 0 : index
    %230 = vector.load %arg5[%c32_164, %c0_165] : memref<216x8xf32, #tpu.memory_space<vmem>>, vector<8x8xf32>
    %c0_166 = arith.constant 0 : index
    %c64_167 = arith.constant 64 : index
    %231 = vector.load %arg17[%c0_166, %c64_167] : memref<8x768xf32, #tpu.memory_space<vmem>>, vector<8x512xf32>
    %cst_168 = arith.constant dense<0.000000e+00> : vector<8x512xf32>
    %232 = tpu.matmul %230, %231, %cst_168 {dimension_numbers = #tpu.dot_dimension_numbers<[1], [0], [0], [1], [0, 0, 1, 1], [], []>} : vector<8x8xf32>, vector<8x512xf32>, vector<8x512xf32> -> vector<8x512xf32>
    %c4_169 = arith.constant 4 : index
    %c0_170 = arith.constant 0 : index
    %233 = vector.load %arg11[%c4_169, %c0_170] : memref<27x512xf32, #tpu.memory_space<vmem>>, vector<1x512xf32>
    %234 = vector.broadcast %233 : vector<1x512xf32> to vector<8x512xf32>
    %235 = arith.mulf %232, %234 : vector<8x512xf32>
    %236 = arith.addf %229, %235 : vector<8x512xf32>
    %c40_171 = arith.constant 40 : index
    %c0_172 = arith.constant 0 : index
    %237 = vector.load %arg5[%c40_171, %c0_172] : memref<216x8xf32, #tpu.memory_space<vmem>>, vector<8x8xf32>
    %c0_173 = arith.constant 0 : index
    %c65_174 = arith.constant 65 : index
    %238 = vector.load %arg17[%c0_173, %c65_174] : memref<8x768xf32, #tpu.memory_space<vmem>>, vector<8x512xf32>
    %cst_175 = arith.constant dense<0.000000e+00> : vector<8x512xf32>
    %239 = tpu.matmul %237, %238, %cst_175 {dimension_numbers = #tpu.dot_dimension_numbers<[1], [0], [0], [1], [0, 0, 1, 1], [], []>} : vector<8x8xf32>, vector<8x512xf32>, vector<8x512xf32> -> vector<8x512xf32>
    %c5_176 = arith.constant 5 : index
    %c0_177 = arith.constant 0 : index
    %240 = vector.load %arg11[%c5_176, %c0_177] : memref<27x512xf32, #tpu.memory_space<vmem>>, vector<1x512xf32>
    %241 = vector.broadcast %240 : vector<1x512xf32> to vector<8x512xf32>
    %242 = arith.mulf %239, %241 : vector<8x512xf32>
    %243 = arith.addf %236, %242 : vector<8x512xf32>
    %c48_178 = arith.constant 48 : index
    %c0_179 = arith.constant 0 : index
    %244 = vector.load %arg5[%c48_178, %c0_179] : memref<216x8xf32, #tpu.memory_space<vmem>>, vector<8x8xf32>
    %c0_180 = arith.constant 0 : index
    %c71_181 = arith.constant 71 : index
    %245 = vector.load %arg17[%c0_180, %c71_181] : memref<8x768xf32, #tpu.memory_space<vmem>>, vector<8x512xf32>
    %cst_182 = arith.constant dense<0.000000e+00> : vector<8x512xf32>
    %246 = tpu.matmul %244, %245, %cst_182 {dimension_numbers = #tpu.dot_dimension_numbers<[1], [0], [0], [1], [0, 0, 1, 1], [], []>} : vector<8x8xf32>, vector<8x512xf32>, vector<8x512xf32> -> vector<8x512xf32>
    %c6_183 = arith.constant 6 : index
    %c0_184 = arith.constant 0 : index
    %247 = vector.load %arg11[%c6_183, %c0_184] : memref<27x512xf32, #tpu.memory_space<vmem>>, vector<1x512xf32>
    %248 = vector.broadcast %247 : vector<1x512xf32> to vector<8x512xf32>
    %249 = arith.mulf %246, %248 : vector<8x512xf32>
    %250 = arith.addf %243, %249 : vector<8x512xf32>
    %c56_185 = arith.constant 56 : index
    %c0_186 = arith.constant 0 : index
    %251 = vector.load %arg5[%c56_185, %c0_186] : memref<216x8xf32, #tpu.memory_space<vmem>>, vector<8x8xf32>
    %c0_187 = arith.constant 0 : index
    %c72_188 = arith.constant 72 : index
    %252 = vector.load %arg17[%c0_187, %c72_188] : memref<8x768xf32, #tpu.memory_space<vmem>>, vector<8x512xf32>
    %cst_189 = arith.constant dense<0.000000e+00> : vector<8x512xf32>
    %253 = tpu.matmul %251, %252, %cst_189 {dimension_numbers = #tpu.dot_dimension_numbers<[1], [0], [0], [1], [0, 0, 1, 1], [], []>} : vector<8x8xf32>, vector<8x512xf32>, vector<8x512xf32> -> vector<8x512xf32>
    %c7_190 = arith.constant 7 : index
    %c0_191 = arith.constant 0 : index
    %254 = vector.load %arg11[%c7_190, %c0_191] : memref<27x512xf32, #tpu.memory_space<vmem>>, vector<1x512xf32>
    %255 = vector.broadcast %254 : vector<1x512xf32> to vector<8x512xf32>
    %256 = arith.mulf %253, %255 : vector<8x512xf32>
    %257 = arith.addf %250, %256 : vector<8x512xf32>
    %c64_192 = arith.constant 64 : index
    %c0_193 = arith.constant 0 : index
    %258 = vector.load %arg5[%c64_192, %c0_193] : memref<216x8xf32, #tpu.memory_space<vmem>>, vector<8x8xf32>
    %c0_194 = arith.constant 0 : index
    %c73_195 = arith.constant 73 : index
    %259 = vector.load %arg17[%c0_194, %c73_195] : memref<8x768xf32, #tpu.memory_space<vmem>>, vector<8x512xf32>
    %cst_196 = arith.constant dense<0.000000e+00> : vector<8x512xf32>
    %260 = tpu.matmul %258, %259, %cst_196 {dimension_numbers = #tpu.dot_dimension_numbers<[1], [0], [0], [1], [0, 0, 1, 1], [], []>} : vector<8x8xf32>, vector<8x512xf32>, vector<8x512xf32> -> vector<8x512xf32>
    %c8_197 = arith.constant 8 : index
    %c0_198 = arith.constant 0 : index
    %261 = vector.load %arg11[%c8_197, %c0_198] : memref<27x512xf32, #tpu.memory_space<vmem>>, vector<1x512xf32>
    %262 = vector.broadcast %261 : vector<1x512xf32> to vector<8x512xf32>
    %263 = arith.mulf %260, %262 : vector<8x512xf32>
    %264 = arith.addf %257, %263 : vector<8x512xf32>
    %c72_199 = arith.constant 72 : index
    %c0_200 = arith.constant 0 : index
    %265 = vector.load %arg5[%c72_199, %c0_200] : memref<216x8xf32, #tpu.memory_space<vmem>>, vector<8x8xf32>
    %c0_201 = arith.constant 0 : index
    %c119_202 = arith.constant 119 : index
    %266 = vector.load %arg17[%c0_201, %c119_202] : memref<8x768xf32, #tpu.memory_space<vmem>>, vector<8x512xf32>
    %cst_203 = arith.constant dense<0.000000e+00> : vector<8x512xf32>
    %267 = tpu.matmul %265, %266, %cst_203 {dimension_numbers = #tpu.dot_dimension_numbers<[1], [0], [0], [1], [0, 0, 1, 1], [], []>} : vector<8x8xf32>, vector<8x512xf32>, vector<8x512xf32> -> vector<8x512xf32>
    %c9_204 = arith.constant 9 : index
    %c0_205 = arith.constant 0 : index
    %268 = vector.load %arg11[%c9_204, %c0_205] : memref<27x512xf32, #tpu.memory_space<vmem>>, vector<1x512xf32>
    %269 = vector.broadcast %268 : vector<1x512xf32> to vector<8x512xf32>
    %270 = arith.mulf %267, %269 : vector<8x512xf32>
    %271 = arith.addf %264, %270 : vector<8x512xf32>
    %c80_206 = arith.constant 80 : index
    %c0_207 = arith.constant 0 : index
    %272 = vector.load %arg5[%c80_206, %c0_207] : memref<216x8xf32, #tpu.memory_space<vmem>>, vector<8x8xf32>
    %c0_208 = arith.constant 0 : index
    %c120_209 = arith.constant 120 : index
    %273 = vector.load %arg17[%c0_208, %c120_209] : memref<8x768xf32, #tpu.memory_space<vmem>>, vector<8x512xf32>
    %cst_210 = arith.constant dense<0.000000e+00> : vector<8x512xf32>
    %274 = tpu.matmul %272, %273, %cst_210 {dimension_numbers = #tpu.dot_dimension_numbers<[1], [0], [0], [1], [0, 0, 1, 1], [], []>} : vector<8x8xf32>, vector<8x512xf32>, vector<8x512xf32> -> vector<8x512xf32>
    %c10_211 = arith.constant 10 : index
    %c0_212 = arith.constant 0 : index
    %275 = vector.load %arg11[%c10_211, %c0_212] : memref<27x512xf32, #tpu.memory_space<vmem>>, vector<1x512xf32>
    %276 = vector.broadcast %275 : vector<1x512xf32> to vector<8x512xf32>
    %277 = arith.mulf %274, %276 : vector<8x512xf32>
    %278 = arith.addf %271, %277 : vector<8x512xf32>
    %c88_213 = arith.constant 88 : index
    %c0_214 = arith.constant 0 : index
    %279 = vector.load %arg5[%c88_213, %c0_214] : memref<216x8xf32, #tpu.memory_space<vmem>>, vector<8x8xf32>
    %c0_215 = arith.constant 0 : index
    %c121_216 = arith.constant 121 : index
    %280 = vector.load %arg17[%c0_215, %c121_216] : memref<8x768xf32, #tpu.memory_space<vmem>>, vector<8x512xf32>
    %cst_217 = arith.constant dense<0.000000e+00> : vector<8x512xf32>
    %281 = tpu.matmul %279, %280, %cst_217 {dimension_numbers = #tpu.dot_dimension_numbers<[1], [0], [0], [1], [0, 0, 1, 1], [], []>} : vector<8x8xf32>, vector<8x512xf32>, vector<8x512xf32> -> vector<8x512xf32>
    %c11_218 = arith.constant 11 : index
    %c0_219 = arith.constant 0 : index
    %282 = vector.load %arg11[%c11_218, %c0_219] : memref<27x512xf32, #tpu.memory_space<vmem>>, vector<1x512xf32>
    %283 = vector.broadcast %282 : vector<1x512xf32> to vector<8x512xf32>
    %284 = arith.mulf %281, %283 : vector<8x512xf32>
    %285 = arith.addf %278, %284 : vector<8x512xf32>
    %c96_220 = arith.constant 96 : index
    %c0_221 = arith.constant 0 : index
    %286 = vector.load %arg5[%c96_220, %c0_221] : memref<216x8xf32, #tpu.memory_space<vmem>>, vector<8x8xf32>
    %c0_222 = arith.constant 0 : index
    %c127_223 = arith.constant 127 : index
    %287 = vector.load %arg17[%c0_222, %c127_223] : memref<8x768xf32, #tpu.memory_space<vmem>>, vector<8x512xf32>
    %cst_224 = arith.constant dense<0.000000e+00> : vector<8x512xf32>
    %288 = tpu.matmul %286, %287, %cst_224 {dimension_numbers = #tpu.dot_dimension_numbers<[1], [0], [0], [1], [0, 0, 1, 1], [], []>} : vector<8x8xf32>, vector<8x512xf32>, vector<8x512xf32> -> vector<8x512xf32>
    %c12_225 = arith.constant 12 : index
    %c0_226 = arith.constant 0 : index
    %289 = vector.load %arg11[%c12_225, %c0_226] : memref<27x512xf32, #tpu.memory_space<vmem>>, vector<1x512xf32>
    %290 = vector.broadcast %289 : vector<1x512xf32> to vector<8x512xf32>
    %291 = arith.mulf %288, %290 : vector<8x512xf32>
    %292 = arith.addf %285, %291 : vector<8x512xf32>
    %c104_227 = arith.constant 104 : index
    %c0_228 = arith.constant 0 : index
    %293 = vector.load %arg5[%c104_227, %c0_228] : memref<216x8xf32, #tpu.memory_space<vmem>>, vector<8x8xf32>
    %c0_229 = arith.constant 0 : index
    %c128_230 = arith.constant 128 : index
    %294 = vector.load %arg17[%c0_229, %c128_230] : memref<8x768xf32, #tpu.memory_space<vmem>>, vector<8x512xf32>
    %cst_231 = arith.constant dense<0.000000e+00> : vector<8x512xf32>
    %295 = tpu.matmul %293, %294, %cst_231 {dimension_numbers = #tpu.dot_dimension_numbers<[1], [0], [0], [1], [0, 0, 1, 1], [], []>} : vector<8x8xf32>, vector<8x512xf32>, vector<8x512xf32> -> vector<8x512xf32>
    %296 = arith.addf %292, %295 : vector<8x512xf32>
    %c112_232 = arith.constant 112 : index
    %c0_233 = arith.constant 0 : index
    %297 = vector.load %arg5[%c112_232, %c0_233] : memref<216x8xf32, #tpu.memory_space<vmem>>, vector<8x8xf32>
    %c0_234 = arith.constant 0 : index
    %c129_235 = arith.constant 129 : index
    %298 = vector.load %arg17[%c0_234, %c129_235] : memref<8x768xf32, #tpu.memory_space<vmem>>, vector<8x512xf32>
    %cst_236 = arith.constant dense<0.000000e+00> : vector<8x512xf32>
    %299 = tpu.matmul %297, %298, %cst_236 {dimension_numbers = #tpu.dot_dimension_numbers<[1], [0], [0], [1], [0, 0, 1, 1], [], []>} : vector<8x8xf32>, vector<8x512xf32>, vector<8x512xf32> -> vector<8x512xf32>
    %c14_237 = arith.constant 14 : index
    %c0_238 = arith.constant 0 : index
    %300 = vector.load %arg11[%c14_237, %c0_238] : memref<27x512xf32, #tpu.memory_space<vmem>>, vector<1x512xf32>
    %301 = vector.broadcast %300 : vector<1x512xf32> to vector<8x512xf32>
    %302 = arith.mulf %299, %301 : vector<8x512xf32>
    %303 = arith.addf %296, %302 : vector<8x512xf32>
    %c120_239 = arith.constant 120 : index
    %c0_240 = arith.constant 0 : index
    %304 = vector.load %arg5[%c120_239, %c0_240] : memref<216x8xf32, #tpu.memory_space<vmem>>, vector<8x8xf32>
    %c0_241 = arith.constant 0 : index
    %c135_242 = arith.constant 135 : index
    %305 = vector.load %arg17[%c0_241, %c135_242] : memref<8x768xf32, #tpu.memory_space<vmem>>, vector<8x512xf32>
    %cst_243 = arith.constant dense<0.000000e+00> : vector<8x512xf32>
    %306 = tpu.matmul %304, %305, %cst_243 {dimension_numbers = #tpu.dot_dimension_numbers<[1], [0], [0], [1], [0, 0, 1, 1], [], []>} : vector<8x8xf32>, vector<8x512xf32>, vector<8x512xf32> -> vector<8x512xf32>
    %c15_244 = arith.constant 15 : index
    %c0_245 = arith.constant 0 : index
    %307 = vector.load %arg11[%c15_244, %c0_245] : memref<27x512xf32, #tpu.memory_space<vmem>>, vector<1x512xf32>
    %308 = vector.broadcast %307 : vector<1x512xf32> to vector<8x512xf32>
    %309 = arith.mulf %306, %308 : vector<8x512xf32>
    %310 = arith.addf %303, %309 : vector<8x512xf32>
    %c128_246 = arith.constant 128 : index
    %c0_247 = arith.constant 0 : index
    %311 = vector.load %arg5[%c128_246, %c0_247] : memref<216x8xf32, #tpu.memory_space<vmem>>, vector<8x8xf32>
    %c0_248 = arith.constant 0 : index
    %c136_249 = arith.constant 136 : index
    %312 = vector.load %arg17[%c0_248, %c136_249] : memref<8x768xf32, #tpu.memory_space<vmem>>, vector<8x512xf32>
    %cst_250 = arith.constant dense<0.000000e+00> : vector<8x512xf32>
    %313 = tpu.matmul %311, %312, %cst_250 {dimension_numbers = #tpu.dot_dimension_numbers<[1], [0], [0], [1], [0, 0, 1, 1], [], []>} : vector<8x8xf32>, vector<8x512xf32>, vector<8x512xf32> -> vector<8x512xf32>
    %c16_251 = arith.constant 16 : index
    %c0_252 = arith.constant 0 : index
    %314 = vector.load %arg11[%c16_251, %c0_252] : memref<27x512xf32, #tpu.memory_space<vmem>>, vector<1x512xf32>
    %315 = vector.broadcast %314 : vector<1x512xf32> to vector<8x512xf32>
    %316 = arith.mulf %313, %315 : vector<8x512xf32>
    %317 = arith.addf %310, %316 : vector<8x512xf32>
    %c136_253 = arith.constant 136 : index
    %c0_254 = arith.constant 0 : index
    %318 = vector.load %arg5[%c136_253, %c0_254] : memref<216x8xf32, #tpu.memory_space<vmem>>, vector<8x8xf32>
    %c0_255 = arith.constant 0 : index
    %c137_256 = arith.constant 137 : index
    %319 = vector.load %arg17[%c0_255, %c137_256] : memref<8x768xf32, #tpu.memory_space<vmem>>, vector<8x512xf32>
    %cst_257 = arith.constant dense<0.000000e+00> : vector<8x512xf32>
    %320 = tpu.matmul %318, %319, %cst_257 {dimension_numbers = #tpu.dot_dimension_numbers<[1], [0], [0], [1], [0, 0, 1, 1], [], []>} : vector<8x8xf32>, vector<8x512xf32>, vector<8x512xf32> -> vector<8x512xf32>
    %c17_258 = arith.constant 17 : index
    %c0_259 = arith.constant 0 : index
    %321 = vector.load %arg11[%c17_258, %c0_259] : memref<27x512xf32, #tpu.memory_space<vmem>>, vector<1x512xf32>
    %322 = vector.broadcast %321 : vector<1x512xf32> to vector<8x512xf32>
    %323 = arith.mulf %320, %322 : vector<8x512xf32>
    %324 = arith.addf %317, %323 : vector<8x512xf32>
    %c144_260 = arith.constant 144 : index
    %c0_261 = arith.constant 0 : index
    %325 = vector.load %arg5[%c144_260, %c0_261] : memref<216x8xf32, #tpu.memory_space<vmem>>, vector<8x8xf32>
    %c0_262 = arith.constant 0 : index
    %c183_263 = arith.constant 183 : index
    %326 = vector.load %arg17[%c0_262, %c183_263] : memref<8x768xf32, #tpu.memory_space<vmem>>, vector<8x512xf32>
    %cst_264 = arith.constant dense<0.000000e+00> : vector<8x512xf32>
    %327 = tpu.matmul %325, %326, %cst_264 {dimension_numbers = #tpu.dot_dimension_numbers<[1], [0], [0], [1], [0, 0, 1, 1], [], []>} : vector<8x8xf32>, vector<8x512xf32>, vector<8x512xf32> -> vector<8x512xf32>
    %c18_265 = arith.constant 18 : index
    %c0_266 = arith.constant 0 : index
    %328 = vector.load %arg11[%c18_265, %c0_266] : memref<27x512xf32, #tpu.memory_space<vmem>>, vector<1x512xf32>
    %329 = vector.broadcast %328 : vector<1x512xf32> to vector<8x512xf32>
    %330 = arith.mulf %327, %329 : vector<8x512xf32>
    %331 = arith.addf %324, %330 : vector<8x512xf32>
    %c152_267 = arith.constant 152 : index
    %c0_268 = arith.constant 0 : index
    %332 = vector.load %arg5[%c152_267, %c0_268] : memref<216x8xf32, #tpu.memory_space<vmem>>, vector<8x8xf32>
    %c0_269 = arith.constant 0 : index
    %c184_270 = arith.constant 184 : index
    %333 = vector.load %arg17[%c0_269, %c184_270] : memref<8x768xf32, #tpu.memory_space<vmem>>, vector<8x512xf32>
    %cst_271 = arith.constant dense<0.000000e+00> : vector<8x512xf32>
    %334 = tpu.matmul %332, %333, %cst_271 {dimension_numbers = #tpu.dot_dimension_numbers<[1], [0], [0], [1], [0, 0, 1, 1], [], []>} : vector<8x8xf32>, vector<8x512xf32>, vector<8x512xf32> -> vector<8x512xf32>
    %c19_272 = arith.constant 19 : index
    %c0_273 = arith.constant 0 : index
    %335 = vector.load %arg11[%c19_272, %c0_273] : memref<27x512xf32, #tpu.memory_space<vmem>>, vector<1x512xf32>
    %336 = vector.broadcast %335 : vector<1x512xf32> to vector<8x512xf32>
    %337 = arith.mulf %334, %336 : vector<8x512xf32>
    %338 = arith.addf %331, %337 : vector<8x512xf32>
    %c160_274 = arith.constant 160 : index
    %c0_275 = arith.constant 0 : index
    %339 = vector.load %arg5[%c160_274, %c0_275] : memref<216x8xf32, #tpu.memory_space<vmem>>, vector<8x8xf32>
    %c0_276 = arith.constant 0 : index
    %c185_277 = arith.constant 185 : index
    %340 = vector.load %arg17[%c0_276, %c185_277] : memref<8x768xf32, #tpu.memory_space<vmem>>, vector<8x512xf32>
    %cst_278 = arith.constant dense<0.000000e+00> : vector<8x512xf32>
    %341 = tpu.matmul %339, %340, %cst_278 {dimension_numbers = #tpu.dot_dimension_numbers<[1], [0], [0], [1], [0, 0, 1, 1], [], []>} : vector<8x8xf32>, vector<8x512xf32>, vector<8x512xf32> -> vector<8x512xf32>
    %c20_279 = arith.constant 20 : index
    %c0_280 = arith.constant 0 : index
    %342 = vector.load %arg11[%c20_279, %c0_280] : memref<27x512xf32, #tpu.memory_space<vmem>>, vector<1x512xf32>
    %343 = vector.broadcast %342 : vector<1x512xf32> to vector<8x512xf32>
    %344 = arith.mulf %341, %343 : vector<8x512xf32>
    %345 = arith.addf %338, %344 : vector<8x512xf32>
    %c168_281 = arith.constant 168 : index
    %c0_282 = arith.constant 0 : index
    %346 = vector.load %arg5[%c168_281, %c0_282] : memref<216x8xf32, #tpu.memory_space<vmem>>, vector<8x8xf32>
    %c0_283 = arith.constant 0 : index
    %c191_284 = arith.constant 191 : index
    %347 = vector.load %arg17[%c0_283, %c191_284] : memref<8x768xf32, #tpu.memory_space<vmem>>, vector<8x512xf32>
    %cst_285 = arith.constant dense<0.000000e+00> : vector<8x512xf32>
    %348 = tpu.matmul %346, %347, %cst_285 {dimension_numbers = #tpu.dot_dimension_numbers<[1], [0], [0], [1], [0, 0, 1, 1], [], []>} : vector<8x8xf32>, vector<8x512xf32>, vector<8x512xf32> -> vector<8x512xf32>
    %c21_286 = arith.constant 21 : index
    %c0_287 = arith.constant 0 : index
    %349 = vector.load %arg11[%c21_286, %c0_287] : memref<27x512xf32, #tpu.memory_space<vmem>>, vector<1x512xf32>
    %350 = vector.broadcast %349 : vector<1x512xf32> to vector<8x512xf32>
    %351 = arith.mulf %348, %350 : vector<8x512xf32>
    %352 = arith.addf %345, %351 : vector<8x512xf32>
    %c176_288 = arith.constant 176 : index
    %c0_289 = arith.constant 0 : index
    %353 = vector.load %arg5[%c176_288, %c0_289] : memref<216x8xf32, #tpu.memory_space<vmem>>, vector<8x8xf32>
    %c0_290 = arith.constant 0 : index
    %c192_291 = arith.constant 192 : index
    %354 = vector.load %arg17[%c0_290, %c192_291] : memref<8x768xf32, #tpu.memory_space<vmem>>, vector<8x512xf32>
    %cst_292 = arith.constant dense<0.000000e+00> : vector<8x512xf32>
    %355 = tpu.matmul %353, %354, %cst_292 {dimension_numbers = #tpu.dot_dimension_numbers<[1], [0], [0], [1], [0, 0, 1, 1], [], []>} : vector<8x8xf32>, vector<8x512xf32>, vector<8x512xf32> -> vector<8x512xf32>
    %c22_293 = arith.constant 22 : index
    %c0_294 = arith.constant 0 : index
    %356 = vector.load %arg11[%c22_293, %c0_294] : memref<27x512xf32, #tpu.memory_space<vmem>>, vector<1x512xf32>
    %357 = vector.broadcast %356 : vector<1x512xf32> to vector<8x512xf32>
    %358 = arith.mulf %355, %357 : vector<8x512xf32>
    %359 = arith.addf %352, %358 : vector<8x512xf32>
    %c184_295 = arith.constant 184 : index
    %c0_296 = arith.constant 0 : index
    %360 = vector.load %arg5[%c184_295, %c0_296] : memref<216x8xf32, #tpu.memory_space<vmem>>, vector<8x8xf32>
    %c0_297 = arith.constant 0 : index
    %c193_298 = arith.constant 193 : index
    %361 = vector.load %arg17[%c0_297, %c193_298] : memref<8x768xf32, #tpu.memory_space<vmem>>, vector<8x512xf32>
    %cst_299 = arith.constant dense<0.000000e+00> : vector<8x512xf32>
    %362 = tpu.matmul %360, %361, %cst_299 {dimension_numbers = #tpu.dot_dimension_numbers<[1], [0], [0], [1], [0, 0, 1, 1], [], []>} : vector<8x8xf32>, vector<8x512xf32>, vector<8x512xf32> -> vector<8x512xf32>
    %c23_300 = arith.constant 23 : index
    %c0_301 = arith.constant 0 : index
    %363 = vector.load %arg11[%c23_300, %c0_301] : memref<27x512xf32, #tpu.memory_space<vmem>>, vector<1x512xf32>
    %364 = vector.broadcast %363 : vector<1x512xf32> to vector<8x512xf32>
    %365 = arith.mulf %362, %364 : vector<8x512xf32>
    %366 = arith.addf %359, %365 : vector<8x512xf32>
    %c192_302 = arith.constant 192 : index
    %c0_303 = arith.constant 0 : index
    %367 = vector.load %arg5[%c192_302, %c0_303] : memref<216x8xf32, #tpu.memory_space<vmem>>, vector<8x8xf32>
    %c0_304 = arith.constant 0 : index
    %c199_305 = arith.constant 199 : index
    %368 = vector.load %arg17[%c0_304, %c199_305] : memref<8x768xf32, #tpu.memory_space<vmem>>, vector<8x512xf32>
    %cst_306 = arith.constant dense<0.000000e+00> : vector<8x512xf32>
    %369 = tpu.matmul %367, %368, %cst_306 {dimension_numbers = #tpu.dot_dimension_numbers<[1], [0], [0], [1], [0, 0, 1, 1], [], []>} : vector<8x8xf32>, vector<8x512xf32>, vector<8x512xf32> -> vector<8x512xf32>
    %c24_307 = arith.constant 24 : index
    %c0_308 = arith.constant 0 : index
    %370 = vector.load %arg11[%c24_307, %c0_308] : memref<27x512xf32, #tpu.memory_space<vmem>>, vector<1x512xf32>
    %371 = vector.broadcast %370 : vector<1x512xf32> to vector<8x512xf32>
    %372 = arith.mulf %369, %371 : vector<8x512xf32>
    %373 = arith.addf %366, %372 : vector<8x512xf32>
    %c200_309 = arith.constant 200 : index
    %c0_310 = arith.constant 0 : index
    %374 = vector.load %arg5[%c200_309, %c0_310] : memref<216x8xf32, #tpu.memory_space<vmem>>, vector<8x8xf32>
    %c0_311 = arith.constant 0 : index
    %c200_312 = arith.constant 200 : index
    %375 = vector.load %arg17[%c0_311, %c200_312] : memref<8x768xf32, #tpu.memory_space<vmem>>, vector<8x512xf32>
    %cst_313 = arith.constant dense<0.000000e+00> : vector<8x512xf32>
    %376 = tpu.matmul %374, %375, %cst_313 {dimension_numbers = #tpu.dot_dimension_numbers<[1], [0], [0], [1], [0, 0, 1, 1], [], []>} : vector<8x8xf32>, vector<8x512xf32>, vector<8x512xf32> -> vector<8x512xf32>
    %c25_314 = arith.constant 25 : index
    %c0_315 = arith.constant 0 : index
    %377 = vector.load %arg11[%c25_314, %c0_315] : memref<27x512xf32, #tpu.memory_space<vmem>>, vector<1x512xf32>
    %378 = vector.broadcast %377 : vector<1x512xf32> to vector<8x512xf32>
    %379 = arith.mulf %376, %378 : vector<8x512xf32>
    %380 = arith.addf %373, %379 : vector<8x512xf32>
    %c208_316 = arith.constant 208 : index
    %c0_317 = arith.constant 0 : index
    %381 = vector.load %arg5[%c208_316, %c0_317] : memref<216x8xf32, #tpu.memory_space<vmem>>, vector<8x8xf32>
    %c0_318 = arith.constant 0 : index
    %c201_319 = arith.constant 201 : index
    %382 = vector.load %arg17[%c0_318, %c201_319] : memref<8x768xf32, #tpu.memory_space<vmem>>, vector<8x512xf32>
    %cst_320 = arith.constant dense<0.000000e+00> : vector<8x512xf32>
    %383 = tpu.matmul %381, %382, %cst_320 {dimension_numbers = #tpu.dot_dimension_numbers<[1], [0], [0], [1], [0, 0, 1, 1], [], []>} : vector<8x8xf32>, vector<8x512xf32>, vector<8x512xf32> -> vector<8x512xf32>
    %c26_321 = arith.constant 26 : index
    %c0_322 = arith.constant 0 : index
    %384 = vector.load %arg11[%c26_321, %c0_322] : memref<27x512xf32, #tpu.memory_space<vmem>>, vector<1x512xf32>
    %385 = vector.broadcast %384 : vector<1x512xf32> to vector<8x512xf32>
    %386 = arith.mulf %383, %385 : vector<8x512xf32>
    %387 = arith.addf %380, %386 : vector<8x512xf32>
    %c0_323 = arith.constant 0 : index
    %c0_324 = arith.constant 0 : index
    %388 = vector.load %arg6[%c0_323, %c0_324] : memref<8x1xf32, #tpu.memory_space<vmem>>, vector<8x1xf32>
    %389 = vector.broadcast %388 : vector<8x1xf32> to vector<8x512xf32>
    %390 = arith.mulf %387, %389 : vector<8x512xf32>
    %c0_325 = arith.constant 0 : index
    %c0_326 = arith.constant 0 : index
    %391 = vector.load %arg7[%c0_325, %c0_326] : memref<8x1xf32, #tpu.memory_space<vmem>>, vector<8x1xf32>
    %392 = vector.broadcast %391 : vector<8x1xf32> to vector<8x512xf32>
    %393 = arith.addf %390, %392 : vector<8x512xf32>
    %cst_327 = arith.constant 0.000000e+00 : f32
    %394 = vector.broadcast %cst_327 : f32 to vector<8x512xf32>
    %395 = arith.cmpf ogt, %393, %394 : vector<8x512xf32>
    %cst_328 = arith.constant 1.000000e-01 : f32
    %396 = vector.broadcast %cst_328 : f32 to vector<8x512xf32>
    %397 = arith.mulf %396, %393 : vector<8x512xf32>
    %398 = arith.select %395, %393, %397 : vector<8x512xi1>, vector<8x512xf32>
    %c0_329 = arith.constant 0 : index
    %c128_330 = arith.constant 128 : index
    %399 = vector.load %arg17[%c0_329, %c128_330] : memref<8x768xf32, #tpu.memory_space<vmem>>, vector<8x512xf32>
    tpu.vector_store %arg17[%c0_329, %c128_330], %398 {strides = array<i32>} : memref<8x768xf32, #tpu.memory_space<vmem>>, vector<8x512xf32>,
    %c0_331 = arith.constant 0 : index
    %c0_332 = arith.constant 0 : index
    %400 = vector.load %arg8[%c0_331, %c0_332] : memref<216x8xf32, #tpu.memory_space<vmem>>, vector<8x8xf32>
    %c0_333 = arith.constant 0 : index
    %c55_334 = arith.constant 55 : index
    %401 = vector.load %arg17[%c0_333, %c55_334] : memref<8x768xf32, #tpu.memory_space<vmem>>, vector<8x512xf32>
    %cst_335 = arith.constant dense<0.000000e+00> : vector<8x512xf32>
    %402 = tpu.matmul %400, %401, %cst_335 {dimension_numbers = #tpu.dot_dimension_numbers<[1], [0], [0], [1], [0, 0, 1, 1], [], []>} : vector<8x8xf32>, vector<8x512xf32>, vector<8x512xf32> -> vector<8x512xf32>
    %c0_336 = arith.constant 0 : index
    %c0_337 = arith.constant 0 : index
    %403 = vector.load %arg11[%c0_336, %c0_337] : memref<27x512xf32, #tpu.memory_space<vmem>>, vector<1x512xf32>
    %404 = vector.broadcast %403 : vector<1x512xf32> to vector<8x512xf32>
    %405 = arith.mulf %402, %404 : vector<8x512xf32>
    %c8_338 = arith.constant 8 : index
    %c0_339 = arith.constant 0 : index
    %406 = vector.load %arg8[%c8_338, %c0_339] : memref<216x8xf32, #tpu.memory_space<vmem>>, vector<8x8xf32>
    %c0_340 = arith.constant 0 : index
    %c56_341 = arith.constant 56 : index
    %407 = vector.load %arg17[%c0_340, %c56_341] : memref<8x768xf32, #tpu.memory_space<vmem>>, vector<8x512xf32>
    %cst_342 = arith.constant dense<0.000000e+00> : vector<8x512xf32>
    %408 = tpu.matmul %406, %407, %cst_342 {dimension_numbers = #tpu.dot_dimension_numbers<[1], [0], [0], [1], [0, 0, 1, 1], [], []>} : vector<8x8xf32>, vector<8x512xf32>, vector<8x512xf32> -> vector<8x512xf32>
    %c1_343 = arith.constant 1 : index
    %c0_344 = arith.constant 0 : index
    %409 = vector.load %arg11[%c1_343, %c0_344] : memref<27x512xf32, #tpu.memory_space<vmem>>, vector<1x512xf32>
    %410 = vector.broadcast %409 : vector<1x512xf32> to vector<8x512xf32>
    %411 = arith.mulf %408, %410 : vector<8x512xf32>
    %412 = arith.addf %405, %411 : vector<8x512xf32>
    %c16_345 = arith.constant 16 : index
    %c0_346 = arith.constant 0 : index
    %413 = vector.load %arg8[%c16_345, %c0_346] : memref<216x8xf32, #tpu.memory_space<vmem>>, vector<8x8xf32>
    %c0_347 = arith.constant 0 : index
    %c57_348 = arith.constant 57 : index
    %414 = vector.load %arg17[%c0_347, %c57_348] : memref<8x768xf32, #tpu.memory_space<vmem>>, vector<8x512xf32>
    %cst_349 = arith.constant dense<0.000000e+00> : vector<8x512xf32>
    %415 = tpu.matmul %413, %414, %cst_349 {dimension_numbers = #tpu.dot_dimension_numbers<[1], [0], [0], [1], [0, 0, 1, 1], [], []>} : vector<8x8xf32>, vector<8x512xf32>, vector<8x512xf32> -> vector<8x512xf32>
    %c2_350 = arith.constant 2 : index
    %c0_351 = arith.constant 0 : index
    %416 = vector.load %arg11[%c2_350, %c0_351] : memref<27x512xf32, #tpu.memory_space<vmem>>, vector<1x512xf32>
    %417 = vector.broadcast %416 : vector<1x512xf32> to vector<8x512xf32>
    %418 = arith.mulf %415, %417 : vector<8x512xf32>
    %419 = arith.addf %412, %418 : vector<8x512xf32>
    %c24_352 = arith.constant 24 : index
    %c0_353 = arith.constant 0 : index
    %420 = vector.load %arg8[%c24_352, %c0_353] : memref<216x8xf32, #tpu.memory_space<vmem>>, vector<8x8xf32>
    %c0_354 = arith.constant 0 : index
    %c63_355 = arith.constant 63 : index
    %421 = vector.load %arg17[%c0_354, %c63_355] : memref<8x768xf32, #tpu.memory_space<vmem>>, vector<8x512xf32>
    %cst_356 = arith.constant dense<0.000000e+00> : vector<8x512xf32>
    %422 = tpu.matmul %420, %421, %cst_356 {dimension_numbers = #tpu.dot_dimension_numbers<[1], [0], [0], [1], [0, 0, 1, 1], [], []>} : vector<8x8xf32>, vector<8x512xf32>, vector<8x512xf32> -> vector<8x512xf32>
    %c3_357 = arith.constant 3 : index
    %c0_358 = arith.constant 0 : index
    %423 = vector.load %arg11[%c3_357, %c0_358] : memref<27x512xf32, #tpu.memory_space<vmem>>, vector<1x512xf32>
    %424 = vector.broadcast %423 : vector<1x512xf32> to vector<8x512xf32>
    %425 = arith.mulf %422, %424 : vector<8x512xf32>
    %426 = arith.addf %419, %425 : vector<8x512xf32>
    %c32_359 = arith.constant 32 : index
    %c0_360 = arith.constant 0 : index
    %427 = vector.load %arg8[%c32_359, %c0_360] : memref<216x8xf32, #tpu.memory_space<vmem>>, vector<8x8xf32>
    %c0_361 = arith.constant 0 : index
    %c64_362 = arith.constant 64 : index
    %428 = vector.load %arg17[%c0_361, %c64_362] : memref<8x768xf32, #tpu.memory_space<vmem>>, vector<8x512xf32>
    %cst_363 = arith.constant dense<0.000000e+00> : vector<8x512xf32>
    %429 = tpu.matmul %427, %428, %cst_363 {dimension_numbers = #tpu.dot_dimension_numbers<[1], [0], [0], [1], [0, 0, 1, 1], [], []>} : vector<8x8xf32>, vector<8x512xf32>, vector<8x512xf32> -> vector<8x512xf32>
    %c4_364 = arith.constant 4 : index
    %c0_365 = arith.constant 0 : index
    %430 = vector.load %arg11[%c4_364, %c0_365] : memref<27x512xf32, #tpu.memory_space<vmem>>, vector<1x512xf32>
    %431 = vector.broadcast %430 : vector<1x512xf32> to vector<8x512xf32>
    %432 = arith.mulf %429, %431 : vector<8x512xf32>
    %433 = arith.addf %426, %432 : vector<8x512xf32>
    %c40_366 = arith.constant 40 : index
    %c0_367 = arith.constant 0 : index
    %434 = vector.load %arg8[%c40_366, %c0_367] : memref<216x8xf32, #tpu.memory_space<vmem>>, vector<8x8xf32>
    %c0_368 = arith.constant 0 : index
    %c65_369 = arith.constant 65 : index
    %435 = vector.load %arg17[%c0_368, %c65_369] : memref<8x768xf32, #tpu.memory_space<vmem>>, vector<8x512xf32>
    %cst_370 = arith.constant dense<0.000000e+00> : vector<8x512xf32>
    %436 = tpu.matmul %434, %435, %cst_370 {dimension_numbers = #tpu.dot_dimension_numbers<[1], [0], [0], [1], [0, 0, 1, 1], [], []>} : vector<8x8xf32>, vector<8x512xf32>, vector<8x512xf32> -> vector<8x512xf32>
    %c5_371 = arith.constant 5 : index
    %c0_372 = arith.constant 0 : index
    %437 = vector.load %arg11[%c5_371, %c0_372] : memref<27x512xf32, #tpu.memory_space<vmem>>, vector<1x512xf32>
    %438 = vector.broadcast %437 : vector<1x512xf32> to vector<8x512xf32>
    %439 = arith.mulf %436, %438 : vector<8x512xf32>
    %440 = arith.addf %433, %439 : vector<8x512xf32>
    %c48_373 = arith.constant 48 : index
    %c0_374 = arith.constant 0 : index
    %441 = vector.load %arg8[%c48_373, %c0_374] : memref<216x8xf32, #tpu.memory_space<vmem>>, vector<8x8xf32>
    %c0_375 = arith.constant 0 : index
    %c71_376 = arith.constant 71 : index
    %442 = vector.load %arg17[%c0_375, %c71_376] : memref<8x768xf32, #tpu.memory_space<vmem>>, vector<8x512xf32>
    %cst_377 = arith.constant dense<0.000000e+00> : vector<8x512xf32>
    %443 = tpu.matmul %441, %442, %cst_377 {dimension_numbers = #tpu.dot_dimension_numbers<[1], [0], [0], [1], [0, 0, 1, 1], [], []>} : vector<8x8xf32>, vector<8x512xf32>, vector<8x512xf32> -> vector<8x512xf32>
    %c6_378 = arith.constant 6 : index
    %c0_379 = arith.constant 0 : index
    %444 = vector.load %arg11[%c6_378, %c0_379] : memref<27x512xf32, #tpu.memory_space<vmem>>, vector<1x512xf32>
    %445 = vector.broadcast %444 : vector<1x512xf32> to vector<8x512xf32>
    %446 = arith.mulf %443, %445 : vector<8x512xf32>
    %447 = arith.addf %440, %446 : vector<8x512xf32>
    %c56_380 = arith.constant 56 : index
    %c0_381 = arith.constant 0 : index
    %448 = vector.load %arg8[%c56_380, %c0_381] : memref<216x8xf32, #tpu.memory_space<vmem>>, vector<8x8xf32>
    %c0_382 = arith.constant 0 : index
    %c72_383 = arith.constant 72 : index
    %449 = vector.load %arg17[%c0_382, %c72_383] : memref<8x768xf32, #tpu.memory_space<vmem>>, vector<8x512xf32>
    %cst_384 = arith.constant dense<0.000000e+00> : vector<8x512xf32>
    %450 = tpu.matmul %448, %449, %cst_384 {dimension_numbers = #tpu.dot_dimension_numbers<[1], [0], [0], [1], [0, 0, 1, 1], [], []>} : vector<8x8xf32>, vector<8x512xf32>, vector<8x512xf32> -> vector<8x512xf32>
    %c7_385 = arith.constant 7 : index
    %c0_386 = arith.constant 0 : index
    %451 = vector.load %arg11[%c7_385, %c0_386] : memref<27x512xf32, #tpu.memory_space<vmem>>, vector<1x512xf32>
    %452 = vector.broadcast %451 : vector<1x512xf32> to vector<8x512xf32>
    %453 = arith.mulf %450, %452 : vector<8x512xf32>
    %454 = arith.addf %447, %453 : vector<8x512xf32>
    %c64_387 = arith.constant 64 : index
    %c0_388 = arith.constant 0 : index
    %455 = vector.load %arg8[%c64_387, %c0_388] : memref<216x8xf32, #tpu.memory_space<vmem>>, vector<8x8xf32>
    %c0_389 = arith.constant 0 : index
    %c73_390 = arith.constant 73 : index
    %456 = vector.load %arg17[%c0_389, %c73_390] : memref<8x768xf32, #tpu.memory_space<vmem>>, vector<8x512xf32>
    %cst_391 = arith.constant dense<0.000000e+00> : vector<8x512xf32>
    %457 = tpu.matmul %455, %456, %cst_391 {dimension_numbers = #tpu.dot_dimension_numbers<[1], [0], [0], [1], [0, 0, 1, 1], [], []>} : vector<8x8xf32>, vector<8x512xf32>, vector<8x512xf32> -> vector<8x512xf32>
    %c8_392 = arith.constant 8 : index
    %c0_393 = arith.constant 0 : index
    %458 = vector.load %arg11[%c8_392, %c0_393] : memref<27x512xf32, #tpu.memory_space<vmem>>, vector<1x512xf32>
    %459 = vector.broadcast %458 : vector<1x512xf32> to vector<8x512xf32>
    %460 = arith.mulf %457, %459 : vector<8x512xf32>
    %461 = arith.addf %454, %460 : vector<8x512xf32>
    %c72_394 = arith.constant 72 : index
    %c0_395 = arith.constant 0 : index
    %462 = vector.load %arg8[%c72_394, %c0_395] : memref<216x8xf32, #tpu.memory_space<vmem>>, vector<8x8xf32>
    %c0_396 = arith.constant 0 : index
    %c119_397 = arith.constant 119 : index
    %463 = vector.load %arg17[%c0_396, %c119_397] : memref<8x768xf32, #tpu.memory_space<vmem>>, vector<8x512xf32>
    %cst_398 = arith.constant dense<0.000000e+00> : vector<8x512xf32>
    %464 = tpu.matmul %462, %463, %cst_398 {dimension_numbers = #tpu.dot_dimension_numbers<[1], [0], [0], [1], [0, 0, 1, 1], [], []>} : vector<8x8xf32>, vector<8x512xf32>, vector<8x512xf32> -> vector<8x512xf32>
    %c9_399 = arith.constant 9 : index
    %c0_400 = arith.constant 0 : index
    %465 = vector.load %arg11[%c9_399, %c0_400] : memref<27x512xf32, #tpu.memory_space<vmem>>, vector<1x512xf32>
    %466 = vector.broadcast %465 : vector<1x512xf32> to vector<8x512xf32>
    %467 = arith.mulf %464, %466 : vector<8x512xf32>
    %468 = arith.addf %461, %467 : vector<8x512xf32>
    %c80_401 = arith.constant 80 : index
    %c0_402 = arith.constant 0 : index
    %469 = vector.load %arg8[%c80_401, %c0_402] : memref<216x8xf32, #tpu.memory_space<vmem>>, vector<8x8xf32>
    %c0_403 = arith.constant 0 : index
    %c120_404 = arith.constant 120 : index
    %470 = vector.load %arg17[%c0_403, %c120_404] : memref<8x768xf32, #tpu.memory_space<vmem>>, vector<8x512xf32>
    %cst_405 = arith.constant dense<0.000000e+00> : vector<8x512xf32>
    %471 = tpu.matmul %469, %470, %cst_405 {dimension_numbers = #tpu.dot_dimension_numbers<[1], [0], [0], [1], [0, 0, 1, 1], [], []>} : vector<8x8xf32>, vector<8x512xf32>, vector<8x512xf32> -> vector<8x512xf32>
    %c10_406 = arith.constant 10 : index
    %c0_407 = arith.constant 0 : index
    %472 = vector.load %arg11[%c10_406, %c0_407] : memref<27x512xf32, #tpu.memory_space<vmem>>, vector<1x512xf32>
    %473 = vector.broadcast %472 : vector<1x512xf32> to vector<8x512xf32>
    %474 = arith.mulf %471, %473 : vector<8x512xf32>
    %475 = arith.addf %468, %474 : vector<8x512xf32>
    %c88_408 = arith.constant 88 : index
    %c0_409 = arith.constant 0 : index
    %476 = vector.load %arg8[%c88_408, %c0_409] : memref<216x8xf32, #tpu.memory_space<vmem>>, vector<8x8xf32>
    %c0_410 = arith.constant 0 : index
    %c121_411 = arith.constant 121 : index
    %477 = vector.load %arg17[%c0_410, %c121_411] : memref<8x768xf32, #tpu.memory_space<vmem>>, vector<8x512xf32>
    %cst_412 = arith.constant dense<0.000000e+00> : vector<8x512xf32>
    %478 = tpu.matmul %476, %477, %cst_412 {dimension_numbers = #tpu.dot_dimension_numbers<[1], [0], [0], [1], [0, 0, 1, 1], [], []>} : vector<8x8xf32>, vector<8x512xf32>, vector<8x512xf32> -> vector<8x512xf32>
    %c11_413 = arith.constant 11 : index
    %c0_414 = arith.constant 0 : index
    %479 = vector.load %arg11[%c11_413, %c0_414] : memref<27x512xf32, #tpu.memory_space<vmem>>, vector<1x512xf32>
    %480 = vector.broadcast %479 : vector<1x512xf32> to vector<8x512xf32>
    %481 = arith.mulf %478, %480 : vector<8x512xf32>
    %482 = arith.addf %475, %481 : vector<8x512xf32>
    %c96_415 = arith.constant 96 : index
    %c0_416 = arith.constant 0 : index
    %483 = vector.load %arg8[%c96_415, %c0_416] : memref<216x8xf32, #tpu.memory_space<vmem>>, vector<8x8xf32>
    %c0_417 = arith.constant 0 : index
    %c127_418 = arith.constant 127 : index
    %484 = vector.load %arg17[%c0_417, %c127_418] : memref<8x768xf32, #tpu.memory_space<vmem>>, vector<8x512xf32>
    %cst_419 = arith.constant dense<0.000000e+00> : vector<8x512xf32>
    %485 = tpu.matmul %483, %484, %cst_419 {dimension_numbers = #tpu.dot_dimension_numbers<[1], [0], [0], [1], [0, 0, 1, 1], [], []>} : vector<8x8xf32>, vector<8x512xf32>, vector<8x512xf32> -> vector<8x512xf32>
    %c12_420 = arith.constant 12 : index
    %c0_421 = arith.constant 0 : index
    %486 = vector.load %arg11[%c12_420, %c0_421] : memref<27x512xf32, #tpu.memory_space<vmem>>, vector<1x512xf32>
    %487 = vector.broadcast %486 : vector<1x512xf32> to vector<8x512xf32>
    %488 = arith.mulf %485, %487 : vector<8x512xf32>
    %489 = arith.addf %482, %488 : vector<8x512xf32>
    %c104_422 = arith.constant 104 : index
    %c0_423 = arith.constant 0 : index
    %490 = vector.load %arg8[%c104_422, %c0_423] : memref<216x8xf32, #tpu.memory_space<vmem>>, vector<8x8xf32>
    %c0_424 = arith.constant 0 : index
    %c128_425 = arith.constant 128 : index
    %491 = vector.load %arg17[%c0_424, %c128_425] : memref<8x768xf32, #tpu.memory_space<vmem>>, vector<8x512xf32>
    %cst_426 = arith.constant dense<0.000000e+00> : vector<8x512xf32>
    %492 = tpu.matmul %490, %491, %cst_426 {dimension_numbers = #tpu.dot_dimension_numbers<[1], [0], [0], [1], [0, 0, 1, 1], [], []>} : vector<8x8xf32>, vector<8x512xf32>, vector<8x512xf32> -> vector<8x512xf32>
    %493 = arith.addf %489, %492 : vector<8x512xf32>
    %c112_427 = arith.constant 112 : index
    %c0_428 = arith.constant 0 : index
    %494 = vector.load %arg8[%c112_427, %c0_428] : memref<216x8xf32, #tpu.memory_space<vmem>>, vector<8x8xf32>
    %c0_429 = arith.constant 0 : index
    %c129_430 = arith.constant 129 : index
    %495 = vector.load %arg17[%c0_429, %c129_430] : memref<8x768xf32, #tpu.memory_space<vmem>>, vector<8x512xf32>
    %cst_431 = arith.constant dense<0.000000e+00> : vector<8x512xf32>
    %496 = tpu.matmul %494, %495, %cst_431 {dimension_numbers = #tpu.dot_dimension_numbers<[1], [0], [0], [1], [0, 0, 1, 1], [], []>} : vector<8x8xf32>, vector<8x512xf32>, vector<8x512xf32> -> vector<8x512xf32>
    %c14_432 = arith.constant 14 : index
    %c0_433 = arith.constant 0 : index
    %497 = vector.load %arg11[%c14_432, %c0_433] : memref<27x512xf32, #tpu.memory_space<vmem>>, vector<1x512xf32>
    %498 = vector.broadcast %497 : vector<1x512xf32> to vector<8x512xf32>
    %499 = arith.mulf %496, %498 : vector<8x512xf32>
    %500 = arith.addf %493, %499 : vector<8x512xf32>
    %c120_434 = arith.constant 120 : index
    %c0_435 = arith.constant 0 : index
    %501 = vector.load %arg8[%c120_434, %c0_435] : memref<216x8xf32, #tpu.memory_space<vmem>>, vector<8x8xf32>
    %c0_436 = arith.constant 0 : index
    %c135_437 = arith.constant 135 : index
    %502 = vector.load %arg17[%c0_436, %c135_437] : memref<8x768xf32, #tpu.memory_space<vmem>>, vector<8x512xf32>
    %cst_438 = arith.constant dense<0.000000e+00> : vector<8x512xf32>
    %503 = tpu.matmul %501, %502, %cst_438 {dimension_numbers = #tpu.dot_dimension_numbers<[1], [0], [0], [1], [0, 0, 1, 1], [], []>} : vector<8x8xf32>, vector<8x512xf32>, vector<8x512xf32> -> vector<8x512xf32>
    %c15_439 = arith.constant 15 : index
    %c0_440 = arith.constant 0 : index
    %504 = vector.load %arg11[%c15_439, %c0_440] : memref<27x512xf32, #tpu.memory_space<vmem>>, vector<1x512xf32>
    %505 = vector.broadcast %504 : vector<1x512xf32> to vector<8x512xf32>
    %506 = arith.mulf %503, %505 : vector<8x512xf32>
    %507 = arith.addf %500, %506 : vector<8x512xf32>
    %c128_441 = arith.constant 128 : index
    %c0_442 = arith.constant 0 : index
    %508 = vector.load %arg8[%c128_441, %c0_442] : memref<216x8xf32, #tpu.memory_space<vmem>>, vector<8x8xf32>
    %c0_443 = arith.constant 0 : index
    %c136_444 = arith.constant 136 : index
    %509 = vector.load %arg17[%c0_443, %c136_444] : memref<8x768xf32, #tpu.memory_space<vmem>>, vector<8x512xf32>
    %cst_445 = arith.constant dense<0.000000e+00> : vector<8x512xf32>
    %510 = tpu.matmul %508, %509, %cst_445 {dimension_numbers = #tpu.dot_dimension_numbers<[1], [0], [0], [1], [0, 0, 1, 1], [], []>} : vector<8x8xf32>, vector<8x512xf32>, vector<8x512xf32> -> vector<8x512xf32>
    %c16_446 = arith.constant 16 : index
    %c0_447 = arith.constant 0 : index
    %511 = vector.load %arg11[%c16_446, %c0_447] : memref<27x512xf32, #tpu.memory_space<vmem>>, vector<1x512xf32>
    %512 = vector.broadcast %511 : vector<1x512xf32> to vector<8x512xf32>
    %513 = arith.mulf %510, %512 : vector<8x512xf32>
    %514 = arith.addf %507, %513 : vector<8x512xf32>
    %c136_448 = arith.constant 136 : index
    %c0_449 = arith.constant 0 : index
    %515 = vector.load %arg8[%c136_448, %c0_449] : memref<216x8xf32, #tpu.memory_space<vmem>>, vector<8x8xf32>
    %c0_450 = arith.constant 0 : index
    %c137_451 = arith.constant 137 : index
    %516 = vector.load %arg17[%c0_450, %c137_451] : memref<8x768xf32, #tpu.memory_space<vmem>>, vector<8x512xf32>
    %cst_452 = arith.constant dense<0.000000e+00> : vector<8x512xf32>
    %517 = tpu.matmul %515, %516, %cst_452 {dimension_numbers = #tpu.dot_dimension_numbers<[1], [0], [0], [1], [0, 0, 1, 1], [], []>} : vector<8x8xf32>, vector<8x512xf32>, vector<8x512xf32> -> vector<8x512xf32>
    %c17_453 = arith.constant 17 : index
    %c0_454 = arith.constant 0 : index
    %518 = vector.load %arg11[%c17_453, %c0_454] : memref<27x512xf32, #tpu.memory_space<vmem>>, vector<1x512xf32>
    %519 = vector.broadcast %518 : vector<1x512xf32> to vector<8x512xf32>
    %520 = arith.mulf %517, %519 : vector<8x512xf32>
    %521 = arith.addf %514, %520 : vector<8x512xf32>
    %c144_455 = arith.constant 144 : index
    %c0_456 = arith.constant 0 : index
    %522 = vector.load %arg8[%c144_455, %c0_456] : memref<216x8xf32, #tpu.memory_space<vmem>>, vector<8x8xf32>
    %c0_457 = arith.constant 0 : index
    %c183_458 = arith.constant 183 : index
    %523 = vector.load %arg17[%c0_457, %c183_458] : memref<8x768xf32, #tpu.memory_space<vmem>>, vector<8x512xf32>
    %cst_459 = arith.constant dense<0.000000e+00> : vector<8x512xf32>
    %524 = tpu.matmul %522, %523, %cst_459 {dimension_numbers = #tpu.dot_dimension_numbers<[1], [0], [0], [1], [0, 0, 1, 1], [], []>} : vector<8x8xf32>, vector<8x512xf32>, vector<8x512xf32> -> vector<8x512xf32>
    %c18_460 = arith.constant 18 : index
    %c0_461 = arith.constant 0 : index
    %525 = vector.load %arg11[%c18_460, %c0_461] : memref<27x512xf32, #tpu.memory_space<vmem>>, vector<1x512xf32>
    %526 = vector.broadcast %525 : vector<1x512xf32> to vector<8x512xf32>
    %527 = arith.mulf %524, %526 : vector<8x512xf32>
    %528 = arith.addf %521, %527 : vector<8x512xf32>
    %c152_462 = arith.constant 152 : index
    %c0_463 = arith.constant 0 : index
    %529 = vector.load %arg8[%c152_462, %c0_463] : memref<216x8xf32, #tpu.memory_space<vmem>>, vector<8x8xf32>
    %c0_464 = arith.constant 0 : index
    %c184_465 = arith.constant 184 : index
    %530 = vector.load %arg17[%c0_464, %c184_465] : memref<8x768xf32, #tpu.memory_space<vmem>>, vector<8x512xf32>
    %cst_466 = arith.constant dense<0.000000e+00> : vector<8x512xf32>
    %531 = tpu.matmul %529, %530, %cst_466 {dimension_numbers = #tpu.dot_dimension_numbers<[1], [0], [0], [1], [0, 0, 1, 1], [], []>} : vector<8x8xf32>, vector<8x512xf32>, vector<8x512xf32> -> vector<8x512xf32>
    %c19_467 = arith.constant 19 : index
    %c0_468 = arith.constant 0 : index
    %532 = vector.load %arg11[%c19_467, %c0_468] : memref<27x512xf32, #tpu.memory_space<vmem>>, vector<1x512xf32>
    %533 = vector.broadcast %532 : vector<1x512xf32> to vector<8x512xf32>
    %534 = arith.mulf %531, %533 : vector<8x512xf32>
    %535 = arith.addf %528, %534 : vector<8x512xf32>
    %c160_469 = arith.constant 160 : index
    %c0_470 = arith.constant 0 : index
    %536 = vector.load %arg8[%c160_469, %c0_470] : memref<216x8xf32, #tpu.memory_space<vmem>>, vector<8x8xf32>
    %c0_471 = arith.constant 0 : index
    %c185_472 = arith.constant 185 : index
    %537 = vector.load %arg17[%c0_471, %c185_472] : memref<8x768xf32, #tpu.memory_space<vmem>>, vector<8x512xf32>
    %cst_473 = arith.constant dense<0.000000e+00> : vector<8x512xf32>
    %538 = tpu.matmul %536, %537, %cst_473 {dimension_numbers = #tpu.dot_dimension_numbers<[1], [0], [0], [1], [0, 0, 1, 1], [], []>} : vector<8x8xf32>, vector<8x512xf32>, vector<8x512xf32> -> vector<8x512xf32>
    %c20_474 = arith.constant 20 : index
    %c0_475 = arith.constant 0 : index
    %539 = vector.load %arg11[%c20_474, %c0_475] : memref<27x512xf32, #tpu.memory_space<vmem>>, vector<1x512xf32>
    %540 = vector.broadcast %539 : vector<1x512xf32> to vector<8x512xf32>
    %541 = arith.mulf %538, %540 : vector<8x512xf32>
    %542 = arith.addf %535, %541 : vector<8x512xf32>
    %c168_476 = arith.constant 168 : index
    %c0_477 = arith.constant 0 : index
    %543 = vector.load %arg8[%c168_476, %c0_477] : memref<216x8xf32, #tpu.memory_space<vmem>>, vector<8x8xf32>
    %c0_478 = arith.constant 0 : index
    %c191_479 = arith.constant 191 : index
    %544 = vector.load %arg17[%c0_478, %c191_479] : memref<8x768xf32, #tpu.memory_space<vmem>>, vector<8x512xf32>
    %cst_480 = arith.constant dense<0.000000e+00> : vector<8x512xf32>
    %545 = tpu.matmul %543, %544, %cst_480 {dimension_numbers = #tpu.dot_dimension_numbers<[1], [0], [0], [1], [0, 0, 1, 1], [], []>} : vector<8x8xf32>, vector<8x512xf32>, vector<8x512xf32> -> vector<8x512xf32>
    %c21_481 = arith.constant 21 : index
    %c0_482 = arith.constant 0 : index
    %546 = vector.load %arg11[%c21_481, %c0_482] : memref<27x512xf32, #tpu.memory_space<vmem>>, vector<1x512xf32>
    %547 = vector.broadcast %546 : vector<1x512xf32> to vector<8x512xf32>
    %548 = arith.mulf %545, %547 : vector<8x512xf32>
    %549 = arith.addf %542, %548 : vector<8x512xf32>
    %c176_483 = arith.constant 176 : index
    %c0_484 = arith.constant 0 : index
    %550 = vector.load %arg8[%c176_483, %c0_484] : memref<216x8xf32, #tpu.memory_space<vmem>>, vector<8x8xf32>
    %c0_485 = arith.constant 0 : index
    %c192_486 = arith.constant 192 : index
    %551 = vector.load %arg17[%c0_485, %c192_486] : memref<8x768xf32, #tpu.memory_space<vmem>>, vector<8x512xf32>
    %cst_487 = arith.constant dense<0.000000e+00> : vector<8x512xf32>
    %552 = tpu.matmul %550, %551, %cst_487 {dimension_numbers = #tpu.dot_dimension_numbers<[1], [0], [0], [1], [0, 0, 1, 1], [], []>} : vector<8x8xf32>, vector<8x512xf32>, vector<8x512xf32> -> vector<8x512xf32>
    %c22_488 = arith.constant 22 : index
    %c0_489 = arith.constant 0 : index
    %553 = vector.load %arg11[%c22_488, %c0_489] : memref<27x512xf32, #tpu.memory_space<vmem>>, vector<1x512xf32>
    %554 = vector.broadcast %553 : vector<1x512xf32> to vector<8x512xf32>
    %555 = arith.mulf %552, %554 : vector<8x512xf32>
    %556 = arith.addf %549, %555 : vector<8x512xf32>
    %c184_490 = arith.constant 184 : index
    %c0_491 = arith.constant 0 : index
    %557 = vector.load %arg8[%c184_490, %c0_491] : memref<216x8xf32, #tpu.memory_space<vmem>>, vector<8x8xf32>
    %c0_492 = arith.constant 0 : index
    %c193_493 = arith.constant 193 : index
    %558 = vector.load %arg17[%c0_492, %c193_493] : memref<8x768xf32, #tpu.memory_space<vmem>>, vector<8x512xf32>
    %cst_494 = arith.constant dense<0.000000e+00> : vector<8x512xf32>
    %559 = tpu.matmul %557, %558, %cst_494 {dimension_numbers = #tpu.dot_dimension_numbers<[1], [0], [0], [1], [0, 0, 1, 1], [], []>} : vector<8x8xf32>, vector<8x512xf32>, vector<8x512xf32> -> vector<8x512xf32>
    %c23_495 = arith.constant 23 : index
    %c0_496 = arith.constant 0 : index
    %560 = vector.load %arg11[%c23_495, %c0_496] : memref<27x512xf32, #tpu.memory_space<vmem>>, vector<1x512xf32>
    %561 = vector.broadcast %560 : vector<1x512xf32> to vector<8x512xf32>
    %562 = arith.mulf %559, %561 : vector<8x512xf32>
    %563 = arith.addf %556, %562 : vector<8x512xf32>
    %c192_497 = arith.constant 192 : index
    %c0_498 = arith.constant 0 : index
    %564 = vector.load %arg8[%c192_497, %c0_498] : memref<216x8xf32, #tpu.memory_space<vmem>>, vector<8x8xf32>
    %c0_499 = arith.constant 0 : index
    %c199_500 = arith.constant 199 : index
    %565 = vector.load %arg17[%c0_499, %c199_500] : memref<8x768xf32, #tpu.memory_space<vmem>>, vector<8x512xf32>
    %cst_501 = arith.constant dense<0.000000e+00> : vector<8x512xf32>
    %566 = tpu.matmul %564, %565, %cst_501 {dimension_numbers = #tpu.dot_dimension_numbers<[1], [0], [0], [1], [0, 0, 1, 1], [], []>} : vector<8x8xf32>, vector<8x512xf32>, vector<8x512xf32> -> vector<8x512xf32>
    %c24_502 = arith.constant 24 : index
    %c0_503 = arith.constant 0 : index
    %567 = vector.load %arg11[%c24_502, %c0_503] : memref<27x512xf32, #tpu.memory_space<vmem>>, vector<1x512xf32>
    %568 = vector.broadcast %567 : vector<1x512xf32> to vector<8x512xf32>
    %569 = arith.mulf %566, %568 : vector<8x512xf32>
    %570 = arith.addf %563, %569 : vector<8x512xf32>
    %c200_504 = arith.constant 200 : index
    %c0_505 = arith.constant 0 : index
    %571 = vector.load %arg8[%c200_504, %c0_505] : memref<216x8xf32, #tpu.memory_space<vmem>>, vector<8x8xf32>
    %c0_506 = arith.constant 0 : index
    %c200_507 = arith.constant 200 : index
    %572 = vector.load %arg17[%c0_506, %c200_507] : memref<8x768xf32, #tpu.memory_space<vmem>>, vector<8x512xf32>
    %cst_508 = arith.constant dense<0.000000e+00> : vector<8x512xf32>
    %573 = tpu.matmul %571, %572, %cst_508 {dimension_numbers = #tpu.dot_dimension_numbers<[1], [0], [0], [1], [0, 0, 1, 1], [], []>} : vector<8x8xf32>, vector<8x512xf32>, vector<8x512xf32> -> vector<8x512xf32>
    %c25_509 = arith.constant 25 : index
    %c0_510 = arith.constant 0 : index
    %574 = vector.load %arg11[%c25_509, %c0_510] : memref<27x512xf32, #tpu.memory_space<vmem>>, vector<1x512xf32>
    %575 = vector.broadcast %574 : vector<1x512xf32> to vector<8x512xf32>
    %576 = arith.mulf %573, %575 : vector<8x512xf32>
    %577 = arith.addf %570, %576 : vector<8x512xf32>
    %c208_511 = arith.constant 208 : index
    %c0_512 = arith.constant 0 : index
    %578 = vector.load %arg8[%c208_511, %c0_512] : memref<216x8xf32, #tpu.memory_space<vmem>>, vector<8x8xf32>
    %c0_513 = arith.constant 0 : index
    %c201_514 = arith.constant 201 : index
    %579 = vector.load %arg17[%c0_513, %c201_514] : memref<8x768xf32, #tpu.memory_space<vmem>>, vector<8x512xf32>
    %cst_515 = arith.constant dense<0.000000e+00> : vector<8x512xf32>
    %580 = tpu.matmul %578, %579, %cst_515 {dimension_numbers = #tpu.dot_dimension_numbers<[1], [0], [0], [1], [0, 0, 1, 1], [], []>} : vector<8x8xf32>, vector<8x512xf32>, vector<8x512xf32> -> vector<8x512xf32>
    %c26_516 = arith.constant 26 : index
    %c0_517 = arith.constant 0 : index
    %581 = vector.load %arg11[%c26_516, %c0_517] : memref<27x512xf32, #tpu.memory_space<vmem>>, vector<1x512xf32>
    %582 = vector.broadcast %581 : vector<1x512xf32> to vector<8x512xf32>
    %583 = arith.mulf %580, %582 : vector<8x512xf32>
    %584 = arith.addf %577, %583 : vector<8x512xf32>
    %c0_518 = arith.constant 0 : index
    %c0_519 = arith.constant 0 : index
    %585 = vector.load %arg9[%c0_518, %c0_519] : memref<8x1xf32, #tpu.memory_space<vmem>>, vector<8x1xf32>
    %586 = vector.broadcast %585 : vector<8x1xf32> to vector<8x512xf32>
    %587 = arith.mulf %584, %586 : vector<8x512xf32>
    %c0_520 = arith.constant 0 : index
    %c0_521 = arith.constant 0 : index
    %588 = vector.load %arg10[%c0_520, %c0_521] : memref<8x1xf32, #tpu.memory_space<vmem>>, vector<8x1xf32>
    %589 = vector.broadcast %588 : vector<8x1xf32> to vector<8x512xf32>
    %590 = arith.addf %587, %589 : vector<8x512xf32>
    %cst_522 = arith.constant 0.000000e+00 : f32
    %591 = vector.broadcast %cst_522 : f32 to vector<8x512xf32>
    %592 = arith.cmpf ogt, %590, %591 : vector<8x512xf32>
    %cst_523 = arith.constant 1.000000e-01 : f32
    %593 = vector.broadcast %cst_523 : f32 to vector<8x512xf32>
    %594 = arith.mulf %593, %590 : vector<8x512xf32>
    %595 = arith.select %592, %590, %594 : vector<8x512xi1>, vector<8x512xf32>
    %cst_524 = arith.constant dense<0.000000e+00> : vector<8xf32>
    %596 = vector.multi_reduction <add>, %595, %cst_524 [1] : vector<8x512xf32> to vector<8xf32>
    %597 = vector.shape_cast %596 : vector<8xf32> to vector<8x1xf32>
    %cst_525 = arith.constant 5.120000e+02 : f32
    %598 = vector.broadcast %cst_525 : f32 to vector<8x1xf32>
    %599 = arith.divf %597, %598 : vector<8x1xf32>
    %c0_526 = arith.constant 0 : index
    %c0_527 = arith.constant 0 : index
    %600 = vector.load %arg12[%c0_526, %c0_527] : memref<8x2xf32, #tpu.memory_space<vmem>>, vector<8x2xf32>
    %601 = vector.broadcast %599 : vector<8x1xf32> to vector<8x2xf32>
    %602 = arith.mulf %600, %601 : vector<8x2xf32>
    %cst_528 = arith.constant dense<0.000000e+00> : vector<2xf32>
    %603 = vector.multi_reduction <add>, %602, %cst_528 [0] : vector<8x2xf32> to vector<2xf32>
    %604 = vector.shape_cast %603 : vector<2xf32> to vector<1x2xf32>
    %c0_529 = arith.constant 0 : index
    %c0_530 = arith.constant 0 : index
    %605 = vector.load %arg13[%c0_529, %c0_530] : memref<1x2xf32, #tpu.memory_space<vmem>>, vector<1x2xf32>
    %606 = arith.addf %604, %605 : vector<1x2xf32>
    %cst_531 = arith.constant 0.000000e+00 : f32
    %607 = vector.broadcast %cst_531 : f32 to vector<1x2xf32>
    %608 = arith.cmpf ogt, %606, %607 : vector<1x2xf32>
    %cst_532 = arith.constant 1.000000e-01 : f32
    %609 = vector.broadcast %cst_532 : f32 to vector<1x2xf32>
    %610 = arith.mulf %609, %606 : vector<1x2xf32>
    %611 = arith.select %608, %606, %610 : vector<1x2xi1>, vector<1x2xf32>
    %c0_533 = arith.constant 0 : index
    %c0_534 = arith.constant 0 : index
    %612 = vector.load %arg14[%c0_533, %c0_534] : memref<8x2xf32, #tpu.memory_space<vmem>>, vector<8x2xf32>
    %613 = vector.broadcast %611 : vector<1x2xf32> to vector<8x2xf32>
    %614 = arith.mulf %612, %613 : vector<8x2xf32>
    %cst_535 = arith.constant dense<0.000000e+00> : vector<8xf32>
    %615 = vector.multi_reduction <add>, %614, %cst_535 [1] : vector<8x2xf32> to vector<8xf32>
    %616 = vector.shape_cast %615 : vector<8xf32> to vector<8x1xf32>
    %c0_536 = arith.constant 0 : index
    %c0_537 = arith.constant 0 : index
    %617 = vector.load %arg15[%c0_536, %c0_537] : memref<8x1xf32, #tpu.memory_space<vmem>>, vector<8x1xf32>
    %618 = arith.addf %616, %617 : vector<8x1xf32>
    %619 = arith.negf %618 : vector<8x1xf32>
    %620 = math.exp %619 : vector<8x1xf32>
    %cst_538 = arith.constant 1.000000e+00 : f32
    %621 = vector.broadcast %cst_538 : f32 to vector<8x1xf32>
    %622 = arith.addf %621, %620 : vector<8x1xf32>
    %623 = arith.divf %621, %622 : vector<8x1xf32>
    %624 = vector.broadcast %623 : vector<8x1xf32> to vector<8x512xf32>
    %625 = arith.mulf %595, %624 : vector<8x512xf32>
    %626 = arith.addf %625, %4 : vector<8x512xf32>
    %c0_539 = arith.constant 0 : index
    %c0_540 = arith.constant 0 : index
    %c0_541 = arith.constant 0 : index
    %627 = vector.load %arg16[%c0_539, %c0_540, %c0_541] : memref<1x8x512xf32, #tpu.memory_space<vmem>>, vector<1x8x512xf32>
    %628 = vector.shape_cast %627 : vector<1x8x512xf32> to vector<8x512xf32>
    %629 = vector.shape_cast %626 : vector<8x512xf32> to vector<1x8x512xf32>
    tpu.vector_store %arg16[%c0_539, %c0_540, %c0_541], %629 {strides = array<i32>} : memref<1x8x512xf32, #tpu.memory_space<vmem>>, vector<1x8x512xf32>,
    return
  }
  func.func @transform_0(%arg0: i32) -> (i32, i32, i32) {
    %c0_i32 = arith.constant 0 : i32
    %c0_i32_0 = arith.constant 0 : i32
    %c0_i32_1 = arith.constant 0 : i32
    return %arg0, %c0_i32, %c0_i32_0 : i32, i32, i32
  }
  func.func @transform_1(%arg0: i32) -> (i32, i32) {
    %c0_i32 = arith.constant 0 : i32
    %c0_i32_0 = arith.constant 0 : i32
    %c0_i32_1 = arith.constant 0 : i32
    return %c0_i32, %c0_i32_0 : i32, i32
  }
  func.func @transform_2(%arg0: i32) -> (i32, i32) {
    %c0_i32 = arith.constant 0 : i32
    %c0_i32_0 = arith.constant 0 : i32
    %c0_i32_1 = arith.constant 0 : i32
    return %c0_i32, %c0_i32_0 : i32, i32
  }
  func.func @transform_3(%arg0: i32) -> (i32, i32) {
    %c0_i32 = arith.constant 0 : i32
    %c0_i32_0 = arith.constant 0 : i32
    %c0_i32_1 = arith.constant 0 : i32
    return %c0_i32, %c0_i32_0 : i32, i32
  }
  func.func @transform_4(%arg0: i32) -> (i32, i32) {
    %c0_i32 = arith.constant 0 : i32
    %c0_i32_0 = arith.constant 0 : i32
    %c0_i32_1 = arith.constant 0 : i32
    return %c0_i32, %c0_i32_0 : i32, i32
  }
  func.func @transform_5(%arg0: i32) -> (i32, i32) {
    %c0_i32 = arith.constant 0 : i32
    %c0_i32_0 = arith.constant 0 : i32
    %c0_i32_1 = arith.constant 0 : i32
    return %c0_i32, %c0_i32_0 : i32, i32
  }
  func.func @transform_6(%arg0: i32) -> (i32, i32) {
    %c0_i32 = arith.constant 0 : i32
    %c0_i32_0 = arith.constant 0 : i32
    %c0_i32_1 = arith.constant 0 : i32
    return %c0_i32, %c0_i32_0 : i32, i32
  }
  func.func @transform_7(%arg0: i32) -> (i32, i32) {
    %c0_i32 = arith.constant 0 : i32
    %c0_i32_0 = arith.constant 0 : i32
    %c0_i32_1 = arith.constant 0 : i32
    return %c0_i32, %c0_i32_0 : i32, i32
  }
  func.func @transform_8(%arg0: i32) -> (i32, i32) {
    %c0_i32 = arith.constant 0 : i32
    %c0_i32_0 = arith.constant 0 : i32
    %c0_i32_1 = arith.constant 0 : i32
    return %c0_i32, %c0_i32_0 : i32, i32
  }
  func.func @transform_9(%arg0: i32) -> (i32, i32) {
    %c0_i32 = arith.constant 0 : i32
    %c0_i32_0 = arith.constant 0 : i32
    %c0_i32_1 = arith.constant 0 : i32
    return %c0_i32, %c0_i32_0 : i32, i32
  }
  func.func @transform_10(%arg0: i32) -> (i32, i32) {
    %c0_i32 = arith.constant 0 : i32
    %c0_i32_0 = arith.constant 0 : i32
    %c0_i32_1 = arith.constant 0 : i32
    return %c0_i32, %c0_i32_0 : i32, i32
  }
  func.func @transform_11(%arg0: i32) -> (i32, i32) {
    %c0_i32 = arith.constant 0 : i32
    %c0_i32_0 = arith.constant 0 : i32
    %c0_i32_1 = arith.constant 0 : i32
    return %c0_i32, %c0_i32_0 : i32, i32
  }
  func.func @transform_12(%arg0: i32) -> (i32, i32) {
    %c0_i32 = arith.constant 0 : i32
    %c0_i32_0 = arith.constant 0 : i32
    %c0_i32_1 = arith.constant 0 : i32
    return %c0_i32, %c0_i32_0 : i32, i32
  }
  func.func @transform_13(%arg0: i32) -> (i32, i32) {
    %c0_i32 = arith.constant 0 : i32
    %c0_i32_0 = arith.constant 0 : i32
    %c0_i32_1 = arith.constant 0 : i32
    return %c0_i32, %c0_i32_0 : i32, i32
  }
  func.func @transform_14(%arg0: i32) -> (i32, i32) {
    %c0_i32 = arith.constant 0 : i32
    %c0_i32_0 = arith.constant 0 : i32
    %c0_i32_1 = arith.constant 0 : i32
    return %c0_i32, %c0_i32_0 : i32, i32
  }
  func.func @transform_15(%arg0: i32) -> (i32, i32, i32) {
    %c0_i32 = arith.constant 0 : i32
    %c0_i32_0 = arith.constant 0 : i32
    %c0_i32_1 = arith.constant 0 : i32
    return %arg0, %c0_i32, %c0_i32_0 : i32, i32, i32
  }
}

</mosaic_0001>

<bundles_post_ra>
// kernel: tpu_custom_call.1
= control target key start
LH: loop header
LB: loop body
LE: loop exit
PB: predicated region body
PF: predicated region fallthrough
CT: control target
= control target key end

     0   :  { %s19777_s0 = inlined_call_operand.vmem [shape: f32[2,8,512], index: 0, kind: input, shape index: {}]   ;;  %s19778_s1 = inlined_call_operand.vmem [shape: f32[216,8], index: 1, kind: input, shape index: {}]   ;;  %s19779_s2 = inlined_call_operand.vmem [shape: f32[8,1], index: 2, kind: input, shape index: {}]   ;;  %s19780_s3 = inlined_call_operand.vmem [shape: f32[8,1], index: 3, kind: input, shape index: {}]   ;;  %s19781_s4 = inlined_call_operand.vmem [shape: f32[216,8], index: 4, kind: input, shape index: {}]   ;;  %s19782_s5 = inlined_call_operand.vmem [shape: f32[8,1], index: 5, kind: input, shape index: {}]   ;;  %s19783_s6 = inlined_call_operand.vmem [shape: f32[8,1], index: 6, kind: input, shape index: {}]   ;;  %s19784_s7 = inlined_call_operand.vmem [shape: f32[216,8], index: 7, kind: input, shape index: {}]   ;;  %s19785_s8 = inlined_call_operand.vmem [shape: f32[8,1], index: 8, kind: input, shape index: {}]   ;;  %s19786_s9 = inlined_call_operand.vmem [shape: f32[8,1], index: 9, kind: input, shape index: {}]   ;;  %s19787_s10 = inlined_call_operand.vmem [shape: f32[27,512], index: 10, kind: input, shape index: {}]   ;;  %s19788_s11 = inlined_call_operand.vmem [shape: f32[8,2], index: 11, kind: input, shape index: {}]   ;;  %s19789_s12 = inlined_call_operand.vmem [shape: f32[1,2], index: 12, kind: input, shape index: {}]   ;;  %s19790_s13 = inlined_call_operand.vmem [shape: f32[8,2], index: 13, kind: input, shape index: {}]   ;;  %s19791_s14 = inlined_call_operand.vmem [shape: f32[8,1], index: 14, kind: input, shape index: {}]   ;;  %s19792_s15 = inlined_call_operand.hbm [shape: f32[2,8,512], index: 15, kind: output, shape index: {}]  }
   0x1   :  { %19867 = sst [smem:[#allocation43_spill]] %s19777_s0 }
   0x2   :  { %19868 = sst [smem:[#allocation44_spill]] %s19779_s2 }
   0x3   :  { %19869 = sst [smem:[#allocation45_spill]] %s19780_s3 }
   0x4   :  { %19870 = sst [smem:[#allocation46_spill]] %s19790_s13 }
   0x5   :  { %19871 = sst [smem:[#allocation47_spill]] %s19791_s14 }
   0x6   :  { %19872 = sst [smem:[#allocation48_spill]] %s19792_s15 }
   0x7   :  { %20 = vsyncpa [#allocation4], 0 }
   0x8   :  { %22 = vsyncpa [#allocation4 + $0x1], 0  ;;  %s16893_s18 = smov 0   ;;  %s16895_s19 = smov 0  }
   0x9   :  { %s16897_s20 = smov 0   ;;  %s16899_s21 = smov 0  }
   0xa LB: > { %19873 = sst [smem:[#allocation6_spill]] %s16779_s18  ;;  %s16914_s22 = sadd.s32 4294967295, %s16791_s21   ;;  %s16791_s21 = sphi %s16899_s21, %s20012_s21   ;;  %s16787_s20 = sphi %s16897_s20, %s20015_s20   ;;  %s16783_s19 = sphi %s16895_s19, %s20014_s19   ;;  %s16779_s18 = sphi %s16893_s18, %s20013_s18  }
   0xb   : > { %19874 = sst [smem:[#allocation7_spill]] %s16783_s19  ;;  %s16409_s23 = sadd.s32 4294967294, %s16791_s21  }
   0xc   : > { %19875 = sst [smem:[#allocation8_spill]] %s16787_s20  ;;  %s16918_s24 = sadd.s32 1, %s16791_s21  }
   0xd   : > { %19876 = sst [smem:[#allocation9_spill]] %s16791_s21  ;;  %s355_s25 = sadd.s32 1, %s16787_s20 }
   0xe   : > { %19877 = sst [smem:[#allocation10_spill]] %s16914_s22  ;;  %s352_s26 = ssub.s32 %s16791_s21, %s16918_s24 }
   0xf   : > { %19878 = sst [smem:[#allocation11_spill]] %s16918_s24  ;;  %p365_p0 = scmp.ne.s32.totalorder %s16787_s20, %s16783_s19 }
  0x10   : > { %p353_p1 = scmp.eq.s32.totalorder %s352_s26, 0  ;;  %p366_p2 = scmp.eq.s32.totalorder %s16914_s22, 1 }
  0x11   : > { %p371_p3 = scmp.ne.s32.totalorder %s16783_s19, %s16779_s18  ;;  %p372_p4 = scmp.eq.s32.totalorder %s16409_s23, 1 }
  0x12   : > { %s16929_s27 = scalar_select %p353_p1, %s16787_s20, %s355_s25  }
  0x13   : > { %p16931_p5 = por %p366_p2, %p365_p0  ;;  %p16935_p6 = por %p372_p4, %p371_p3 }
  0x14   : > { %19879 = sst [smem:[#allocation12_spill]] %s16929_s27  ;;  %p16412_p7 = scmp.ge.s32.totalorder %s16791_s21, 1 }
  0x15   : > { %s19880_s28 = scalar_select %p16931_p5, 1, 0 }
  0x16   : > { %s19882_s29 = scalar_select %p16935_p6, 1, 0 }
  0x17   : > { %19881 = sst [smem:[#allocation13_spill]] %s19880_s28  ;;  %p440_p8 = scmp.lt.s32.totalorder %s16791_s21, 3 }
  0x18   : > { %19883 = sst [smem:[#allocation14_spill]] %s19882_s29 }
  0x19   : > { %p441_p9 = pnand %p16412_p7, %p440_p8 }
  0x1b   : > { %444 = sbr.rel (%p441_p9) target bundleno = 2246 (0x8c6), region = 80 }
  0x22   : > { %p488_p10 = scmp.lt.s32.totalorder %s16914_s22, 1  ;;  %v19851_v0 = vmov 0.0   ;;  %s19825_s30 = smov 73   ;;  %vm524_vm0 = vcmask 596992   ;;  %v503_v11 = vld [vmem:[%s19778_s1] sm:$0xff]  ;;  %vm533_vm1 = vcmask 64512  }
  0x23   : > { %514 = vrot.lane.b32.xlu1 %v19851_v0, %s19825_s30  ;;  %601 = vmatprep.mubr.f32.mxu0 %v19851_v0  ;;  %s19884_s0 = sld [smem:[#allocation43_spill]]  ;;  %s19795_s23 = smov 65   ;;  %vm716_vm2 = vcmask 588800   ;;  %v705_v20 = vld [vmem:[%s19778_s1 + $0x8] sm:$0xff]  ;;  %vm912_vm3 = vcmask 580608   ;;  %v901_v32 = vld [vmem:[%s19778_s1 + $0x10] sm:$0xff] }
  0x24   : > { %s489_s16 = scalar_select %p488_p10, %s16914_s22, 1  ;;  %672 = vmatprep.mubr.f32.mxu1 %v19851_v0  ;;  %vm1108_vm4 = vcmask 531456   ;;  %v1097_v40 = vld [vmem:[%s19778_s1 + $0x18] sm:$0xff]  ;;  %vm1304_vm5 = vcmask 523264   ;;  %v1293_v52 = vld [vmem:[%s19778_s1 + $0x20] sm:$0xff]  ;;  %vm1500_vm6 = vcmask 515072  }
  0x25   : > { %s19797_s25 = smov 64   ;;  %v1489_v60 = vld [vmem:[%s19778_s1 + $0x28] sm:$0xff]  ;;  %vm1696_vm7 = vcmask 465920   ;;  %vm1892_vm8 = vcmask 457728   ;;  %vm2088_vm9 = vcmask 449536   ;;  %vm2284_vm10 = vcmask 72704  }
  0x26   : > { %s16659_s17 = sshll.u32 %s489_s16, 5  ;;  %s19811_s16 = smov 72   ;;  %vm2675_vm11 = vcmask 56320   ;;  %vm19855_vm12 = vcmask 7168   ;;  %vm19854_vm13 = vcmask 1039360   ;;  %vm19836_vm14 = vcmask 990208  }
  0x27   : > { %s19891_s20 = smov 57   ;;  %s19892_s27 = smov 56   ;;  %vm19842_vm15 = vcmask 982016  }
  0x28   : > { %s19893_s29 = smov 55   ;;  %s19894_s3 = sld [smem:[#allocation45_spill]] }
  0x29   : > { %s16950_s26 = scalar_lea.vmem %s19884_s0, %s16659_s17  ;;  %s19793_s17 = smov 71  }
  0x2a   : > { %19885 = sst [smem:[#allocation15_spill]] %s16950_s26  ;;  %v16953_v1 = vld [vmem:[%s16950_s26 + $0x10] sm:$0xff]  ;;  %v16956_v2 = vld [vmem:[%s16950_s26] sm:$0xff]  ;;  %v16963_v3 = vld [vmem:[%s16950_s26 + $0x8] sm:$0xff]  ;;  %s19889_s0 = smov 64  }
  0x2b   : > { %520 = vrot.lane.b32.xlu1 %v16953_v1, %s19825_s30  ;;  %516 = vrot.lane.b32.xlu0 %v16956_v2, %s19825_s30  ;;  %v16970_v4 = vld [vmem:[%s16950_s26 + $0x18] sm:$0xff]  ;;  %s19895_s2 = sld [smem:[#allocation44_spill]]  ;;  %s19896_s18 = smov 73  }
  0x2c   : > { %s19898_s15 = smov 8   ;;  %s19899_s21 = smov 7  }
  0x2d   : > { %s19902_s28 = smov 121   ;;  %s19903_s24 = smov 120  }
  0x2e   : > { %s19904_s26 = smov 119   ;;  %s20006_s13 = sld [smem:[#allocation15_spill]] }
  0x2f   : > { %708 = vrot.lane.b32.xlu1 %v16956_v2, %s19811_s16  ;;  %518 = vrot.lane.b32.xlu0 %v16963_v3, %s19825_s30 }
  0x33   : > { %706 = vrot.lane.b32.xlu1 %v19851_v0, %s19811_s16  ;;  %522 = vrot.lane.b32.xlu0 %v16970_v4, %s19825_s30 }
  0x37   : > { %714 = vrot.lane.b32.xlu1 %v16970_v4, %s19811_s16  ;;  %710 = vrot.lane.b32.xlu0 %v16963_v3, %s19811_s16 }
  0x3b   : > { %906 = vrot.lane.b32.xlu1 %v16963_v3, %s19793_s17  ;;  %712 = vrot.lane.b32.xlu0 %v16953_v1, %s19811_s16  ;;  %s19819_s16 = smov 121  }
  0x3f   : > { %908 = vrot.lane.b32.xlu1 %v16953_v1, %s19793_s17  ;;  %904 = vrot.lane.b32.xlu0 %v16956_v2, %s19793_s17 }
  0x43   : > { %1100 = vrot.lane.b32.xlu1 %v16956_v2, %s19795_s23  ;;  %902 = vrot.lane.b32.xlu0 %v19851_v0, %s19793_s17 }
  0x47   : > { %1098 = vrot.lane.b32.xlu1 %v19851_v0, %s19795_s23  ;;  %910 = vrot.lane.b32.xlu0 %v16970_v4, %s19793_s17  ;;  %s19799_s17 = smov 63  }
  0x4b   : > { %1106 = vrot.lane.b32.xlu1 %v16970_v4, %s19795_s23  ;;  %1102 = vrot.lane.b32.xlu0 %v16963_v3, %s19795_s23 }
  0x4f   : > { %1298 = vrot.lane.b32.xlu1 %v16963_v3, %s19797_s25  ;;  %1104 = vrot.lane.b32.xlu0 %v16953_v1, %s19795_s23  ;;  %s19801_s23 = smov 57  }
  0x53   : > { %1300 = vrot.lane.b32.xlu1 %v16953_v1, %s19797_s25  ;;  %1296 = vrot.lane.b32.xlu0 %v16956_v2, %s19797_s25 }
  0x57   : > { %1492 = vrot.lane.b32.xlu1 %v16956_v2, %s19799_s17  ;;  %1294 = vrot.lane.b32.xlu0 %v19851_v0, %s19797_s25 }
  0x5b   : > { %1490 = vrot.lane.b32.xlu1 %v19851_v0, %s19799_s17  ;;  %1302 = vrot.lane.b32.xlu0 %v16970_v4, %s19797_s25  ;;  %s19803_s25 = smov 56  }
  0x5f   : > { %1498 = vrot.lane.b32.xlu1 %v16970_v4, %s19799_s17  ;;  %1494 = vrot.lane.b32.xlu0 %v16963_v3, %s19799_s17 }
  0x63   : > { %1690 = vrot.lane.b32.xlu1 %v16963_v3, %s19801_s23  ;;  %1496 = vrot.lane.b32.xlu0 %v16953_v1, %s19799_s17  ;;  %s19805_s17 = smov 55  }
  0x67   : > { %1692 = vrot.lane.b32.xlu1 %v16953_v1, %s19801_s23  ;;  %1688 = vrot.lane.b32.xlu0 %v16956_v2, %s19801_s23 }
  0x6b   : > { %1884 = vrot.lane.b32.xlu1 %v16956_v2, %s19803_s25  ;;  %1686 = vrot.lane.b32.xlu0 %v19851_v0, %s19801_s23 }
  0x6f   : > { %1882 = vrot.lane.b32.xlu1 %v19851_v0, %s19803_s25  ;;  %1694 = vrot.lane.b32.xlu0 %v16970_v4, %s19801_s23  ;;  %s19807_s23 = smov 9  }
  0x73   : > { %1890 = vrot.lane.b32.xlu1 %v16970_v4, %s19803_s25  ;;  %1886 = vrot.lane.b32.xlu0 %v16963_v3, %s19803_s25 }
  0x77   : > { %2082 = vrot.lane.b32.xlu1 %v16963_v3, %s19805_s17  ;;  %1888 = vrot.lane.b32.xlu0 %v16953_v1, %s19803_s25  ;;  %s19809_s25 = smov 8  }
  0x7b   : > { %2084 = vrot.lane.b32.xlu1 %v16953_v1, %s19805_s17  ;;  %2080 = vrot.lane.b32.xlu0 %v16956_v2, %s19805_s17 }
  0x7f   : > { %2276 = vrot.lane.b32.xlu1 %v16956_v2, %s19807_s23  ;;  %2078 = vrot.lane.b32.xlu0 %v19851_v0, %s19805_s17 }
  0x83   : > { %2274 = vrot.lane.b32.xlu1 %v19851_v0, %s19807_s23  ;;  %2086 = vrot.lane.b32.xlu0 %v16970_v4, %s19805_s17  ;;  %s19813_s17 = smov 7  }
  0x87   : > { %2282 = vrot.lane.b32.xlu1 %v16970_v4, %s19807_s23  ;;  %2278 = vrot.lane.b32.xlu0 %v16963_v3, %s19807_s23 }
  0x8b   : > { %2474 = vrot.lane.b32.xlu1 %v16963_v3, %s19809_s25  ;;  %2280 = vrot.lane.b32.xlu0 %v16953_v1, %s19807_s23  ;;  %s19815_s23 = smov 1  }
  0x8f   : > { %2476 = vrot.lane.b32.xlu1 %v16953_v1, %s19809_s25  ;;  %2472 = vrot.lane.b32.xlu0 %v16956_v2, %s19809_s25 }
  0x93   : > { %2667 = vrot.lane.b32.xlu1 %v16956_v2, %s19813_s17  ;;  %2470 = vrot.lane.b32.xlu0 %v19851_v0, %s19809_s25 }
  0x95   : > { %v515_v5 = vpop.permute.xlu1 %514 }
  0x97   : > { %2665 = vrot.lane.b32.xlu1 %v19851_v0, %s19813_s17  ;;  %2478 = vrot.lane.b32.xlu0 %v16970_v4, %s19809_s25  ;;  %s19897_s25 = smov 9  }
  0x9b   : > { %2673 = vrot.lane.b32.xlu1 %v16970_v4, %s19813_s17  ;;  %2669 = vrot.lane.b32.xlu0 %v16963_v3, %s19813_s17 }
  0x9d   : > { %v521_v6 = vpop.permute.xlu1 %520  ;;  %v517_v7 = vpop.permute.xlu0 %516 }
  0x9e   : > { %v525_v12 = vsel %vm524_vm0, %v515_v5, %v517_v7 }
  0x9f   : > { %2865 = vrot.lane.b32.xlu1 %v16963_v3, %s19815_s23  ;;  %2671 = vrot.lane.b32.xlu0 %v16953_v1, %s19813_s17  ;;  %s19817_s17 = smov 127  }
  0xa1   : > { %v709_v8 = vpop.permute.xlu1 %708  ;;  %v519_v9 = vpop.permute.xlu0 %518 }
  0xa2   : > { %v526_v10 = vsel %vm524_vm0, %v517_v7, %v519_v9  ;;  %v527_v16 = vsel %vm524_vm0, %v519_v9, %v521_v6 }
  0xa3   : > { %2867 = vrot.lane.b32.xlu1 %v16953_v1, %s19815_s23  ;;  %2863 = vrot.lane.b32.xlu0 %v16956_v2, %s19815_s23 }
  0xa4   : > { %537 = vmatprep.subr.mxu0 %v526_v10 }
  0xa5   : > { %538 = vmatpush1.msra.mxu0 %v525_v12  ;;  %v707_v13 = vpop.permute.xlu1 %706  ;;  %v523_v14 = vpop.permute.xlu0 %522 }
  0xa6   : > { %v528_v15 = vsel %vm524_vm0, %v521_v6, %v523_v14  ;;  %16416 = vmatmul.mubr.msk.f32.vlgmr.msra.gmra.mrb[0].mxu0 %vm533_vm1, %v503_v11  ;;  %v717_v21 = vsel %vm716_vm2, %v707_v13, %v709_v8  ;;  %v1685_v13 = vld [vmem:[%s19778_s1 + $0x30] sm:$0xff] }
  0xa7   : > { %3219 = vrot.lane.b32.xlu1 %v16963_v3, %s19817_s17  ;;  %2861 = vrot.lane.b32.xlu0 %v19851_v0, %s19815_s23 }
  0xa8   : > { %608 = vmatprep.subr.mxu1 %v528_v15  ;;  %792 = vmatprep.mubr.f32.mxu0 %v19851_v0 }
  0xa9   : > { %609 = vmatpush1.msra.mxu1 %v527_v16  ;;  %v715_v17 = vpop.permute.xlu1 %714  ;;  %v711_v18 = vpop.permute.xlu0 %710 }
  0xaa   : > { %v718_v19 = vsel %vm716_vm2, %v709_v8, %v711_v18  ;;  %16417 = vmatmul.mubr.msk.f32.vlgmr.msra.gmra.mrb[0].mxu1 %vm533_vm1, %v503_v11 }
  0xab   : > { %3217 = vrot.lane.b32.xlu1 %v16956_v2, %s19817_s17  ;;  %2869 = vrot.lane.b32.xlu0 %v16970_v4, %s19815_s23  ;;  %s19821_s23 = smov 119  }
  0xac   : > { %728 = vmatprep.subr.mxu0 %v718_v19  ;;  %863 = vmatprep.mubr.f32.mxu1 %v19851_v0 }
  0xad   : > { %729 = vmatpush1.msra.mxu0 %v717_v21  ;;  %v907_v22 = vpop.permute.xlu1 %906  ;;  %v713_v23 = vpop.permute.xlu0 %712  ;;  %v1881_v21 = vld [vmem:[%s19778_s1 + $0x38] sm:$0xff] }
  0xae   : > { %v720_v24 = vsel %vm716_vm2, %v713_v23, %v715_v17  ;;  %v719_v25 = vsel %vm716_vm2, %v711_v18, %v713_v23  ;;  %16418 = vmatmul.mubr.msk.f32.vlgmr.msra.gmra.mrb[2].mxu0 %vm533_vm1, %v705_v20 }
  0xaf   : > { %3225 = vrot.lane.b32.xlu1 %v19851_v0, %s19817_s17  ;;  %3221 = vrot.lane.b32.xlu0 %v16953_v1, %s19817_s17 }
  0xb0   : > { %799 = vmatprep.subr.mxu1 %v720_v24  ;;  %988 = vmatprep.mubr.f32.mxu0 %v19851_v0 }
  0xb1   : > { %800 = vmatpush1.msra.mxu1 %v719_v25  ;;  %v909_v26 = vpop.permute.xlu1 %908  ;;  %v905_v27 = vpop.permute.xlu0 %904 }
  0xb2   : > { %v914_v28 = vsel %vm912_vm3, %v905_v27, %v907_v22  ;;  %16419 = vmatmul.mubr.msk.f32.vlgmr.msra.gmra.mrb[2].mxu1 %vm533_vm1, %v705_v20  ;;  %v915_v36 = vsel %vm912_vm3, %v907_v22, %v909_v26 }
  0xb3   : > { %3417 = vrot.lane.b32.xlu1 %v16953_v1, %s19819_s16  ;;  %3223 = vrot.lane.b32.xlu0 %v16970_v4, %s19817_s17  ;;  %s19823_s17 = smov 120  }
  0xb4   : > { %924 = vmatprep.subr.mxu0 %v914_v28  ;;  %1059 = vmatprep.mubr.f32.mxu1 %v19851_v0 }
  0xb5   : > { %v1101_v29 = vpop.permute.xlu1 %1100  ;;  %v903_v30 = vpop.permute.xlu0 %902 }
  0xb6   : > { %v913_v31 = vsel %vm912_vm3, %v903_v30, %v905_v27 }
  0xb7   : > { %3419 = vrot.lane.b32.xlu1 %v16970_v4, %s19819_s16  ;;  %3415 = vrot.lane.b32.xlu0 %v16963_v3, %s19819_s16 }
  0xb8   : > { %925 = vmatpush1.msra.mxu0 %v913_v31 }
  0xb9   : > { %v1099_v33 = vpop.permute.xlu1 %1098  ;;  %v911_v34 = vpop.permute.xlu0 %910  ;;  %16421 = vmatmul.mubr.msk.f32.vlgmr.msra.gmra.mrb[4].mxu0 %vm533_vm1, %v901_v32 }
  0xba   : > { %v916_v35 = vsel %vm912_vm3, %v909_v26, %v911_v34  ;;  %1184 = vmatprep.mubr.f32.mxu0 %v19851_v0  ;;  %v1109_v41 = vsel %vm1108_vm4, %v1099_v33, %v1101_v29  ;;  %v2077_v33 = vld [vmem:[%s19778_s1 + $0x40] sm:$0xff] }
  0xbb   : > { %3611 = vrot.lane.b32.xlu1 %v16963_v3, %s19823_s17  ;;  %3413 = vrot.lane.b32.xlu0 %v16956_v2, %s19819_s16 }
  0xbc   : > { %995 = vmatprep.subr.mxu1 %v916_v35 }
  0xbd   : > { %996 = vmatpush1.msra.mxu1 %v915_v36  ;;  %v1107_v37 = vpop.permute.xlu1 %1106  ;;  %v1103_v38 = vpop.permute.xlu0 %1102 }
  0xbe   : > { %v1110_v39 = vsel %vm1108_vm4, %v1101_v29, %v1103_v38  ;;  %16422 = vmatmul.mubr.msk.f32.vlgmr.msra.gmra.mrb[4].mxu1 %vm533_vm1, %v901_v32 }
  0xbf   : > { %3609 = vrot.lane.b32.xlu1 %v16956_v2, %s19823_s17  ;;  %3421 = vrot.lane.b32.xlu0 %v19851_v0, %s19819_s16  ;;  %s19886_s16 = smov 72  }
  0xc0   : > { %1120 = vmatprep.subr.mxu0 %v1110_v39  ;;  %1255 = vmatprep.mubr.f32.mxu1 %v19851_v0 }
  0xc1   : > { %1121 = vmatpush1.msra.mxu0 %v1109_v41  ;;  %v1299_v42 = vpop.permute.xlu1 %1298  ;;  %v1105_v43 = vpop.permute.xlu0 %1104  ;;  %v2273_v41 = vld [vmem:[%s19778_s1 + $0x48] sm:$0xff] }
  0xc2   : > { %v1112_v44 = vsel %vm1108_vm4, %v1105_v43, %v1107_v37  ;;  %v1111_v45 = vsel %vm1108_vm4, %v1103_v38, %v1105_v43  ;;  %16424 = vmatmul.mubr.msk.f32.vlgmr.msra.gmra.mrb[6].mxu0 %vm533_vm1, %v1097_v40 }
  0xc3   : > { %3617 = vrot.lane.b32.xlu1 %v19851_v0, %s19823_s17  ;;  %3613 = vrot.lane.b32.xlu0 %v16953_v1, %s19823_s17 }
  0xc4   : > { %1191 = vmatprep.subr.mxu1 %v1112_v44  ;;  %1380 = vmatprep.mubr.f32.mxu0 %v19851_v0 }
  0xc5   : > { %1192 = vmatpush1.msra.mxu1 %v1111_v45  ;;  %v1301_v46 = vpop.permute.xlu1 %1300  ;;  %v1297_v47 = vpop.permute.xlu0 %1296 }
  0xc6   : > { %v1306_v48 = vsel %vm1304_vm5, %v1297_v47, %v1299_v42  ;;  %16425 = vmatmul.mubr.msk.f32.vlgmr.msra.gmra.mrb[6].mxu1 %vm533_vm1, %v1097_v40  ;;  %v1307_v56 = vsel %vm1304_vm5, %v1299_v42, %v1301_v46 }
  0xc7   : > { %3809 = vrot.lane.b32.xlu1 %v16953_v1, %s19821_s23  ;;  %3615 = vrot.lane.b32.xlu0 %v16970_v4, %s19823_s17  ;;  %s19887_s17 = smov 71  }
  0xc8   : > { %1316 = vmatprep.subr.mxu0 %v1306_v48  ;;  %1451 = vmatprep.mubr.f32.mxu1 %v19851_v0 }
  0xc9   : > { %v1493_v49 = vpop.permute.xlu1 %1492  ;;  %v1295_v50 = vpop.permute.xlu0 %1294 }
  0xca   : > { %v1305_v51 = vsel %vm1304_vm5, %v1295_v50, %v1297_v47 }
  0xcb   : > { %3811 = vrot.lane.b32.xlu1 %v16970_v4, %s19821_s23  ;;  %3807 = vrot.lane.b32.xlu0 %v16963_v3, %s19821_s23 }
  0xcc   : > { %1317 = vmatpush1.msra.mxu0 %v1305_v51 }
  0xcd   : > { %v1491_v53 = vpop.permute.xlu1 %1490  ;;  %v1303_v54 = vpop.permute.xlu0 %1302  ;;  %16427 = vmatmul.mubr.msk.f32.vlgmr.msra.gmra.mrb[8].mxu0 %vm533_vm1, %v1293_v52 }
  0xce   : > { %v1308_v55 = vsel %vm1304_vm5, %v1301_v46, %v1303_v54  ;;  %1576 = vmatprep.mubr.f32.mxu0 %v19851_v0  ;;  %v1501_v61 = vsel %vm1500_vm6, %v1491_v53, %v1493_v49  ;;  %v2469_v53 = vld [vmem:[%s19778_s1 + $0x50] sm:$0xff] }
  0xcf   : > { %4003 = vrot.lane.b32.xlu1 %v16963_v3, %s19825_s30  ;;  %3805 = vrot.lane.b32.xlu0 %v16956_v2, %s19821_s23 }
  0xd0   : > { %1387 = vmatprep.subr.mxu1 %v1308_v55 }
  0xd1   : > { %1388 = vmatpush1.msra.mxu1 %v1307_v56  ;;  %v1499_v57 = vpop.permute.xlu1 %1498  ;;  %v1495_v58 = vpop.permute.xlu0 %1494 }
  0xd2   : > { %v1502_v59 = vsel %vm1500_vm6, %v1493_v49, %v1495_v58  ;;  %16428 = vmatmul.mubr.msk.f32.vlgmr.msra.gmra.mrb[8].mxu1 %vm533_vm1, %v1293_v52 }
  0xd3   : > { %4001 = vrot.lane.b32.xlu1 %v16956_v2, %s19825_s30  ;;  %3813 = vrot.lane.b32.xlu0 %v19851_v0, %s19821_s23  ;;  %s19888_s23 = smov 65  }
  0xd4   : > { %1512 = vmatprep.subr.mxu0 %v1502_v59  ;;  %1647 = vmatprep.mubr.f32.mxu1 %v19851_v0 }
  0xd5   : > { %1513 = vmatpush1.msra.mxu0 %v1501_v61  ;;  %v1691_v62 = vpop.permute.xlu1 %1690  ;;  %v1497_v63 = vpop.permute.xlu0 %1496  ;;  %v2664_v61 = vld [vmem:[%s19778_s1 + $0x58] sm:$0xff] }
  0xd6   : > { %v1504_v5 = vsel %vm1500_vm6, %v1497_v63, %v1499_v57  ;;  %v1503_v6 = vsel %vm1500_vm6, %v1495_v58, %v1497_v63  ;;  %16430 = vmatmul.mubr.msk.f32.vlgmr.msra.gmra.mrb[10].mxu0 %vm533_vm1, %v1489_v60 }
  0xd7   : > { %4009 = vrot.lane.b32.xlu1 %v19851_v0, %s19825_s30  ;;  %4005 = vrot.lane.b32.xlu0 %v16953_v1, %s19825_s30 }
  0xd8   : > { %1583 = vmatprep.subr.mxu1 %v1504_v5  ;;  %1772 = vmatprep.mubr.f32.mxu0 %v19851_v0 }
  0xd9   : > { %1584 = vmatpush1.msra.mxu1 %v1503_v6  ;;  %v1693_v7 = vpop.permute.xlu1 %1692  ;;  %v1689_v8 = vpop.permute.xlu0 %1688 }
  0xda   : > { %v1698_v9 = vsel %vm1696_vm7, %v1689_v8, %v1691_v62  ;;  %16431 = vmatmul.mubr.msk.f32.vlgmr.msra.gmra.mrb[10].mxu1 %vm533_vm1, %v1489_v60  ;;  %v1699_v17 = vsel %vm1696_vm7, %v1691_v62, %v1693_v7 }
  0xdb   : > { %4200 = vrot.lane.b32.xlu1 %v16953_v1, %s19886_s16  ;;  %4007 = vrot.lane.b32.xlu0 %v16970_v4, %s19825_s30  ;;  %s19890_s30 = smov 63  }
  0xdc   : > { %1708 = vmatprep.subr.mxu0 %v1698_v9  ;;  %1843 = vmatprep.mubr.f32.mxu1 %v19851_v0 }
  0xdd   : > { %v1885_v10 = vpop.permute.xlu1 %1884  ;;  %v1687_v11 = vpop.permute.xlu0 %1686 }
  0xde   : > { %v1697_v12 = vsel %vm1696_vm7, %v1687_v11, %v1689_v8 }
  0xdf   : > { %4202 = vrot.lane.b32.xlu1 %v16970_v4, %s19886_s16  ;;  %4198 = vrot.lane.b32.xlu0 %v16963_v3, %s19886_s16 }
  0xe0   : > { %1709 = vmatpush1.msra.mxu0 %v1697_v12 }
  0xe1   : > { %v1883_v14 = vpop.permute.xlu1 %1882  ;;  %v1695_v15 = vpop.permute.xlu0 %1694  ;;  %16433 = vmatmul.mubr.msk.f32.vlgmr.msra.gmra.mrb[12].mxu0 %vm533_vm1, %v1685_v13 }
  0xe2   : > { %v1700_v16 = vsel %vm1696_vm7, %v1693_v7, %v1695_v15  ;;  %1968 = vmatprep.mubr.f32.mxu0 %v19851_v0  ;;  %v1893_v22 = vsel %vm1892_vm8, %v1883_v14, %v1885_v10  ;;  %v2860_v14 = vld [vmem:[%s19778_s1 + $0x60] sm:$0xff] }
  0xe3   : > { %4393 = vrot.lane.b32.xlu1 %v16963_v3, %s19887_s17  ;;  %4196 = vrot.lane.b32.xlu0 %v16956_v2, %s19886_s16 }
  0xe4   : > { %1779 = vmatprep.subr.mxu1 %v1700_v16 }
  0xe5   : > { %1780 = vmatpush1.msra.mxu1 %v1699_v17  ;;  %v1891_v18 = vpop.permute.xlu1 %1890  ;;  %v1887_v19 = vpop.permute.xlu0 %1886 }
  0xe6   : > { %v1894_v20 = vsel %vm1892_vm8, %v1885_v10, %v1887_v19  ;;  %16434 = vmatmul.mubr.msk.f32.vlgmr.msra.gmra.mrb[12].mxu1 %vm533_vm1, %v1685_v13 }
  0xe7   : > { %4391 = vrot.lane.b32.xlu1 %v16956_v2, %s19887_s17  ;;  %4204 = vrot.lane.b32.xlu0 %v19851_v0, %s19886_s16 }
  0xe8   : > { %1904 = vmatprep.subr.mxu0 %v1894_v20  ;;  %2039 = vmatprep.mubr.f32.mxu1 %v19851_v0 }
  0xe9   : > { %1905 = vmatpush1.msra.mxu0 %v1893_v22  ;;  %v2083_v23 = vpop.permute.xlu1 %2082  ;;  %v1889_v24 = vpop.permute.xlu0 %1888 }
  0xea   : > { %v1896_v25 = vsel %vm1892_vm8, %v1889_v24, %v1891_v18  ;;  %v1895_v26 = vsel %vm1892_vm8, %v1887_v19, %v1889_v24  ;;  %16436 = vmatmul.mubr.msk.f32.vlgmr.msra.gmra.mrb[14].mxu0 %vm533_vm1, %v1881_v21  ;;  %v3056_v18 = vld [vmem:[%s19778_s1 + $0x68] sm:$0xff] }
  0xeb   : > { %4399 = vrot.lane.b32.xlu1 %v19851_v0, %s19887_s17  ;;  %4395 = vrot.lane.b32.xlu0 %v16953_v1, %s19887_s17 }
  0xec   : > { %1975 = vmatprep.subr.mxu1 %v1896_v25  ;;  %2164 = vmatprep.mubr.f32.mxu0 %v19851_v0 }
  0xed   : > { %1976 = vmatpush1.msra.mxu1 %v1895_v26  ;;  %v2085_v27 = vpop.permute.xlu1 %2084  ;;  %v2081_v28 = vpop.permute.xlu0 %2080 }
  0xee   : > { %v2090_v29 = vsel %vm2088_vm9, %v2081_v28, %v2083_v23  ;;  %16437 = vmatmul.mubr.msk.f32.vlgmr.msra.gmra.mrb[14].mxu1 %vm533_vm1, %v1881_v21  ;;  %v2091_v37 = vsel %vm2088_vm9, %v2083_v23, %v2085_v27 }
  0xef   : > { %4590 = vrot.lane.b32.xlu1 %v16953_v1, %s19888_s23  ;;  %4397 = vrot.lane.b32.xlu0 %v16970_v4, %s19887_s17 }
  0xf0   : > { %2100 = vmatprep.subr.mxu0 %v2090_v29  ;;  %2235 = vmatprep.mubr.f32.mxu1 %v19851_v0 }
  0xf1   : > { %v2277_v30 = vpop.permute.xlu1 %2276  ;;  %v2079_v31 = vpop.permute.xlu0 %2078 }
  0xf2   : > { %v2089_v32 = vsel %vm2088_vm9, %v2079_v31, %v2081_v28  ;;  %v5755_v31 = vld [vmem:[%s19895_s2] sm:$0xff]  ;;  %s19900_s2 = smov 1  }
  0xf3   : > { %4592 = vrot.lane.b32.xlu1 %v16970_v4, %s19888_s23  ;;  %4588 = vrot.lane.b32.xlu0 %v16963_v3, %s19888_s23 }
  0xf4   : > { %2101 = vmatpush1.msra.mxu0 %v2089_v32 }
  0xf5   : > { %v2275_v34 = vpop.permute.xlu1 %2274  ;;  %v2087_v35 = vpop.permute.xlu0 %2086  ;;  %16439 = vmatmul.mubr.msk.f32.vlgmr.msra.gmra.mrb[16].mxu0 %vm533_vm1, %v2077_v33 }
  0xf6   : > { %v2092_v36 = vsel %vm2088_vm9, %v2085_v27, %v2087_v35  ;;  %2360 = vmatprep.mubr.f32.mxu0 %v19851_v0  ;;  %v2285_v42 = vsel %vm2284_vm10, %v2275_v34, %v2277_v30  ;;  %v3412_v34 = vld [vmem:[%s19778_s1 + $0x78] sm:$0xff] }
  0xf7   : > { %4783 = vrot.lane.b32.xlu1 %v16963_v3, %s19889_s0  ;;  %4586 = vrot.lane.b32.xlu0 %v16956_v2, %s19888_s23 }
  0xf8   : > { %2171 = vmatprep.subr.mxu1 %v2092_v36 }
  0xf9   : > { %2172 = vmatpush1.msra.mxu1 %v2091_v37  ;;  %v2283_v38 = vpop.permute.xlu1 %2282  ;;  %v2279_v39 = vpop.permute.xlu0 %2278 }
  0xfa   : > { %v2286_v40 = vsel %vm2284_vm10, %v2277_v30, %v2279_v39  ;;  %16440 = vmatmul.mubr.msk.f32.vlgmr.msra.gmra.mrb[16].mxu1 %vm533_vm1, %v2077_v33  ;;  %v16811_v30 = vmov 0  }
  0xfb   : > { %4781 = vrot.lane.b32.xlu1 %v16956_v2, %s19889_s0  ;;  %4594 = vrot.lane.b32.xlu0 %v19851_v0, %s19888_s23 }
  0xfc   : > { %2296 = vmatprep.subr.mxu0 %v2286_v40  ;;  %2431 = vmatprep.mubr.f32.mxu1 %v19851_v0 }
  0xfd   : > { %2297 = vmatpush1.msra.mxu0 %v2285_v42  ;;  %v2475_v43 = vpop.permute.xlu1 %2474  ;;  %v2281_v44 = vpop.permute.xlu0 %2280  ;;  %16719 = vset.pattern.permute.xlu0 %v16811_v30  ;;  %v3608_v42 = vld [vmem:[%s19778_s1 + $0x80] sm:$0xff] }
  0xfe   : > { %v2288_v45 = vsel %vm2284_vm10, %v2281_v44, %v2283_v38  ;;  %v2287_v46 = vsel %vm2284_vm10, %v2279_v39, %v2281_v44  ;;  %16442 = vmatmul.mubr.msk.f32.vlgmr.msra.gmra.mrb[18].mxu0 %vm533_vm1, %v2273_v41  ;;  %16720 = vset.pattern.permute.xlu1 %v16811_v30 }
  0xff   : > { %4789 = vrot.lane.b32.xlu1 %v19851_v0, %s19889_s0  ;;  %4785 = vrot.lane.b32.xlu0 %v16953_v1, %s19889_s0 }
 0x100   : > { %2367 = vmatprep.subr.mxu1 %v2288_v45  ;;  %2555 = vmatprep.mubr.f32.mxu0 %v19851_v0 }
 0x101   : > { %2368 = vmatpush1.msra.mxu1 %v2287_v46  ;;  %v2477_v47 = vpop.permute.xlu1 %2476  ;;  %v2473_v48 = vpop.permute.xlu0 %2472 }
 0x102   : > { %v2481_v49 = vsel %vm533_vm1, %v2473_v48, %v2475_v43  ;;  %16443 = vmatmul.mubr.msk.f32.vlgmr.msra.gmra.mrb[18].mxu1 %vm533_vm1, %v2273_v41  ;;  %v2482_v57 = vsel %vm533_vm1, %v2475_v43, %v2477_v47 }
 0x103   : > { %4980 = vrot.lane.b32.xlu1 %v16953_v1, %s19890_s30  ;;  %4787 = vrot.lane.b32.xlu0 %v16970_v4, %s19889_s0 }
 0x104   : > { %2491 = vmatprep.subr.mxu0 %v2481_v49  ;;  %2626 = vmatprep.mubr.f32.mxu1 %v19851_v0 }
 0x105   : > { %v2668_v50 = vpop.permute.xlu1 %2667  ;;  %v2471_v51 = vpop.permute.xlu0 %2470 }
 0x106   : > { %v2480_v52 = vsel %vm533_vm1, %v2471_v51, %v2473_v48 }
 0x107   : > { %4982 = vrot.lane.b32.xlu1 %v16970_v4, %s19890_s30  ;;  %4978 = vrot.lane.b32.xlu0 %v16963_v3, %s19890_s30 }
 0x108   : > { %2492 = vmatpush1.msra.mxu0 %v2480_v52 }
 0x109   : > { %v2666_v54 = vpop.permute.xlu1 %2665  ;;  %v2479_v55 = vpop.permute.xlu0 %2478  ;;  %16445 = vmatmul.mubr.msk.f32.vlgmr.msra.gmra.mrb[20].mxu0 %vm533_vm1, %v2469_v53 }
 0x10a   : > { %v2483_v56 = vsel %vm533_vm1, %v2477_v47, %v2479_v55  ;;  %2751 = vmatprep.mubr.f32.mxu0 %v19851_v0  ;;  %v2676_v62 = vsel %vm2675_vm11, %v2666_v54, %v2668_v50 }
 0x10b   : > { %5173 = vrot.lane.b32.xlu1 %v16963_v3, %s19891_s20  ;;  %4976 = vrot.lane.b32.xlu0 %v16956_v2, %s19890_s30 }
 0x10c   : > { %2562 = vmatprep.subr.mxu1 %v2483_v56 }
 0x10d   : > { %2563 = vmatpush1.msra.mxu1 %v2482_v57  ;;  %v2674_v58 = vpop.permute.xlu1 %2673  ;;  %v2670_v59 = vpop.permute.xlu0 %2669 }
 0x10e   : > { %v2677_v60 = vsel %vm2675_vm11, %v2668_v50, %v2670_v59  ;;  %16446 = vmatmul.mubr.msk.f32.vlgmr.msra.gmra.mrb[20].mxu1 %vm533_vm1, %v2469_v53  ;;  %v3804_v53 = vld [vmem:[%s19778_s1 + $0x88] sm:$0xff] }
 0x10f   : > { %5171 = vrot.lane.b32.xlu1 %v16956_v2, %s19891_s20  ;;  %4984 = vrot.lane.b32.xlu0 %v19851_v0, %s19890_s30 }
 0x110   : > { %2687 = vmatprep.subr.mxu0 %v2677_v60  ;;  %2822 = vmatprep.mubr.f32.mxu1 %v19851_v0 }
 0x111   : > { %2688 = vmatpush1.msra.mxu0 %v2676_v62  ;;  %v2866_v63 = vpop.permute.xlu1 %2865  ;;  %v2672_v5 = vpop.permute.xlu0 %2671  ;;  %v4000_v62 = vld [vmem:[%s19778_s1 + $0x90] sm:$0xff] }
 0x112   : > { %v2679_v6 = vsel %vm2675_vm11, %v2672_v5, %v2674_v58  ;;  %v2678_v7 = vsel %vm2675_vm11, %v2670_v59, %v2672_v5  ;;  %16448 = vmatmul.mubr.msk.f32.vlgmr.msra.gmra.mrb[22].mxu0 %vm533_vm1, %v2664_v61 }
 0x113   : > { %5179 = vrot.lane.b32.xlu1 %v19851_v0, %s19891_s20  ;;  %5175 = vrot.lane.b32.xlu0 %v16953_v1, %s19891_s20 }
 0x114   : > { %2758 = vmatprep.subr.mxu1 %v2679_v6  ;;  %2947 = vmatprep.mubr.f32.mxu0 %v19851_v0 }
 0x115   : > { %2759 = vmatpush1.msra.mxu1 %v2678_v7  ;;  %v2868_v8 = vpop.permute.xlu1 %2867  ;;  %v2864_v9 = vpop.permute.xlu0 %2863 }
 0x116   : > { %v2873_v10 = vsel %vm19855_vm12, %v2864_v9, %v2866_v63  ;;  %16449 = vmatmul.mubr.msk.f32.vlgmr.msra.gmra.mrb[22].mxu1 %vm533_vm1, %v2664_v61  ;;  %v2874_v19 = vsel %vm19855_vm12, %v2866_v63, %v2868_v8 }
 0x117   : > { %5370 = vrot.lane.b32.xlu1 %v16953_v1, %s19892_s27  ;;  %5177 = vrot.lane.b32.xlu0 %v16970_v4, %s19891_s20 }
 0x118   : > { %2883 = vmatprep.subr.mxu0 %v2873_v10  ;;  %3018 = vmatprep.mubr.f32.mxu1 %v19851_v0 }
 0x119   : > { %v3220_v11 = vpop.permute.xlu1 %3219  ;;  %v2862_v12 = vpop.permute.xlu0 %2861 }
 0x11a   : > { %v2872_v13 = vsel %vm19855_vm12, %v2862_v12, %v2864_v9 }
 0x11b   : > { %5372 = vrot.lane.b32.xlu1 %v16970_v4, %s19892_s27  ;;  %5368 = vrot.lane.b32.xlu0 %v16963_v3, %s19892_s27 }
 0x11c   : > { %2884 = vmatpush1.msra.mxu0 %v2872_v13 }
 0x11d   : > { %v3218_v15 = vpop.permute.xlu1 %3217  ;;  %v2870_v16 = vpop.permute.xlu0 %2869  ;;  %16451 = vmatmul.mubr.msk.f32.vlgmr.msra.gmra.mrb[24].mxu0 %vm533_vm1, %v2860_v14  ;;  %3060 = vmatprep.subr.mxu0 %v16963_v3 }
 0x11e   : > { %v2875_v17 = vsel %vm19855_vm12, %v2868_v8, %v2870_v16  ;;  %3061 = vmatpush1.msra.mxu0 %v16956_v2  ;;  %3124 = vmatprep.mubr.f32.mxu0 %v19851_v0 }
 0x11f   : > { %5563 = vrot.lane.b32.xlu1 %v16963_v3, %s19893_s29  ;;  %5366 = vrot.lane.b32.xlu0 %v16956_v2, %s19892_s27  ;;  %v3228_v3 = vsel %vm19854_vm13, %v3218_v15, %v3220_v11 }
 0x120   : > { %2954 = vmatprep.subr.mxu1 %v2875_v17 }
 0x121   : > { %2955 = vmatpush1.msra.mxu1 %v2874_v19  ;;  %v3226_v20 = vpop.permute.xlu1 %3225  ;;  %v3222_v21 = vpop.permute.xlu0 %3221  ;;  %16454 = vmatmul.mubr.msk.f32.vlgmr.msra.gmra.mrb[26].mxu0 %vm533_vm1, %v3056_v18 }
 0x122   : > { %v3229_v22 = vsel %vm19854_vm13, %v3220_v11, %v3222_v21  ;;  %16452 = vmatmul.mubr.msk.f32.vlgmr.msra.gmra.mrb[24].mxu1 %vm533_vm1, %v2860_v14  ;;  %3131 = vmatprep.subr.mxu1 %v16970_v4  ;;  %v4195_v14 = vld [vmem:[%s19778_s1 + $0x98] sm:$0xff] }
 0x123   : > { %5561 = vrot.lane.b32.xlu1 %v16956_v2, %s19893_s29  ;;  %5374 = vrot.lane.b32.xlu0 %v19851_v0, %s19892_s27  ;;  %v3206_v2 = vld [vmem:[%s19778_s1 + $0x70] sm:$0xff] }
 0x124   : > { %3239 = vmatprep.subr.mxu0 %v3229_v22  ;;  %3132 = vmatpush1.msra.mxu1 %v16953_v1 }
 0x125   : > { %3240 = vmatpush1.msra.mxu0 %v3228_v3  ;;  %v3418_v23 = vpop.permute.xlu1 %3417  ;;  %v3224_v24 = vpop.permute.xlu0 %3223  ;;  %3195 = vmatprep.mubr.f32.mxu1 %v19851_v0  ;;  %v4390_v3 = vld [vmem:[%s19778_s1 + $0xa0] sm:$0xff] }
 0x126   : > { %v3231_v25 = vsel %vm19854_vm13, %v3224_v24, %v3226_v20  ;;  %16455 = vmatmul.mubr.msk.f32.vlgmr.msra.gmra.mrb[26].mxu1 %vm533_vm1, %v3056_v18  ;;  %v3230_v26 = vsel %vm19854_vm13, %v3222_v21, %v3224_v24  ;;  %3303 = vmatprep.mubr.f32.mxu0 %v19851_v0 }
 0x127   : > { %5565 = vrot.lane.b32.xlu0 %v16953_v1, %s19893_s29  ;;  %3310 = vmatprep.subr.mxu1 %v3231_v25  ;;  %v5765_v1 = vld [vmem:[%s19894_s3] sm:$0xff]  ;;  %s19901_s3 = smov 127  }
 0x128   : > { %3311 = vmatpush1.msra.mxu1 %v3230_v26  ;;  %5569 = vrot.lane.b32.xlu1 %v19851_v0, %s19893_s29 }
 0x129   : > { %v3420_v27 = vpop.permute.xlu1 %3419  ;;  %v3416_v28 = vpop.permute.xlu0 %3415  ;;  %16456 = vmatmul.mubr.msk.f32.vlgmr.msra.gmra.mrb[28].mxu0 %vm533_vm1, %v3206_v2  ;;  %3374 = vmatprep.mubr.f32.mxu1 %v19851_v0 }
 0x12a   : > { %v3425_v29 = vsel %vm19836_vm14, %v3416_v28, %v3418_v23  ;;  %16457 = vmatmul.mubr.msk.f32.vlgmr.msra.gmra.mrb[28].mxu1 %vm533_vm1, %v3206_v2  ;;  %3499 = vmatprep.mubr.f32.mxu0 %v19851_v0  ;;  %v3426_v38 = vsel %vm19836_vm14, %v3418_v23, %v3420_v27 }
 0x12b   : > { %5567 = vrot.lane.b32.xlu0 %v16970_v4, %s19893_s29  ;;  %3435 = vmatprep.subr.mxu0 %v3425_v29 }
 0x12c   : > { %3570 = vmatprep.mubr.f32.mxu1 %v19851_v0  ;;  %5768 = vperm.xlu1 %16720, %v5765_v1  }
 0x12d   : > { %v3612_v32 = vpop.permute.xlu1 %3611  ;;  %v3414_v33 = vpop.permute.xlu0 %3413 }
 0x12e   : > { %v3424_v4 = vsel %vm19836_vm14, %v3414_v33, %v3416_v28 }
 0x12f   : > { %3436 = vmatpush1.msra.mxu0 %v3424_v4  ;;  %5758 = vperm.xlu0 %16719, %v5755_v31   ;;  %v4585_v31 = vld [vmem:[%s19778_s1 + $0xa8] sm:$0xff] }
 0x130   : > { %16459 = vmatmul.mubr.msk.f32.vlgmr.msra.gmra.mrb[30].mxu0 %vm533_vm1, %v3412_v34  ;;  %5802 = vrot.lane.b32.xlu1 %v19851_v0, %s19896_s18 }
 0x131   : > { %v3610_v35 = vpop.permute.xlu1 %3609  ;;  %v3422_v36 = vpop.permute.xlu0 %3421  ;;  %3695 = vmatprep.mubr.f32.mxu0 %v19851_v0 }
 0x132   : > { %v3427_v37 = vsel %vm19836_vm14, %v3420_v27, %v3422_v36  ;;  %v3620_v43 = vsel %vm19842_vm15, %v3610_v35, %v3612_v32  ;;  %vm19841_vm14 = vcmask 973824   ;;  %v681_v35 = vlaneseq }
 0x133   : > { %3506 = vmatprep.subr.mxu1 %v3427_v37  ;;  %5992 = vrot.lane.b32.xlu0 %v19851_v0, %s19886_s16 }
 0x134   : > { %3507 = vmatpush1.msra.mxu1 %v3426_v38  ;;  %6186 = vrot.lane.b32.xlu1 %v19851_v0, %s19887_s17 }
 0x135   : > { %v3618_v39 = vpop.permute.xlu1 %3617  ;;  %v3614_v40 = vpop.permute.xlu0 %3613  ;;  %16460 = vmatmul.mubr.msk.f32.vlgmr.msra.gmra.mrb[30].mxu1 %vm533_vm1, %v3412_v34 }
 0x136   : > { %v3621_v41 = vsel %vm19842_vm15, %v3612_v32, %v3614_v40  ;;  %3766 = vmatprep.mubr.f32.mxu1 %v19851_v0 }
 0x137   : > { %3631 = vmatprep.subr.mxu0 %v3621_v41  ;;  %6380 = vrot.lane.b32.xlu0 %v19851_v0, %s19888_s23  ;;  %v682_v41 = vshrl.u32 %v681_v35, 7 }
 0x138   : > { %3632 = vmatpush1.msra.mxu0 %v3620_v43  ;;  %6574 = vrot.lane.b32.xlu1 %v19851_v0, %s19889_s0 }
 0x139   : > { %v3810_v44 = vpop.permute.xlu1 %3809  ;;  %v3616_v45 = vpop.permute.xlu0 %3615  ;;  %16462 = vmatmul.mubr.msk.f32.vlgmr.msra.gmra.mrb[32].mxu0 %vm533_vm1, %v3608_v42  ;;  %v17513_v43 = vsub.s32 1, %v682_v41 }
 0x13a   : > { %v3623_v46 = vsel %vm19842_vm15, %v3616_v45, %v3618_v39  ;;  %v3622_v47 = vsel %vm19842_vm15, %v3614_v40, %v3616_v45  ;;  %3891 = vmatprep.mubr.f32.mxu0 %v19851_v0  ;;  %v4780_v40 = vld [vmem:[%s19778_s1 + $0xb0] sm:$0xff] }
 0x13b   : > { %3702 = vmatprep.subr.mxu1 %v3623_v46  ;;  %6768 = vrot.lane.b32.xlu0 %v19851_v0, %s19890_s30  ;;  %19905 = vst [vmem:[#allocation16_spill] sm:$0xff] %v17513_v43 }
 0x13c   : > { %3703 = vmatpush1.msra.mxu1 %v3622_v47  ;;  %6962 = vrot.lane.b32.xlu1 %v19851_v0, %s19891_s20 }
 0x13d   : > { %v3812_v48 = vpop.permute.xlu1 %3811  ;;  %v3808_v49 = vpop.permute.xlu0 %3807  ;;  %16463 = vmatmul.mubr.msk.f32.vlgmr.msra.gmra.mrb[32].mxu1 %vm533_vm1, %v3608_v42 }
 0x13e   : > { %v3817_v50 = vsel %vm19841_vm14, %v3808_v49, %v3810_v44  ;;  %3962 = vmatprep.mubr.f32.mxu1 %v19851_v0  ;;  %v3818_v58 = vsel %vm19841_vm14, %v3810_v44, %v3812_v48 }
 0x13f   : > { %3827 = vmatprep.subr.mxu0 %v3817_v50  ;;  %7156 = vrot.lane.b32.xlu0 %v19851_v0, %s19892_s27 }
 0x140   : > { %7350 = vrot.lane.b32.xlu1 %v19851_v0, %s19893_s29 }
 0x141   : > { %v4004_v51 = vpop.permute.xlu1 %4003  ;;  %v3806_v52 = vpop.permute.xlu0 %3805 }
 0x142   : > { %v3816_v54 = vsel %vm19841_vm14, %v3806_v52, %v3808_v49  ;;  %v17522_v49 = vsub.s32 3, %v682_v41 }
 0x143   : > { %3828 = vmatpush1.msra.mxu0 %v3816_v54  ;;  %7544 = vrot.lane.b32.xlu0 %v19851_v0, %s19897_s25 }
 0x144   : > { %16465 = vmatmul.mubr.msk.f32.vlgmr.msra.gmra.mrb[34].mxu0 %vm533_vm1, %v3804_v53  ;;  %7738 = vrot.lane.b32.xlu1 %v19851_v0, %s19898_s15  ;;  %19906 = vst [vmem:[#allocation17_spill] sm:$0xff] %v17522_v49 }
 0x145   : > { %v4002_v55 = vpop.permute.xlu1 %4001  ;;  %v3814_v56 = vpop.permute.xlu0 %3813  ;;  %4086 = vmatprep.mubr.f32.mxu0 %v19851_v0 }
 0x146   : > { %v3819_v57 = vsel %vm19841_vm14, %v3812_v48, %v3814_v56  ;;  %v4011_v63 = vsel %vm524_vm0, %v4002_v55, %v4004_v51  ;;  %v679_v48 = vld [vmem:[%s19787_s10] ss:$8 sm:$0xf] }
 0x147   : > { %3898 = vmatprep.subr.mxu1 %v3819_v57  ;;  %7932 = vrot.lane.b32.xlu0 %v19851_v0, %s19899_s21  ;;  %v688_v50 = vrot.slane %v679_v48, %v17513_v43  ;;  %v696_v57 = vrot.slane %v679_v48, %v17522_v49 }
 0x148   : > { %3899 = vmatpush1.msra.mxu1 %v3818_v58  ;;  %8126 = vrot.lane.b32.xlu1 %v19851_v0, %s19900_s2 }
 0x149   : > { %v4010_v59 = vpop.permute.xlu1 %4009  ;;  %v4006_v60 = vpop.permute.xlu0 %4005  ;;  %16466 = vmatmul.mubr.msk.f32.vlgmr.msra.gmra.mrb[34].mxu1 %vm533_vm1, %v3804_v53  ;;  %v17526_v53 = vsub.s32 0, %v682_v41 }
 0x14a   : > { %v4012_v61 = vsel %vm524_vm0, %v4004_v51, %v4006_v60  ;;  %4157 = vmatprep.mubr.f32.mxu1 %v19851_v0 }
 0x14b   : > { %4022 = vmatprep.subr.mxu0 %v4012_v61  ;;  %8488 = vrot.lane.b32.xlu0 %v19851_v0, %s19901_s3  ;;  %19907 = vst [vmem:[#allocation18_spill] sm:$0xff] %v17526_v53  ;;  %v4975_v61 = vld [vmem:[%s19778_s1 + $0xb8] sm:$0xff] }
 0x14c   : > { %4023 = vmatpush1.msra.mxu0 %v4011_v63  ;;  %8682 = vrot.lane.b32.xlu1 %v19851_v0, %s19902_s28  ;;  %v684_v63 = vrot.slane %v679_v48, %v17526_v53 }
 0x14d   : > { %v4201_v5 = vpop.permute.xlu1 %4200  ;;  %v4008_v6 = vpop.permute.xlu0 %4007  ;;  %16468 = vmatmul.mubr.msk.f32.vlgmr.msra.gmra.mrb[36].mxu0 %vm533_vm1, %v4000_v62 }
 0x14e   : > { %v4014_v7 = vsel %vm524_vm0, %v4008_v6, %v4010_v59  ;;  %v4013_v8 = vsel %vm524_vm0, %v4006_v60, %v4008_v6  ;;  %4281 = vmatprep.mubr.f32.mxu0 %v19851_v0 }
 0x14f   : > { %4093 = vmatprep.subr.mxu1 %v4014_v7  ;;  %8876 = vrot.lane.b32.xlu0 %v19851_v0, %s19903_s24  ;;  %v16420_v7 = vld [vmem:[%s19787_s10 + $0x1] ss:$8 sm:$0xf] }
 0x150   : > { %4094 = vmatpush1.msra.mxu1 %v4013_v8  ;;  %9070 = vrot.lane.b32.xlu1 %v19851_v0, %s19904_s26 }
 0x151   : > { %v4203_v9 = vpop.permute.xlu1 %4202  ;;  %v4199_v10 = vpop.permute.xlu0 %4198  ;;  %16469 = vmatmul.mubr.msk.f32.vlgmr.msra.gmra.mrb[36].mxu1 %vm533_vm1, %v4000_v62  ;;  %v17534_v62 = vsub.s32 2, %v682_v41 }
 0x152   : > { %v4207_v11 = vsel %vm716_vm2, %v4199_v10, %v4201_v5  ;;  %4352 = vmatprep.mubr.f32.mxu1 %v19851_v0  ;;  %v4208_v19 = vsel %vm716_vm2, %v4201_v5, %v4203_v9 }
 0x153   : > { %4217 = vmatprep.subr.mxu0 %v4207_v11  ;;  %9264 = vrot.lane.b32.xlu0 %v19851_v0, %s19896_s18  ;;  %19908 = vst [vmem:[#allocation19_spill] sm:$0xff] %v17534_v62  ;;  %v880_v11 = vrot.slane %v16420_v7, %v17513_v43 }
 0x154   : > { %9458 = vrot.lane.b32.xlu1 %v19851_v0, %s19886_s16 }
 0x155   : > { %v4394_v12 = vpop.permute.xlu1 %4393  ;;  %v4197_v13 = vpop.permute.xlu0 %4196 }
 0x156   : > { %v4206_v15 = vsel %vm716_vm2, %v4197_v13, %v4199_v10 }
 0x157   : > { %4218 = vmatpush1.msra.mxu0 %v4206_v15 }
 0x158   : > { %16471 = vmatmul.mubr.msk.f32.vlgmr.msra.gmra.mrb[38].mxu0 %vm533_vm1, %v4195_v14 }
 0x159   : > { %v4392_v16 = vpop.permute.xlu1 %4391  ;;  %v4205_v17 = vpop.permute.xlu0 %4204  ;;  %4476 = vmatprep.mubr.f32.mxu0 %v19851_v0 }
 0x15a   : > { %v4209_v18 = vsel %vm716_vm2, %v4203_v9, %v4205_v17  ;;  %v4401_v23 = vsel %vm912_vm3, %v4392_v16, %v4394_v12  ;;  %v876_v9 = vrot.slane %v16420_v7, %v17526_v53 }
 0x15b   : > { %4288 = vmatprep.subr.mxu1 %v4209_v18 }
 0x15c   : > { %4289 = vmatpush1.msra.mxu1 %v4208_v19  ;;  %v884_v19 = vrot.slane %v16420_v7, %v17534_v62 }
 0x15d   : > { %v4400_v20 = vpop.permute.xlu1 %4399  ;;  %16472 = vmatmul.mubr.msk.f32.vlgmr.msra.gmra.mrb[38].mxu1 %vm533_vm1, %v4195_v14  ;;  %v4396_v21 = vpop.permute.xlu0 %4395  ;;  %v692_v14 = vrot.slane %v679_v48, %v17534_v62 }
 0x15e   : > { %v4402_v22 = vsel %vm912_vm3, %v4394_v12, %v4396_v21  ;;  %4547 = vmatprep.mubr.f32.mxu1 %v19851_v0 }
 0x15f   : > { %4412 = vmatprep.subr.mxu0 %v4402_v22  ;;  %v888_v22 = vrot.slane %v16420_v7, %v17522_v49 }
 0x160   : > { %4413 = vmatpush1.msra.mxu0 %v4401_v23 }
 0x161   : > { %v4591_v24 = vpop.permute.xlu1 %4590  ;;  %v4398_v25 = vpop.permute.xlu0 %4397  ;;  %16474 = vmatmul.mubr.msk.f32.vlgmr.msra.gmra.mrb[40].mxu0 %vm533_vm1, %v4390_v3 }
 0x162   : > { %v4404_v26 = vsel %vm912_vm3, %v4398_v25, %v4400_v20  ;;  %v4403_v2 = vsel %vm912_vm3, %v4396_v21, %v4398_v25  ;;  %4671 = vmatprep.mubr.f32.mxu0 %v19851_v0 }
 0x163   : > { %4483 = vmatprep.subr.mxu1 %v4404_v26 }
 0x164   : > { %4484 = vmatpush1.msra.mxu1 %v4403_v2 }
 0x165   : > { %v4593_v27 = vpop.permute.xlu1 %4592  ;;  %16475 = vmatmul.mubr.msk.f32.vlgmr.msra.gmra.mrb[40].mxu1 %vm533_vm1, %v4390_v3  ;;  %v4589_v28 = vpop.permute.xlu0 %4588 }
 0x166   : > { %v4597_v29 = vsel %vm1108_vm4, %v4589_v28, %v4591_v24  ;;  %4742 = vmatprep.mubr.f32.mxu1 %v19851_v0  ;;  %v4598_v36 = vsel %vm1108_vm4, %v4591_v24, %v4593_v27 }
 0x167   : > { %4607 = vmatprep.subr.mxu0 %v4597_v29 }
 0x169   : > { %v4784_v1 = vpop.permute.xlu1 %4783  ;;  %v4587_v30 = vpop.permute.xlu0 %4586 }
 0x16a   : > { %v4596_v32 = vsel %vm1108_vm4, %v4587_v30, %v4589_v28 }
 0x16b   : > { %4608 = vmatpush1.msra.mxu0 %v4596_v32 }
 0x16c   : > { %16477 = vmatmul.mubr.msk.f32.vlgmr.msra.gmra.mrb[42].mxu0 %vm533_vm1, %v4585_v31 }
 0x16d   : > { %v4782_v33 = vpop.permute.xlu1 %4781  ;;  %v4595_v34 = vpop.permute.xlu0 %4594  ;;  %4866 = vmatprep.mubr.f32.mxu0 %v19851_v0 }
 0x16e   : > { %v4599_v4 = vsel %vm1108_vm4, %v4593_v27, %v4595_v34  ;;  %v4791_v42 = vsel %vm1304_vm5, %v4782_v33, %v4784_v1  ;;  %v5170_v27 = vld [vmem:[%s19778_s1 + $0xc0] sm:$0xff] }
 0x16f   : > { %4678 = vmatprep.subr.mxu1 %v4599_v4  ;;  %v16423_v33 = vld [vmem:[%s19787_s10 + $0x2] ss:$8 sm:$0xf] }
 0x170   : > { %4679 = vmatpush1.msra.mxu1 %v4598_v36  ;;  %v1072_v36 = vrot.slane %v16423_v33, %v17526_v53  ;;  %v1080_v48 = vrot.slane %v16423_v33, %v17534_v62 }
 0x171   : > { %v4790_v37 = vpop.permute.xlu1 %4789  ;;  %16478 = vmatmul.mubr.msk.f32.vlgmr.msra.gmra.mrb[42].mxu1 %vm533_vm1, %v4585_v31  ;;  %v4786_v38 = vpop.permute.xlu0 %4785 }
 0x172   : > { %v4792_v39 = vsel %vm1304_vm5, %v4784_v1, %v4786_v38  ;;  %4937 = vmatprep.mubr.f32.mxu1 %v19851_v0 }
 0x173   : > { %4802 = vmatprep.subr.mxu0 %v4792_v39 }
 0x174   : > { %4803 = vmatpush1.msra.mxu0 %v4791_v42 }
 0x175   : > { %v4981_v44 = vpop.permute.xlu1 %4980  ;;  %16480 = vmatmul.mubr.msk.f32.vlgmr.msra.gmra.mrb[44].mxu0 %vm533_vm1, %v4780_v40  ;;  %v4788_v45 = vpop.permute.xlu0 %4787 }
 0x176   : > { %v4794_v46 = vsel %vm1304_vm5, %v4788_v45, %v4790_v37  ;;  %v4793_v47 = vsel %vm1304_vm5, %v4786_v38, %v4788_v45  ;;  %5061 = vmatprep.mubr.f32.mxu0 %v19851_v0 }
 0x177   : > { %4873 = vmatprep.subr.mxu1 %v4794_v46 }
 0x178   : > { %4874 = vmatpush1.msra.mxu1 %v4793_v47 }
 0x179   : > { %v4983_v51 = vpop.permute.xlu1 %4982  ;;  %16481 = vmatmul.mubr.msk.f32.vlgmr.msra.gmra.mrb[44].mxu1 %vm533_vm1, %v4780_v40  ;;  %v4979_v52 = vpop.permute.xlu0 %4978  ;;  %v1076_v40 = vrot.slane %v16423_v33, %v17513_v43 }
 0x17a   : > { %v4987_v54 = vsel %vm1500_vm6, %v4979_v52, %v4981_v44  ;;  %5132 = vmatprep.mubr.f32.mxu1 %v19851_v0  ;;  %v603_v55 = vpop.f32.mrb[0].mxu0  ;;  %v4988_v18 = vsel %vm1500_vm6, %v4981_v44, %v4983_v51 }
 0x17b   : > { %4997 = vmatprep.subr.mxu0 %v4987_v54  ;;  %v605_v56 = vpop.f32.mrb[1].mxu0  ;;  %v701_v15 = vmul.f32 %v684_v63, %v603_v55 }
 0x17c   : > { %v702_v58 = vmul.f32 %v688_v50, %v605_v56  ;;  %v5365_v56 = vld [vmem:[%s19778_s1 + $0xc8] sm:$0xff] }
 0x17d   : > { %v5174_v59 = vpop.permute.xlu1 %5173  ;;  %v4977_v60 = vpop.permute.xlu0 %4976 }
 0x17e   : > { %v4986_v5 = vsel %vm1500_vm6, %v4977_v60, %v4979_v52  ;;  %v674_v6 = vpop.f32.mrb[0].mxu1  ;;  %v1084_v52 = vrot.slane %v16423_v33, %v17522_v49  ;;  %v16426_v60 = vld [vmem:[%s19787_s10 + $0x3] ss:$8 sm:$0xf] }
 0x17f   : > { %4998 = vmatpush1.msra.mxu0 %v4986_v5  ;;  %v676_v8 = vpop.f32.mrb[1].mxu1  ;;  %v703_v25 = vmul.f32 %v692_v14, %v674_v6  ;;  %v1268_v5 = vrot.slane %v16426_v60, %v17526_v53  ;;  %v1272_v7 = vrot.slane %v16426_v60, %v17513_v43 }
 0x180   : > { %16483 = vmatmul.mubr.msk.f32.vlgmr.msra.gmra.mrb[46].mxu0 %vm533_vm1, %v4975_v61  ;;  %v704_v10 = vmul.f32 %v696_v57, %v676_v8 }
 0x181   : > { %v5172_v12 = vpop.permute.xlu1 %5171  ;;  %v4985_v13 = vpop.permute.xlu0 %4984  ;;  %5256 = vmatprep.mubr.f32.mxu0 %v19851_v0 }
 0x182   : > { %v4989_v16 = vsel %vm1500_vm6, %v4983_v51, %v4985_v13  ;;  %v794_v17 = vpop.f32.mrb[2].mxu0  ;;  %v5181_v1 = vsel %vm1696_vm7, %v5172_v12, %v5174_v59  ;;  %v1276_v12 = vrot.slane %v16426_v60, %v17534_v62 }
 0x183   : > { %5068 = vmatprep.subr.mxu1 %v4989_v16  ;;  %v893_v20 = vmul.f32 %v876_v9, %v794_v17  ;;  %v796_v21 = vpop.f32.mrb[3].mxu0  ;;  %v1280_v16 = vrot.slane %v16426_v60, %v17522_v49 }
 0x184   : > { %5069 = vmatpush1.msra.mxu1 %v4988_v18  ;;  %v894_v3 = vmul.f32 %v880_v11, %v796_v21 }
 0x185   : > { %v5180_v23 = vpop.permute.xlu1 %5179  ;;  %16484 = vmatmul.mubr.msk.f32.vlgmr.msra.gmra.mrb[46].mxu1 %vm533_vm1, %v4975_v61  ;;  %v5176_v24 = vpop.permute.xlu0 %5175  ;;  %v897_v26 = vadd.f32 %v893_v20, %v701_v15 }
 0x186   : > { %v5182_v2 = vsel %vm1696_vm7, %v5174_v59, %v5176_v24  ;;  %5327 = vmatprep.mubr.f32.mxu1 %v19851_v0  ;;  %v865_v28 = vpop.f32.mrb[2].mxu1  ;;  %v898_v29 = vadd.f32 %v894_v3, %v702_v58 }
 0x187   : > { %5192 = vmatprep.subr.mxu0 %v5182_v2  ;;  %v895_v30 = vmul.f32 %v884_v19, %v865_v28  ;;  %v867_v31 = vpop.f32.mrb[3].mxu1 }
 0x188   : > { %5193 = vmatpush1.msra.mxu0 %v5181_v1  ;;  %v896_v32 = vmul.f32 %v888_v22, %v867_v31  ;;  %v16429_v1 = vld [vmem:[%s19787_s10 + $0x4] ss:$8 sm:$0xf] }
 0x189   : > { %v5371_v34 = vpop.permute.xlu1 %5370  ;;  %16486 = vmatmul.mubr.msk.f32.vlgmr.msra.gmra.mrb[48].mxu0 %vm533_vm1, %v5170_v27  ;;  %v5178_v4 = vpop.permute.xlu0 %5177  ;;  %v899_v35 = vadd.f32 %v895_v30, %v703_v25 }
 0x18a   : > { %v5184_v37 = vsel %vm1696_vm7, %v5178_v4, %v5180_v23  ;;  %v5183_v38 = vsel %vm1696_vm7, %v5176_v24, %v5178_v4  ;;  %5451 = vmatprep.mubr.f32.mxu0 %v19851_v0  ;;  %v900_v39 = vadd.f32 %v896_v32, %v704_v10  ;;  %v5560_v23 = vld [vmem:[%s19778_s1 + $0xd0] sm:$0xff]  ;;  %v1464_v32 = vrot.slane %v16429_v1, %v17526_v53 }
 0x18b   : > { %5263 = vmatprep.subr.mxu1 %v5184_v37  ;;  %v1468_v4 = vrot.slane %v16429_v1, %v17513_v43 }
 0x18c   : > { %5264 = vmatpush1.msra.mxu1 %v5183_v38  ;;  %v990_v41 = vpop.f32.mrb[4].mxu0  ;;  %v1472_v38 = vrot.slane %v16429_v1, %v17534_v62 }
 0x18d   : > { %v5373_v42 = vpop.permute.xlu1 %5372  ;;  %16487 = vmatmul.mubr.msk.f32.vlgmr.msra.gmra.mrb[48].mxu1 %vm533_vm1, %v5170_v27  ;;  %v5369_v44 = vpop.permute.xlu0 %5368  ;;  %v1089_v45 = vmul.f32 %v1072_v36, %v990_v41 }
 0x18e   : > { %v5377_v46 = vsel %vm1892_vm8, %v5369_v44, %v5371_v34  ;;  %5522 = vmatprep.mubr.f32.mxu1 %v19851_v0  ;;  %v992_v47 = vpop.f32.mrb[5].mxu0  ;;  %v5378_v15 = vsel %vm1892_vm8, %v5371_v34, %v5373_v42 }
 0x18f   : > { %5387 = vmatprep.subr.mxu0 %v5377_v46  ;;  %v1093_v50 = vadd.f32 %v1089_v45, %v897_v26  ;;  %v1090_v51 = vmul.f32 %v1076_v40, %v992_v47  ;;  %v1476_v40 = vrot.slane %v16429_v1, %v17522_v49  ;;  %v16432_v45 = vld [vmem:[%s19787_s10 + $0x5] ss:$8 sm:$0xf] }
 0x191   : > { %v5564_v54 = vpop.permute.xlu1 %5563  ;;  %v5367_v55 = vpop.permute.xlu0 %5366  ;;  %v1094_v57 = vadd.f32 %v1090_v51, %v898_v29  ;;  %v1664_v51 = vrot.slane %v16432_v45, %v17513_v43 }
 0x192   : > { %v5376_v58 = vsel %vm1892_vm8, %v5367_v55, %v5369_v44  ;;  %v1061_v59 = vpop.f32.mrb[4].mxu1 }
 0x193   : > { %5388 = vmatpush1.msra.mxu0 %v5376_v58  ;;  %v1091_v61 = vmul.f32 %v1080_v48, %v1061_v59  ;;  %v1063_v63 = vpop.f32.mrb[5].mxu1  ;;  %v1660_v48 = vrot.slane %v16432_v45, %v17526_v53  ;;  %v1672_v59 = vrot.slane %v16432_v45, %v17522_v49 }
 0x194   : > { %16489 = vmatmul.mubr.msk.f32.vlgmr.msra.gmra.mrb[50].mxu0 %vm533_vm1, %v5365_v56  ;;  %v1092_v6 = vmul.f32 %v1084_v52, %v1063_v63 }
 0x195   : > { %v5375_v8 = vpop.permute.xlu0 %5374  ;;  %5646 = vmatprep.mubr.f32.mxu0 %v19851_v0  ;;  %v1095_v9 = vadd.f32 %v1091_v61, %v899_v35  ;;  %v1186_v13 = vpop.f32.mrb[6].mxu0 }
 0x196   : > { %v5379_v10 = vsel %vm1892_vm8, %v5373_v42, %v5375_v8  ;;  %v1096_v11 = vadd.f32 %v1092_v6, %v900_v39  ;;  %v5562_v14 = vpop.permute.xlu1 %5561  ;;  %v1285_v17 = vmul.f32 %v1268_v5, %v1186_v13  ;;  %v1188_v18 = vpop.f32.mrb[7].mxu0 }
 0x197   : > { %5458 = vmatprep.subr.mxu1 %v5379_v10  ;;  %v1286_v19 = vmul.f32 %v1272_v7, %v1188_v18  ;;  %v5571_v2 = vsel %vm2088_vm9, %v5562_v14, %v5564_v54  ;;  %v16435_v10 = vld [vmem:[%s19787_s10 + $0x6] ss:$8 sm:$0xf] }
 0x198   : > { %5459 = vmatpush1.msra.mxu1 %v5378_v15  ;;  %v1289_v22 = vadd.f32 %v1285_v17, %v1093_v50  ;;  %v1860_v13 = vrot.slane %v16435_v10, %v17513_v43  ;;  %v1864_v17 = vrot.slane %v16435_v10, %v17534_v62 }
 0x199   : > { %16490 = vmatmul.mubr.msk.f32.vlgmr.msra.gmra.mrb[50].mxu1 %vm533_vm1, %v5365_v56  ;;  %v5566_v20 = vpop.permute.xlu0 %5565  ;;  %v1257_v21 = vpop.f32.mrb[6].mxu1  ;;  %v1290_v26 = vadd.f32 %v1286_v19, %v1094_v57  ;;  %v1668_v56 = vrot.slane %v16432_v45, %v17534_v62  ;;  %v1868_v19 = vrot.slane %v16435_v10, %v17522_v49 }
 0x19a   : > { %v5572_v3 = vsel %vm2088_vm9, %v5564_v54, %v5566_v20  ;;  %5717 = vmatprep.mubr.f32.mxu1 %v19851_v0  ;;  %v1287_v24 = vmul.f32 %v1276_v12, %v1257_v21  ;;  %v1259_v25 = vpop.f32.mrb[7].mxu1  ;;  %v5570_v27 = vpop.permute.xlu1 %5569  ;;  %v1856_v12 = vrot.slane %v16435_v10, %v17526_v53 }
 0x19b   : > { %5582 = vmatprep.subr.mxu0 %v5572_v3  ;;  %v1288_v28 = vmul.f32 %v1280_v16, %v1259_v25  ;;  %v16438_v3 = vld [vmem:[%s19787_s10 + $0x7] ss:$8 sm:$0xf] }
 0x19c   : > { %5583 = vmatpush1.msra.mxu0 %v5571_v2  ;;  %v1291_v29 = vadd.f32 %v1287_v24, %v1095_v9  ;;  %v2052_v25 = vrot.slane %v16438_v3, %v17526_v53  ;;  %v2056_v2 = vrot.slane %v16438_v3, %v17513_v43  ;;  %v2060_v1 = vrot.slane %v16438_v3, %v17534_v62 }
 0x19d   : > { %16492 = vmatmul.mubr.msk.f32.vlgmr.msra.gmra.mrb[52].mxu0 %vm533_vm1, %v5560_v23  ;;  %v5568_v30 = vpop.permute.xlu0 %5567  ;;  %v1292_v31 = vadd.f32 %v1288_v28, %v1096_v11 }
 0x19e   : > { %v5574_v33 = vsel %vm2088_vm9, %v5568_v30, %v5570_v27  ;;  %v5573_v34 = vsel %vm2088_vm9, %v5566_v20, %v5568_v30  ;;  %5887 = vmatprep.mubr.f32.mxu0 %v19851_v0 }
 0x19f   : > { %5653 = vmatprep.subr.mxu1 %v5574_v33 }
 0x1a0   : > { %5654 = vmatpush1.msra.mxu1 %v5573_v34  ;;  %v1382_v35 = vpop.f32.mrb[8].mxu0 }
 0x1a1   : > { %16493 = vmatmul.mubr.msk.f32.vlgmr.msra.gmra.mrb[52].mxu1 %vm533_vm1, %v5560_v23  ;;  %v1481_v36 = vmul.f32 %v1464_v32, %v1382_v35  ;;  %v1384_v37 = vpop.f32.mrb[9].mxu0  ;;  %v2064_v32 = vrot.slane %v16438_v3, %v17522_v49 }
 0x1a2   : > { %v1482_v39 = vmul.f32 %v1468_v4, %v1384_v37  ;;  %5958 = vmatprep.mubr.f32.mxu1 %v19851_v0 }
 0x1a3   : > { %v1485_v41 = vadd.f32 %v1481_v36, %v1289_v22 }
 0x1a4   : > { %v1486_v42 = vadd.f32 %v1482_v39, %v1290_v26 }
 0x1a5   : > { %v1453_v44 = vpop.f32.mrb[8].mxu1 }
 0x1a6   : > { %v1483_v46 = vmul.f32 %v1472_v38, %v1453_v44  ;;  %v1455_v47 = vpop.f32.mrb[9].mxu1 }
 0x1a7   : > { %v1484_v50 = vmul.f32 %v1476_v40, %v1455_v47  ;;  %v16441_v40 = vld [vmem:[%s19787_s10 + $0x20] ss:$8 sm:$0xf] }
 0x1a8   : > { %v1487_v52 = vadd.f32 %v1483_v46, %v1291_v29  ;;  %v2252_v44 = vrot.slane %v16441_v40, %v17513_v43 }
 0x1a9   : > { %v1488_v54 = vadd.f32 %v1484_v50, %v1292_v31  ;;  %v1578_v55 = vpop.f32.mrb[10].mxu0 }
 0x1aa   : > { %v1677_v57 = vmul.f32 %v1660_v48, %v1578_v55  ;;  %v1580_v58 = vpop.f32.mrb[11].mxu0  ;;  %v2256_v48 = vrot.slane %v16441_v40, %v17534_v62 }
 0x1ab   : > { %v1678_v60 = vmul.f32 %v1664_v51, %v1580_v58  ;;  %v2260_v51 = vrot.slane %v16441_v40, %v17522_v49 }
 0x1ac   : > { %v1681_v61 = vadd.f32 %v1677_v57, %v1485_v41 }
 0x1ad   : > { %v1649_v63 = vpop.f32.mrb[10].mxu1  ;;  %v1682_v5 = vadd.f32 %v1678_v60, %v1486_v42  ;;  %v2248_v42 = vrot.slane %v16441_v40, %v17526_v53 }
 0x1ae   : > { %v1679_v6 = vmul.f32 %v1668_v56, %v1649_v63  ;;  %v1651_v7 = vpop.f32.mrb[11].mxu1  ;;  %v16444_v56 = vld [vmem:[%s19787_s10 + $0x21] ss:$8 sm:$0xf] }
 0x1af   : > { %v1680_v8 = vmul.f32 %v1672_v59, %v1651_v7  ;;  %v2444_v59 = vrot.slane %v16444_v56, %v17526_v53  ;;  %v2452_v7 = vrot.slane %v16444_v56, %v17534_v62  ;;  %v2456_v10 = vrot.slane %v16444_v56, %v17522_v49 }
 0x1b0   : > { %v1683_v9 = vadd.f32 %v1679_v6, %v1487_v52 }
 0x1b1   : > { %v1684_v11 = vadd.f32 %v1680_v8, %v1488_v54 }
 0x1b4   : > { %v1774_v14 = vpop.f32.mrb[12].mxu0 }
 0x1b5   : > { %v1873_v15 = vmul.f32 %v1856_v12, %v1774_v14  ;;  %v1776_v16 = vpop.f32.mrb[13].mxu0 }
 0x1b6   : > { %v1874_v18 = vmul.f32 %v1860_v13, %v1776_v16 }
 0x1b7   : > { %v1877_v20 = vadd.f32 %v1873_v15, %v1681_v61  ;;  %v2448_v61 = vrot.slane %v16444_v56, %v17513_v43 }
 0x1b8   : > { %v1878_v21 = vadd.f32 %v1874_v18, %v1682_v5 }
 0x1b9   : > { %v1845_v22 = vpop.f32.mrb[12].mxu1 }
 0x1ba   : > { %v1875_v23 = vmul.f32 %v1864_v17, %v1845_v22  ;;  %v1847_v24 = vpop.f32.mrb[13].mxu1 }
 0x1bb   : > { %v1876_v26 = vmul.f32 %v1868_v19, %v1847_v24  ;;  %v16447_v19 = vld [vmem:[%s19787_s10 + $0x22] ss:$8 sm:$0xf] }
 0x1bc   : > { %v1879_v27 = vadd.f32 %v1875_v23, %v1683_v9  ;;  %v2643_v22 = vrot.slane %v16447_v19, %v17513_v43 }
 0x1bd   : > { %v1880_v28 = vadd.f32 %v1876_v26, %v1684_v11  ;;  %v1970_v29 = vpop.f32.mrb[14].mxu0 }
 0x1be   : > { %v2069_v30 = vmul.f32 %v2052_v25, %v1970_v29  ;;  %v1972_v31 = vpop.f32.mrb[15].mxu0  ;;  %v2647_v25 = vrot.slane %v16447_v19, %v17534_v62 }
 0x1bf   : > { %v2070_v33 = vmul.f32 %v2056_v2, %v1972_v31  ;;  %v2651_v2 = vrot.slane %v16447_v19, %v17522_v49 }
 0x1c0   : > { %v2073_v34 = vadd.f32 %v2069_v30, %v1877_v20 }
 0x1c1   : > { %v2041_v4 = vpop.f32.mrb[14].mxu1  ;;  %v2074_v35 = vadd.f32 %v2070_v33, %v1878_v21  ;;  %v2639_v21 = vrot.slane %v16447_v19, %v17526_v53 }
 0x1c2   : > { %v2071_v36 = vmul.f32 %v2060_v1, %v2041_v4  ;;  %v2043_v37 = vpop.f32.mrb[15].mxu1  ;;  %v16450_v1 = vld [vmem:[%s19787_s10 + $0x23] ss:$8 sm:$0xf] }
 0x1c3   : > { %v2072_v38 = vmul.f32 %v2064_v32, %v2043_v37  ;;  %v2835_v32 = vrot.slane %v16450_v1, %v17526_v53  ;;  %v2843_v37 = vrot.slane %v16450_v1, %v17534_v62  ;;  %v2847_v40 = vrot.slane %v16450_v1, %v17522_v49 }
 0x1c4   : > { %v2075_v39 = vadd.f32 %v2071_v36, %v1879_v27 }
 0x1c5   : > { %v2076_v41 = vadd.f32 %v2072_v38, %v1880_v28 }
 0x1c8   : > { %v2166_v45 = vpop.f32.mrb[16].mxu0 }
 0x1c9   : > { %v2265_v46 = vmul.f32 %v2248_v42, %v2166_v45  ;;  %v2168_v47 = vpop.f32.mrb[17].mxu0 }
 0x1ca   : > { %v2266_v50 = vmul.f32 %v2252_v44, %v2168_v47 }
 0x1cb   : > { %v2269_v52 = vadd.f32 %v2265_v46, %v2073_v34  ;;  %v2839_v34 = vrot.slane %v16450_v1, %v17513_v43 }
 0x1cc   : > { %v2270_v54 = vadd.f32 %v2266_v50, %v2074_v35 }
 0x1cd   : > { %v2237_v55 = vpop.f32.mrb[16].mxu1 }
 0x1ce   : > { %v2267_v57 = vmul.f32 %v2256_v48, %v2237_v55  ;;  %v2239_v58 = vpop.f32.mrb[17].mxu1 }
 0x1cf   : > { %v2268_v60 = vmul.f32 %v2260_v51, %v2239_v58  ;;  %v16453_v51 = vld [vmem:[%s19787_s10 + $0x24] ss:$8 sm:$0xf] }
 0x1d0   : > { %v2271_v63 = vadd.f32 %v2267_v57, %v2075_v39  ;;  %v3035_v55 = vrot.slane %v16453_v51, %v17513_v43 }
 0x1d1   : > { %v2272_v5 = vadd.f32 %v2268_v60, %v2076_v41  ;;  %v2362_v6 = vpop.f32.mrb[18].mxu0 }
 0x1d2   : > { %v2461_v8 = vmul.f32 %v2444_v59, %v2362_v6  ;;  %v2364_v9 = vpop.f32.mrb[19].mxu0  ;;  %v3039_v59 = vrot.slane %v16453_v51, %v17534_v62 }
 0x1d3   : > { %v2462_v11 = vmul.f32 %v2448_v61, %v2364_v9  ;;  %v3043_v61 = vrot.slane %v16453_v51, %v17522_v49 }
 0x1d4   : > { %v2465_v12 = vadd.f32 %v2461_v8, %v2269_v52 }
 0x1d5   : > { %v2433_v13 = vpop.f32.mrb[18].mxu1  ;;  %v2466_v14 = vadd.f32 %v2462_v11, %v2270_v54  ;;  %v3031_v54 = vrot.slane %v16453_v51, %v17526_v53 }
 0x1d6   : > { %v2463_v15 = vmul.f32 %v2452_v7, %v2433_v13  ;;  %v2435_v16 = vpop.f32.mrb[19].mxu1 }
 0x1d7   : > { %v2464_v17 = vmul.f32 %v2456_v10, %v2435_v16 }
 0x1d8   : > { %v2467_v18 = vadd.f32 %v2463_v15, %v2271_v63 }
 0x1d9   : > { %v2468_v20 = vadd.f32 %v2464_v17, %v2272_v5 }
 0x1dc   : > { %v2557_v3 = vpop.f32.mrb[20].mxu0 }
 0x1dd   : > { %v2656_v23 = vmul.f32 %v2639_v21, %v2557_v3  ;;  %v2559_v24 = vpop.f32.mrb[21].mxu0 }
 0x1de   : > { %v2657_v26 = vmul.f32 %v2643_v22, %v2559_v24 }
 0x1df   : > { %v2660_v27 = vadd.f32 %v2656_v23, %v2465_v12 }
 0x1e0   : > { %v2661_v28 = vadd.f32 %v2657_v26, %v2466_v14  ;;  %v16458_v14 = vld [vmem:[%s19787_s10 + $0x26] ss:$8 sm:$0xf] }
 0x1e1   : > { %v2628_v29 = vpop.f32.mrb[20].mxu1  ;;  %v3395_v21 = vrot.slane %v16458_v14, %v17534_v62  ;;  %v3391_v22 = vrot.slane %v16458_v14, %v17513_v43  ;;  %v3399_v23 = vrot.slane %v16458_v14, %v17522_v49 }
 0x1e2   : > { %v2658_v30 = vmul.f32 %v2647_v25, %v2628_v29  ;;  %v2630_v31 = vpop.f32.mrb[21].mxu1 }
 0x1e3   : > { %v2659_v33 = vmul.f32 %v2651_v2, %v2630_v31 }
 0x1e4   : > { %v2662_v4 = vadd.f32 %v2658_v30, %v2467_v18  ;;  %v3387_v18 = vrot.slane %v16458_v14, %v17526_v53  ;;  %v16461_v30 = vld [vmem:[%s19787_s10 + $0x27] ss:$8 sm:$0xf] }
 0x1e5   : > { %v2663_v35 = vadd.f32 %v2659_v33, %v2468_v20  ;;  %v2753_v36 = vpop.f32.mrb[22].mxu0 }
 0x1e6   : > { %v2852_v38 = vmul.f32 %v2835_v32, %v2753_v36  ;;  %v2755_v39 = vpop.f32.mrb[23].mxu0 }
 0x1e7   : > { %v2853_v41 = vmul.f32 %v2839_v34, %v2755_v39  ;;  %v3583_v34 = vrot.slane %v16461_v30, %v17526_v53  ;;  %v3591_v39 = vrot.slane %v16461_v30, %v17534_v62 }
 0x1e8   : > { %v2856_v42 = vadd.f32 %v2852_v38, %v2660_v27 }
 0x1e9   : > { %v2824_v44 = vpop.f32.mrb[22].mxu1  ;;  %v2857_v45 = vadd.f32 %v2853_v41, %v2661_v28  ;;  %v3595_v41 = vrot.slane %v16461_v30, %v17522_v49 }
 0x1ea   : > { %v2854_v46 = vmul.f32 %v2843_v37, %v2824_v44  ;;  %v2826_v47 = vpop.f32.mrb[23].mxu1 }
 0x1eb   : > { %v2855_v48 = vmul.f32 %v2847_v40, %v2826_v47 }
 0x1ec   : > { %v2858_v50 = vadd.f32 %v2854_v46, %v2662_v4  ;;  %v16464_v46 = vld [vmem:[%s19787_s10 + $0x40] ss:$8 sm:$0xf] }
 0x1ed   : > { %v2859_v52 = vadd.f32 %v2855_v48, %v2663_v35  ;;  %v3587_v35 = vrot.slane %v16461_v30, %v17513_v43 }
 0x1f0   : > { %v2949_v56 = vpop.f32.mrb[24].mxu0 }
 0x1f1   : > { %v3048_v57 = vmul.f32 %v3031_v54, %v2949_v56  ;;  %v2951_v58 = vpop.f32.mrb[25].mxu0 }
 0x1f2   : > { %v3049_v60 = vmul.f32 %v3035_v55, %v2951_v58 }
 0x1f3   : > { %v3052_v63 = vadd.f32 %v3048_v57, %v2856_v42  ;;  %v3787_v57 = vrot.slane %v16464_v46, %v17534_v62 }
 0x1f4   : > { %v3126_v5 = vpop.f32.mrb[26].mxu0  ;;  %v3053_v6 = vadd.f32 %v3049_v60, %v2857_v45  ;;  %v3791_v60 = vrot.slane %v16464_v46, %v17522_v49 }
 0x1f5   : > { %v3020_v7 = vpop.f32.mrb[24].mxu1  ;;  %v3202_v8 = vadd.f32 %v3126_v5, %v3052_v63  ;;  %v3128_v9 = vpop.f32.mrb[27].mxu0 }
 0x1f6   : > { %v3050_v10 = vmul.f32 %v3039_v59, %v3020_v7  ;;  %v3022_v11 = vpop.f32.mrb[25].mxu1  ;;  %v3203_v12 = vadd.f32 %v3128_v9, %v3053_v6 }
 0x1f7   : > { %v3051_v13 = vmul.f32 %v3043_v61, %v3022_v11  ;;  %v16467_v11 = vld [vmem:[%s19787_s10 + $0x41] ss:$8 sm:$0xf] }
 0x1f8   : > { %v3054_v15 = vadd.f32 %v3050_v10, %v2858_v50  ;;  %v3779_v50 = vrot.slane %v16464_v46, %v17526_v53  ;;  %v3979_v14 = vrot.slane %v16467_v11, %v17513_v43 }
 0x1f9   : > { %v3197_v16 = vpop.f32.mrb[26].mxu1  ;;  %v3055_v17 = vadd.f32 %v3051_v13, %v2859_v52  ;;  %v3783_v52 = vrot.slane %v16464_v46, %v17513_v43  ;;  %v3975_v13 = vrot.slane %v16467_v11, %v17526_v53 }
 0x1fa   : > { %v3204_v19 = vadd.f32 %v3197_v16, %v3054_v15  ;;  %v3199_v20 = vpop.f32.mrb[27].mxu1 }
 0x1fb   : > { %v3205_v3 = vadd.f32 %v3199_v20, %v3055_v17  ;;  %v3987_v20 = vrot.slane %v16467_v11, %v17522_v49 }
 0x1fc   : > { %v3305_v24 = vpop.f32.mrb[28].mxu0 }
 0x1fd   : > { %v3376_v25 = vpop.f32.mrb[28].mxu1  ;;  %v3404_v26 = vmul.f32 %v3387_v18, %v3305_v24  ;;  %v3307_v2 = vpop.f32.mrb[29].mxu0  ;;  %v3983_v18 = vrot.slane %v16467_v11, %v17534_v62 }
 0x1fe   : > { %v3406_v27 = vmul.f32 %v3395_v21, %v3376_v25  ;;  %v3378_v28 = vpop.f32.mrb[29].mxu1  ;;  %v3405_v29 = vmul.f32 %v3391_v22, %v3307_v2 }
 0x1ff   : > { %v3407_v1 = vmul.f32 %v3399_v23, %v3378_v28  ;;  %v3408_v31 = vadd.f32 %v3404_v26, %v3202_v8  ;;  %v16470_v23 = vld [vmem:[%s19787_s10 + $0x42] ss:$8 sm:$0xf] }
 0x200   : > { %v3410_v32 = vadd.f32 %v3406_v27, %v3204_v19  ;;  %v3409_v33 = vadd.f32 %v3405_v29, %v3203_v12  ;;  %v4170_v26 = vrot.slane %v16470_v23, %v17526_v53  ;;  %v4174_v27 = vrot.slane %v16470_v23, %v17513_v43 }
 0x201   : > { %v3411_v4 = vadd.f32 %v3407_v1, %v3205_v3  ;;  %v4178_v30 = vrot.slane %v16470_v23, %v17534_v62 }
 0x203   : > { %v3501_v36 = vpop.f32.mrb[30].mxu0 }
 0x204   : > { %v3600_v37 = vmul.f32 %v3583_v34, %v3501_v36  ;;  %v3503_v38 = vpop.f32.mrb[31].mxu0 }
 0x205   : > { %v3601_v40 = vmul.f32 %v3587_v35, %v3503_v38 }
 0x206   : > { %v3604_v42 = vadd.f32 %v3600_v37, %v3408_v31 }
 0x207   : > { %v3605_v44 = vadd.f32 %v3601_v40, %v3409_v33  ;;  %v4182_v33 = vrot.slane %v16470_v23, %v17522_v49 }
 0x208   : > { %v3572_v45 = vpop.f32.mrb[30].mxu1 }
 0x209   : > { %v3602_v47 = vmul.f32 %v3591_v39, %v3572_v45  ;;  %v3574_v48 = vpop.f32.mrb[31].mxu1 }
 0x20a   : > { %v3603_v51 = vmul.f32 %v3595_v41, %v3574_v48  ;;  %v16473_v41 = vld [vmem:[%s19787_s10 + $0x43] ss:$8 sm:$0xf] }
 0x20b   : > { %v3606_v54 = vadd.f32 %v3602_v47, %v3410_v32  ;;  %v4369_v45 = vrot.slane %v16473_v41, %v17513_v43 }
 0x20c   : > { %v3607_v55 = vadd.f32 %v3603_v51, %v3411_v4  ;;  %v3697_v56 = vpop.f32.mrb[32].mxu0 }
 0x20d   : > { %v3796_v58 = vmul.f32 %v3779_v50, %v3697_v56  ;;  %v3699_v59 = vpop.f32.mrb[33].mxu0  ;;  %v4373_v50 = vrot.slane %v16473_v41, %v17534_v62 }
 0x20e   : > { %v3797_v61 = vmul.f32 %v3783_v52, %v3699_v59  ;;  %v4377_v52 = vrot.slane %v16473_v41, %v17522_v49 }
 0x20f   : > { %v3800_v63 = vadd.f32 %v3796_v58, %v3604_v42 }
 0x210   : > { %v3768_v5 = vpop.f32.mrb[32].mxu1  ;;  %v3801_v6 = vadd.f32 %v3797_v61, %v3605_v44  ;;  %v4365_v44 = vrot.slane %v16473_v41, %v17526_v53 }
 0x211   : > { %v3798_v7 = vmul.f32 %v3787_v57, %v3768_v5  ;;  %v3770_v8 = vpop.f32.mrb[33].mxu1 }
 0x212   : > { %v3799_v9 = vmul.f32 %v3791_v60, %v3770_v8 }
 0x213   : > { %v3802_v10 = vadd.f32 %v3798_v7, %v3606_v54 }
 0x214   : > { %v3803_v12 = vadd.f32 %v3799_v9, %v3607_v55  ;;  %v16476_v55 = vld [vmem:[%s19787_s10 + $0x44] ss:$8 sm:$0xf] }
 0x215   : > { %v4560_v60 = vrot.slane %v16476_v55, %v17526_v53 }
 0x217   : > { %v3893_v15 = vpop.f32.mrb[34].mxu0 }
 0x218   : > { %v3992_v16 = vmul.f32 %v3975_v13, %v3893_v15  ;;  %v3895_v17 = vpop.f32.mrb[35].mxu0 }
 0x219   : > { %v3993_v19 = vmul.f32 %v3979_v14, %v3895_v17 }
 0x21a   : > { %v3996_v21 = vadd.f32 %v3992_v16, %v3800_v63  ;;  %v4564_v63 = vrot.slane %v16476_v55, %v17513_v43 }
 0x21b   : > { %v3997_v22 = vadd.f32 %v3993_v19, %v3801_v6 }
 0x21c   : > { %v3964_v3 = vpop.f32.mrb[34].mxu1 }
 0x21d   : > { %v3994_v24 = vmul.f32 %v3983_v18, %v3964_v3  ;;  %v3966_v25 = vpop.f32.mrb[35].mxu1  ;;  %v16479_v18 = vld [vmem:[%s19787_s10 + $0x45] ss:$8 sm:$0xf] }
 0x21e   : > { %v3995_v2 = vmul.f32 %v3987_v20, %v3966_v25  ;;  %v4759_v3 = vrot.slane %v16479_v18, %v17513_v43 }
 0x21f   : > { %v3998_v28 = vadd.f32 %v3994_v24, %v3802_v10  ;;  %v4568_v10 = vrot.slane %v16476_v55, %v17534_v62 }
 0x220   : > { %v3999_v29 = vadd.f32 %v3995_v2, %v3803_v12  ;;  %v4088_v1 = vpop.f32.mrb[36].mxu0  ;;  %v4572_v12 = vrot.slane %v16476_v55, %v17522_v49  ;;  %v4763_v2 = vrot.slane %v16479_v18, %v17534_v62 }
 0x221   : > { %v4187_v31 = vmul.f32 %v4170_v26, %v4088_v1  ;;  %v4090_v32 = vpop.f32.mrb[37].mxu0 }
 0x222   : > { %v4188_v34 = vmul.f32 %v4174_v27, %v4090_v32 }
 0x223   : > { %v4191_v4 = vadd.f32 %v4187_v31, %v3996_v21 }
 0x224   : > { %v4159_v35 = vpop.f32.mrb[36].mxu1  ;;  %v4192_v36 = vadd.f32 %v4188_v34, %v3997_v22  ;;  %v4755_v22 = vrot.slane %v16479_v18, %v17526_v53 }
 0x225   : > { %v4189_v37 = vmul.f32 %v4178_v30, %v4159_v35  ;;  %v4161_v38 = vpop.f32.mrb[37].mxu1 }
 0x226   : > { %v4190_v39 = vmul.f32 %v4182_v33, %v4161_v38 }
 0x227   : > { %v4193_v40 = vadd.f32 %v4189_v37, %v3998_v28  ;;  %v4767_v28 = vrot.slane %v16479_v18, %v17522_v49 }
 0x228   : > { %v4194_v42 = vadd.f32 %v4190_v39, %v3999_v29  ;;  %v16482_v29 = vld [vmem:[%s19787_s10 + $0x46] ss:$8 sm:$0xf] }
 0x229   : > { %v4950_v33 = vrot.slane %v16482_v29, %v17526_v53 }
 0x22b   : > { %v4283_v46 = vpop.f32.mrb[38].mxu0 }
 0x22c   : > { %v4382_v47 = vmul.f32 %v4365_v44, %v4283_v46  ;;  %v4285_v48 = vpop.f32.mrb[39].mxu0 }
 0x22d   : > { %v4383_v51 = vmul.f32 %v4369_v45, %v4285_v48 }
 0x22e   : > { %v4386_v54 = vadd.f32 %v4382_v47, %v4191_v4  ;;  %v4954_v4 = vrot.slane %v16482_v29, %v17513_v43 }
 0x22f   : > { %v4387_v56 = vadd.f32 %v4383_v51, %v4192_v36 }
 0x230   : > { %v4354_v57 = vpop.f32.mrb[38].mxu1 }
 0x231   : > { %v4384_v58 = vmul.f32 %v4373_v50, %v4354_v57  ;;  %v4356_v59 = vpop.f32.mrb[39].mxu1  ;;  %v16485_v50 = vld [vmem:[%s19787_s10 + $0x47] ss:$8 sm:$0xf] }
 0x232   : > { %v4385_v61 = vmul.f32 %v4377_v52, %v4356_v59  ;;  %v5145_v55 = vrot.slane %v16485_v50, %v17526_v53 }
 0x233   : > { %v4388_v5 = vadd.f32 %v4384_v58, %v4193_v40  ;;  %v4958_v40 = vrot.slane %v16482_v29, %v17534_v62 }
 0x234   : > { %v4389_v6 = vadd.f32 %v4385_v61, %v4194_v42  ;;  %v4478_v7 = vpop.f32.mrb[40].mxu0  ;;  %v4962_v42 = vrot.slane %v16482_v29, %v17522_v49  ;;  %v5153_v61 = vrot.slane %v16485_v50, %v17534_v62 }
 0x235   : > { %v4577_v8 = vmul.f32 %v4560_v60, %v4478_v7  ;;  %v4480_v9 = vpop.f32.mrb[41].mxu0 }
 0x236   : > { %v4578_v11 = vmul.f32 %v4564_v63, %v4480_v9 }
 0x237   : > { %v4581_v13 = vadd.f32 %v4577_v8, %v4386_v54 }
 0x238   : > { %v4582_v14 = vadd.f32 %v4578_v11, %v4387_v56  ;;  %v4549_v15 = vpop.f32.mrb[40].mxu1  ;;  %v5149_v56 = vrot.slane %v16485_v50, %v17513_v43 }
 0x239   : > { %v4579_v16 = vmul.f32 %v4568_v10, %v4549_v15  ;;  %v4551_v17 = vpop.f32.mrb[41].mxu1 }
 0x23a   : > { %v4580_v19 = vmul.f32 %v4572_v12, %v4551_v17 }
 0x23b   : > { %v4583_v20 = vadd.f32 %v4579_v16, %v4388_v5  ;;  %v5157_v5 = vrot.slane %v16485_v50, %v17522_v49 }
 0x23c   : > { %v4584_v21 = vadd.f32 %v4580_v19, %v4389_v6  ;;  %v16488_v6 = vld [vmem:[%s19787_s10 + $0x60] ss:$8 sm:$0xf] }
 0x23d   : > { %v5340_v11 = vrot.slane %v16488_v6, %v17526_v53  ;;  %v5348_v19 = vrot.slane %v16488_v6, %v17534_v62 }
 0x23f   : > { %v4673_v23 = vpop.f32.mrb[42].mxu0 }
 0x240   : > { %v4772_v24 = vmul.f32 %v4755_v22, %v4673_v23  ;;  %v4675_v25 = vpop.f32.mrb[43].mxu0 }
 0x241   : > { %v4773_v26 = vmul.f32 %v4759_v3, %v4675_v25 }
 0x242   : > { %v4776_v27 = vadd.f32 %v4772_v24, %v4581_v13  ;;  %v5344_v13 = vrot.slane %v16488_v6, %v17513_v43 }
 0x243   : > { %v4777_v1 = vadd.f32 %v4773_v26, %v4582_v14  ;;  %v16491_v26 = vld [vmem:[%s19787_s10 + $0x61] ss:$8 sm:$0xf] }
 0x244   : > { %v4744_v30 = vpop.f32.mrb[42].mxu1  ;;  %v5535_v29 = vrot.slane %v16491_v26, %v17526_v53 }
 0x245   : > { %v4774_v31 = vmul.f32 %v4763_v2, %v4744_v30  ;;  %v4746_v32 = vpop.f32.mrb[43].mxu1 }
 0x246   : > { %v4775_v34 = vmul.f32 %v4767_v28, %v4746_v32 }
 0x247   : > { %v4778_v35 = vadd.f32 %v4774_v31, %v4583_v20 }
 0x248   : > { %v4779_v36 = vadd.f32 %v4775_v34, %v4584_v21  ;;  %v4868_v37 = vpop.f32.mrb[44].mxu0  ;;  %v5352_v21 = vrot.slane %v16488_v6, %v17522_v49  ;;  %v5543_v34 = vrot.slane %v16491_v26, %v17534_v62 }
 0x249   : > { %v4967_v38 = vmul.f32 %v4950_v33, %v4868_v37  ;;  %v4870_v39 = vpop.f32.mrb[45].mxu0 }
 0x24a   : > { %v4968_v41 = vmul.f32 %v4954_v4, %v4870_v39 }
 0x24b   : > { %v4971_v44 = vadd.f32 %v4967_v38, %v4776_v27 }
 0x24c   : > { %v4972_v45 = vadd.f32 %v4968_v41, %v4777_v1  ;;  %v4939_v46 = vpop.f32.mrb[44].mxu1  ;;  %v5539_v1 = vrot.slane %v16491_v26, %v17513_v43 }
 0x24d   : > { %v4969_v47 = vmul.f32 %v4958_v40, %v4939_v46  ;;  %v4941_v48 = vpop.f32.mrb[45].mxu1 }
 0x24e   : > { %v4970_v51 = vmul.f32 %v4962_v42, %v4941_v48 }
 0x24f   : > { %v4973_v52 = vadd.f32 %v4969_v47, %v4778_v35  ;;  %v5547_v35 = vrot.slane %v16491_v26, %v17522_v49 }
 0x250   : > { %v4974_v54 = vadd.f32 %v4970_v51, %v4779_v36  ;;  %v16494_v36 = vld [vmem:[%s19787_s10 + $0x62] ss:$8 sm:$0xf] }
 0x251   : > { %v5730_v41 = vrot.slane %v16494_v36, %v17526_v53  ;;  %v5738_v51 = vrot.slane %v16494_v36, %v17534_v62 }
 0x253   : > { %v5063_v57 = vpop.f32.mrb[46].mxu0 }
 0x254   : > { %v5162_v58 = vmul.f32 %v5145_v55, %v5063_v57  ;;  %v5065_v59 = vpop.f32.mrb[47].mxu0  ;;  %v5742_v55 = vrot.slane %v16494_v36, %v17522_v49 }
 0x255   : > { %v5163_v60 = vmul.f32 %v5149_v56, %v5065_v59  ;;  %v5769_v59 = vpop.permute.xlu1 %5768 }
 0x256   : > { %v5166_v63 = vadd.f32 %v5162_v58, %v4971_v44  ;;  %v5734_v44 = vrot.slane %v16494_v36, %v17513_v43 }
 0x257   : > { %v5167_v7 = vadd.f32 %v5163_v60, %v4972_v45 }
 0x258   : > { %v5134_v8 = vpop.f32.mrb[46].mxu1 }
 0x259   : > { %v5164_v9 = vmul.f32 %v5153_v61, %v5134_v8  ;;  %v5136_v10 = vpop.f32.mrb[47].mxu1 }
 0x25a   : > { %v5165_v12 = vmul.f32 %v5157_v5, %v5136_v10 }
 0x25b   : > { %v5168_v14 = vadd.f32 %v5164_v9, %v4973_v52 }
 0x25c   : > { %v5169_v15 = vadd.f32 %v5165_v12, %v4974_v54  ;;  %v5258_v16 = vpop.f32.mrb[48].mxu0  ;;  %v5759_v54 = vpop.permute.xlu0 %5758 }
 0x25d   : > { %v5357_v17 = vmul.f32 %v5340_v11, %v5258_v16  ;;  %v5260_v18 = vpop.f32.mrb[49].mxu0 }
 0x25e   : > { %v5358_v20 = vmul.f32 %v5344_v13, %v5260_v18 }
 0x25f   : > { %v5361_v22 = vadd.f32 %v5357_v17, %v5166_v63 }
 0x260   : > { %v5362_v3 = vadd.f32 %v5358_v20, %v5167_v7  ;;  %v5329_v23 = vpop.f32.mrb[48].mxu1  ;;  %v17827_v18 = vpop.permute.xlu0 %5992 }
 0x261   : > { %v5359_v24 = vmul.f32 %v5348_v19, %v5329_v23  ;;  %v5331_v25 = vpop.f32.mrb[49].mxu1 }
 0x262   : > { %v5360_v2 = vmul.f32 %v5352_v21, %v5331_v25 }
 0x263   : > { %v5363_v27 = vadd.f32 %v5359_v24, %v5168_v14 }
 0x264   : > { %v5364_v28 = vadd.f32 %v5360_v2, %v5169_v15  ;;  %v17811_v15 = vpop.permute.xlu1 %5802 }
 0x267   : > { %v5453_v30 = vpop.f32.mrb[50].mxu0 }
 0x268   : > { %v5552_v31 = vmul.f32 %v5535_v29, %v5453_v30  ;;  %v5455_v32 = vpop.f32.mrb[51].mxu0  ;;  %v17821_v16 = vpop.permute.xlu1 %6186 }
 0x269   : > { %v5553_v33 = vmul.f32 %v5539_v1, %v5455_v32 }
 0x26a   : > { %v5556_v4 = vadd.f32 %v5552_v31, %v5361_v22  ;;  %v17835_v22 = vpop.permute.xlu0 %6380 }
 0x26b   : > { %v5557_v37 = vadd.f32 %v5553_v33, %v5362_v3 }
 0x26c   : > { %v5524_v38 = vpop.f32.mrb[50].mxu1  ;;  %v17829_v19 = vpop.permute.xlu1 %6574 }
 0x26d   : > { %v5554_v39 = vmul.f32 %v5543_v34, %v5524_v38  ;;  %v5526_v40 = vpop.f32.mrb[51].mxu1 }
 0x26e   : > { %v5555_v42 = vmul.f32 %v5547_v35, %v5526_v40  ;;  %v17849_v2 = vpop.permute.xlu0 %6768 }
 0x26f   : > { %v5558_v45 = vadd.f32 %v5554_v39, %v5363_v27 }
 0x270   : > { %v5559_v46 = vadd.f32 %v5555_v42, %v5364_v28  ;;  %v5648_v47 = vpop.f32.mrb[52].mxu0  ;;  %v17841_v24 = vpop.permute.xlu1 %6962 }
 0x271   : > { %v5747_v48 = vmul.f32 %v5730_v41, %v5648_v47  ;;  %v5650_v50 = vpop.f32.mrb[53].mxu0 }
 0x272   : > { %v5748_v52 = vmul.f32 %v5734_v44, %v5650_v50  ;;  %v17859_v29 = vpop.permute.xlu0 %7156 }
 0x273   : > { %v5751_v56 = vadd.f32 %v5747_v48, %v5556_v4 }
 0x274   : > { %v5752_v57 = vadd.f32 %v5748_v52, %v5557_v37  ;;  %v5719_v58 = vpop.f32.mrb[52].mxu1  ;;  %v17851_v27 = vpop.permute.xlu1 %7350 }
 0x275   : > { %v5749_v60 = vmul.f32 %v5738_v51, %v5719_v58  ;;  %v5761_v61 = vmul.f32 %v5759_v54, %v5751_v56  ;;  %v5721_v63 = vpop.f32.mrb[53].mxu1 }
 0x276   : > { %v5750_v5 = vmul.f32 %v5742_v55, %v5721_v63  ;;  %v5762_v20 = vmul.f32 %v5759_v54, %v5752_v57  ;;  %v17871_v30 = vpop.permute.xlu0 %7544 }
 0x277   : > { %v5753_v6 = vadd.f32 %v5749_v60, %v5558_v45  ;;  %v5771_v7 = vadd.f32 %v5769_v59, %v5761_v61 }
 0x278   : > { %v5754_v8 = vadd.f32 %v5750_v5, %v5559_v46  ;;  %v5772_v3 = vadd.f32 %v5769_v59, %v5762_v20  ;;  %v17865_v1 = vpop.permute.xlu1 %7738 }
 0x279   : > { %v5763_v9 = vmul.f32 %v5759_v54, %v5753_v6  ;;  %vm5775_vm14 = vcmp.gt.f32.partialorder %v5771_v7, 0.0  ;;  %v5779_v10 = vmul.f32 0.1, %v5771_v7 }
 0x27a   : > { %v5764_v17 = vmul.f32 %v5759_v54, %v5754_v8  ;;  %v5780_v25 = vmul.f32 0.1, %v5772_v3  ;;  %v17879_v32 = vpop.permute.xlu0 %7932 }
 0x27b   : > { %v5773_v11 = vadd.f32 %v5769_v59, %v5763_v9  ;;  %v17753_v12 = vsel %vm5775_vm14, %v5771_v7, %v5779_v10 }
 0x27c   : > { %5804 = vrot.lane.b32.xlu1 %v17753_v12, %s19896_s18  ;;  %v5774_v21 = vadd.f32 %v5769_v59, %v5764_v17  ;;  %v17873_v31 = vpop.permute.xlu1 %8126 }
 0x27d   : > { %vm5777_vm15 = vcmp.gt.f32.partialorder %v5773_v11, 0.0  ;;  %v5781_v13 = vmul.f32 0.1, %v5773_v11 }
 0x27e   : > { %v5782_v23 = vmul.f32 0.1, %v5774_v21  ;;  %vm5778_vm14 = vcmp.gt.f32.partialorder %v5774_v21, 0.0  ;;  %v17891_v34 = vpop.permute.xlu0 %8488 }
 0x27f   : > { %v17757_v14 = vsel %vm5777_vm15, %v5773_v11, %v5781_v13  ;;  %vm5776_vm15 = vcmp.gt.f32.partialorder %v5772_v3, 0.0 }
 0x280   : > { %5808 = vrot.lane.b32.xlu0 %v17757_v14, %s19896_s18  ;;  %5998 = vrot.lane.b32.xlu1 %v17757_v14, %s19886_s16  ;;  %v17843_v26 = vsel %vm5778_vm14, %v5774_v21, %v5782_v23  ;;  %v17853_v28 = vsel %vm5776_vm15, %v5772_v3, %v5780_v25  ;;  %v17885_v33 = vpop.permute.xlu1 %8682  ;;  %vm19914_vm14 = vcmask 990208  }
 0x281   : > { %vm19915_vm15 = vmmov %vm19914_vm14 }
 0x282   : > { %v17899_v35 = vpop.permute.xlu0 %8876 }
 0x284   : > { %5994 = vrot.lane.b32.xlu0 %v17753_v12, %s19886_s16  ;;  %6188 = vrot.lane.b32.xlu1 %v17753_v12, %s19887_s17  ;;  %v17893_v4 = vpop.permute.xlu1 %9070 }
 0x286   : > { %v17911_v37 = vpop.permute.xlu0 %9264 }
 0x288   : > { %6192 = vrot.lane.b32.xlu0 %v17757_v14, %s19887_s17  ;;  %6386 = vrot.lane.b32.xlu1 %v17757_v14, %s19888_s23  ;;  %v17905_v36 = vpop.permute.xlu1 %9458 }
 0x289   : > { %19909 = vst [vmem:[#allocation20_spill] sm:$0xff] %v17905_v36 }
 0x28c   : > { %6382 = vrot.lane.b32.xlu0 %v17753_v12, %s19888_s23  ;;  %6576 = vrot.lane.b32.xlu1 %v17753_v12, %s19889_s0 }
 0x290   : > { %6580 = vrot.lane.b32.xlu0 %v17757_v14, %s19889_s0  ;;  %6774 = vrot.lane.b32.xlu1 %v17757_v14, %s19890_s30 }
 0x294   : > { %6770 = vrot.lane.b32.xlu0 %v17753_v12, %s19890_s30  ;;  %6964 = vrot.lane.b32.xlu1 %v17753_v12, %s19891_s20 }
 0x298   : > { %6968 = vrot.lane.b32.xlu0 %v17757_v14, %s19891_s20  ;;  %7162 = vrot.lane.b32.xlu1 %v17757_v14, %s19892_s27 }
 0x29c   : > { %7158 = vrot.lane.b32.xlu0 %v17753_v12, %s19892_s27  ;;  %7352 = vrot.lane.b32.xlu1 %v17753_v12, %s19893_s29 }
 0x2a0   : > { %7356 = vrot.lane.b32.xlu0 %v17757_v14, %s19893_s29  ;;  %7550 = vrot.lane.b32.xlu1 %v17757_v14, %s19897_s25 }
 0x2a4   : > { %7546 = vrot.lane.b32.xlu0 %v17753_v12, %s19897_s25  ;;  %7740 = vrot.lane.b32.xlu1 %v17753_v12, %s19898_s15 }
 0x2a8   : > { %7744 = vrot.lane.b32.xlu0 %v17757_v14, %s19898_s15  ;;  %7938 = vrot.lane.b32.xlu1 %v17757_v14, %s19899_s21 }
 0x2ac   : > { %7934 = vrot.lane.b32.xlu0 %v17753_v12, %s19899_s21  ;;  %8128 = vrot.lane.b32.xlu1 %v17753_v12, %s19900_s2 }
 0x2b0   : > { %8132 = vrot.lane.b32.xlu0 %v17757_v14, %s19900_s2  ;;  %8484 = vrot.lane.b32.xlu1 %v17757_v14, %s19901_s3 }
 0x2b4   : > { %8480 = vrot.lane.b32.xlu0 %v17753_v12, %s19901_s3  ;;  %8674 = vrot.lane.b32.xlu1 %v17753_v12, %s19902_s28 }
 0x2b8   : > { %8678 = vrot.lane.b32.xlu0 %v17757_v14, %s19902_s28  ;;  %8872 = vrot.lane.b32.xlu1 %v17757_v14, %s19903_s24 }
 0x2bc   : > { %8868 = vrot.lane.b32.xlu0 %v17753_v12, %s19903_s24  ;;  %9062 = vrot.lane.b32.xlu1 %v17753_v12, %s19904_s26 }
 0x2c0   : > { %9066 = vrot.lane.b32.xlu0 %v17757_v14, %s19904_s26  ;;  %9260 = vrot.lane.b32.xlu1 %v17757_v14, %s19896_s18 }
 0x2c4   : > { %9256 = vrot.lane.b32.xlu0 %v17753_v12, %s19896_s18  ;;  %9450 = vrot.lane.b32.xlu1 %v17753_v12, %s19886_s16 }
 0x2c8   : > { %9454 = vrot.lane.b32.xlu0 %v17757_v14, %s19886_s16  ;;  %5810 = vrot.lane.b32.xlu1 %v17843_v26, %s19896_s18 }
 0x2cc   : > { %5806 = vrot.lane.b32.xlu0 %v17853_v28, %s19896_s18  ;;  %5996 = vrot.lane.b32.xlu1 %v17853_v28, %s19886_s16 }
 0x2d0   : > { %6000 = vrot.lane.b32.xlu0 %v17843_v26, %s19886_s16  ;;  %6194 = vrot.lane.b32.xlu1 %v17843_v26, %s19887_s17 }
 0x2d4   : > { %6190 = vrot.lane.b32.xlu0 %v17853_v28, %s19887_s17  ;;  %6384 = vrot.lane.b32.xlu1 %v17853_v28, %s19888_s23 }
 0x2d8   : > { %6388 = vrot.lane.b32.xlu0 %v17843_v26, %s19888_s23  ;;  %6582 = vrot.lane.b32.xlu1 %v17843_v26, %s19889_s0 }
 0x2dc   : > { %6578 = vrot.lane.b32.xlu0 %v17853_v28, %s19889_s0  ;;  %6772 = vrot.lane.b32.xlu1 %v17853_v28, %s19890_s30 }
 0x2e0   : > { %6776 = vrot.lane.b32.xlu0 %v17843_v26, %s19890_s30  ;;  %6970 = vrot.lane.b32.xlu1 %v17843_v26, %s19891_s20 }
 0x2e4   : > { %6966 = vrot.lane.b32.xlu0 %v17853_v28, %s19891_s20  ;;  %7160 = vrot.lane.b32.xlu1 %v17853_v28, %s19892_s27 }
 0x2e8   : > { %7164 = vrot.lane.b32.xlu0 %v17843_v26, %s19892_s27  ;;  %7358 = vrot.lane.b32.xlu1 %v17843_v26, %s19893_s29 }
 0x2ec   : > { %7354 = vrot.lane.b32.xlu0 %v17853_v28, %s19893_s29  ;;  %7548 = vrot.lane.b32.xlu1 %v17853_v28, %s19897_s25 }
 0x2ee   : > { %v17913_v38 = vpop.permute.xlu1 %5804 }
 0x2f0   : > { %7552 = vrot.lane.b32.xlu0 %v17843_v26, %s19897_s25  ;;  %7746 = vrot.lane.b32.xlu1 %v17843_v26, %s19898_s15 }
 0x2f2   : > { %v17919_v39 = vpop.permute.xlu1 %5998  ;;  %v17921_v40 = vpop.permute.xlu0 %5808 }
 0x2f4   : > { %7742 = vrot.lane.b32.xlu0 %v17853_v28, %s19898_s15  ;;  %7936 = vrot.lane.b32.xlu1 %v17853_v28, %s19899_s21 }
 0x2f6   : > { %v17927_v41 = vpop.permute.xlu1 %6188  ;;  %v17929_v42 = vpop.permute.xlu0 %5994 }
 0x2f8   : > { %7940 = vrot.lane.b32.xlu0 %v17843_v26, %s19899_s21  ;;  %8134 = vrot.lane.b32.xlu1 %v17843_v26, %s19900_s2 }
 0x2fa   : > { %v17935_v44 = vpop.permute.xlu1 %6386  ;;  %v17937_v45 = vpop.permute.xlu0 %6192 }
 0x2fc   : > { %8130 = vrot.lane.b32.xlu0 %v17853_v28, %s19900_s2  ;;  %8486 = vrot.lane.b32.xlu1 %v17843_v26, %s19901_s3 }
 0x2fe   : > { %v17943_v46 = vpop.permute.xlu1 %6576  ;;  %v17945_v47 = vpop.permute.xlu0 %6382 }
 0x300   : > { %8482 = vrot.lane.b32.xlu0 %v17853_v28, %s19901_s3  ;;  %8676 = vrot.lane.b32.xlu1 %v17853_v28, %s19902_s28 }
 0x302   : > { %v17951_v48 = vpop.permute.xlu1 %6774  ;;  %v17953_v50 = vpop.permute.xlu0 %6580 }
 0x304   : > { %8680 = vrot.lane.b32.xlu0 %v17843_v26, %s19902_s28  ;;  %8874 = vrot.lane.b32.xlu1 %v17843_v26, %s19903_s24 }
 0x306   : > { %v17959_v51 = vpop.permute.xlu1 %6964  ;;  %v17961_v52 = vpop.permute.xlu0 %6770 }
 0x308   : > { %8870 = vrot.lane.b32.xlu0 %v17853_v28, %s19903_s24  ;;  %9064 = vrot.lane.b32.xlu1 %v17853_v28, %s19904_s26 }
 0x30a   : > { %v17967_v54 = vpop.permute.xlu1 %7162  ;;  %v17969_v55 = vpop.permute.xlu0 %6968 }
 0x30c   : > { %9068 = vrot.lane.b32.xlu0 %v17843_v26, %s19904_s26  ;;  %9262 = vrot.lane.b32.xlu1 %v17843_v26, %s19896_s18 }
 0x30e   : > { %v17975_v56 = vpop.permute.xlu1 %7352  ;;  %v17977_v57 = vpop.permute.xlu0 %7158 }
 0x310   : > { %9258 = vrot.lane.b32.xlu0 %v17853_v28, %s19896_s18  ;;  %9452 = vrot.lane.b32.xlu1 %v17853_v28, %s19886_s16 }
 0x312   : > { %v17983_v58 = vpop.permute.xlu1 %7550  ;;  %v17985_v59 = vpop.permute.xlu0 %7356 }
 0x314   : > { %9456 = vrot.lane.b32.xlu0 %v17843_v26, %s19886_s16  ;;  %9648 = vrot.lane.b32.xlu1 %v17757_v14, %s19887_s17 }
 0x316   : > { %v17991_v60 = vpop.permute.xlu1 %7740  ;;  %v17993_v61 = vpop.permute.xlu0 %7546 }
 0x318   : > { %9646 = vrot.lane.b32.xlu0 %v17853_v28, %s19887_s17  ;;  %9650 = vrot.lane.b32.xlu1 %v17843_v26, %s19887_s17 }
 0x31a   : > { %v17999_v63 = vpop.permute.xlu1 %7938  ;;  %v18001_v5 = vpop.permute.xlu0 %7744 }
 0x31c   : > { %9644 = vrot.lane.b32.xlu0 %v17753_v12, %s19887_s17  ;;  %9840 = vrot.lane.b32.xlu1 %v17853_v28, %s19888_s23 }
 0x31e   : > { %v18007_v6 = vpop.permute.xlu1 %8128  ;;  %v18009_v7 = vpop.permute.xlu0 %7934 }
 0x320   : > { %9838 = vrot.lane.b32.xlu1 %v17753_v12, %s19888_s23  ;;  %9652 = vrot.lane.b32.xlu0 %v19851_v0, %s19887_s17 }
 0x322   : > { %v18015_v8 = vpop.permute.xlu1 %8484  ;;  %v18017_v9 = vpop.permute.xlu0 %8132 }
 0x324   : > { %9846 = vrot.lane.b32.xlu1 %v19851_v0, %s19888_s23  ;;  %9842 = vrot.lane.b32.xlu0 %v17757_v14, %s19888_s23 }
 0x326   : > { %v18023_v10 = vpop.permute.xlu1 %8674  ;;  %v18025_v11 = vpop.permute.xlu0 %8480 }
 0x328   : > { %10036 = vrot.lane.b32.xlu1 %v17757_v14, %s19889_s0  ;;  %9844 = vrot.lane.b32.xlu0 %v17843_v26, %s19888_s23 }
 0x32a   : > { %v18031_v13 = vpop.permute.xlu1 %8872  ;;  %v18033_v17 = vpop.permute.xlu0 %8678 }
 0x32c   : > { %10038 = vrot.lane.b32.xlu1 %v17843_v26, %s19889_s0  ;;  %10034 = vrot.lane.b32.xlu0 %v17853_v28, %s19889_s0 }
 0x32e   : > { %v18039_v20 = vpop.permute.xlu1 %9062  ;;  %v18041_v21 = vpop.permute.xlu0 %8868 }
 0x330   : > { %10228 = vrot.lane.b32.xlu1 %v17853_v28, %s19890_s30  ;;  %10032 = vrot.lane.b32.xlu0 %v17753_v12, %s19889_s0 }
 0x332   : > { %v18047_v3 = vpop.permute.xlu1 %9260  ;;  %v18049_v23 = vpop.permute.xlu0 %9066 }
 0x334   : > { %10226 = vrot.lane.b32.xlu1 %v17753_v12, %s19890_s30  ;;  %10040 = vrot.lane.b32.xlu0 %v19851_v0, %s19889_s0 }
 0x336   : > { %v18055_v25 = vpop.permute.xlu1 %9450  ;;  %v18057_v62 = vpop.permute.xlu0 %9256 }
 0x337   : > { %19910 = vst [vmem:[#allocation21_spill] sm:$0xff] %v18055_v25  ;;  %19911 = vst [vmem:[#allocation22_spill] sm:$0xff] %v18057_v62 }
 0x338   : > { %10234 = vrot.lane.b32.xlu1 %v19851_v0, %s19890_s30  ;;  %10230 = vrot.lane.b32.xlu0 %v17757_v14, %s19890_s30 }
 0x33a   : > { %v5811_v53 = vpop.permute.xlu1 %5810  ;;  %v18063_v43 = vpop.permute.xlu0 %9454 }
 0x33b   : > { %19912 = vst [vmem:[#allocation23_spill] sm:$0xff] %v18063_v43  ;;  %v5815_v49 = vsel %vm524_vm0, %v17921_v40, %v5811_v53  ;;  %v5791_v43 = vld [vmem:[%s19781_s4] sm:$0xff] }
 0x33c   : > { %10424 = vrot.lane.b32.xlu1 %v17757_v14, %s19891_s20  ;;  %10232 = vrot.lane.b32.xlu0 %v17843_v26, %s19890_s30 }
 0x33d   : > { %5894 = vmatprep.subr.mxu1 %v5815_v49  ;;  %v5812_v49 = vsel %vm524_vm0, %v17811_v15, %v17913_v38  ;;  %v5991_v15 = vld [vmem:[%s19781_s4 + $0x8] sm:$0xff] }
 0x33e   : > { %v5997_v25 = vpop.permute.xlu1 %5996  ;;  %v5807_v36 = vpop.permute.xlu0 %5806 }
 0x33f   : > { %v5813_v0 = vsel %vm524_vm0, %v17913_v38, %v5807_v36  ;;  %v5814_v62 = vsel %vm524_vm0, %v5807_v36, %v17921_v40  ;;  %v6003_v36 = vsel %vm716_vm2, %v17929_v42, %v5997_v25  ;;  %v19913_v38 = vmov 0.0  }
 0x340   : > { %10426 = vrot.lane.b32.xlu1 %v17843_v26, %s19891_s20  ;;  %10422 = vrot.lane.b32.xlu0 %v17853_v28, %s19891_s20 }
 0x341   : > { %5823 = vmatprep.subr.mxu0 %v5813_v0  ;;  %5895 = vmatpush1.msra.mxu1 %v5814_v62  ;;  %v6002_v0 = vsel %vm716_vm2, %v17827_v18, %v17929_v42 }
 0x342   : > { %5824 = vmatpush1.msra.mxu0 %v5812_v49  ;;  %v6195_v53 = vpop.permute.xlu1 %6194  ;;  %16496 = vmatmul.mubr.msk.f32.vlgmr.msra.gmra.mrb[54].mxu1 %vm533_vm1, %v5791_v43  ;;  %v6001_v40 = vpop.permute.xlu0 %6000 }
 0x343   : > { %16495 = vmatmul.mubr.msk.f32.vlgmr.msra.gmra.mrb[54].mxu0 %vm533_vm1, %v5791_v43  ;;  %6013 = vmatprep.subr.mxu0 %v6003_v36  ;;  %v6005_v62 = vsel %vm716_vm2, %v17919_v39, %v6001_v40  ;;  %v6004_v43 = vsel %vm716_vm2, %v5997_v25, %v17919_v39  ;;  %v6199_v49 = vsel %vm912_vm3, %v17937_v45, %v6195_v53  ;;  %v6185_v39 = vld [vmem:[%s19781_s4 + $0x10] sm:$0xff] }
 0x344   : > { %6014 = vmatpush1.msra.mxu0 %v6002_v0  ;;  %10616 = vrot.lane.b32.xlu1 %v17853_v28, %s19892_s27  ;;  %v6196_v25 = vsel %vm912_vm3, %v17821_v16, %v17927_v41  ;;  %v6390_v16 = vsel %vm1108_vm4, %v17835_v22, %v17945_v47 }
 0x345   : > { %10420 = vrot.lane.b32.xlu0 %v17753_v12, %s19891_s20  ;;  %6084 = vmatprep.subr.mxu1 %v6005_v62 }
 0x346   : > { %6077 = vmatprep.mubr.f32.mxu0 %v19913_v38  ;;  %6085 = vmatpush1.msra.mxu1 %v6004_v43  ;;  %v6385_v18 = vpop.permute.xlu1 %6384  ;;  %v6191_v42 = vpop.permute.xlu0 %6190 }
 0x347   : > { %6148 = vmatprep.mubr.f32.mxu1 %v19913_v38  ;;  %16497 = vmatmul.mubr.msk.f32.vlgmr.msra.gmra.mrb[56].mxu0 %vm533_vm1, %v5991_v15  ;;  %v6197_v36 = vsel %vm912_vm3, %v17927_v41, %v6191_v42  ;;  %v6198_v40 = vsel %vm912_vm3, %v6191_v42, %v17937_v45  ;;  %v6391_v0 = vsel %vm1108_vm4, %v17945_v47, %v6385_v18 }
 0x348   : > { %16498 = vmatmul.mubr.msk.f32.vlgmr.msra.gmra.mrb[56].mxu1 %vm533_vm1, %v5991_v15  ;;  %6278 = vmatprep.subr.mxu1 %v6199_v49  ;;  %v6379_v15 = vld [vmem:[%s19781_s4 + $0x18] sm:$0xff]  ;;  %v6392_v42 = vsel %vm1108_vm4, %v6385_v18, %v17935_v44 }
 0x349   : > { %10614 = vrot.lane.b32.xlu1 %v17753_v12, %s19892_s27  ;;  %10428 = vrot.lane.b32.xlu0 %v19913_v38, %s19891_s20 }
 0x34a   : > { %6207 = vmatprep.subr.mxu0 %v6197_v36  ;;  %6279 = vmatpush1.msra.mxu1 %v6198_v40  ;;  %v6583_v45 = vpop.permute.xlu1 %6582  ;;  %v6389_v53 = vpop.permute.xlu0 %6388  ;;  %v6573_v36 = vld [vmem:[%s19781_s4 + $0x20] sm:$0xff] }
 0x34b   : > { %6208 = vmatpush1.msra.mxu0 %v6196_v25  ;;  %6271 = vmatprep.mubr.f32.mxu0 %v19913_v38  ;;  %v6393_v62 = vsel %vm1108_vm4, %v17935_v44, %v6389_v53  ;;  %v6587_v22 = vsel %vm1304_vm5, %v17953_v50, %v6583_v45 }
 0x34c   : > { %6342 = vmatprep.mubr.f32.mxu1 %v19913_v38  ;;  %16500 = vmatmul.mubr.msk.f32.vlgmr.msra.gmra.mrb[58].mxu0 %vm533_vm1, %v6185_v39 }
 0x34d   : > { %16501 = vmatmul.mubr.msk.f32.vlgmr.msra.gmra.mrb[58].mxu1 %vm533_vm1, %v6185_v39  ;;  %6401 = vmatprep.subr.mxu0 %v6391_v0 }
 0x34e   : > { %6402 = vmatpush1.msra.mxu0 %v6390_v16  ;;  %10622 = vrot.lane.b32.xlu1 %v19913_v38, %s19892_s27  ;;  %v6773_v41 = vpop.permute.xlu1 %6772  ;;  %v6579_v43 = vpop.permute.xlu0 %6578 }
 0x34f   : > { %10618 = vrot.lane.b32.xlu0 %v17757_v14, %s19892_s27  ;;  %6472 = vmatprep.subr.mxu1 %v6393_v62  ;;  %v6585_v47 = vsel %vm1304_vm5, %v17943_v46, %v6579_v43  ;;  %v6586_v49 = vsel %vm1304_vm5, %v6579_v43, %v17953_v50  ;;  %v6584_v50 = vsel %vm1304_vm5, %v17829_v19, %v17943_v46  ;;  %v6767_v46 = vld [vmem:[%s19781_s4 + $0x28] sm:$0xff] }
 0x350   : > { %6465 = vmatprep.mubr.f32.mxu0 %v19913_v38  ;;  %6473 = vmatpush1.msra.mxu1 %v6392_v42  ;;  %v6779_v40 = vsel %vm1500_vm6, %v17961_v52, %v6773_v41  ;;  %v6778_v19 = vsel %vm1500_vm6, %v17849_v2, %v17961_v52  ;;  %v6780_v53 = vsel %vm1500_vm6, %v6773_v41, %v17951_v48  ;;  %v11001_v2 = vld [vmem:[%s19782_s5] sm:$0xff]  ;;  %v6961_v41 = vld [vmem:[%s19781_s4 + $0x30] sm:$0xff] }
 0x351   : > { %6536 = vmatprep.mubr.f32.mxu1 %v19913_v38  ;;  %16503 = vmatmul.mubr.msk.f32.vlgmr.msra.gmra.mrb[60].mxu0 %vm533_vm1, %v6379_v15 }
 0x352   : > { %16504 = vmatmul.mubr.msk.f32.vlgmr.msra.gmra.mrb[60].mxu1 %vm533_vm1, %v6379_v15  ;;  %6666 = vmatprep.subr.mxu1 %v6587_v22  ;;  %v6971_v44 = vpop.permute.xlu1 %6970  ;;  %v6777_v18 = vpop.permute.xlu0 %6776  ;;  %v6972_v15 = vsel %vm1696_vm7, %v17841_v24, %v17959_v51  ;;  %v7166_v24 = vsel %vm1892_vm8, %v17859_v29, %v17977_v57  ;;  %v11011_v29 = vld [vmem:[%s19783_s6] sm:$0xff] }
 0x353   : > { %10812 = vrot.lane.b32.xlu1 %v17757_v14, %s19893_s29  ;;  %10620 = vrot.lane.b32.xlu0 %v17843_v26, %s19892_s27  ;;  %v6781_v39 = vsel %vm1500_vm6, %v17951_v48, %v6777_v18  ;;  %v6975_v62 = vsel %vm1696_vm7, %v17969_v55, %v6971_v44 }
 0x354   : > { %6595 = vmatprep.subr.mxu0 %v6585_v47  ;;  %6667 = vmatpush1.msra.mxu1 %v6586_v49 }
 0x355   : > { %6596 = vmatpush1.msra.mxu0 %v6584_v50  ;;  %6659 = vmatprep.mubr.f32.mxu0 %v19913_v38 }
 0x356   : > { %6730 = vmatprep.mubr.f32.mxu1 %v19913_v38  ;;  %16506 = vmatmul.mubr.msk.f32.vlgmr.msra.gmra.mrb[62].mxu0 %vm533_vm1, %v6573_v36  ;;  %v7161_v25 = vpop.permute.xlu1 %7160  ;;  %v6967_v45 = vpop.permute.xlu0 %6966 }
 0x357   : > { %16507 = vmatmul.mubr.msk.f32.vlgmr.msra.gmra.mrb[62].mxu1 %vm533_vm1, %v6573_v36  ;;  %6789 = vmatprep.subr.mxu0 %v6779_v40  ;;  %v6973_v16 = vsel %vm1696_vm7, %v17959_v51, %v6967_v45  ;;  %v6974_v48 = vsel %vm1696_vm7, %v6967_v45, %v17969_v55  ;;  %v7167_v55 = vsel %vm1892_vm8, %v17977_v57, %v7161_v25  ;;  %v7155_v51 = vld [vmem:[%s19781_s4 + $0x38] sm:$0xff]  ;;  %v7349_v36 = vld [vmem:[%s19781_s4 + $0x40] sm:$0xff] }
 0x358   : > { %6790 = vmatpush1.msra.mxu0 %v6778_v19  ;;  %10814 = vrot.lane.b32.xlu1 %v17843_v26, %s19893_s29  ;;  %v7168_v44 = vsel %vm1892_vm8, %v7161_v25, %v17967_v54 }
 0x359   : > { %10810 = vrot.lane.b32.xlu0 %v17853_v28, %s19893_s29  ;;  %6860 = vmatprep.subr.mxu1 %v6781_v39  ;;  %v7360_v39 = vsel %vm2088_vm9, %v17851_v27, %v17975_v56  ;;  %v7554_v27 = vsel %vm2284_vm10, %v17871_v30, %v17993_v61 }
 0x35a   : > { %6853 = vmatprep.mubr.f32.mxu0 %v19913_v38  ;;  %6861 = vmatpush1.msra.mxu1 %v6780_v53  ;;  %v7359_v52 = vpop.permute.xlu1 %7358  ;;  %v7165_v0 = vpop.permute.xlu0 %7164 }
 0x35b   : > { %6924 = vmatprep.mubr.f32.mxu1 %v19913_v38  ;;  %16509 = vmatmul.mubr.msk.f32.vlgmr.msra.gmra.mrb[64].mxu0 %vm533_vm1, %v6767_v46  ;;  %v7169_v22 = vsel %vm1892_vm8, %v17967_v54, %v7165_v0  ;;  %v7363_v54 = vsel %vm2088_vm9, %v17985_v59, %v7359_v52  ;;  %v7748_v0 = vsel %vm533_vm1, %v17865_v1, %v17991_v60 }
 0x35c   : > { %16510 = vmatmul.mubr.msk.f32.vlgmr.msra.gmra.mrb[64].mxu1 %vm533_vm1, %v6767_v46  ;;  %7054 = vmatprep.subr.mxu1 %v6975_v62  ;;  %v7942_v1 = vsel %vm2675_vm11, %v17879_v32, %v18009_v7 }
 0x35d   : > { %11004 = vperm.xlu1 %16720, %v11001_v2   ;;  %10808 = vrot.lane.b32.xlu0 %v17753_v12, %s19893_s29 }
 0x35e   : > { %6983 = vmatprep.subr.mxu0 %v6973_v16  ;;  %7055 = vmatpush1.msra.mxu1 %v6974_v48  ;;  %v7549_v43 = vpop.permute.xlu1 %7548  ;;  %v7355_v42 = vpop.permute.xlu0 %7354 }
 0x35f   : > { %6984 = vmatpush1.msra.mxu0 %v6972_v15  ;;  %7047 = vmatprep.mubr.f32.mxu0 %v19913_v38  ;;  %v7361_v57 = vsel %vm2088_vm9, %v17975_v56, %v7355_v42  ;;  %v7362_v18 = vsel %vm2088_vm9, %v7355_v42, %v17985_v59  ;;  %v7555_v25 = vsel %vm2284_vm10, %v17993_v61, %v7549_v43  ;;  %v7543_v56 = vld [vmem:[%s19781_s4 + $0x48] sm:$0xff] }
 0x360   : > { %7118 = vmatprep.mubr.f32.mxu1 %v19913_v38  ;;  %16512 = vmatmul.mubr.msk.f32.vlgmr.msra.gmra.mrb[66].mxu0 %vm533_vm1, %v6961_v41  ;;  %v7556_v46 = vsel %vm2284_vm10, %v7549_v43, %v17983_v58  ;;  %v8136_v42 = vsel %vm19855_vm12, %v17873_v31, %v18007_v6 }
 0x361   : > { %16513 = vmatmul.mubr.msk.f32.vlgmr.msra.gmra.mrb[66].mxu1 %vm533_vm1, %v6961_v41  ;;  %7177 = vmatprep.subr.mxu0 %v7167_v55  ;;  %v8125_v55 = vld [vmem:[%s19781_s4 + $0x60] sm:$0xff] }
 0x362   : > { %7178 = vmatpush1.msra.mxu0 %v7166_v24  ;;  %10816 = vrot.lane.b32.xlu0 %v19913_v38, %s19893_s29  ;;  %v7747_v47 = vpop.permute.xlu1 %7746  ;;  %v7553_v49 = vpop.permute.xlu0 %7552 }
 0x363   : > { %7248 = vmatprep.subr.mxu1 %v7169_v22  ;;  %7241 = vmatprep.mubr.f32.mxu0 %v19913_v38  ;;  %v7557_v59 = vsel %vm2284_vm10, %v17983_v58, %v7553_v49  ;;  %v7751_v61 = vsel %vm533_vm1, %v18001_v5, %v7747_v47  ;;  %v7737_v58 = vld [vmem:[%s19781_s4 + $0x50] sm:$0xff] }
 0x364   : > { %7249 = vmatpush1.msra.mxu1 %v7168_v44  ;;  %7312 = vmatprep.mubr.f32.mxu1 %v19913_v38  ;;  %v8469_v47 = vld [vmem:[%s19781_s4 + $0x70] sm:$0xff] }
 0x365   : > { %16515 = vmatmul.mubr.msk.f32.vlgmr.msra.gmra.mrb[68].mxu0 %vm533_vm1, %v7155_v51  ;;  %16516 = vmatmul.mubr.msk.f32.vlgmr.msra.gmra.mrb[68].mxu1 %vm533_vm1, %v7155_v51 }
 0x366   : > { %7442 = vmatprep.subr.mxu1 %v7363_v54  ;;  %11014 = vperm.xlu0 %16719, %v11011_v29   ;;  %v7937_v50 = vpop.permute.xlu1 %7936  ;;  %v7743_v40 = vpop.permute.xlu0 %7742  ;;  %v8673_v29 = vld [vmem:[%s19781_s4 + $0x78] sm:$0xff] }
 0x367   : > { %7371 = vmatprep.subr.mxu0 %v7361_v57  ;;  %7443 = vmatpush1.msra.mxu1 %v7362_v18  ;;  %v7749_v53 = vsel %vm533_vm1, %v17991_v60, %v7743_v40  ;;  %v7750_v30 = vsel %vm533_vm1, %v7743_v40, %v18001_v5  ;;  %v7943_v62 = vsel %vm2675_vm11, %v18009_v7, %v7937_v50  ;;  %v7931_v60 = vld [vmem:[%s19781_s4 + $0x58] sm:$0xff] }
 0x368   : > { %7372 = vmatpush1.msra.mxu0 %v7360_v39  ;;  %7435 = vmatprep.mubr.f32.mxu0 %v19913_v38  ;;  %v7944_v41 = vsel %vm2675_vm11, %v7937_v50, %v17999_v63  ;;  %v8867_v50 = vld [vmem:[%s19781_s4 + $0x80] sm:$0xff] }
 0x369   : > { %7506 = vmatprep.mubr.f32.mxu1 %v19913_v38  ;;  %16518 = vmatmul.mubr.msk.f32.vlgmr.msra.gmra.mrb[70].mxu0 %vm533_vm1, %v7349_v36 }
 0x36a   : > { %16519 = vmatmul.mubr.msk.f32.vlgmr.msra.gmra.mrb[70].mxu1 %vm533_vm1, %v7349_v36  ;;  %7565 = vmatprep.subr.mxu0 %v7555_v25  ;;  %v8135_v45 = vpop.permute.xlu1 %8134  ;;  %v7941_v19 = vpop.permute.xlu0 %7940 }
 0x36b   : > { %7566 = vmatpush1.msra.mxu0 %v7554_v27  ;;  %7636 = vmatprep.subr.mxu1 %v7557_v59  ;;  %v7945_v5 = vsel %vm2675_vm11, %v17999_v63, %v7941_v19  ;;  %v8139_v7 = vsel %vm19855_vm12, %v18017_v9, %v8135_v45  ;;  %v9061_v59 = vld [vmem:[%s19781_s4 + $0x88] sm:$0xff]  ;;  %v19925_v27 = vld [vmem:[#allocation20_spill] sm:$0xff] }
 0x36c   : > { %7629 = vmatprep.mubr.f32.mxu0 %v19913_v38  ;;  %7637 = vmatpush1.msra.mxu1 %v7556_v46  ;;  %v19926_v46 = vld [vmem:[#allocation23_spill] sm:$0xff] }
 0x36d   : > { %7700 = vmatprep.mubr.f32.mxu1 %v19913_v38  ;;  %16521 = vmatmul.mubr.msk.f32.vlgmr.msra.gmra.mrb[72].mxu0 %vm533_vm1, %v7543_v56 }
 0x36e   : > { %16522 = vmatmul.mubr.msk.f32.vlgmr.msra.gmra.mrb[72].mxu1 %vm533_vm1, %v7543_v56  ;;  %7830 = vmatprep.subr.mxu1 %v7751_v61  ;;  %v8487_v2 = vpop.permute.xlu1 %8486  ;;  %v8131_v52 = vpop.permute.xlu0 %8130 }
 0x36f   : > { %7759 = vmatprep.subr.mxu0 %v7749_v53  ;;  %7831 = vmatpush1.msra.mxu1 %v7750_v30  ;;  %v8137_v15 = vsel %vm19855_vm12, %v18007_v6, %v8131_v52  ;;  %v8138_v32 = vsel %vm19855_vm12, %v8131_v52, %v18017_v9  ;;  %v8493_v6 = vsel %vm19854_vm13, %v8487_v2, %v17891_v34  ;;  %v9255_v30 = vld [vmem:[%s19781_s4 + $0x90] sm:$0xff] }
 0x370   : > { %7760 = vmatpush1.msra.mxu0 %v7748_v0  ;;  %7823 = vmatprep.mubr.f32.mxu0 %v19913_v38 }
 0x371   : > { %7894 = vmatprep.mubr.f32.mxu1 %v19913_v38  ;;  %16524 = vmatmul.mubr.msk.f32.vlgmr.msra.gmra.mrb[74].mxu0 %vm533_vm1, %v7737_v58 }
 0x372   : > { %16525 = vmatmul.mubr.msk.f32.vlgmr.msra.gmra.mrb[74].mxu1 %vm533_vm1, %v7737_v58  ;;  %7953 = vmatprep.subr.mxu0 %v7943_v62  ;;  %v8677_v16 = vpop.permute.xlu1 %8676  ;;  %v8483_v48 = vpop.permute.xlu0 %8482 }
 0x373   : > { %7954 = vmatpush1.msra.mxu0 %v7942_v1  ;;  %8024 = vmatprep.subr.mxu1 %v7945_v5  ;;  %v8491_v9 = vsel %vm19854_vm13, %v8483_v48, %v18015_v8  ;;  %v8685_v51 = vsel %vm19915_vm15, %v8677_v16, %v18033_v17  ;;  %v9449_v5 = vld [vmem:[%s19781_s4 + $0x98] sm:$0xff] }
 0x374   : > { %8017 = vmatprep.mubr.f32.mxu0 %v19913_v38  ;;  %8025 = vmatpush1.msra.mxu1 %v7944_v41 }
 0x375   : > { %8088 = vmatprep.mubr.f32.mxu1 %v19913_v38  ;;  %16527 = vmatmul.mubr.msk.f32.vlgmr.msra.gmra.mrb[76].mxu0 %vm533_vm1, %v7931_v60 }
 0x376   : > { %16528 = vmatmul.mubr.msk.f32.vlgmr.msra.gmra.mrb[76].mxu1 %vm533_vm1, %v7931_v60  ;;  %8218 = vmatprep.subr.mxu1 %v8139_v7  ;;  %v8875_v63 = vpop.permute.xlu1 %8874  ;;  %v8681_v43 = vpop.permute.xlu0 %8680 }
 0x377   : > { %8147 = vmatprep.subr.mxu0 %v8137_v15  ;;  %8219 = vmatpush1.msra.mxu1 %v8138_v32 }
 0x378   : > { %8148 = vmatpush1.msra.mxu0 %v8136_v42  ;;  %8211 = vmatprep.mubr.f32.mxu0 %v19913_v38 }
 0x379   : > { %8282 = vmatprep.mubr.f32.mxu1 %v19913_v38  ;;  %8394 = vmatprep.subr.mxu1 %v17843_v26  ;;  %v8319_v26 = vld [vmem:[%s19781_s4 + $0x68] sm:$0xff] }
 0x37a   : > { %16530 = vmatmul.mubr.msk.f32.vlgmr.msra.gmra.mrb[78].mxu0 %vm533_vm1, %v8125_v55  ;;  %16531 = vmatmul.mubr.msk.f32.vlgmr.msra.gmra.mrb[78].mxu1 %vm533_vm1, %v8125_v55  ;;  %v9065_v22 = vpop.permute.xlu1 %9064  ;;  %v8871_v31 = vpop.permute.xlu0 %8870 }
 0x37b   : > { %8323 = vmatprep.subr.mxu0 %v17853_v28  ;;  %8395 = vmatpush1.msra.mxu1 %v17757_v14  ;;  %v8490_v14 = vsel %vm19854_vm13, %v18025_v11, %v8483_v48  ;;  %v8687_v28 = vsel %vm19914_vm14, %v8681_v43, %v17885_v33  ;;  %vm19916_vm14 = vcmask 982016   ;;  %v9643_v48 = vld [vmem:[%s19781_s4 + $0xa0] sm:$0xff] }
 0x37c   : > { %8324 = vmatpush1.msra.mxu0 %v17753_v12  ;;  %8572 = vmatprep.subr.mxu1 %v8493_v6  ;;  %v8492_v12 = vsel %vm19854_vm13, %v18015_v8, %v8487_v2  ;;  %v8879_v33 = vsel %vm19916_vm14, %v8871_v31, %v18031_v13  ;;  %vm19917_vm13 = vmmov %vm19915_vm15  ;;  %v8881_v57 = vsel %vm19916_vm14, %v8875_v63, %v17899_v35 }
 0x37d   : > { %8501 = vmatprep.subr.mxu0 %v8491_v9  ;;  %8387 = vmatprep.mubr.f32.mxu0 %v19913_v38  ;;  %v8684_v8 = vsel %vm19917_vm13, %v18023_v10, %v8677_v16  ;;  %vm19918_vm15 = vmmov %vm19917_vm13 }
 0x37e   : > { %8458 = vmatprep.mubr.f32.mxu1 %v19913_v38  ;;  %16533 = vmatmul.mubr.msk.f32.vlgmr.msra.gmra.mrb[80].mxu0 %vm533_vm1, %v8319_v26  ;;  %v18327_v34 = vpop.permute.xlu1 %9262  ;;  %v9069_v24 = vpop.permute.xlu0 %9068  ;;  %v8686_v44 = vsel %vm19918_vm15, %v18033_v17, %v8681_v43  ;;  %vm19919_vm13 = vmmov %vm19916_vm14  ;;  %vm19920_vm15 = vcmask 973824   ;;  %v9837_v43 = vld [vmem:[%s19781_s4 + $0xa8] sm:$0xff] }
 0x37f   : > { %16534 = vmatmul.mubr.msk.f32.vlgmr.msra.gmra.mrb[80].mxu1 %vm533_vm1, %v8319_v26  ;;  %8502 = vmatpush1.msra.mxu0 %v8490_v14  ;;  %v8878_v10 = vsel %vm19919_vm13, %v18041_v21, %v8871_v31  ;;  %v9075_v17 = vsel %vm19920_vm15, %v9069_v24, %v17893_v4  ;;  %vm19921_vm14 = vmmov %vm19919_vm13  ;;  %v9269_v25 = vsel %vm524_vm0, %v18327_v34, %v17911_v37  ;;  %v10031_v14 = vld [vmem:[%s19781_s4 + $0xb0] sm:$0xff] }
 0x380   : > { %8573 = vmatpush1.msra.mxu1 %v8492_v12  ;;  %8695 = vmatprep.subr.mxu0 %v8685_v51  ;;  %v8880_v35 = vsel %vm19921_vm14, %v18031_v13, %v8875_v63  ;;  %vm19922_vm12 = vmmov %vm19920_vm15  ;;  %v9268_v37 = vsel %vm524_vm0, %v18047_v3, %v18327_v34 }
 0x381   : > { %8766 = vmatprep.subr.mxu1 %v8687_v28  ;;  %8565 = vmatprep.mubr.f32.mxu0 %v19913_v38  ;;  %v9073_v36 = vsel %vm19922_vm12, %v9065_v22, %v18049_v23  ;;  %vm19923_vm13 = vmmov %vm19922_vm12  ;;  %v9074_v39 = vsel %vm19922_vm12, %v18049_v23, %v9069_v24 }
 0x382   : > { %8636 = vmatprep.mubr.f32.mxu1 %v19913_v38  ;;  %16535 = vmatmul.mubr.msk.f32.vlgmr.msra.gmra.mrb[82].mxu0 %vm533_vm1, %v8469_v47  ;;  %v9453_v11 = vpop.permute.xlu1 %9452  ;;  %v9259_v49 = vpop.permute.xlu0 %9258  ;;  %v9072_v13 = vsel %vm19923_vm13, %v18039_v20, %v9065_v22  ;;  %v19924_v20 = vld [vmem:[#allocation22_spill] sm:$0xff] }
 0x383   : > { %16536 = vmatmul.mubr.msk.f32.vlgmr.msra.gmra.mrb[82].mxu1 %vm533_vm1, %v8469_v47  ;;  %8696 = vmatpush1.msra.mxu0 %v8684_v8  ;;  %v9267_v4 = vsel %vm524_vm0, %v9259_v49, %v18047_v3  ;;  %v9266_v23 = vsel %vm524_vm0, %v19924_v20, %v9259_v49  ;;  %v9461_v53 = vsel %vm716_vm2, %v9453_v11, %v19926_v46  ;;  %v19927_v3 = vld [vmem:[#allocation21_spill] sm:$0xff] }
 0x384   : > { %8767 = vmatpush1.msra.mxu1 %v8686_v44  ;;  %8889 = vmatprep.subr.mxu0 %v8879_v33  ;;  %v9460_v58 = vsel %vm716_vm2, %v19927_v3, %v9453_v11  ;;  %v10225_v11 = vld [vmem:[%s19781_s4 + $0xb8] sm:$0xff]  ;;  %v10613_v20 = vld [vmem:[%s19781_s4 + $0xc8] sm:$0xff] }
 0x385   : > { %8960 = vmatprep.subr.mxu1 %v8881_v57  ;;  %8759 = vmatprep.mubr.f32.mxu0 %v19913_v38 }
 0x386   : > { %8830 = vmatprep.mubr.f32.mxu1 %v19913_v38  ;;  %16538 = vmatmul.mubr.msk.f32.vlgmr.msra.gmra.mrb[84].mxu0 %vm533_vm1, %v8673_v29  ;;  %v18359_v18 = vpop.permute.xlu1 %9648  ;;  %v9457_v54 = vpop.permute.xlu0 %9456 }
 0x387   : > { %16539 = vmatmul.mubr.msk.f32.vlgmr.msra.gmra.mrb[84].mxu1 %vm533_vm1, %v8673_v29  ;;  %8890 = vmatpush1.msra.mxu0 %v8878_v10  ;;  %v9463_v56 = vsel %vm716_vm2, %v9457_v54, %v19925_v27  ;;  %v9462_v0 = vsel %vm716_vm2, %v19926_v46, %v9457_v54 }
 0x388   : > { %8961 = vmatpush1.msra.mxu1 %v8880_v35  ;;  %9083 = vmatprep.subr.mxu0 %v9073_v36  ;;  %v10419_v36 = vld [vmem:[%s19781_s4 + $0xc0] sm:$0xff] }
 0x389   : > { %9154 = vmatprep.subr.mxu1 %v9075_v17  ;;  %8953 = vmatprep.mubr.f32.mxu0 %v19913_v38 }
 0x38a   : > { %9024 = vmatprep.mubr.f32.mxu1 %v19913_v38  ;;  %16541 = vmatmul.mubr.msk.f32.vlgmr.msra.gmra.mrb[86].mxu0 %vm533_vm1, %v8867_v50  ;;  %v9651_v21 = vpop.permute.xlu1 %9650  ;;  %v9647_v40 = vpop.permute.xlu0 %9646 }
 0x38b   : > { %16542 = vmatmul.mubr.msk.f32.vlgmr.msra.gmra.mrb[86].mxu1 %vm533_vm1, %v8867_v50  ;;  %9084 = vmatpush1.msra.mxu0 %v9072_v13  ;;  %v9655_v61 = vsel %vm912_vm3, %v9647_v40, %v18359_v18  ;;  %v9656_v41 = vsel %vm912_vm3, %v18359_v18, %v9651_v21 }
 0x38c   : > { %9155 = vmatpush1.msra.mxu1 %v9074_v39  ;;  %9277 = vmatprep.subr.mxu0 %v9267_v4 }
 0x38d   : > { %9348 = vmatprep.subr.mxu1 %v9269_v25  ;;  %9147 = vmatprep.mubr.f32.mxu0 %v19913_v38 }
 0x38e   : > { %9218 = vmatprep.mubr.f32.mxu1 %v19913_v38  ;;  %16544 = vmatmul.mubr.msk.f32.vlgmr.msra.gmra.mrb[88].mxu0 %vm533_vm1, %v9061_v59  ;;  %v9841_v45 = vpop.permute.xlu1 %9840  ;;  %v9645_v19 = vpop.permute.xlu0 %9644 }
 0x38f   : > { %16545 = vmatmul.mubr.msk.f32.vlgmr.msra.gmra.mrb[88].mxu1 %vm533_vm1, %v9061_v59  ;;  %9278 = vmatpush1.msra.mxu0 %v9266_v23  ;;  %v9654_v1 = vsel %vm912_vm3, %v9645_v19, %v9647_v40 }
 0x390   : > { %9349 = vmatpush1.msra.mxu1 %v9268_v37  ;;  %9471 = vmatprep.subr.mxu0 %v9461_v53 }
 0x391   : > { %9542 = vmatprep.subr.mxu1 %v9463_v56  ;;  %9341 = vmatprep.mubr.f32.mxu0 %v19913_v38 }
 0x392   : > { %9412 = vmatprep.mubr.f32.mxu1 %v19913_v38  ;;  %16547 = vmatmul.mubr.msk.f32.vlgmr.msra.gmra.mrb[90].mxu0 %vm533_vm1, %v9255_v30  ;;  %v9839_v2 = vpop.permute.xlu1 %9838  ;;  %v9653_v52 = vpop.permute.xlu0 %9652 }
 0x393   : > { %16548 = vmatmul.mubr.msk.f32.vlgmr.msra.gmra.mrb[90].mxu1 %vm533_vm1, %v9255_v30  ;;  %9472 = vmatpush1.msra.mxu0 %v9460_v58  ;;  %v9657_v62 = vsel %vm912_vm3, %v9651_v21, %v9653_v52  ;;  %v9848_v32 = vsel %vm1108_vm4, %v9839_v2, %v9841_v45 }
 0x394   : > { %9543 = vmatpush1.msra.mxu1 %v9462_v0  ;;  %9665 = vmatprep.subr.mxu0 %v9655_v61  ;;  %v10807_v61 = vld [vmem:[%s19781_s4 + $0xd0] sm:$0xff] }
 0x395   : > { %9535 = vmatprep.mubr.f32.mxu0 %v19913_v38  ;;  %9606 = vmatprep.mubr.f32.mxu1 %v19913_v38 }
 0x396   : > { %16550 = vmatmul.mubr.msk.f32.vlgmr.msra.gmra.mrb[92].mxu0 %vm533_vm1, %v9449_v5  ;;  %9736 = vmatprep.subr.mxu1 %v9657_v62  ;;  %v9847_v60 = vpop.permute.xlu1 %9846  ;;  %v9843_v16 = vpop.permute.xlu0 %9842  ;;  %v19928_v62 = vld [vmem:[#allocation17_spill] sm:$0xff] }
 0x397   : > { %16551 = vmatmul.mubr.msk.f32.vlgmr.msra.gmra.mrb[92].mxu1 %vm533_vm1, %v9449_v5  ;;  %9666 = vmatpush1.msra.mxu0 %v9654_v1  ;;  %v9849_v15 = vsel %vm1108_vm4, %v9841_v45, %v9843_v16  ;;  %v5965_v5 = vld [vmem:[%s19787_s10] ss:$8 sm:$0xf] }
 0x398   : > { %9729 = vmatprep.mubr.f32.mxu0 %v19913_v38  ;;  %9737 = vmatpush1.msra.mxu1 %v9656_v41  ;;  %v5982_v1 = vrot.slane %v5965_v5, %v19928_v62  ;;  %v19930_v41 = vld [vmem:[#allocation18_spill] sm:$0xff] }
 0x399   : > { %9800 = vmatprep.mubr.f32.mxu1 %v19913_v38  ;;  %9859 = vmatprep.subr.mxu0 %v9849_v15  ;;  %v5970_v15 = vrot.slane %v5965_v5, %v19930_v41 }
 0x39a   : > { %16553 = vmatmul.mubr.msk.f32.vlgmr.msra.gmra.mrb[94].mxu0 %vm533_vm1, %v9643_v48  ;;  %v10037_v7 = vpop.permute.xlu1 %10036  ;;  %v9845_v63 = vpop.permute.xlu0 %9844  ;;  %11048 = vrot.lane.b32.xlu1 %v19913_v38, %s19896_s18 }
 0x39b   : > { %16554 = vmatmul.mubr.msk.f32.vlgmr.msra.gmra.mrb[94].mxu1 %vm533_vm1, %v9643_v48  ;;  %9860 = vmatpush1.msra.mxu0 %v9848_v32  ;;  %v9851_v42 = vsel %vm1108_vm4, %v9845_v63, %v9847_v60  ;;  %v9850_v55 = vsel %vm1108_vm4, %v9843_v16, %v9845_v63  ;;  %v19929_v60 = vld [vmem:[#allocation16_spill] sm:$0xff]  ;;  %v19931_v63 = vld [vmem:[#allocation19_spill] sm:$0xff] }
 0x39c   : > { %9923 = vmatprep.mubr.f32.mxu0 %v19913_v38  ;;  %9930 = vmatprep.subr.mxu1 %v9851_v42  ;;  %v5974_v16 = vrot.slane %v5965_v5, %v19929_v60  ;;  %v16499_v48 = vld [vmem:[%s19787_s10 + $0x1] ss:$8 sm:$0xf] }
 0x39d   : > { %9931 = vmatpush1.msra.mxu1 %v9850_v55  ;;  %9994 = vmatprep.mubr.f32.mxu1 %v19913_v38 }
 0x39e   : > { %16556 = vmatmul.mubr.msk.f32.vlgmr.msra.gmra.mrb[96].mxu0 %vm533_vm1, %v9837_v43  ;;  %v10039_v9 = vpop.permute.xlu1 %10038  ;;  %v10035_v22 = vpop.permute.xlu0 %10034  ;;  %11432 = vrot.lane.b32.xlu1 %v19913_v38, %s19887_s17 }
 0x39f   : > { %16557 = vmatmul.mubr.msk.f32.vlgmr.msra.gmra.mrb[96].mxu1 %vm533_vm1, %v9837_v43  ;;  %v10043_v31 = vsel %vm1304_vm5, %v10035_v22, %v10037_v7  ;;  %10117 = vmatprep.mubr.f32.mxu0 %v19913_v38  ;;  %v10044_v51 = vsel %vm1304_vm5, %v10037_v7, %v10039_v9  ;;  %v5978_v43 = vrot.slane %v5965_v5, %v19931_v63 }
 0x3a0   : > { %10053 = vmatprep.subr.mxu0 %v10043_v31  ;;  %10188 = vmatprep.mubr.f32.mxu1 %v19913_v38 }
 0x3a1   : > { %11238 = vrot.lane.b32.xlu0 %v19913_v38, %s19886_s16 }
 0x3a2   : > { %v10229_v6 = vpop.permute.xlu1 %10228  ;;  %v10033_v26 = vpop.permute.xlu0 %10032  ;;  %11820 = vrot.lane.b32.xlu1 %v19913_v38, %s19889_s0 }
 0x3a3   : > { %v10042_v28 = vsel %vm1304_vm5, %v10033_v26, %v10035_v22  ;;  %v6160_v22 = vrot.slane %v16499_v48, %v19930_v41  ;;  %v6164_v26 = vrot.slane %v16499_v48, %v19929_v60 }
 0x3a4   : > { %10054 = vmatpush1.msra.mxu0 %v10042_v28  ;;  %v6172_v28 = vrot.slane %v16499_v48, %v19928_v62 }
 0x3a5   : > { %16559 = vmatmul.mubr.msk.f32.vlgmr.msra.gmra.mrb[98].mxu0 %vm533_vm1, %v10031_v14  ;;  %11626 = vrot.lane.b32.xlu0 %v19913_v38, %s19888_s23 }
 0x3a6   : > { %v10227_v34 = vpop.permute.xlu1 %10226  ;;  %v10041_v24 = vpop.permute.xlu0 %10040  ;;  %10311 = vmatprep.mubr.f32.mxu0 %v19913_v38  ;;  %12208 = vrot.lane.b32.xlu1 %v19913_v38, %s19891_s20 }
 0x3a7   : > { %v10045_v12 = vsel %vm1304_vm5, %v10039_v9, %v10041_v24  ;;  %v10236_v49 = vsel %vm1500_vm6, %v10227_v34, %v10229_v6  ;;  %v16502_v34 = vld [vmem:[%s19787_s10 + $0x2] ss:$8 sm:$0xf] }
 0x3a8   : > { %10124 = vmatprep.subr.mxu1 %v10045_v12 }
 0x3a9   : > { %10125 = vmatpush1.msra.mxu1 %v10044_v51  ;;  %12014 = vrot.lane.b32.xlu0 %v19913_v38, %s19890_s30 }
 0x3aa   : > { %v10235_v47 = vpop.permute.xlu1 %10234  ;;  %16560 = vmatmul.mubr.msk.f32.vlgmr.msra.gmra.mrb[98].mxu1 %vm533_vm1, %v10031_v14  ;;  %v10231_v33 = vpop.permute.xlu0 %10230  ;;  %12596 = vrot.lane.b32.xlu1 %v19913_v38, %s19893_s29 }
 0x3ab   : > { %v10237_v8 = vsel %vm1500_vm6, %v10229_v6, %v10231_v33  ;;  %10382 = vmatprep.mubr.f32.mxu1 %v19913_v38  ;;  %v6168_v6 = vrot.slane %v16499_v48, %v19931_v63 }
 0x3ac   : > { %10247 = vmatprep.subr.mxu0 %v10237_v8 }
 0x3ad   : > { %10248 = vmatpush1.msra.mxu0 %v10236_v49  ;;  %12402 = vrot.lane.b32.xlu0 %v19913_v38, %s19892_s27 }
 0x3ae   : > { %v10425_v44 = vpop.permute.xlu1 %10424  ;;  %16562 = vmatmul.mubr.msk.f32.vlgmr.msra.gmra.mrb[100].mxu0 %vm533_vm1, %v10225_v11  ;;  %v10233_v29 = vpop.permute.xlu0 %10232  ;;  %12984 = vrot.lane.b32.xlu1 %v19913_v38, %s19898_s15 }
 0x3af   : > { %v10239_v57 = vsel %vm1500_vm6, %v10233_v29, %v10235_v47  ;;  %v10238_v10 = vsel %vm1500_vm6, %v10231_v33, %v10233_v29  ;;  %10505 = vmatprep.mubr.f32.mxu0 %v19913_v38 }
 0x3b0   : > { %10318 = vmatprep.subr.mxu1 %v10239_v57 }
 0x3b1   : > { %10319 = vmatpush1.msra.mxu1 %v10238_v10  ;;  %12790 = vrot.lane.b32.xlu0 %v19913_v38, %s19897_s25  ;;  %v6362_v10 = vrot.slane %v16502_v34, %v19931_v63 }
 0x3b2   : > { %16563 = vmatmul.mubr.msk.f32.vlgmr.msra.gmra.mrb[100].mxu1 %vm533_vm1, %v10225_v11  ;;  %v10423_v17 = vpop.permute.xlu0 %10422  ;;  %13372 = vrot.lane.b32.xlu1 %v19913_v38, %s19900_s2  ;;  %v10427_v18 = vpop.permute.xlu1 %10426 }
 0x3b3   : > { %v10431_v54 = vsel %vm1696_vm7, %v10423_v17, %v10425_v44  ;;  %10576 = vmatprep.mubr.f32.mxu1 %v19913_v38  ;;  %v10432_v40 = vsel %vm1696_vm7, %v10425_v44, %v10427_v18  ;;  %v6354_v44 = vrot.slane %v16502_v34, %v19930_v41 }
 0x3b4   : > { %10441 = vmatprep.subr.mxu0 %v10431_v54 }
 0x3b5   : > { %13178 = vrot.lane.b32.xlu0 %v19913_v38, %s19899_s21 }
 0x3b6   : > { %13928 = vrot.lane.b32.xlu1 %v19913_v38, %s19902_s28  ;;  %v10617_v4 = vpop.permute.xlu1 %10616 }
 0x3b7   : > { %v10421_v35 = vpop.permute.xlu0 %10420 }
 0x3b8   : > { %v10430_v50 = vsel %vm1696_vm7, %v10421_v35, %v10423_v17  ;;  %v6358_v17 = vrot.slane %v16502_v34, %v19929_v60  ;;  %v6366_v35 = vrot.slane %v16502_v34, %v19928_v62 }
 0x3b9   : > { %10442 = vmatpush1.msra.mxu0 %v10430_v50  ;;  %13734 = vrot.lane.b32.xlu0 %v19913_v38, %s19901_s3 }
 0x3ba   : > { %16565 = vmatmul.mubr.msk.f32.vlgmr.msra.gmra.mrb[102].mxu0 %vm533_vm1, %v10419_v36  ;;  %14316 = vrot.lane.b32.xlu1 %v19913_v38, %s19904_s26 }
 0x3bb   : > { %v10429_v13 = vpop.permute.xlu0 %10428  ;;  %10699 = vmatprep.mubr.f32.mxu0 %v19913_v38  ;;  %v10615_v39 = vpop.permute.xlu1 %10614 }
 0x3bc   : > { %v10433_v21 = vsel %vm1696_vm7, %v10427_v18, %v10429_v13  ;;  %v10624_v23 = vsel %vm1892_vm8, %v10615_v39, %v10617_v4 }
 0x3bd   : > { %10512 = vmatprep.subr.mxu1 %v10433_v21  ;;  %14122 = vrot.lane.b32.xlu0 %v19913_v38, %s19903_s24 }
 0x3be   : > { %10513 = vmatpush1.msra.mxu1 %v10432_v40  ;;  %14704 = vrot.lane.b32.xlu1 %v19913_v38, %s19886_s16 }
 0x3bf   : > { %16566 = vmatmul.mubr.msk.f32.vlgmr.msra.gmra.mrb[102].mxu1 %vm533_vm1, %v10419_v36  ;;  %v16505_v36 = vld [vmem:[%s19787_s10 + $0x3] ss:$8 sm:$0xf] }
 0x3c0   : > { %10770 = vmatprep.mubr.f32.mxu1 %v19913_v38  ;;  %v10623_v27 = vpop.permute.xlu1 %10622 }
 0x3c1   : > { %v10619_v59 = vpop.permute.xlu0 %10618  ;;  %14510 = vrot.lane.b32.xlu0 %v19913_v38, %s19896_s18 }
 0x3c2   : > { %v10625_v25 = vsel %vm1892_vm8, %v10617_v4, %v10619_v59  ;;  %15092 = vrot.lane.b32.xlu1 %v19913_v38, %s19888_s23 }
 0x3c3   : > { %10635 = vmatprep.subr.mxu0 %v10625_v25 }
 0x3c4   : > { %10636 = vmatpush1.msra.mxu0 %v10624_v23 }
 0x3c5   : > { %16568 = vmatmul.mubr.msk.f32.vlgmr.msra.gmra.mrb[104].mxu0 %vm533_vm1, %v10613_v20  ;;  %v10621_v56 = vpop.permute.xlu0 %10620  ;;  %14898 = vrot.lane.b32.xlu0 %v19913_v38, %s19887_s17  ;;  %v10813_v37 = vpop.permute.xlu1 %10812 }
 0x3c6   : > { %v10627_v45 = vsel %vm1892_vm8, %v10621_v56, %v10623_v27  ;;  %v10626_v19 = vsel %vm1892_vm8, %v10619_v59, %v10621_v56  ;;  %10893 = vmatprep.mubr.f32.mxu0 %v19913_v38  ;;  %15480 = vrot.lane.b32.xlu1 %v19913_v38, %s19890_s30  ;;  %v6556_v56 = vrot.slane %v16505_v36, %v19931_v63 }
 0x3c7   : > { %10706 = vmatprep.subr.mxu1 %v10627_v45  ;;  %v6552_v45 = vrot.slane %v16505_v36, %v19929_v60 }
 0x3c8   : > { %10707 = vmatpush1.msra.mxu1 %v10626_v19 }
 0x3c9   : > { %16569 = vmatmul.mubr.msk.f32.vlgmr.msra.gmra.mrb[104].mxu1 %vm533_vm1, %v10613_v20  ;;  %15286 = vrot.lane.b32.xlu0 %v19913_v38, %s19889_s0  ;;  %v6548_v20 = vrot.slane %v16505_v36, %v19930_v41 }
 0x3ca   : > { %10964 = vmatprep.mubr.f32.mxu1 %v19913_v38  ;;  %v10815_v58 = vpop.permute.xlu1 %10814 }
 0x3cb   : > { %v10811_v46 = vpop.permute.xlu0 %10810  ;;  %v10820_v0 = vsel %vm2088_vm9, %v10813_v37, %v10815_v58 }
 0x3cc   : > { %v10819_v53 = vsel %vm2088_vm9, %v10811_v46, %v10813_v37 }
 0x3cd   : > { %10829 = vmatprep.subr.mxu0 %v10819_v53  ;;  %15674 = vrot.lane.b32.xlu0 %v19913_v38, %s19891_s20  ;;  %v16508_v53 = vld [vmem:[%s19787_s10 + $0x4] ss:$8 sm:$0xf] }
 0x3cf   : > { %v10809_v30 = vpop.permute.xlu0 %10808 }
 0x3d0   : > { %v10818_v3 = vsel %vm2088_vm9, %v10809_v30, %v10811_v46  ;;  %v6560_v46 = vrot.slane %v16505_v36, %v19928_v62 }
 0x3d1   : > { %10830 = vmatpush1.msra.mxu0 %v10818_v3 }
 0x3d2   : > { %16571 = vmatmul.mubr.msk.f32.vlgmr.msra.gmra.mrb[106].mxu0 %vm533_vm1, %v10807_v61 }
 0x3d3   : > { %11133 = vmatprep.mubr.f32.mxu0 %v19913_v38 }
 0x3d4   : > { %v10817_v2 = vpop.permute.xlu0 %10816 }
 0x3d5   : > { %v10821_v52 = vsel %vm2088_vm9, %v10815_v58, %v10817_v2 }
 0x3d6   : > { %10900 = vmatprep.subr.mxu1 %v10821_v52 }
 0x3d7   : > { %10901 = vmatpush1.msra.mxu1 %v10820_v0 }
 0x3d8   : > { %16572 = vmatmul.mubr.msk.f32.vlgmr.msra.gmra.mrb[106].mxu1 %vm533_vm1, %v10807_v61 }
 0x3d9   : > { %11204 = vmatprep.mubr.f32.mxu1 %v19913_v38 }
 0x415   : > { %v5960_v32 = vpop.f32.mrb[54].mxu1 }
 0x416   : > { %v5889_v7 = vpop.f32.mrb[54].mxu0  ;;  %v5962_v42 = vpop.f32.mrb[55].mxu1  ;;  %v5989_v24 = vmul.f32 %v5978_v43, %v5960_v32  ;;  %v6746_v32 = vrot.slane %v16508_v53, %v19929_v60 }
 0x417   : > { %v5891_v55 = vpop.f32.mrb[55].mxu0  ;;  %v5990_v9 = vmul.f32 %v5982_v1, %v5962_v42  ;;  %v5987_v14 = vmul.f32 %v5970_v15, %v5889_v7  ;;  %v6742_v1 = vrot.slane %v16508_v53, %v19930_v41  ;;  %v6750_v15 = vrot.slane %v16508_v53, %v19931_v63 }
 0x418   : > { %v5988_v31 = vmul.f32 %v5974_v16, %v5891_v55  ;;  %v6754_v42 = vrot.slane %v16508_v53, %v19928_v62  ;;  %v16511_v55 = vld [vmem:[%s19787_s10 + $0x5] ss:$8 sm:$0xf] }
 0x41a   : > { %v6079_v12 = vpop.f32.mrb[56].mxu0 }
 0x41b   : > { %v6177_v51 = vmul.f32 %v6160_v22, %v6079_v12  ;;  %v6150_v47 = vpop.f32.mrb[56].mxu1  ;;  %v6081_v33 = vpop.f32.mrb[57].mxu0 }
 0x41c   : > { %v6179_v8 = vmul.f32 %v6168_v6, %v6150_v47  ;;  %v6178_v11 = vmul.f32 %v6164_v26, %v6081_v33  ;;  %v6152_v49 = vpop.f32.mrb[57].mxu1  ;;  %v6944_v47 = vrot.slane %v16511_v55, %v19931_v63  ;;  %v6940_v33 = vrot.slane %v16511_v55, %v19929_v60 }
 0x41d   : > { %v6181_v29 = vadd.f32 %v6177_v51, %v5987_v14  ;;  %v6180_v57 = vmul.f32 %v6172_v28, %v6152_v49  ;;  %v6948_v49 = vrot.slane %v16511_v55, %v19928_v62 }
 0x41e   : > { %v6183_v18 = vadd.f32 %v6179_v8, %v5989_v24  ;;  %v6182_v54 = vadd.f32 %v6178_v11, %v5988_v31  ;;  %v6936_v24 = vrot.slane %v16511_v55, %v19930_v41 }
 0x41f   : > { %v6184_v50 = vadd.f32 %v6180_v57, %v5990_v9  ;;  %v6273_v4 = vpop.f32.mrb[58].mxu0 }
 0x420   : > { %v6371_v13 = vmul.f32 %v6354_v44, %v6273_v4  ;;  %v6344_v21 = vpop.f32.mrb[58].mxu1  ;;  %v6275_v40 = vpop.f32.mrb[59].mxu0  ;;  %v16514_v44 = vld [vmem:[%s19787_s10 + $0x6] ss:$8 sm:$0xf] }
 0x421   : > { %v6373_v39 = vmul.f32 %v6362_v10, %v6344_v21  ;;  %v6372_v59 = vmul.f32 %v6358_v17, %v6275_v40  ;;  %v6346_v25 = vpop.f32.mrb[59].mxu1  ;;  %v7138_v21 = vrot.slane %v16514_v44, %v19931_v63  ;;  %v7134_v40 = vrot.slane %v16514_v44, %v19929_v60 }
 0x422   : > { %v6375_v23 = vadd.f32 %v6371_v13, %v6181_v29  ;;  %v6374_v27 = vmul.f32 %v6366_v35, %v6346_v25  ;;  %v7142_v25 = vrot.slane %v16514_v44, %v19928_v62 }
 0x423   : > { %v6377_v19 = vadd.f32 %v6373_v39, %v6183_v18  ;;  %v6376_v37 = vadd.f32 %v6372_v59, %v6182_v54 }
 0x424   : > { %v6378_v30 = vadd.f32 %v6374_v27, %v6184_v50  ;;  %v6467_v61 = vpop.f32.mrb[60].mxu0  ;;  %v7130_v50 = vrot.slane %v16514_v44, %v19930_v41 }
 0x425   : > { %v6565_v3 = vmul.f32 %v6548_v20, %v6467_v61  ;;  %v6538_v58 = vpop.f32.mrb[60].mxu1  ;;  %v6469_v2 = vpop.f32.mrb[61].mxu0  ;;  %v16517_v20 = vld [vmem:[%s19787_s10 + $0x7] ss:$8 sm:$0xf] }
 0x426   : > { %v6567_v52 = vmul.f32 %v6556_v56, %v6538_v58  ;;  %v6566_v0 = vmul.f32 %v6552_v45, %v6469_v2  ;;  %v6540_v5 = vpop.f32.mrb[61].mxu1  ;;  %v7332_v61 = vrot.slane %v16517_v20, %v19931_v63  ;;  %v7328_v2 = vrot.slane %v16517_v20, %v19929_v60 }
 0x427   : > { %v6569_v16 = vadd.f32 %v6565_v3, %v6375_v23  ;;  %v6568_v48 = vmul.f32 %v6560_v46, %v6540_v5 }
 0x428   : > { %v6571_v7 = vadd.f32 %v6567_v52, %v6377_v19  ;;  %v6570_v43 = vadd.f32 %v6566_v0, %v6376_v37  ;;  %v7336_v52 = vrot.slane %v16517_v20, %v19928_v62  ;;  %v16520_v0 = vld [vmem:[%s19787_s10 + $0x20] ss:$8 sm:$0xf] }
 0x429   : > { %v6572_v9 = vadd.f32 %v6568_v48, %v6378_v30  ;;  %v6661_v22 = vpop.f32.mrb[62].mxu0  ;;  %v7324_v30 = vrot.slane %v16517_v20, %v19930_v41  ;;  %v7518_v55 = vrot.slane %v16520_v0, %v19930_v41 }
 0x42a   : > { %v6759_v31 = vmul.f32 %v6742_v1, %v6661_v22  ;;  %v6732_v6 = vpop.f32.mrb[62].mxu1  ;;  %v6663_v26 = vpop.f32.mrb[63].mxu0 }
 0x42b   : > { %v6761_v14 = vmul.f32 %v6750_v15, %v6732_v6  ;;  %v6760_v28 = vmul.f32 %v6746_v32, %v6663_v26  ;;  %v6734_v34 = vpop.f32.mrb[63].mxu1  ;;  %v7522_v6 = vrot.slane %v16520_v0, %v19929_v60  ;;  %v16523_v26 = vld [vmem:[%s19787_s10 + $0x21] ss:$8 sm:$0xf] }
 0x42c   : > { %v6763_v12 = vadd.f32 %v6759_v31, %v6569_v16  ;;  %v6762_v51 = vmul.f32 %v6754_v42, %v6734_v34  ;;  %v7526_v31 = vrot.slane %v16520_v0, %v19931_v63  ;;  %v7530_v34 = vrot.slane %v16520_v0, %v19928_v62 }
 0x42d   : > { %v6765_v8 = vadd.f32 %v6761_v14, %v6571_v7  ;;  %v6764_v11 = vadd.f32 %v6760_v28, %v6570_v43 }
 0x42e   : > { %v6766_v29 = vadd.f32 %v6762_v51, %v6572_v9  ;;  %v6855_v57 = vpop.f32.mrb[64].mxu0 }
 0x42f   : > { %v6953_v10 = vmul.f32 %v6936_v24, %v6855_v57  ;;  %v6926_v17 = vpop.f32.mrb[64].mxu1  ;;  %v6857_v18 = vpop.f32.mrb[65].mxu0  ;;  %v7720_v57 = vrot.slane %v16523_v26, %v19931_v63 }
 0x430   : > { %v6955_v54 = vmul.f32 %v6944_v47, %v6926_v17  ;;  %v6954_v35 = vmul.f32 %v6940_v33, %v6857_v18  ;;  %v6928_v36 = vpop.f32.mrb[65].mxu1  ;;  %v16526_v17 = vld [vmem:[%s19787_s10 + $0x22] ss:$8 sm:$0xf] }
 0x431   : > { %v6957_v4 = vadd.f32 %v6953_v10, %v6763_v12  ;;  %v6956_v13 = vmul.f32 %v6948_v49, %v6928_v36  ;;  %v7716_v10 = vrot.slane %v16523_v26, %v19929_v60 }
 0x432   : > { %v6959_v39 = vadd.f32 %v6955_v54, %v6765_v8  ;;  %v6958_v59 = vadd.f32 %v6954_v35, %v6764_v11  ;;  %v7712_v11 = vrot.slane %v16523_v26, %v19930_v41  ;;  %v7724_v35 = vrot.slane %v16523_v26, %v19928_v62 }
 0x433   : > { %v6960_v23 = vadd.f32 %v6956_v13, %v6766_v29  ;;  %v7049_v27 = vpop.f32.mrb[66].mxu0 }
 0x434   : > { %v7147_v56 = vmul.f32 %v7130_v50, %v7049_v27  ;;  %v7120_v45 = vpop.f32.mrb[66].mxu1  ;;  %v7051_v19 = vpop.f32.mrb[67].mxu0  ;;  %v7914_v27 = vrot.slane %v16526_v17, %v19931_v63 }
 0x435   : > { %v7149_v37 = vmul.f32 %v7138_v21, %v7120_v45  ;;  %v7148_v46 = vmul.f32 %v7134_v40, %v7051_v19  ;;  %v7122_v53 = vpop.f32.mrb[67].mxu1  ;;  %v16529_v45 = vld [vmem:[%s19787_s10 + $0x23] ss:$8 sm:$0xf] }
 0x436   : > { %v7151_v3 = vadd.f32 %v7147_v56, %v6957_v4  ;;  %v7150_v58 = vmul.f32 %v7142_v25, %v7122_v53  ;;  %v7910_v56 = vrot.slane %v16526_v17, %v19929_v60  ;;  %v8100_v0 = vrot.slane %v16529_v45, %v19930_v41 }
 0x437   : > { %v7153_v5 = vadd.f32 %v7149_v37, %v6959_v39  ;;  %v7152_v1 = vadd.f32 %v7148_v46, %v6958_v59  ;;  %v7906_v59 = vrot.slane %v16526_v17, %v19930_v41  ;;  %v7918_v46 = vrot.slane %v16526_v17, %v19928_v62 }
 0x438   : > { %v7154_v16 = vadd.f32 %v7150_v58, %v6960_v23  ;;  %v7243_v48 = vpop.f32.mrb[68].mxu0  ;;  %v7314_v15 = vpop.f32.mrb[68].mxu1 }
 0x439   : > { %v7341_v32 = vmul.f32 %v7324_v30, %v7243_v48  ;;  %v7343_v7 = vmul.f32 %v7332_v61, %v7314_v15  ;;  %v7245_v43 = vpop.f32.mrb[69].mxu0  ;;  %v7316_v42 = vpop.f32.mrb[69].mxu1  ;;  %v8108_v48 = vrot.slane %v16529_v45, %v19931_v63  ;;  %v8104_v15 = vrot.slane %v16529_v45, %v19929_v60 }
 0x43a   : > { %v7342_v9 = vmul.f32 %v7328_v2, %v7245_v43  ;;  %v7344_v22 = vmul.f32 %v7336_v52, %v7316_v42  ;;  %v8112_v43 = vrot.slane %v16529_v45, %v19928_v62  ;;  %v16532_v42 = vld [vmem:[%s19787_s10 + $0x24] ss:$8 sm:$0xf] }
 0x43b   : > { %v7345_v14 = vadd.f32 %v7341_v32, %v7151_v3  ;;  %v7347_v28 = vadd.f32 %v7343_v7, %v7153_v5 }
 0x43c   : > { %v7346_v24 = vadd.f32 %v7342_v9, %v7152_v1  ;;  %v7348_v12 = vadd.f32 %v7344_v22, %v7154_v16  ;;  %v7437_v51 = vpop.f32.mrb[70].mxu0 }
 0x43d   : > { %v7535_v47 = vmul.f32 %v7518_v55, %v7437_v51  ;;  %v7508_v33 = vpop.f32.mrb[70].mxu1  ;;  %v7439_v8 = vpop.f32.mrb[71].mxu0  ;;  %v8302_v51 = vrot.slane %v16532_v42, %v19931_v63 }
 0x43e   : > { %v7537_v49 = vmul.f32 %v7526_v31, %v7508_v33  ;;  %v7536_v44 = vmul.f32 %v7522_v6, %v7439_v8  ;;  %v7510_v29 = vpop.f32.mrb[71].mxu1  ;;  %v8298_v8 = vrot.slane %v16532_v42, %v19929_v60 }
 0x43f   : > { %v7539_v18 = vadd.f32 %v7535_v47, %v7345_v14  ;;  %v7538_v54 = vmul.f32 %v7530_v34, %v7510_v29 }
 0x440   : > { %v7541_v36 = vadd.f32 %v7537_v49, %v7347_v28  ;;  %v7540_v50 = vadd.f32 %v7536_v44, %v7346_v24  ;;  %v7631_v4 = vpop.f32.mrb[72].mxu0 }
 0x441   : > { %v7542_v13 = vadd.f32 %v7538_v54, %v7348_v12  ;;  %v7729_v21 = vmul.f32 %v7712_v11, %v7631_v4  ;;  %v7702_v40 = vpop.f32.mrb[72].mxu1  ;;  %v7633_v39 = vpop.f32.mrb[73].mxu0  ;;  %v8294_v12 = vrot.slane %v16532_v42, %v19930_v41  ;;  %v8306_v11 = vrot.slane %v16532_v42, %v19928_v62  ;;  %v16537_v4 = vld [vmem:[%s19787_s10 + $0x26] ss:$8 sm:$0xf] }
 0x442   : > { %v7731_v25 = vmul.f32 %v7720_v57, %v7702_v40  ;;  %v7730_v20 = vmul.f32 %v7716_v10, %v7633_v39  ;;  %v7704_v23 = vpop.f32.mrb[73].mxu1 }
 0x443   : > { %v7733_v19 = vadd.f32 %v7729_v21, %v7539_v18  ;;  %v7732_v37 = vmul.f32 %v7724_v35, %v7704_v23 }
 0x444   : > { %v7735_v53 = vadd.f32 %v7731_v25, %v7541_v36  ;;  %v7734_v30 = vadd.f32 %v7730_v20, %v7540_v50  ;;  %v7825_v61 = vpop.f32.mrb[74].mxu0 }
 0x445   : > { %v7736_v3 = vadd.f32 %v7732_v37, %v7542_v13  ;;  %v7923_v58 = vmul.f32 %v7906_v59, %v7825_v61  ;;  %v7896_v2 = vpop.f32.mrb[74].mxu1  ;;  %v7827_v52 = vpop.f32.mrb[75].mxu0  ;;  %v8656_v37 = vrot.slane %v16537_v4, %v19931_v63  ;;  %v8660_v61 = vrot.slane %v16537_v4, %v19928_v62 }
 0x446   : > { %v7925_v5 = vmul.f32 %v7914_v27, %v7896_v2  ;;  %v7924_v1 = vmul.f32 %v7910_v56, %v7827_v52  ;;  %v7898_v16 = vpop.f32.mrb[75].mxu1  ;;  %v8648_v27 = vrot.slane %v16537_v4, %v19930_v41 }
 0x447   : > { %v7927_v32 = vadd.f32 %v7923_v58, %v7733_v19  ;;  %v7926_v7 = vmul.f32 %v7918_v46, %v7898_v16  ;;  %v8652_v46 = vrot.slane %v16537_v4, %v19929_v60 }
 0x448   : > { %v7929_v55 = vadd.f32 %v7925_v5, %v7735_v53  ;;  %v7928_v9 = vadd.f32 %v7924_v1, %v7734_v30  ;;  %v8019_v22 = vpop.f32.mrb[76].mxu0  ;;  %v16540_v53 = vld [vmem:[%s19787_s10 + $0x27] ss:$8 sm:$0xf] }
 0x449   : > { %v7930_v31 = vadd.f32 %v7926_v7, %v7736_v3  ;;  %v8117_v6 = vmul.f32 %v8100_v0, %v8019_v22  ;;  %v8090_v26 = vpop.f32.mrb[76].mxu1  ;;  %v8021_v14 = vpop.f32.mrb[77].mxu0  ;;  %v8842_v0 = vrot.slane %v16540_v53, %v19930_v41  ;;  %v8854_v42 = vrot.slane %v16540_v53, %v19928_v62 }
 0x44a   : > { %v8119_v28 = vmul.f32 %v8108_v48, %v8090_v26  ;;  %v8118_v34 = vmul.f32 %v8104_v15, %v8021_v14  ;;  %v8092_v24 = vpop.f32.mrb[77].mxu1  ;;  %v8850_v48 = vrot.slane %v16540_v53, %v19931_v63  ;;  %v8846_v15 = vrot.slane %v16540_v53, %v19929_v60 }
 0x44b   : > { %v8121_v47 = vadd.f32 %v8117_v6, %v7927_v32  ;;  %v8120_v33 = vmul.f32 %v8112_v43, %v8092_v24  ;;  %v16543_v32 = vld [vmem:[%s19787_s10 + $0x40] ss:$8 sm:$0xf] }
 0x44c   : > { %v8123_v49 = vadd.f32 %v8119_v28, %v7929_v55  ;;  %v8122_v44 = vadd.f32 %v8118_v34, %v7928_v9  ;;  %v9036_v28 = vrot.slane %v16543_v32, %v19930_v41 }
 0x44d   : > { %v8124_v29 = vadd.f32 %v8120_v33, %v7930_v31  ;;  %v8213_v57 = vpop.f32.mrb[78].mxu0  ;;  %v8284_v10 = vpop.f32.mrb[78].mxu1  ;;  %v16546_v33 = vld [vmem:[%s19787_s10 + $0x41] ss:$8 sm:$0xf] }
 0x44e   : > { %v8311_v17 = vmul.f32 %v8294_v12, %v8213_v57  ;;  %v8313_v18 = vmul.f32 %v8302_v51, %v8284_v10  ;;  %v8215_v54 = vpop.f32.mrb[79].mxu0  ;;  %v8286_v35 = vpop.f32.mrb[79].mxu1  ;;  %v9044_v51 = vrot.slane %v16543_v32, %v19931_v63 }
 0x44f   : > { %v8312_v36 = vmul.f32 %v8298_v8, %v8215_v54  ;;  %v8314_v50 = vmul.f32 %v8306_v11, %v8286_v35  ;;  %v9230_v35 = vrot.slane %v16546_v33, %v19930_v41 }
 0x450   : > { %v8315_v13 = vadd.f32 %v8311_v17, %v8121_v47  ;;  %v8317_v21 = vadd.f32 %v8313_v18, %v8123_v49  ;;  %v9040_v47 = vrot.slane %v16543_v32, %v19929_v60  ;;  %v9048_v49 = vrot.slane %v16543_v32, %v19928_v62 }
 0x451   : > { %v8389_v40 = vpop.f32.mrb[80].mxu0  ;;  %v8316_v39 = vadd.f32 %v8312_v36, %v8122_v44  ;;  %v8318_v59 = vadd.f32 %v8314_v50, %v8124_v29 }
 0x452   : > { %v8465_v25 = vadd.f32 %v8389_v40, %v8315_v13  ;;  %v8460_v20 = vpop.f32.mrb[80].mxu1  ;;  %v8391_v23 = vpop.f32.mrb[81].mxu0  ;;  %v9238_v13 = vrot.slane %v16546_v33, %v19931_v63  ;;  %v16549_v40 = vld [vmem:[%s19787_s10 + $0x42] ss:$8 sm:$0xf] }
 0x453   : > { %v8467_v56 = vadd.f32 %v8460_v20, %v8317_v21  ;;  %v8466_v45 = vadd.f32 %v8391_v23, %v8316_v39  ;;  %v8462_v19 = vpop.f32.mrb[81].mxu1  ;;  %v9234_v21 = vrot.slane %v16546_v33, %v19929_v60 }
 0x454   : > { %v8468_v30 = vadd.f32 %v8462_v19, %v8318_v59 }
 0x455   : > { %v8567_v3 = vpop.f32.mrb[82].mxu0 }
 0x456   : > { %v8665_v58 = vmul.f32 %v8648_v27, %v8567_v3  ;;  %v8638_v2 = vpop.f32.mrb[82].mxu1  ;;  %v8569_v52 = vpop.f32.mrb[83].mxu0  ;;  %v9432_v3 = vrot.slane %v16549_v40, %v19931_v63 }
 0x457   : > { %v8667_v5 = vmul.f32 %v8656_v37, %v8638_v2  ;;  %v8666_v1 = vmul.f32 %v8652_v46, %v8569_v52  ;;  %v8640_v16 = vpop.f32.mrb[83].mxu1  ;;  %v9424_v46 = vrot.slane %v16549_v40, %v19930_v41  ;;  %v16552_v2 = vld [vmem:[%s19787_s10 + $0x43] ss:$8 sm:$0xf] }
 0x458   : > { %v8669_v7 = vadd.f32 %v8665_v58, %v8465_v25  ;;  %v8668_v43 = vmul.f32 %v8660_v61, %v8640_v16  ;;  %v9242_v25 = vrot.slane %v16546_v33, %v19928_v62  ;;  %v9428_v58 = vrot.slane %v16549_v40, %v19929_v60 }
 0x459   : > { %v8671_v55 = vadd.f32 %v8667_v5, %v8467_v56  ;;  %v8670_v9 = vadd.f32 %v8666_v1, %v8466_v45  ;;  %v8761_v22 = vpop.f32.mrb[84].mxu0  ;;  %v9436_v5 = vrot.slane %v16549_v40, %v19928_v62 }
 0x45a   : > { %v8672_v31 = vadd.f32 %v8668_v43, %v8468_v30  ;;  %v8859_v6 = vmul.f32 %v8842_v0, %v8761_v22  ;;  %v8832_v26 = vpop.f32.mrb[84].mxu1  ;;  %v8763_v14 = vpop.f32.mrb[85].mxu0 }
 0x45b   : > { %v8861_v34 = vmul.f32 %v8850_v48, %v8832_v26  ;;  %v8860_v24 = vmul.f32 %v8846_v15, %v8763_v14  ;;  %v8834_v12 = vpop.f32.mrb[85].mxu1  ;;  %v16555_v26 = vld [vmem:[%s19787_s10 + $0x44] ss:$8 sm:$0xf] }
 0x45c   : > { %v8863_v8 = vadd.f32 %v8859_v6, %v8669_v7  ;;  %v8862_v11 = vmul.f32 %v8854_v42, %v8834_v12  ;;  %v9618_v42 = vrot.slane %v16552_v2, %v19930_v41  ;;  %v9622_v6 = vrot.slane %v16552_v2, %v19929_v60 }
 0x45d   : > { %v8865_v44 = vadd.f32 %v8861_v34, %v8671_v55  ;;  %v8864_v29 = vadd.f32 %v8860_v24, %v8670_v9  ;;  %v8955_v57 = vpop.f32.mrb[86].mxu0  ;;  %v9630_v34 = vrot.slane %v16552_v2, %v19928_v62 }
 0x45e   : > { %v8866_v10 = vadd.f32 %v8862_v11, %v8672_v31  ;;  %v9053_v17 = vmul.f32 %v9036_v28, %v8955_v57  ;;  %v9026_v18 = vpop.f32.mrb[86].mxu1  ;;  %v8957_v54 = vpop.f32.mrb[87].mxu0  ;;  %v9626_v31 = vrot.slane %v16552_v2, %v19931_v63 }
 0x45f   : > { %v9055_v36 = vmul.f32 %v9044_v51, %v9026_v18  ;;  %v9054_v50 = vmul.f32 %v9040_v47, %v8957_v54  ;;  %v9028_v4 = vpop.f32.mrb[87].mxu1  ;;  %v16558_v18 = vld [vmem:[%s19787_s10 + $0x45] ss:$8 sm:$0xf] }
 0x460   : > { %v9057_v39 = vadd.f32 %v9053_v17, %v8863_v8  ;;  %v9056_v59 = vmul.f32 %v9048_v49, %v9028_v4  ;;  %v9812_v49 = vrot.slane %v16555_v26, %v19930_v41  ;;  %v9820_v17 = vrot.slane %v16555_v26, %v19931_v63 }
 0x461   : > { %v9059_v20 = vadd.f32 %v9055_v36, %v8865_v44  ;;  %v9058_v23 = vadd.f32 %v9054_v50, %v8864_v29  ;;  %v9149_v27 = vpop.f32.mrb[88].mxu0  ;;  %v9824_v36 = vrot.slane %v16555_v26, %v19928_v62 }
 0x462   : > { %v9060_v56 = vadd.f32 %v9056_v59, %v8866_v10  ;;  %v9247_v45 = vmul.f32 %v9230_v35, %v9149_v27  ;;  %v9220_v19 = vpop.f32.mrb[88].mxu1  ;;  %v9151_v37 = vpop.f32.mrb[89].mxu0  ;;  %v9816_v10 = vrot.slane %v16555_v26, %v19929_v60 }
 0x463   : > { %v9249_v53 = vmul.f32 %v9238_v13, %v9220_v19  ;;  %v9248_v30 = vmul.f32 %v9234_v21, %v9151_v37  ;;  %v9222_v61 = vpop.f32.mrb[89].mxu1 }
 0x464   : > { %v9251_v52 = vadd.f32 %v9247_v45, %v9057_v39  ;;  %v9250_v0 = vmul.f32 %v9242_v25, %v9222_v61  ;;  %v10006_v25 = vrot.slane %v16558_v18, %v19930_v41  ;;  %v10014_v45 = vrot.slane %v16558_v18, %v19931_v63 }
 0x465   : > { %v9253_v1 = vadd.f32 %v9249_v53, %v9059_v20  ;;  %v9252_v16 = vadd.f32 %v9248_v30, %v9058_v23  ;;  %v9343_v48 = vpop.f32.mrb[90].mxu0 }
 0x466   : > { %v9254_v15 = vadd.f32 %v9250_v0, %v9060_v56  ;;  %v9441_v32 = vmul.f32 %v9424_v46, %v9343_v48  ;;  %v9414_v7 = vpop.f32.mrb[90].mxu1  ;;  %v9345_v43 = vpop.f32.mrb[91].mxu0  ;;  %v10010_v56 = vrot.slane %v16558_v18, %v19929_v60  ;;  %v10018_v46 = vrot.slane %v16558_v18, %v19928_v62  ;;  %v16561_v0 = vld [vmem:[%s19787_s10 + $0x46] ss:$8 sm:$0xf] }
 0x467   : > { %v9443_v55 = vmul.f32 %v9432_v3, %v9414_v7  ;;  %v9442_v9 = vmul.f32 %v9428_v58, %v9345_v43  ;;  %v9416_v22 = vpop.f32.mrb[91].mxu1  ;;  %v10200_v43 = vrot.slane %v16561_v0, %v19930_v41  ;;  %v10208_v26 = vrot.slane %v16561_v0, %v19931_v63 }
 0x468   : > { %v9445_v14 = vadd.f32 %v9441_v32, %v9251_v52  ;;  %v9444_v28 = vmul.f32 %v9436_v5, %v9416_v22 }
 0x469   : > { %v9447_v24 = vadd.f32 %v9443_v55, %v9253_v1  ;;  %v9446_v12 = vadd.f32 %v9442_v9, %v9252_v16  ;;  %v9537_v51 = vpop.f32.mrb[92].mxu0  ;;  %v10204_v55 = vrot.slane %v16561_v0, %v19929_v60 }
 0x46a   : > { %v9448_v47 = vadd.f32 %v9444_v28, %v9254_v15  ;;  %v9635_v33 = vmul.f32 %v9618_v42, %v9537_v51  ;;  %v9608_v8 = vpop.f32.mrb[92].mxu1  ;;  %v9539_v11 = vpop.f32.mrb[93].mxu0  ;;  %v10212_v28 = vrot.slane %v16561_v0, %v19928_v62 }
 0x46b   : > { %v9637_v44 = vmul.f32 %v9626_v31, %v9608_v8  ;;  %v9636_v29 = vmul.f32 %v9622_v6, %v9539_v11  ;;  %v9610_v57 = vpop.f32.mrb[93].mxu1 }
 0x46c   : > { %v9639_v54 = vadd.f32 %v9635_v33, %v9445_v14  ;;  %v9638_v35 = vmul.f32 %v9630_v34, %v9610_v57  ;;  %v16564_v34 = vld [vmem:[%s19787_s10 + $0x47] ss:$8 sm:$0xf] }
 0x46d   : > { %v9641_v50 = vadd.f32 %v9637_v44, %v9447_v24  ;;  %v9640_v4 = vadd.f32 %v9636_v29, %v9446_v12  ;;  %v9731_v13 = vpop.f32.mrb[94].mxu0  ;;  %v10394_v33 = vrot.slane %v16564_v34, %v19930_v41  ;;  %v10398_v11 = vrot.slane %v16564_v34, %v19929_v60 }
 0x46e   : > { %v9642_v21 = vadd.f32 %v9638_v35, %v9448_v47  ;;  %v9829_v40 = vmul.f32 %v9812_v49, %v9731_v13  ;;  %v9733_v39 = vpop.f32.mrb[95].mxu0  ;;  %v9802_v59 = vpop.f32.mrb[94].mxu1 }
 0x46f   : > { %v9830_v20 = vmul.f32 %v9816_v10, %v9733_v39  ;;  %v9831_v23 = vmul.f32 %v9820_v17, %v9802_v59  ;;  %v9804_v27 = vpop.f32.mrb[95].mxu1  ;;  %v10402_v17 = vrot.slane %v16564_v34, %v19931_v63 }
 0x470   : > { %v9833_v19 = vadd.f32 %v9829_v40, %v9639_v54  ;;  %v9832_v37 = vmul.f32 %v9824_v36, %v9804_v27  ;;  %v10406_v54 = vrot.slane %v16564_v34, %v19928_v62  ;;  %v16567_v40 = vld [vmem:[%s19787_s10 + $0x60] ss:$8 sm:$0xf] }
 0x471   : > { %v9834_v53 = vadd.f32 %v9830_v20, %v9640_v4  ;;  %v9835_v30 = vadd.f32 %v9831_v23, %v9641_v50  ;;  %v9925_v61 = vpop.f32.mrb[96].mxu0  ;;  %v10592_v20 = vrot.slane %v16567_v40, %v19929_v60 }
 0x472   : > { %v9836_v3 = vadd.f32 %v9832_v37, %v9642_v21  ;;  %v10023_v58 = vmul.f32 %v10006_v25, %v9925_v61  ;;  %v9927_v2 = vpop.f32.mrb[97].mxu0  ;;  %v9996_v52 = vpop.f32.mrb[96].mxu1  ;;  %v10588_v25 = vrot.slane %v16567_v40, %v19930_v41  ;;  %v16570_v61 = vld [vmem:[%s19787_s10 + $0x61] ss:$8 sm:$0xf] }
 0x473   : > { %v10024_v5 = vmul.f32 %v10010_v56, %v9927_v2  ;;  %v10025_v1 = vmul.f32 %v10014_v45, %v9996_v52  ;;  %v9998_v16 = vpop.f32.mrb[97].mxu1  ;;  %v10782_v0 = vrot.slane %v16570_v61, %v19930_v41 }
 0x474   : > { %v10027_v48 = vadd.f32 %v10023_v58, %v9833_v19  ;;  %v10026_v15 = vmul.f32 %v10018_v46, %v9998_v16  ;;  %v10596_v19 = vrot.slane %v16567_v40, %v19931_v63  ;;  %v10600_v46 = vrot.slane %v16567_v40, %v19928_v62 }
 0x475   : > { %v10028_v32 = vadd.f32 %v10024_v5, %v9834_v53  ;;  %v10029_v7 = vadd.f32 %v10025_v1, %v9835_v30  ;;  %v10786_v1 = vrot.slane %v16570_v61, %v19929_v60 }
 0x476   : > { %v10030_v42 = vadd.f32 %v10026_v15, %v9836_v3 }
 0x478   : > { %v10119_v9 = vpop.f32.mrb[98].mxu0 }
 0x479   : > { %v10217_v22 = vmul.f32 %v10200_v43, %v10119_v9  ;;  %v10121_v31 = vpop.f32.mrb[99].mxu0  ;;  %v10794_v43 = vrot.slane %v16570_v61, %v19928_v62 }
 0x47a   : > { %v10218_v6 = vmul.f32 %v10204_v55, %v10121_v31 }
 0x47b   : > { %v10221_v14 = vadd.f32 %v10217_v22, %v10027_v48 }
 0x47c   : > { %v10222_v24 = vadd.f32 %v10218_v6, %v10028_v32  ;;  %v10790_v32 = vrot.slane %v16570_v61, %v19931_v63 }
 0x47d   : > { %v10190_v12 = vpop.f32.mrb[98].mxu1 }
 0x47e   : > { %v10219_v51 = vmul.f32 %v10208_v26, %v10190_v12  ;;  %v10192_v47 = vpop.f32.mrb[99].mxu1 }
 0x47f   : > { %v10220_v8 = vmul.f32 %v10212_v28, %v10192_v47 }
 0x480   : > { %v10223_v49 = vadd.f32 %v10219_v51, %v10029_v7 }
 0x481   : > { %v10224_v44 = vadd.f32 %v10220_v8, %v10030_v42  ;;  %v10313_v29 = vpop.f32.mrb[100].mxu0 }
 0x482   : > { %v10411_v57 = vmul.f32 %v10394_v33, %v10313_v29  ;;  %v10315_v10 = vpop.f32.mrb[101].mxu0 }
 0x483   : > { %v10412_v18 = vmul.f32 %v10398_v11, %v10315_v10  ;;  %v18732_v10 = vpop.permute.xlu0 %11014 }
 0x484   : > { %v10415_v35 = vadd.f32 %v10411_v57, %v10221_v14  ;;  %v16573_v14 = vld [vmem:[%s19787_s10 + $0x62] ss:$8 sm:$0xf] }
 0x485   : > { %v10416_v36 = vadd.f32 %v10412_v18, %v10222_v24  ;;  %v10384_v50 = vpop.f32.mrb[100].mxu1  ;;  %v10976_v34 = vrot.slane %v16573_v14, %v19930_v41  ;;  %v10980_v24 = vrot.slane %v16573_v14, %v19929_v60  ;;  %v10984_v11 = vrot.slane %v16573_v14, %v19931_v63 }
 0x486   : > { %v10413_v4 = vmul.f32 %v10402_v17, %v10384_v50  ;;  %v10386_v13 = vpop.f32.mrb[101].mxu1  ;;  %v10988_v29 = vrot.slane %v16573_v14, %v19928_v62 }
 0x487   : > { %v10414_v21 = vmul.f32 %v10406_v54, %v10386_v13 }
 0x488   : > { %v10417_v39 = vadd.f32 %v10413_v4, %v10223_v49  ;;  %v18726_v49 = vpop.permute.xlu1 %11004 }
 0x489   : > { %v10418_v59 = vadd.f32 %v10414_v21, %v10224_v44 }
 0x48d   : > { %v10507_v23 = vpop.f32.mrb[102].mxu0 }
 0x48e   : > { %v10605_v27 = vmul.f32 %v10588_v25, %v10507_v23  ;;  %v10509_v56 = vpop.f32.mrb[103].mxu0 }
 0x48f   : > { %v10606_v45 = vmul.f32 %v10592_v20, %v10509_v56  ;;  %v18785_v20 = vpop.permute.xlu1 %11048 }
 0x490   : > { %v10609_v37 = vadd.f32 %v10605_v27, %v10415_v35  ;;  %v18793_v27 = vpop.permute.xlu0 %11238 }
 0x491   : > { %v10610_v53 = vadd.f32 %v10606_v45, %v10416_v36 }
 0x492   : > { %v10578_v30 = vpop.f32.mrb[102].mxu1 }
 0x493   : > { %v10607_v3 = vmul.f32 %v10596_v19, %v10578_v30  ;;  %v10580_v58 = vpop.f32.mrb[103].mxu1  ;;  %v18791_v23 = vpop.permute.xlu1 %11432 }
 0x494   : > { %v10608_v2 = vmul.f32 %v10600_v46, %v10580_v58  ;;  %v18805_v45 = vpop.permute.xlu0 %11626 }
 0x495   : > { %v10611_v52 = vadd.f32 %v10607_v3, %v10417_v39 }
 0x496   : > { %v10612_v5 = vadd.f32 %v10608_v2, %v10418_v59 }
 0x497   : > { %v18803_v56 = vpop.permute.xlu1 %11820 }
 0x498   : > { %v10701_v16 = vpop.f32.mrb[104].mxu0 }
 0x499   : > { %v10799_v48 = vmul.f32 %v10782_v0, %v10701_v16  ;;  %v10703_v15 = vpop.f32.mrb[105].mxu0 }
 0x49a   : > { %v10800_v7 = vmul.f32 %v10786_v1, %v10703_v15 }
 0x49b   : > { %v10803_v42 = vadd.f32 %v10799_v48, %v10609_v37  ;;  %v18811_v19 = vpop.permute.xlu1 %12208  ;;  %v18813_v37 = vpop.permute.xlu0 %12014 }
 0x49c   : > { %v10804_v55 = vadd.f32 %v10800_v7, %v10610_v53  ;;  %v10772_v9 = vpop.f32.mrb[104].mxu1 }
 0x49d   : > { %v10801_v22 = vmul.f32 %v10790_v32, %v10772_v9  ;;  %v10774_v31 = vpop.f32.mrb[105].mxu1 }
 0x49e   : > { %v10802_v6 = vmul.f32 %v10794_v43, %v10774_v31 }
 0x49f   : > { %v10805_v26 = vadd.f32 %v10801_v22, %v10611_v52  ;;  %v18823_v46 = vpop.permute.xlu1 %12596  ;;  %v18825_v53 = vpop.permute.xlu0 %12402 }
 0x4a0   : > { %v10806_v28 = vadd.f32 %v10802_v6, %v10612_v5 }
 0x4a3   : > { %v18831_v30 = vpop.permute.xlu1 %12984  ;;  %v18833_v61 = vpop.permute.xlu0 %12790 }
 0x4a5   : > { %v10895_v12 = vpop.f32.mrb[106].mxu0 }
 0x4a6   : > { %v10993_v51 = vmul.f32 %v10976_v34, %v10895_v12  ;;  %v10897_v47 = vpop.f32.mrb[107].mxu0 }
 0x4a7   : > { %v10994_v33 = vmul.f32 %v10980_v24, %v10897_v47  ;;  %v18843_v3 = vpop.permute.xlu1 %13372  ;;  %v18845_v58 = vpop.permute.xlu0 %13178 }
 0x4a8   : > { %v10997_v8 = vadd.f32 %v10993_v51, %v10803_v42 }
 0x4a9   : > { %v18728_v44 = vadd.f32 %v10994_v33, %v10804_v55 }
 0x4aa   : > { %v11007_v57 = vmul.f32 %v18726_v49, %v10997_v8 }
 0x4ab   : > { %v10966_v17 = vpop.f32.mrb[106].mxu1  ;;  %v18851_v2 = vpop.permute.xlu1 %13928  ;;  %v11008_v16 = vmul.f32 %v18726_v49, %v18728_v44 }
 0x4ac   : > { %v11017_v18 = vadd.f32 %v18732_v10, %v11007_v57  ;;  %v10995_v54 = vmul.f32 %v10984_v11, %v10966_v17  ;;  %v10968_v35 = vpop.f32.mrb[107].mxu1  ;;  %v18853_v52 = vpop.permute.xlu0 %13734 }
 0x4ad   : > { %v10996_v36 = vmul.f32 %v10988_v29, %v10968_v35  ;;  %v11018_v7 = vadd.f32 %v18732_v10, %v11008_v16 }
 0x4ae   : > { %vm11021_vm15 = vcmp.gt.f32.partialorder %v11017_v18, 0.0  ;;  %v11025_v50 = vmul.f32 0.1, %v11017_v18  ;;  %v10999_v4 = vadd.f32 %v10995_v54, %v10805_v26 }
 0x4af   : > { %v18735_v13 = vadd.f32 %v10996_v36, %v10806_v28  ;;  %v18865_v5 = vpop.permute.xlu1 %14316  ;;  %v11026_v42 = vmul.f32 0.1, %v11018_v7  ;;  %vm11022_vm12 = vcmp.gt.f32.partialorder %v11018_v7, 0.0 }
 0x4b0   : > { %v18737_v21 = vsel %vm11021_vm15, %v11017_v18, %v11025_v50  ;;  %v11009_v40 = vmul.f32 %v18726_v49, %v10999_v4  ;;  %v18867_v1 = vpop.permute.xlu0 %14122 }
 0x4b1   : > { %11050 = vrot.lane.b32.xlu1 %v18737_v21, %s19896_s18  ;;  %v11010_v0 = vmul.f32 %v18726_v49, %v18735_v13  ;;  %v18895_v31 = vsel %vm11022_vm12, %v11018_v7, %v11026_v42 }
 0x4b2   : > { %v11019_v39 = vadd.f32 %v18732_v10, %v11009_v40 }
 0x4b3   : > { %v11020_v48 = vadd.f32 %v18732_v10, %v11010_v0  ;;  %v18876_v15 = vpop.permute.xlu1 %14704 }
 0x4b4   : > { %vm11023_vm14 = vcmp.gt.f32.partialorder %v11019_v39, 0.0  ;;  %v11027_v59 = vmul.f32 0.1, %v11019_v39  ;;  %19932 = vst [vmem:[#allocation22_spill] sm:$0xff] %v18876_v15  ;;  %v18878_v32 = vpop.permute.xlu0 %14510 }
 0x4b5   : > { %19933 = vst [vmem:[#allocation20_spill] sm:$0xff] %v18878_v32  ;;  %v11028_v43 = vmul.f32 0.1, %v11020_v48  ;;  %vm11024_vm13 = vcmp.gt.f32.partialorder %v11020_v48, 0.0 }
 0x4b6   : > { %v18743_v25 = vsel %vm11023_vm14, %v11019_v39, %v11027_v59 }
 0x4b7   : > { %11054 = vrot.lane.b32.xlu0 %v18743_v25, %s19896_s18  ;;  %11244 = vrot.lane.b32.xlu1 %v18743_v25, %s19886_s16  ;;  %v18885_v55 = vsel %vm11024_vm13, %v11020_v48, %v11028_v43  ;;  %v18891_v9 = vpop.permute.xlu1 %15092  ;;  %vm19959_vm13 = vcmask 1039360  }
 0x4b8   : > { %19934 = vst [vmem:[#allocation23_spill] sm:$0xff] %v18891_v9  ;;  %v18893_v22 = vpop.permute.xlu0 %14898  ;;  %vm19960_vm12 = vmmov %vm19959_vm13 }
 0x4b9   : > { %19935 = vst [vmem:[#allocation21_spill] sm:$0xff] %v18893_v22 }
 0x4bb   : > { %11240 = vrot.lane.b32.xlu0 %v18737_v21, %s19886_s16  ;;  %11434 = vrot.lane.b32.xlu1 %v18737_v21, %s19887_s17  ;;  %v18901_v6 = vpop.permute.xlu1 %15480 }
 0x4bc   : > { %19936 = vst [vmem:[#allocation24_spill] sm:$0xff] %v18901_v6  ;;  %v18903_v26 = vpop.permute.xlu0 %15286 }
 0x4bd   : > { %19937 = vst [vmem:[#allocation25_spill] sm:$0xff] %v18903_v26 }
 0x4bf   : > { %11438 = vrot.lane.b32.xlu0 %v18743_v25, %s19887_s17  ;;  %11632 = vrot.lane.b32.xlu1 %v18743_v25, %s19888_s23 }
 0x4c0   : > { %v18915_v28 = vpop.permute.xlu0 %15674 }
 0x4c1   : > { %19938 = vst [vmem:[#allocation26_spill] sm:$0xff] %v18915_v28 }
 0x4c3   : > { %11628 = vrot.lane.b32.xlu0 %v18737_v21, %s19888_s23  ;;  %11822 = vrot.lane.b32.xlu1 %v18737_v21, %s19889_s0 }
 0x4c7   : > { %11826 = vrot.lane.b32.xlu0 %v18743_v25, %s19889_s0  ;;  %12020 = vrot.lane.b32.xlu1 %v18743_v25, %s19890_s30 }
 0x4cb   : > { %12016 = vrot.lane.b32.xlu0 %v18737_v21, %s19890_s30  ;;  %12210 = vrot.lane.b32.xlu1 %v18737_v21, %s19891_s20 }
 0x4cf   : > { %12214 = vrot.lane.b32.xlu0 %v18743_v25, %s19891_s20  ;;  %12408 = vrot.lane.b32.xlu1 %v18743_v25, %s19892_s27 }
 0x4d3   : > { %12404 = vrot.lane.b32.xlu0 %v18737_v21, %s19892_s27  ;;  %12598 = vrot.lane.b32.xlu1 %v18737_v21, %s19893_s29 }
 0x4d7   : > { %12602 = vrot.lane.b32.xlu0 %v18743_v25, %s19893_s29  ;;  %12796 = vrot.lane.b32.xlu1 %v18743_v25, %s19897_s25 }
 0x4db   : > { %12792 = vrot.lane.b32.xlu0 %v18737_v21, %s19897_s25  ;;  %12986 = vrot.lane.b32.xlu1 %v18737_v21, %s19898_s15 }
 0x4df   : > { %12990 = vrot.lane.b32.xlu0 %v18743_v25, %s19898_s15  ;;  %13184 = vrot.lane.b32.xlu1 %v18743_v25, %s19899_s21 }
 0x4e3   : > { %13180 = vrot.lane.b32.xlu0 %v18737_v21, %s19899_s21  ;;  %13374 = vrot.lane.b32.xlu1 %v18737_v21, %s19900_s2 }
 0x4e7   : > { %13378 = vrot.lane.b32.xlu0 %v18743_v25, %s19900_s2  ;;  %13730 = vrot.lane.b32.xlu1 %v18743_v25, %s19901_s3 }
 0x4eb   : > { %13726 = vrot.lane.b32.xlu0 %v18737_v21, %s19901_s3  ;;  %13920 = vrot.lane.b32.xlu1 %v18737_v21, %s19902_s28 }
 0x4ef   : > { %13924 = vrot.lane.b32.xlu0 %v18743_v25, %s19902_s28  ;;  %14118 = vrot.lane.b32.xlu1 %v18743_v25, %s19903_s24 }
 0x4f3   : > { %14114 = vrot.lane.b32.xlu0 %v18737_v21, %s19903_s24  ;;  %14308 = vrot.lane.b32.xlu1 %v18737_v21, %s19904_s26 }
 0x4f7   : > { %14312 = vrot.lane.b32.xlu0 %v18743_v25, %s19904_s26  ;;  %14506 = vrot.lane.b32.xlu1 %v18743_v25, %s19896_s18 }
 0x4fb   : > { %14502 = vrot.lane.b32.xlu0 %v18737_v21, %s19896_s18  ;;  %14696 = vrot.lane.b32.xlu1 %v18737_v21, %s19886_s16 }
 0x4ff   : > { %14700 = vrot.lane.b32.xlu0 %v18743_v25, %s19886_s16  ;;  %14894 = vrot.lane.b32.xlu1 %v18743_v25, %s19887_s17 }
 0x503   : > { %14890 = vrot.lane.b32.xlu0 %v18737_v21, %s19887_s17  ;;  %15084 = vrot.lane.b32.xlu1 %v18737_v21, %s19888_s23 }
 0x507   : > { %15088 = vrot.lane.b32.xlu0 %v18743_v25, %s19888_s23  ;;  %15282 = vrot.lane.b32.xlu1 %v18743_v25, %s19889_s0 }
 0x50b   : > { %15278 = vrot.lane.b32.xlu0 %v18737_v21, %s19889_s0  ;;  %15472 = vrot.lane.b32.xlu1 %v18737_v21, %s19890_s30 }
 0x50f   : > { %15476 = vrot.lane.b32.xlu0 %v18743_v25, %s19890_s30  ;;  %15670 = vrot.lane.b32.xlu1 %v18743_v25, %s19891_s20 }
 0x513   : > { %15666 = vrot.lane.b32.xlu0 %v18737_v21, %s19891_s20  ;;  %15860 = vrot.lane.b32.xlu1 %v18737_v21, %s19892_s27 }
 0x517   : > { %15864 = vrot.lane.b32.xlu0 %v18743_v25, %s19892_s27  ;;  %11056 = vrot.lane.b32.xlu1 %v18885_v55, %s19896_s18 }
 0x51b   : > { %11052 = vrot.lane.b32.xlu0 %v18895_v31, %s19896_s18  ;;  %11242 = vrot.lane.b32.xlu1 %v18895_v31, %s19886_s16 }
 0x51f   : > { %11246 = vrot.lane.b32.xlu0 %v18885_v55, %s19886_s16  ;;  %11440 = vrot.lane.b32.xlu1 %v18885_v55, %s19887_s17 }
 0x523   : > { %11436 = vrot.lane.b32.xlu0 %v18895_v31, %s19887_s17  ;;  %11630 = vrot.lane.b32.xlu1 %v18895_v31, %s19888_s23  ;;  %v18913_v14 = vpop.permute.xlu1 %11050 }
 0x527   : > { %11634 = vrot.lane.b32.xlu0 %v18885_v55, %s19888_s23  ;;  %11828 = vrot.lane.b32.xlu1 %v18885_v55, %s19889_s0 }
 0x529   : > { %v18921_v34 = vpop.permute.xlu1 %11244  ;;  %v18923_v24 = vpop.permute.xlu0 %11054 }
 0x52b   : > { %11824 = vrot.lane.b32.xlu0 %v18895_v31, %s19889_s0  ;;  %12018 = vrot.lane.b32.xlu1 %v18895_v31, %s19890_s30 }
 0x52d   : > { %v18929_v12 = vpop.permute.xlu1 %11434  ;;  %v18931_v51 = vpop.permute.xlu0 %11240 }
 0x52f   : > { %12022 = vrot.lane.b32.xlu0 %v18885_v55, %s19890_s30  ;;  %12216 = vrot.lane.b32.xlu1 %v18885_v55, %s19891_s20 }
 0x531   : > { %v18937_v47 = vpop.permute.xlu1 %11632  ;;  %v18939_v33 = vpop.permute.xlu0 %11438 }
 0x533   : > { %12212 = vrot.lane.b32.xlu0 %v18895_v31, %s19891_s20  ;;  %12406 = vrot.lane.b32.xlu1 %v18895_v31, %s19892_s27 }
 0x535   : > { %v18945_v8 = vpop.permute.xlu1 %11822  ;;  %v18947_v11 = vpop.permute.xlu0 %11628 }
 0x537   : > { %12410 = vrot.lane.b32.xlu0 %v18885_v55, %s19892_s27  ;;  %12604 = vrot.lane.b32.xlu1 %v18885_v55, %s19893_s29 }
 0x539   : > { %v18953_v49 = vpop.permute.xlu1 %12020  ;;  %v18955_v44 = vpop.permute.xlu0 %11826 }
 0x53b   : > { %12600 = vrot.lane.b32.xlu0 %v18895_v31, %s19893_s29  ;;  %12794 = vrot.lane.b32.xlu1 %v18895_v31, %s19897_s25 }
 0x53d   : > { %v18961_v29 = vpop.permute.xlu1 %12210  ;;  %v18963_v57 = vpop.permute.xlu0 %12016 }
 0x53f   : > { %12798 = vrot.lane.b32.xlu0 %v18885_v55, %s19897_s25  ;;  %12992 = vrot.lane.b32.xlu1 %v18885_v55, %s19898_s15  ;;  %s20003_s25 = sld [smem:[#allocation7_spill]] }
 0x541   : > { %v18969_v10 = vpop.permute.xlu1 %12408  ;;  %v18971_v17 = vpop.permute.xlu0 %12214 }
 0x543   : > { %12988 = vrot.lane.b32.xlu0 %v18895_v31, %s19898_s15  ;;  %13182 = vrot.lane.b32.xlu1 %v18895_v31, %s19899_s21  ;;  %s20004_s15 = sld [smem:[#allocation10_spill]] }
 0x545   : > { %v18977_v18 = vpop.permute.xlu1 %12598  ;;  %v18979_v54 = vpop.permute.xlu0 %12404  ;;  %s485_s19 = sand.u32 1, %s20003_s25  }
 0x546   : > { %s16413_s14 = sshll.u32 %s485_s19, 5 }
 0x547   : > { %13186 = vrot.lane.b32.xlu0 %v18885_v55, %s19899_s21  ;;  %15868 = vrot.lane.b32.xlu1 %v19913_v38, %s19892_s27 }
 0x549   : > { %v18985_v35 = vpop.permute.xlu1 %12796  ;;  %v18987_v36 = vpop.permute.xlu0 %12602  ;;  %s16660_s22 = sshll.u32 %s20004_s15, 9 }
 0x54b   : > { %13380 = vrot.lane.b32.xlu1 %v18885_v55, %s19900_s2  ;;  %13376 = vrot.lane.b32.xlu0 %v18895_v31, %s19900_s2 }
 0x54d   : > { %v18993_v50 = vpop.permute.xlu1 %12986  ;;  %v18995_v4 = vpop.permute.xlu0 %12792 }
 0x54f   : > { %13732 = vrot.lane.b32.xlu1 %v18885_v55, %s19901_s3  ;;  %13728 = vrot.lane.b32.xlu0 %v18895_v31, %s19901_s3 }
 0x551   : > { %v19001_v13 = vpop.permute.xlu1 %13184  ;;  %v19003_v40 = vpop.permute.xlu0 %12990 }
 0x553   : > { %13922 = vrot.lane.b32.xlu1 %v18895_v31, %s19902_s28  ;;  %13926 = vrot.lane.b32.xlu0 %v18885_v55, %s19902_s28 }
 0x555   : > { %v19009_v39 = vpop.permute.xlu1 %13374  ;;  %v19011_v59 = vpop.permute.xlu0 %13180 }
 0x557   : > { %14120 = vrot.lane.b32.xlu1 %v18885_v55, %s19903_s24  ;;  %14116 = vrot.lane.b32.xlu0 %v18895_v31, %s19903_s24  ;;  %s20005_s24 = sld [smem:[#allocation47_spill]] }
 0x559   : > { %v19017_v0 = vpop.permute.xlu1 %13730  ;;  %v19019_v16 = vpop.permute.xlu0 %13378 }
 0x55b   : > { %14310 = vrot.lane.b32.xlu1 %v18895_v31, %s19904_s26  ;;  %14314 = vrot.lane.b32.xlu0 %v18885_v55, %s19904_s26 }
 0x55d   : > { %v19025_v48 = vpop.permute.xlu1 %13920  ;;  %v19027_v7 = vpop.permute.xlu0 %13726 }
 0x55f   : > { %14508 = vrot.lane.b32.xlu1 %v18885_v55, %s19896_s18  ;;  %14504 = vrot.lane.b32.xlu0 %v18895_v31, %s19896_s18  ;;  %s20002_s18 = sld [smem:[#allocation46_spill]] }
 0x561   : > { %v19033_v43 = vpop.permute.xlu1 %14118  ;;  %v19035_v42 = vpop.permute.xlu0 %13924 }
 0x563   : > { %14698 = vrot.lane.b32.xlu1 %v18895_v31, %s19886_s16  ;;  %14702 = vrot.lane.b32.xlu0 %v18885_v55, %s19886_s16  ;;  %s16336_s16 = scalar_lea.sflag [#allocation4], %s485_s19 }
 0x565   : > { %v19041_v60 = vpop.permute.xlu1 %14308  ;;  %v19043_v41 = vpop.permute.xlu0 %14114 }
 0x566   : > { %19939 = vst [vmem:[#allocation27_spill] sm:$0xff] %v19041_v60 }
 0x567   : > { %14896 = vrot.lane.b32.xlu1 %v18885_v55, %s19887_s17  ;;  %14892 = vrot.lane.b32.xlu0 %v18895_v31, %s19887_s17  ;;  %s20008_s17 = sld [smem:[#allocation48_spill]] }
 0x569   : > { %v19049_v62 = vpop.permute.xlu1 %14506  ;;  %v19051_v63 = vpop.permute.xlu0 %14312 }
 0x56a   : > { %19940 = vst [vmem:[#allocation28_spill] sm:$0xff] %v19049_v62 }
 0x56b   : > { %15086 = vrot.lane.b32.xlu1 %v18895_v31, %s19888_s23  ;;  %15090 = vrot.lane.b32.xlu0 %v18885_v55, %s19888_s23 }
 0x56d   : > { %v19057_v28 = vpop.permute.xlu1 %14696  ;;  %v19059_v6 = vpop.permute.xlu0 %14502 }
 0x56e   : > { %19941 = vst [vmem:[#allocation29_spill] sm:$0xff] %v19057_v28  ;;  %19942 = vst [vmem:[#allocation30_spill] sm:$0xff] %v19059_v6 }
 0x56f   : > { %15284 = vrot.lane.b32.xlu1 %v18885_v55, %s19889_s0  ;;  %15280 = vrot.lane.b32.xlu0 %v18895_v31, %s19889_s0  ;;  %s487_s0 = scalar_lea.vmem [#allocation3], %s16413_s14 }
 0x570   : > { %s16350_s2 = sshll.u32 %s487_s0, 4  ;;  %s19737_s2 = int_to_ptr.vmem [resolvable:$true] %s16350_s2 }
 0x571   : > { %v19065_v26 = vpop.permute.xlu1 %14894  ;;  %v19067_v9 = vpop.permute.xlu0 %14700  ;;  %s16729_s23 = scalar_lea.vmem %s19737_s2, 512 }
 0x572   : > { %19943 = vst [vmem:[#allocation31_spill] sm:$0xff] %v19065_v26  ;;  %19944 = vst [vmem:[#allocation32_spill] sm:$0xff] %v19067_v9  ;;  %p16730_p11 = scmp.ne.s32.totalorder %s19737_s2, %s16729_s23 }
 0x573   : > { %15474 = vrot.lane.b32.xlu1 %v18895_v31, %s19890_s30  ;;  %15478 = vrot.lane.b32.xlu0 %v18885_v55, %s19890_s30  ;;  %s16812_s30 = smov [#allocation3]  }
 0x574   : > { %p16731_p12 = pnand %p16730_p11, %p16931_p5 }
 0x575   : > { %v19073_v22 = vpop.permute.xlu1 %15084  ;;  %v19075_v28 = vpop.permute.xlu0 %14890 }
 0x576   : > { %19945 = vst [vmem:[#allocation33_spill] sm:$0xff] %v19073_v22  ;;  %19946 = vst [vmem:[#allocation34_spill] sm:$0xff] %v19075_v28  ;;  %p16732_p13 = pneg %p16731_p12 }
 0x577   : > { %15672 = vrot.lane.b32.xlu1 %v18885_v55, %s19891_s20  ;;  %15668 = vrot.lane.b32.xlu0 %v18895_v31, %s19891_s20 }
 0x579   : > { %v19081_v15 = vpop.permute.xlu1 %15282  ;;  %v19083_v26 = vpop.permute.xlu0 %15088 }
 0x57a   : > { %19947 = vst [vmem:[#allocation35_spill] sm:$0xff] %v19081_v15  ;;  %19948 = vst [vmem:[#allocation36_spill] sm:$0xff] %v19083_v26 }
 0x57b   : > { %15862 = vrot.lane.b32.xlu1 %v18895_v31, %s19892_s27  ;;  %16054 = vrot.lane.b32.xlu0 %v18737_v21, %s19893_s29 }
 0x57d   : > { %v19089_v9 = vpop.permute.xlu1 %15472  ;;  %v19091_v22 = vpop.permute.xlu0 %15278 }
 0x57e   : > { %19949 = vst [vmem:[#allocation37_spill] sm:$0xff] %v19089_v9  ;;  %19950 = vst [vmem:[#allocation38_spill] sm:$0xff] %v19091_v22  ;;  %v16247_v9 = vld [vmem:[%s19785_s8] sm:$0xff] }
 0x57f   : > { %16058 = vrot.lane.b32.xlu1 %v18743_v25, %s19893_s29  ;;  %15866 = vrot.lane.b32.xlu0 %v18885_v55, %s19892_s27  ;;  %s16733_s27 = sshll.u32 %s16812_s30, 4  ;;  %s16734_s27 = int_to_ptr.vmem [resolvable:$false] %s16733_s27 }
 0x580   : > { %p16736_p0 = scmp.lt.s32.totalorder %s19737_s2, %s16734_s27 }
 0x581   : > { %v19097_v28 = vpop.permute.xlu1 %15670  ;;  %v19099_v15 = vpop.permute.xlu0 %15476 }
 0x582   : > { %19951 = vst [vmem:[#allocation39_spill] sm:$0xff] %v19097_v28  ;;  %19952 = vst [vmem:[#allocation40_spill] sm:$0xff] %v19099_v15  ;;  %v16257_v28 = vld [vmem:[%s19786_s9] sm:$0xff] }
 0x583   : > { %16060 = vrot.lane.b32.xlu1 %v18885_v55, %s19893_s29  ;;  %16056 = vrot.lane.b32.xlu0 %v18895_v31, %s19893_s29 }
 0x585   : > { %v19108_v22 = vpop.permute.xlu1 %15860  ;;  %v19110_v26 = vpop.permute.xlu0 %15666 }
 0x586   : > { %19953 = vst [vmem:[#allocation41_spill] sm:$0xff] %v19108_v22  ;;  %19954 = vst [vmem:[#allocation42_spill] sm:$0xff] %v19110_v26 }
 0x587   : > { %16250 = vperm.xlu1 %16720, %v16247_v9   ;;  %16062 = vrot.lane.b32.xlu0 %v19913_v38, %s19893_s29  ;;  %v11037_v9 = vld [vmem:[%s19784_s7] sm:$0xff]  ;;  %s19735_s29 = scalar_lea.hbm %s20008_s17, %s16660_s22 }
 0x589   : > { %v11057_v15 = vpop.permute.xlu1 %11056  ;;  %v19117_v6 = vpop.permute.xlu0 %15864 }
 0x58a   : > { %v11061_v32 = vsel %vm524_vm0, %v18923_v24, %v11057_v15  ;;  %v11058_v15 = vsel %vm524_vm0, %v18785_v20, %v18913_v14  ;;  %v11237_v20 = vld [vmem:[%s19784_s7 + $0x8] sm:$0xff] }
 0x58b   : > { %11140 = vmatprep.subr.mxu1 %v11061_v32  ;;  %16260 = vperm.xlu0 %16719, %v16257_v28  }
 0x58d   : > { %v11243_v62 = vpop.permute.xlu1 %11242  ;;  %v11053_v22 = vpop.permute.xlu0 %11052 }
 0x58e   : > { %v11060_v26 = vsel %vm524_vm0, %v11053_v22, %v18923_v24  ;;  %v11059_v60 = vsel %vm524_vm0, %v18913_v14, %v11053_v22  ;;  %v11249_v32 = vsel %vm716_vm2, %v18931_v51, %v11243_v62 }
 0x58f   : > { %11069 = vmatprep.subr.mxu0 %v11059_v60  ;;  %11141 = vmatpush1.msra.mxu1 %v11060_v26  ;;  %v11248_v60 = vsel %vm716_vm2, %v18793_v27, %v18931_v51  ;;  %v11250_v26 = vsel %vm716_vm2, %v11243_v62, %v18921_v34 }
 0x590   : > { %11070 = vmatpush1.msra.mxu0 %v11058_v15  ;;  %16575 = vmatmul.mubr.msk.f32.vlgmr.msra.gmra.mrb[108].mxu1 %vm533_vm1, %v11037_v9  ;;  %v11442_v15 = vsel %vm912_vm3, %v18791_v23, %v18929_v12 }
 0x591   : > { %v11441_v28 = vpop.permute.xlu1 %11440  ;;  %16574 = vmatmul.mubr.msk.f32.vlgmr.msra.gmra.mrb[108].mxu0 %vm533_vm1, %v11037_v9  ;;  %11259 = vmatprep.subr.mxu0 %v11249_v32  ;;  %v11247_v24 = vpop.permute.xlu0 %11246 }
 0x592   : > { %11260 = vmatpush1.msra.mxu0 %v11248_v60  ;;  %v11251_v22 = vsel %vm716_vm2, %v18921_v34, %v11247_v24  ;;  %11323 = vmatprep.mubr.f32.mxu0 %v19913_v38  ;;  %v11445_v27 = vsel %vm912_vm3, %v18939_v33, %v11441_v28  ;;  %v11431_v34 = vld [vmem:[%s19784_s7 + $0x10] sm:$0xff]  ;;  %v11636_v24 = vsel %vm1108_vm4, %v18805_v45, %v18947_v11 }
 0x593   : > { %11330 = vmatprep.subr.mxu1 %v11251_v22  ;;  %11394 = vmatprep.mubr.f32.mxu1 %v19913_v38 }
 0x594   : > { %11331 = vmatpush1.msra.mxu1 %v11250_v26  ;;  %v11819_v26 = vld [vmem:[%s19784_s7 + $0x20] sm:$0xff] }
 0x595   : > { %v11631_v14 = vpop.permute.xlu1 %11630  ;;  %16576 = vmatmul.mubr.msk.f32.vlgmr.msra.gmra.mrb[110].mxu0 %vm533_vm1, %v11237_v20  ;;  %16577 = vmatmul.mubr.msk.f32.vlgmr.msra.gmra.mrb[110].mxu1 %vm533_vm1, %v11237_v20  ;;  %v11437_v51 = vpop.permute.xlu0 %11436 }
 0x596   : > { %11524 = vmatprep.subr.mxu1 %v11445_v27  ;;  %v11444_v9 = vsel %vm912_vm3, %v11437_v51, %v18939_v33  ;;  %v11443_v62 = vsel %vm912_vm3, %v18929_v12, %v11437_v51  ;;  %11517 = vmatprep.mubr.f32.mxu0 %v19913_v38  ;;  %v11637_v33 = vsel %vm1108_vm4, %v18947_v11, %v11631_v14  ;;  %v11625_v12 = vld [vmem:[%s19784_s7 + $0x18] sm:$0xff] }
 0x597   : > { %11453 = vmatprep.subr.mxu0 %v11443_v62  ;;  %11525 = vmatpush1.msra.mxu1 %v11444_v9  ;;  %v11638_v60 = vsel %vm1108_vm4, %v11631_v14, %v18937_v47  ;;  %v11830_v14 = vsel %vm1304_vm5, %v18803_v56, %v18945_v8  ;;  %v12024_v9 = vsel %vm1500_vm6, %v18813_v37, %v18963_v57 }
 0x598   : > { %11454 = vmatpush1.msra.mxu0 %v11442_v15  ;;  %11588 = vmatprep.mubr.f32.mxu1 %v19913_v38 }
 0x599   : > { %v11829_v32 = vpop.permute.xlu1 %11828  ;;  %16579 = vmatmul.mubr.msk.f32.vlgmr.msra.gmra.mrb[112].mxu0 %vm533_vm1, %v11431_v34  ;;  %16580 = vmatmul.mubr.msk.f32.vlgmr.msra.gmra.mrb[112].mxu1 %vm533_vm1, %v11431_v34  ;;  %v11635_v28 = vpop.permute.xlu0 %11634 }
 0x59a   : > { %11647 = vmatprep.subr.mxu0 %v11637_v33  ;;  %v11639_v23 = vsel %vm1108_vm4, %v18937_v47, %v11635_v28  ;;  %11711 = vmatprep.mubr.f32.mxu0 %v19913_v38  ;;  %v11833_v45 = vsel %vm1304_vm5, %v18955_v44, %v11829_v32  ;;  %v12207_v32 = vld [vmem:[%s19784_s7 + $0x30] sm:$0xff]  ;;  %v12218_v33 = vsel %vm1696_vm7, %v18811_v19, %v18961_v29 }
 0x59b   : > { %11648 = vmatpush1.msra.mxu0 %v11636_v24  ;;  %11718 = vmatprep.subr.mxu1 %v11639_v23  ;;  %v12412_v23 = vsel %vm1892_vm8, %v18825_v53, %v18979_v54 }
 0x59c   : > { %11719 = vmatpush1.msra.mxu1 %v11638_v60  ;;  %11782 = vmatprep.mubr.f32.mxu1 %v19913_v38 }
 0x59d   : > { %v12019_v22 = vpop.permute.xlu1 %12018  ;;  %16582 = vmatmul.mubr.msk.f32.vlgmr.msra.gmra.mrb[114].mxu0 %vm533_vm1, %v11625_v12  ;;  %16583 = vmatmul.mubr.msk.f32.vlgmr.msra.gmra.mrb[114].mxu1 %vm533_vm1, %v11625_v12  ;;  %v11825_v11 = vpop.permute.xlu0 %11824 }
 0x59e   : > { %11912 = vmatprep.subr.mxu1 %v11833_v45  ;;  %v11832_v20 = vsel %vm1304_vm5, %v11825_v11, %v18955_v44  ;;  %v11831_v47 = vsel %vm1304_vm5, %v18945_v8, %v11825_v11  ;;  %11905 = vmatprep.mubr.f32.mxu0 %v19913_v38  ;;  %v12025_v44 = vsel %vm1500_vm6, %v18963_v57, %v12019_v22  ;;  %v12013_v8 = vld [vmem:[%s19784_s7 + $0x28] sm:$0xff]  ;;  %v12595_v45 = vld [vmem:[%s19784_s7 + $0x40] sm:$0xff] }
 0x59f   : > { %11841 = vmatprep.subr.mxu0 %v11831_v47  ;;  %11913 = vmatpush1.msra.mxu1 %v11832_v20  ;;  %v12026_v62 = vsel %vm1500_vm6, %v12019_v22, %v18953_v49  ;;  %v12606_v11 = vsel %vm2088_vm9, %v18823_v46, %v18977_v18 }
 0x5a0   : > { %11842 = vmatpush1.msra.mxu0 %v11830_v14  ;;  %11976 = vmatprep.mubr.f32.mxu1 %v19913_v38 }
 0x5a1   : > { %v12217_v27 = vpop.permute.xlu1 %12216  ;;  %16585 = vmatmul.mubr.msk.f32.vlgmr.msra.gmra.mrb[116].mxu0 %vm533_vm1, %v11819_v26  ;;  %16586 = vmatmul.mubr.msk.f32.vlgmr.msra.gmra.mrb[116].mxu1 %vm533_vm1, %v11819_v26  ;;  %v12023_v51 = vpop.permute.xlu0 %12022  ;;  %v12800_v26 = vsel %vm2284_vm10, %v18833_v61, %v18995_v4 }
 0x5a2   : > { %12035 = vmatprep.subr.mxu0 %v12025_v44  ;;  %v12027_v56 = vsel %vm1500_vm6, %v18953_v49, %v12023_v51  ;;  %12099 = vmatprep.mubr.f32.mxu0 %v19913_v38  ;;  %v12221_v37 = vsel %vm1696_vm7, %v18971_v17, %v12217_v27  ;;  %v12983_v51 = vld [vmem:[%s19784_s7 + $0x50] sm:$0xff] }
 0x5a3   : > { %12036 = vmatpush1.msra.mxu0 %v12024_v9  ;;  %12106 = vmatprep.subr.mxu1 %v12027_v56  ;;  %v12994_v9 = vsel %vm533_vm1, %v18831_v30, %v18993_v50 }
 0x5a4   : > { %12107 = vmatpush1.msra.mxu1 %v12026_v62  ;;  %12170 = vmatprep.mubr.f32.mxu1 %v19913_v38  ;;  %v13188_v62 = vsel %vm2675_vm11, %v18845_v58, %v19011_v59 }
 0x5a5   : > { %v12407_v34 = vpop.permute.xlu1 %12406  ;;  %16588 = vmatmul.mubr.msk.f32.vlgmr.msra.gmra.mrb[118].mxu0 %vm533_vm1, %v12013_v8  ;;  %16589 = vmatmul.mubr.msk.f32.vlgmr.msra.gmra.mrb[118].mxu1 %vm533_vm1, %v12013_v8  ;;  %v12213_v57 = vpop.permute.xlu0 %12212 }
 0x5a6   : > { %12300 = vmatprep.subr.mxu1 %v12221_v37  ;;  %v12220_v15 = vsel %vm1696_vm7, %v12213_v57, %v18971_v17  ;;  %v12219_v49 = vsel %vm1696_vm7, %v18961_v29, %v12213_v57  ;;  %12293 = vmatprep.mubr.f32.mxu0 %v19913_v38  ;;  %v12413_v17 = vsel %vm1892_vm8, %v18979_v54, %v12407_v34  ;;  %v12401_v29 = vld [vmem:[%s19784_s7 + $0x38] sm:$0xff] }
 0x5a7   : > { %12229 = vmatprep.subr.mxu0 %v12219_v49  ;;  %12301 = vmatpush1.msra.mxu1 %v12220_v15  ;;  %v12414_v12 = vsel %vm1892_vm8, %v12407_v34, %v18969_v10  ;;  %v13371_v15 = vld [vmem:[%s19784_s7 + $0x60] sm:$0xff] }
 0x5a8   : > { %12230 = vmatpush1.msra.mxu0 %v12218_v33  ;;  %12364 = vmatprep.mubr.f32.mxu1 %v19913_v38 }
 0x5a9   : > { %v12605_v28 = vpop.permute.xlu1 %12604  ;;  %16591 = vmatmul.mubr.msk.f32.vlgmr.msra.gmra.mrb[120].mxu0 %vm533_vm1, %v12207_v32  ;;  %16592 = vmatmul.mubr.msk.f32.vlgmr.msra.gmra.mrb[120].mxu1 %vm533_vm1, %v12207_v32  ;;  %v12411_v24 = vpop.permute.xlu0 %12410 }
 0x5aa   : > { %12423 = vmatprep.subr.mxu0 %v12413_v17  ;;  %v12415_v19 = vsel %vm1892_vm8, %v18969_v10, %v12411_v24  ;;  %12487 = vmatprep.mubr.f32.mxu0 %v19913_v38  ;;  %v12609_v53 = vsel %vm2088_vm9, %v18987_v36, %v12605_v28  ;;  %v13715_v17 = vld [vmem:[%s19784_s7 + $0x70] sm:$0xff] }
 0x5ab   : > { %12424 = vmatpush1.msra.mxu0 %v12412_v23  ;;  %12494 = vmatprep.subr.mxu1 %v12415_v19 }
 0x5ac   : > { %12495 = vmatpush1.msra.mxu1 %v12414_v12  ;;  %12558 = vmatprep.mubr.f32.mxu1 %v19913_v38 }
 0x5ad   : > { %v12795_v60 = vpop.permute.xlu1 %12794  ;;  %16594 = vmatmul.mubr.msk.f32.vlgmr.msra.gmra.mrb[122].mxu0 %vm533_vm1, %v12401_v29  ;;  %16595 = vmatmul.mubr.msk.f32.vlgmr.msra.gmra.mrb[122].mxu1 %vm533_vm1, %v12401_v29  ;;  %v12601_v54 = vpop.permute.xlu0 %12600  ;;  %v13919_v29 = vld [vmem:[%s19784_s7 + $0x78] sm:$0xff] }
 0x5ae   : > { %12688 = vmatprep.subr.mxu1 %v12609_v53  ;;  %v12608_v22 = vsel %vm2088_vm9, %v12601_v54, %v18987_v36  ;;  %v12607_v10 = vsel %vm2088_vm9, %v18977_v18, %v12601_v54  ;;  %12681 = vmatprep.mubr.f32.mxu0 %v19913_v38  ;;  %v12801_v36 = vsel %vm2284_vm10, %v18995_v4, %v12795_v60  ;;  %v12789_v18 = vld [vmem:[%s19784_s7 + $0x48] sm:$0xff]  ;;  %v14113_v54 = vld [vmem:[%s19784_s7 + $0x80] sm:$0xff] }
 0x5af   : > { %12617 = vmatprep.subr.mxu0 %v12607_v10  ;;  %12689 = vmatpush1.msra.mxu1 %v12608_v22  ;;  %v12802_v14 = vsel %vm2284_vm10, %v12795_v60, %v18985_v35  ;;  %v19973_v22 = vld [vmem:[#allocation27_spill] sm:$0xff] }
 0x5b0   : > { %12618 = vmatpush1.msra.mxu0 %v12606_v11  ;;  %12752 = vmatprep.mubr.f32.mxu1 %v19913_v38 }
 0x5b1   : > { %v12993_v20 = vpop.permute.xlu1 %12992  ;;  %16597 = vmatmul.mubr.msk.f32.vlgmr.msra.gmra.mrb[124].mxu0 %vm533_vm1, %v12595_v45  ;;  %16598 = vmatmul.mubr.msk.f32.vlgmr.msra.gmra.mrb[124].mxu1 %vm533_vm1, %v12595_v45  ;;  %v12799_v47 = vpop.permute.xlu0 %12798 }
 0x5b2   : > { %12811 = vmatprep.subr.mxu0 %v12801_v36  ;;  %v12803_v46 = vsel %vm2284_vm10, %v18985_v35, %v12799_v47  ;;  %12875 = vmatprep.mubr.f32.mxu0 %v19913_v38  ;;  %v12997_v61 = vsel %vm533_vm1, %v19003_v40, %v12993_v20  ;;  %vm19955_vm10 = vcmask 7168   ;;  %v19977_v20 = vld [vmem:[#allocation20_spill] sm:$0xff]  ;;  %v14307_v47 = vld [vmem:[%s19784_s7 + $0x88] sm:$0xff] }
 0x5b3   : > { %12812 = vmatpush1.msra.mxu0 %v12800_v26  ;;  %12882 = vmatprep.subr.mxu1 %v12803_v46  ;;  %vm19956_vm15 = vmmov %vm19955_vm10 }
 0x5b4   : > { %12883 = vmatpush1.msra.mxu1 %v12802_v14  ;;  %12946 = vmatprep.mubr.f32.mxu1 %v19913_v38  ;;  %vm19957_vm14 = vmmov %vm19955_vm10 }
 0x5b5   : > { %v13183_v27 = vpop.permute.xlu1 %13182  ;;  %16600 = vmatmul.mubr.msk.f32.vlgmr.msra.gmra.mrb[126].mxu0 %vm533_vm1, %v12789_v18  ;;  %16601 = vmatmul.mubr.msk.f32.vlgmr.msra.gmra.mrb[126].mxu1 %vm533_vm1, %v12789_v18  ;;  %v12989_v4 = vpop.permute.xlu0 %12988  ;;  %v19978_v18 = vld [vmem:[#allocation30_spill] sm:$0xff] }
 0x5b6   : > { %13076 = vmatprep.subr.mxu1 %v12997_v61  ;;  %v12996_v44 = vsel %vm533_vm1, %v12989_v4, %v19003_v40  ;;  %v12995_v35 = vsel %vm533_vm1, %v18993_v50, %v12989_v4  ;;  %13069 = vmatprep.mubr.f32.mxu0 %v19913_v38  ;;  %v13189_v40 = vsel %vm2675_vm11, %v19011_v59, %v13183_v27  ;;  %v13177_v50 = vld [vmem:[%s19784_s7 + $0x58] sm:$0xff]  ;;  %v19980_v4 = vld [vmem:[#allocation22_spill] sm:$0xff] }
 0x5b7   : > { %13005 = vmatprep.subr.mxu0 %v12995_v35  ;;  %13077 = vmatpush1.msra.mxu1 %v12996_v44  ;;  %v13190_v34 = vsel %vm2675_vm11, %v13183_v27, %v19001_v13  ;;  %v19979_v27 = vld [vmem:[#allocation32_spill] sm:$0xff]  ;;  %v14501_v35 = vld [vmem:[%s19784_s7 + $0x90] sm:$0xff] }
 0x5b8   : > { %13006 = vmatpush1.msra.mxu0 %v12994_v9  ;;  %13140 = vmatprep.mubr.f32.mxu1 %v19913_v38 }
 0x5b9   : > { %v19291_v56 = vpop.permute.xlu1 %15868  ;;  %16603 = vmatmul.mubr.msk.f32.vlgmr.msra.gmra.mrb[128].mxu0 %vm533_vm1, %v12983_v51  ;;  %16604 = vmatmul.mubr.msk.f32.vlgmr.msra.gmra.mrb[128].mxu1 %vm533_vm1, %v12983_v51  ;;  %v13187_v8 = vpop.permute.xlu0 %13186 }
 0x5ba   : > { %13199 = vmatprep.subr.mxu0 %v13189_v40  ;;  %v13191_v30 = vsel %vm2675_vm11, %v19001_v13, %v13187_v8  ;;  %13263 = vmatprep.mubr.f32.mxu0 %v19913_v38  ;;  %vm19958_vm11 = vmmov %vm19955_vm10  ;;  %v19981_v40 = vld [vmem:[#allocation29_spill] sm:$0xff] }
 0x5bb   : > { %13200 = vmatpush1.msra.mxu0 %v13188_v62  ;;  %13270 = vmatprep.subr.mxu1 %v13191_v30  ;;  %v13382_v49 = vsel %vm19958_vm11, %v18843_v3, %v19009_v39  ;;  %v19982_v30 = vld [vmem:[#allocation31_spill] sm:$0xff] }
 0x5bc   : > { %13271 = vmatpush1.msra.mxu1 %v13190_v34  ;;  %13334 = vmatprep.mubr.f32.mxu1 %v19913_v38  ;;  %v19983_v34 = vld [vmem:[#allocation21_spill] sm:$0xff] }
 0x5bd   : > { %v13381_v37 = vpop.permute.xlu1 %13380  ;;  %16606 = vmatmul.mubr.msk.f32.vlgmr.msra.gmra.mrb[130].mxu0 %vm533_vm1, %v13177_v50  ;;  %16607 = vmatmul.mubr.msk.f32.vlgmr.msra.gmra.mrb[130].mxu1 %vm533_vm1, %v13177_v50  ;;  %v13377_v58 = vpop.permute.xlu0 %13376 }
 0x5be   : > { %v13384_v59 = vsel %vm19955_vm10, %v13377_v58, %v19019_v16  ;;  %v13383_v57 = vsel %vm19956_vm15, %v19009_v39, %v13377_v58  ;;  %v13385_v13 = vsel %vm19957_vm14, %v19019_v16, %v13381_v37  ;;  %13457 = vmatprep.mubr.f32.mxu0 %v19913_v38  ;;  %13528 = vmatprep.mubr.f32.mxu1 %v19913_v38  ;;  %v13565_v39 = vld [vmem:[%s19784_s7 + $0x68] sm:$0xff]  ;;  %vm19961_vm10 = vmmov %vm19960_vm12  ;;  %vm19963_vm14 = vcmask 990208   ;;  %v14695_v58 = vld [vmem:[%s19784_s7 + $0x98] sm:$0xff] }
 0x5bf   : > { %13393 = vmatprep.subr.mxu0 %v13383_v57  ;;  %13464 = vmatprep.subr.mxu1 %v13385_v13  ;;  %vm19962_vm15 = vmmov %vm19961_vm10 }
 0x5c0   : > { %13394 = vmatpush1.msra.mxu0 %v13382_v49  ;;  %13465 = vmatpush1.msra.mxu1 %v13384_v59  ;;  %vm19964_vm11 = vmmov %vm19963_vm14 }
 0x5c1   : > { %v13733_v32 = vpop.permute.xlu1 %13732  ;;  %16609 = vmatmul.mubr.msk.f32.vlgmr.msra.gmra.mrb[132].mxu0 %vm533_vm1, %v13371_v15  ;;  %16610 = vmatmul.mubr.msk.f32.vlgmr.msra.gmra.mrb[132].mxu1 %vm533_vm1, %v13371_v15  ;;  %v13729_v16 = vpop.permute.xlu0 %13728  ;;  %v19984_v15 = vld [vmem:[#allocation34_spill] sm:$0xff] }
 0x5c2   : > { %13569 = vmatprep.subr.mxu0 %v18895_v31  ;;  %13640 = vmatprep.subr.mxu1 %v18885_v55  ;;  %v13737_v33 = vsel %vm19959_vm13, %v13729_v16, %v19017_v0  ;;  %v13739_v3 = vsel %vm19960_vm12, %v13733_v32, %v18853_v52  ;;  %vm19965_vm13 = vmmov %vm19964_vm11 }
 0x5c3   : > { %13570 = vmatpush1.msra.mxu0 %v18737_v21  ;;  %13641 = vmatpush1.msra.mxu1 %v18743_v25  ;;  %v13738_v21 = vsel %vm19961_vm10, %v19017_v0, %v13733_v32  ;;  %v13736_v25 = vsel %vm19962_vm15, %v19027_v7, %v13729_v16  ;;  %vm19966_vm12 = vmmov %vm19964_vm11  ;;  %vm19967_vm10 = vcmask 982016   ;;  %v19985_v32 = vld [vmem:[#allocation36_spill] sm:$0xff] }
 0x5c4   : > { %13747 = vmatprep.subr.mxu0 %v13737_v33  ;;  %13818 = vmatprep.subr.mxu1 %v13739_v3  ;;  %vm19968_vm15 = vmmov %vm19967_vm10  ;;  %v19986_v33 = vld [vmem:[#allocation23_spill] sm:$0xff] }
 0x5c5   : > { %13633 = vmatprep.mubr.f32.mxu0 %v19913_v38  ;;  %13704 = vmatprep.mubr.f32.mxu1 %v19913_v38  ;;  %v13923_v55 = vpop.permute.xlu1 %13922  ;;  %v13927_v31 = vpop.permute.xlu0 %13926 }
 0x5c6   : > { %16612 = vmatmul.mubr.msk.f32.vlgmr.msra.gmra.mrb[134].mxu0 %vm533_vm1, %v13565_v39  ;;  %16613 = vmatmul.mubr.msk.f32.vlgmr.msra.gmra.mrb[134].mxu1 %vm533_vm1, %v13565_v39  ;;  %v13931_v52 = vsel %vm19963_vm14, %v13923_v55, %v19035_v42  ;;  %v13933_v28 = vsel %vm19964_vm11, %v13927_v31, %v18851_v2  ;;  %v13930_v24 = vsel %vm19965_vm13, %v19025_v48, %v13923_v55  ;;  %vm19969_vm14 = vmmov %vm19967_vm10  ;;  %vm19971_vm13 = vcmask 973824   ;;  %v14889_v39 = vld [vmem:[%s19784_s7 + $0xa0] sm:$0xff] }
 0x5c7   : > { %13748 = vmatpush1.msra.mxu0 %v13736_v25  ;;  %13819 = vmatpush1.msra.mxu1 %v13738_v21  ;;  %v13932_v23 = vsel %vm19966_vm12, %v19035_v42, %v13927_v31  ;;  %vm19970_vm11 = vmmov %vm19967_vm10  ;;  %v19987_v21 = vld [vmem:[#allocation33_spill] sm:$0xff] }
 0x5c8   : > { %13941 = vmatprep.subr.mxu0 %v13931_v52  ;;  %14012 = vmatprep.subr.mxu1 %v13933_v28  ;;  %vm19972_vm12 = vmmov %vm19971_vm13  ;;  %v19988_v28 = vld [vmem:[#allocation35_spill] sm:$0xff] }
 0x5c9   : > { %13811 = vmatprep.mubr.f32.mxu0 %v19913_v38  ;;  %13882 = vmatprep.mubr.f32.mxu1 %v19913_v38  ;;  %v14121_v0 = vpop.permute.xlu1 %14120  ;;  %v14117_v7 = vpop.permute.xlu0 %14116 }
 0x5ca   : > { %16614 = vmatmul.mubr.msk.f32.vlgmr.msra.gmra.mrb[136].mxu0 %vm533_vm1, %v13715_v17  ;;  %16615 = vmatmul.mubr.msk.f32.vlgmr.msra.gmra.mrb[136].mxu1 %vm533_vm1, %v13715_v17  ;;  %v14125_v2 = vsel %vm19967_vm10, %v14117_v7, %v19033_v43  ;;  %v14127_v19 = vsel %vm19968_vm15, %v14121_v0, %v18867_v1  ;;  %v14126_v12 = vsel %vm19969_vm14, %v19033_v43, %v14121_v0  ;;  %vm19974_vm10 = vmmov %vm19972_vm12  ;;  %v19989_v0 = vld [vmem:[#allocation25_spill] sm:$0xff] }
 0x5cb   : > { %13942 = vmatpush1.msra.mxu0 %v13930_v24  ;;  %14013 = vmatpush1.msra.mxu1 %v13932_v23  ;;  %v14124_v60 = vsel %vm19970_vm11, %v19043_v41, %v14117_v7  ;;  %vm19975_vm15 = vmmov %vm19974_vm10  ;;  %v15083_v24 = vld [vmem:[%s19784_s7 + $0xa8] sm:$0xff] }
 0x5cc   : > { %14135 = vmatprep.subr.mxu0 %v14125_v2  ;;  %14206 = vmatprep.subr.mxu1 %v14127_v19 }
 0x5cd   : > { %14005 = vmatprep.mubr.f32.mxu0 %v19913_v38  ;;  %14076 = vmatprep.mubr.f32.mxu1 %v19913_v38  ;;  %v14311_v48 = vpop.permute.xlu1 %14310  ;;  %v14315_v42 = vpop.permute.xlu0 %14314 }
 0x5ce   : > { %16617 = vmatmul.mubr.msk.f32.vlgmr.msra.gmra.mrb[138].mxu0 %vm533_vm1, %v13919_v29  ;;  %16618 = vmatmul.mubr.msk.f32.vlgmr.msra.gmra.mrb[138].mxu1 %vm533_vm1, %v13919_v29  ;;  %v14319_v1 = vsel %vm19971_vm13, %v14311_v48, %v19051_v63  ;;  %v14321_v53 = vsel %vm19972_vm12, %v14315_v42, %v18865_v5  ;;  %v14318_v10 = vsel %vm19974_vm10, %v19973_v22, %v14311_v48  ;;  %v19976_v5 = vld [vmem:[#allocation28_spill] sm:$0xff]  ;;  %v19990_v29 = vld [vmem:[#allocation38_spill] sm:$0xff] }
 0x5cf   : > { %14136 = vmatpush1.msra.mxu0 %v14124_v60  ;;  %14207 = vmatpush1.msra.mxu1 %v14126_v12  ;;  %v14320_v45 = vsel %vm19975_vm15, %v19051_v63, %v14315_v42  ;;  %v19991_v42 = vld [vmem:[#allocation40_spill] sm:$0xff] }
 0x5d0   : > { %14329 = vmatprep.subr.mxu0 %v14319_v1  ;;  %14400 = vmatprep.subr.mxu1 %v14321_v53  ;;  %v19992_v60 = vld [vmem:[#allocation24_spill] sm:$0xff]  ;;  %v15277_v53 = vld [vmem:[%s19784_s7 + $0xb0] sm:$0xff] }
 0x5d1   : > { %14199 = vmatprep.mubr.f32.mxu0 %v19913_v38  ;;  %14270 = vmatprep.mubr.f32.mxu1 %v19913_v38  ;;  %v14509_v41 = vpop.permute.xlu1 %14508  ;;  %v14505_v43 = vpop.permute.xlu0 %14504 }
 0x5d2   : > { %16620 = vmatmul.mubr.msk.f32.vlgmr.msra.gmra.mrb[140].mxu0 %vm533_vm1, %v14113_v54  ;;  %16621 = vmatmul.mubr.msk.f32.vlgmr.msra.gmra.mrb[140].mxu1 %vm533_vm1, %v14113_v54  ;;  %v14513_v11 = vsel %vm524_vm0, %v14505_v43, %v19976_v5  ;;  %v14515_v36 = vsel %vm524_vm0, %v14509_v41, %v19977_v20  ;;  %v14514_v46 = vsel %vm524_vm0, %v19976_v5, %v14509_v41 }
 0x5d3   : > { %14330 = vmatpush1.msra.mxu0 %v14318_v10  ;;  %14401 = vmatpush1.msra.mxu1 %v14320_v45  ;;  %v14512_v14 = vsel %vm524_vm0, %v19978_v18, %v14505_v43  ;;  %v19993_v43 = vld [vmem:[#allocation37_spill] sm:$0xff]  ;;  %v19994_v45 = vld [vmem:[#allocation39_spill] sm:$0xff] }
 0x5d4   : > { %14523 = vmatprep.subr.mxu0 %v14513_v11  ;;  %14594 = vmatprep.subr.mxu1 %v14515_v36  ;;  %v19995_v11 = vld [vmem:[#allocation26_spill] sm:$0xff]  ;;  %v15471_v36 = vld [vmem:[%s19784_s7 + $0xb8] sm:$0xff] }
 0x5d5   : > { %14393 = vmatprep.mubr.f32.mxu0 %v19913_v38  ;;  %14464 = vmatprep.mubr.f32.mxu1 %v19913_v38  ;;  %v14699_v63 = vpop.permute.xlu1 %14698  ;;  %v14703_v26 = vpop.permute.xlu0 %14702 }
 0x5d6   : > { %16623 = vmatmul.mubr.msk.f32.vlgmr.msra.gmra.mrb[142].mxu0 %vm533_vm1, %v14307_v47  ;;  %16624 = vmatmul.mubr.msk.f32.vlgmr.msra.gmra.mrb[142].mxu1 %vm533_vm1, %v14307_v47  ;;  %v14707_v61 = vsel %vm716_vm2, %v14699_v63, %v19979_v27  ;;  %v14709_v44 = vsel %vm716_vm2, %v14703_v26, %v19980_v4  ;;  %v14706_v8 = vsel %vm716_vm2, %v19981_v40, %v14699_v63  ;;  %v19997_v4 = vld [vmem:[#allocation41_spill] sm:$0xff] }
 0x5d7   : > { %14524 = vmatpush1.msra.mxu0 %v14512_v14  ;;  %14595 = vmatpush1.msra.mxu1 %v14514_v46  ;;  %v14708_v62 = vsel %vm716_vm2, %v19979_v27, %v14703_v26  ;;  %v19996_v46 = vld [vmem:[#allocation42_spill] sm:$0xff]  ;;  %v15665_v27 = vld [vmem:[%s19784_s7 + $0xc0] sm:$0xff]  ;;  %v15859_v40 = vld [vmem:[%s19784_s7 + $0xc8] sm:$0xff] }
 0x5d8   : > { %14717 = vmatprep.subr.mxu0 %v14707_v61  ;;  %14788 = vmatprep.subr.mxu1 %v14709_v44 }
 0x5d9   : > { %14587 = vmatprep.mubr.f32.mxu0 %v19913_v38  ;;  %14658 = vmatprep.mubr.f32.mxu1 %v19913_v38  ;;  %v14897_v51 = vpop.permute.xlu1 %14896  ;;  %v14893_v9 = vpop.permute.xlu0 %14892 }
 0x5da   : > { %16626 = vmatmul.mubr.msk.f32.vlgmr.msra.gmra.mrb[144].mxu0 %vm533_vm1, %v14501_v35  ;;  %16627 = vmatmul.mubr.msk.f32.vlgmr.msra.gmra.mrb[144].mxu1 %vm533_vm1, %v14501_v35  ;;  %v14901_v50 = vsel %vm912_vm3, %v14893_v9, %v19982_v30  ;;  %v14903_v37 = vsel %vm912_vm3, %v14897_v51, %v19983_v34  ;;  %v14902_v13 = vsel %vm912_vm3, %v19982_v30, %v14897_v51 }
 0x5db   : > { %14718 = vmatpush1.msra.mxu0 %v14706_v8  ;;  %14789 = vmatpush1.msra.mxu1 %v14708_v62  ;;  %v14900_v49 = vsel %vm912_vm3, %v19984_v15, %v14893_v9  ;;  %v16053_v62 = vld [vmem:[%s19784_s7 + $0xd0] sm:$0xff] }
 0x5dc   : > { %14911 = vmatprep.subr.mxu0 %v14901_v50  ;;  %14982 = vmatprep.subr.mxu1 %v14903_v37 }
 0x5dd   : > { %14781 = vmatprep.mubr.f32.mxu0 %v19913_v38  ;;  %14852 = vmatprep.mubr.f32.mxu1 %v19913_v38  ;;  %v15087_v59 = vpop.permute.xlu1 %15086  ;;  %v15091_v57 = vpop.permute.xlu0 %15090 }
 0x5de   : > { %16629 = vmatmul.mubr.msk.f32.vlgmr.msra.gmra.mrb[146].mxu0 %vm533_vm1, %v14695_v58  ;;  %16630 = vmatmul.mubr.msk.f32.vlgmr.msra.gmra.mrb[146].mxu1 %vm533_vm1, %v14695_v58  ;;  %v15095_v16 = vsel %vm1108_vm4, %v15087_v59, %v19985_v32  ;;  %v15097_v3 = vsel %vm1108_vm4, %v15091_v57, %v19986_v33  ;;  %v15094_v25 = vsel %vm1108_vm4, %v19987_v21, %v15087_v59  ;;  %v11211_v58 = vld [vmem:[%s19787_s10] ss:$8 sm:$0xf]  ;;  %v16578_v59 = vld [vmem:[%s19787_s10 + $0x1] ss:$8 sm:$0xf] }
 0x5df   : > { %14912 = vmatpush1.msra.mxu0 %v14900_v49  ;;  %14983 = vmatpush1.msra.mxu1 %v14902_v13  ;;  %v15096_v52 = vsel %vm1108_vm4, %v19985_v32, %v15091_v57  ;;  %v19998_v57 = vld [vmem:[#allocation19_spill] sm:$0xff]  ;;  %v19999_v32 = vld [vmem:[#allocation17_spill] sm:$0xff]  ;;  %v20000_v33 = vld [vmem:[#allocation18_spill] sm:$0xff]  ;;  %vm16288_vm4 = vcmask 15360  }
 0x5e0   : > { %15105 = vmatprep.subr.mxu0 %v15095_v16  ;;  %15176 = vmatprep.subr.mxu1 %v15097_v3  ;;  %v11224_v13 = vrot.slane %v11211_v58, %v19998_v57  ;;  %v11228_v16 = vrot.slane %v11211_v58, %v19999_v32  ;;  %v11216_v3 = vrot.slane %v11211_v58, %v20000_v33  ;;  %v16581_v21 = vld [vmem:[%s19787_s10 + $0x2] ss:$8 sm:$0xf] }
 0x5e1   : > { %14975 = vmatprep.mubr.f32.mxu0 %v19913_v38  ;;  %15046 = vmatprep.mubr.f32.mxu1 %v19913_v38  ;;  %v15285_v55 = vpop.permute.xlu1 %15284  ;;  %v15281_v31 = vpop.permute.xlu0 %15280 }
 0x5e2   : > { %16632 = vmatmul.mubr.msk.f32.vlgmr.msra.gmra.mrb[148].mxu0 %vm533_vm1, %v14889_v39  ;;  %16633 = vmatmul.mubr.msk.f32.vlgmr.msra.gmra.mrb[148].mxu1 %vm533_vm1, %v14889_v39  ;;  %v15289_v17 = vsel %vm1304_vm5, %v15281_v31, %v19988_v28  ;;  %v15291_v7 = vsel %vm1304_vm5, %v15285_v55, %v19989_v0  ;;  %v15290_v19 = vsel %vm1304_vm5, %v19988_v28, %v15285_v55 }
 0x5e3   : > { %15106 = vmatpush1.msra.mxu0 %v15094_v25  ;;  %15177 = vmatpush1.msra.mxu1 %v15096_v52  ;;  %v15288_v48 = vsel %vm1304_vm5, %v19990_v29, %v15281_v31  ;;  %v11406_v55 = vrot.slane %v16578_v59, %v20000_v33  ;;  %v11414_v31 = vrot.slane %v16578_v59, %v19998_v57  ;;  %v20001_v25 = vld [vmem:[#allocation16_spill] sm:$0xff] }
 0x5e4   : > { %15299 = vmatprep.subr.mxu0 %v15289_v17  ;;  %15370 = vmatprep.subr.mxu1 %v15291_v7  ;;  %v11220_v52 = vrot.slane %v11211_v58, %v20001_v25  ;;  %v11410_v28 = vrot.slane %v16578_v59, %v20001_v25  ;;  %v11418_v17 = vrot.slane %v16578_v59, %v19999_v32 }
 0x5e5   : > { %15169 = vmatprep.mubr.f32.mxu0 %v19913_v38  ;;  %15240 = vmatprep.mubr.f32.mxu1 %v19913_v38  ;;  %v15475_v23 = vpop.permute.xlu1 %15474  ;;  %v15479_v2 = vpop.permute.xlu0 %15478 }
 0x5e6   : > { %16635 = vmatmul.mubr.msk.f32.vlgmr.msra.gmra.mrb[150].mxu0 %vm533_vm1, %v15083_v24  ;;  %16636 = vmatmul.mubr.msk.f32.vlgmr.msra.gmra.mrb[150].mxu1 %vm533_vm1, %v15083_v24  ;;  %v15483_v12 = vsel %vm1500_vm6, %v15475_v23, %v19991_v42  ;;  %v15485_v1 = vsel %vm1500_vm6, %v15479_v2, %v19992_v60  ;;  %v15482_v22 = vsel %vm1500_vm6, %v19993_v43, %v15475_v23 }
 0x5e7   : > { %15300 = vmatpush1.msra.mxu0 %v15288_v48  ;;  %15371 = vmatpush1.msra.mxu1 %v15290_v19  ;;  %v15484_v10 = vsel %vm1500_vm6, %v19991_v42, %v15479_v2  ;;  %v11600_v2 = vrot.slane %v16581_v21, %v20000_v33  ;;  %v11608_v19 = vrot.slane %v16581_v21, %v19998_v57 }
 0x5e8   : > { %15493 = vmatprep.subr.mxu0 %v15483_v12  ;;  %15564 = vmatprep.subr.mxu1 %v15485_v1  ;;  %v11604_v1 = vrot.slane %v16581_v21, %v20001_v25  ;;  %v11612_v43 = vrot.slane %v16581_v21, %v19999_v32 }
 0x5e9   : > { %15363 = vmatprep.mubr.f32.mxu0 %v19913_v38  ;;  %15434 = vmatprep.mubr.f32.mxu1 %v19913_v38  ;;  %v15673_v54 = vpop.permute.xlu1 %15672  ;;  %v15669_v41 = vpop.permute.xlu0 %15668 }
 0x5ea   : > { %16638 = vmatmul.mubr.msk.f32.vlgmr.msra.gmra.mrb[152].mxu0 %vm533_vm1, %v15277_v53  ;;  %16639 = vmatmul.mubr.msk.f32.vlgmr.msra.gmra.mrb[152].mxu1 %vm533_vm1, %v15277_v53  ;;  %v15677_v5 = vsel %vm1696_vm7, %v15669_v41, %v19994_v45  ;;  %v15679_v20 = vsel %vm1696_vm7, %v15673_v54, %v19995_v11  ;;  %v15678_v26 = vsel %vm1696_vm7, %v19994_v45, %v15673_v54 }
 0x5eb   : > { %15494 = vmatpush1.msra.mxu0 %v15482_v22  ;;  %15565 = vmatpush1.msra.mxu1 %v15484_v10  ;;  %v15676_v18 = vsel %vm1696_vm7, %v19996_v46, %v15669_v41  ;;  %v16584_v22 = vld [vmem:[%s19787_s10 + $0x3] ss:$8 sm:$0xf] }
 0x5ec   : > { %15687 = vmatprep.subr.mxu0 %v15677_v5  ;;  %15758 = vmatprep.subr.mxu1 %v15679_v20 }
 0x5ed   : > { %15557 = vmatprep.mubr.f32.mxu0 %v19913_v38  ;;  %15628 = vmatprep.mubr.f32.mxu1 %v19913_v38  ;;  %v15863_v47 = vpop.permute.xlu1 %15862  ;;  %v16055_v63 = vpop.permute.xlu0 %16054 }
 0x5ee   : > { %16641 = vmatmul.mubr.msk.f32.vlgmr.msra.gmra.mrb[154].mxu0 %vm533_vm1, %v15471_v36  ;;  %16642 = vmatmul.mubr.msk.f32.vlgmr.msra.gmra.mrb[154].mxu1 %vm533_vm1, %v15471_v36  ;;  %v15871_v14 = vsel %vm1892_vm8, %v15863_v47, %v19117_v6  ;;  %v15870_v44 = vsel %vm1892_vm8, %v19997_v4, %v15863_v47  ;;  %v11798_v4 = vrot.slane %v16584_v22, %v20001_v25 }
 0x5ef   : > { %15688 = vmatpush1.msra.mxu0 %v15676_v18  ;;  %15759 = vmatpush1.msra.mxu1 %v15678_v26  ;;  %v11794_v18 = vrot.slane %v16584_v22, %v20000_v33 }
 0x5f0   : > { %15881 = vmatprep.subr.mxu0 %v15871_v14  ;;  %15751 = vmatprep.mubr.f32.mxu0 %v19913_v38  ;;  %v11802_v14 = vrot.slane %v16584_v22, %v19998_v57 }
 0x5f1   : > { %15822 = vmatprep.mubr.f32.mxu1 %v19913_v38  ;;  %v15867_v61 = vpop.permute.xlu0 %15866  ;;  %v16059_v35 = vpop.permute.xlu1 %16058 }
 0x5f2   : > { %16644 = vmatmul.mubr.msk.f32.vlgmr.msra.gmra.mrb[156].mxu0 %vm533_vm1, %v15665_v27  ;;  %16645 = vmatmul.mubr.msk.f32.vlgmr.msra.gmra.mrb[156].mxu1 %vm533_vm1, %v15665_v27  ;;  %v15872_v51 = vsel %vm1892_vm8, %v19117_v6, %v15867_v61  ;;  %v15873_v9 = vsel %vm1892_vm8, %v15867_v61, %v19291_v56 }
 0x5f3   : > { %15882 = vmatpush1.msra.mxu0 %v15870_v44  ;;  %15952 = vmatprep.subr.mxu1 %v15873_v9  ;;  %v11806_v44 = vrot.slane %v16584_v22, %v19999_v32 }
 0x5f4   : > { %15945 = vmatprep.mubr.f32.mxu0 %v19913_v38  ;;  %15953 = vmatpush1.msra.mxu1 %v15872_v51 }
 0x5f5   : > { %16016 = vmatprep.mubr.f32.mxu1 %v19913_v38  ;;  %v16057_v8 = vpop.permute.xlu0 %16056  ;;  %v16061_v30 = vpop.permute.xlu1 %16060 }
 0x5f6   : > { %16647 = vmatmul.mubr.msk.f32.vlgmr.msra.gmra.mrb[158].mxu0 %vm533_vm1, %v15859_v40  ;;  %16648 = vmatmul.mubr.msk.f32.vlgmr.msra.gmra.mrb[158].mxu1 %vm533_vm1, %v15859_v40  ;;  %v16064_v6 = vsel %vm2088_vm9, %v16055_v63, %v16057_v8  ;;  %v16065_v56 = vsel %vm2088_vm9, %v16057_v8, %v16059_v35  ;;  %v16066_v37 = vsel %vm2088_vm9, %v16059_v35, %v16061_v30  ;;  %v16587_v35 = vld [vmem:[%s19787_s10 + $0x4] ss:$8 sm:$0xf] }
 0x5f7   : > { %16075 = vmatprep.subr.mxu0 %v16065_v56  ;;  %16139 = vmatprep.mubr.f32.mxu0 %v19913_v38  ;;  %v11996_v58 = vrot.slane %v16587_v35, %v19998_v57 }
 0x5f8   : > { %16076 = vmatpush1.msra.mxu0 %v16064_v6  ;;  %16210 = vmatprep.mubr.f32.mxu1 %v19913_v38 }
 0x5f9   : > { %v16063_v50 = vpop.permute.xlu0 %16062 }
 0x5fa   : > { %16650 = vmatmul.mubr.msk.f32.vlgmr.msra.gmra.mrb[160].mxu0 %vm533_vm1, %v16053_v62  ;;  %v16067_v34 = vsel %vm2088_vm9, %v16061_v30, %v16063_v50 }
 0x5fb   : > { %16146 = vmatprep.subr.mxu1 %v16067_v34 }
 0x5fc   : > { %16147 = vmatpush1.msra.mxu1 %v16066_v37  ;;  %v11988_v37 = vrot.slane %v16587_v35, %v20000_v33 }
 0x5fd   : > { %16651 = vmatmul.mubr.msk.f32.vlgmr.msra.gmra.mrb[160].mxu1 %vm533_vm1, %v16053_v62 }
 0x663   : > { %v11206_v38 = vpop.f32.mrb[108].mxu1 }
 0x664   : > { %v11135_v15 = vpop.f32.mrb[108].mxu0  ;;  %v11208_v49 = vpop.f32.mrb[109].mxu1  ;;  %v11235_v0 = vmul.f32 %v11224_v13, %v11206_v38  ;;  %v11992_v13 = vrot.slane %v16587_v35, %v20001_v25 }
 0x665   : > { %v11137_v39 = vpop.f32.mrb[109].mxu0  ;;  %v11236_v24 = vmul.f32 %v11228_v16, %v11208_v49  ;;  %v11233_v29 = vmul.f32 %v11216_v3, %v11135_v15  ;;  %v12000_v15 = vrot.slane %v16587_v35, %v19999_v32  ;;  %v16590_v49 = vld [vmem:[%s19787_s10 + $0x5] ss:$8 sm:$0xf] }
 0x666   : > { %v11234_v53 = vmul.f32 %v11220_v52, %v11137_v39 }
 0x668   : > { %v11325_v7 = vpop.f32.mrb[110].mxu0  ;;  %v11396_v23 = vpop.f32.mrb[110].mxu1 }
 0x669   : > { %v11423_v48 = vmul.f32 %v11406_v55, %v11325_v7  ;;  %v11327_v42 = vpop.f32.mrb[111].mxu0  ;;  %v11425_v12 = vmul.f32 %v11414_v31, %v11396_v23  ;;  %v11398_v60 = vpop.f32.mrb[111].mxu1  ;;  %v12182_v7 = vrot.slane %v16590_v49, %v20000_v33 }
 0x66a   : > { %v11424_v54 = vmul.f32 %v11410_v28, %v11327_v42  ;;  %v11426_v41 = vmul.f32 %v11418_v17, %v11398_v60 }
 0x66b   : > { %v11427_v10 = vadd.f32 %v11423_v48, %v11233_v29  ;;  %v11429_v45 = vadd.f32 %v11425_v12, %v11235_v0  ;;  %v12194_v29 = vrot.slane %v16590_v49, %v19999_v32  ;;  %v16593_v48 = vld [vmem:[%s19787_s10 + $0x6] ss:$8 sm:$0xf] }
 0x66c   : > { %v11428_v5 = vadd.f32 %v11424_v54, %v11234_v53  ;;  %v11430_v11 = vadd.f32 %v11426_v41, %v11236_v24  ;;  %v11519_v20 = vpop.f32.mrb[112].mxu0  ;;  %v11590_v36 = vpop.f32.mrb[112].mxu1  ;;  %v12190_v24 = vrot.slane %v16590_v49, %v19998_v57 }
 0x66d   : > { %v11617_v47 = vmul.f32 %v11600_v2, %v11519_v20  ;;  %v11619_v63 = vmul.f32 %v11608_v19, %v11590_v36  ;;  %v11521_v26 = vpop.f32.mrb[113].mxu0  ;;  %v11592_v46 = vpop.f32.mrb[113].mxu1  ;;  %v12186_v19 = vrot.slane %v16590_v49, %v20001_v25  ;;  %v12380_v36 = vrot.slane %v16593_v48, %v20001_v25 }
 0x66e   : > { %v11618_v27 = vmul.f32 %v11604_v1, %v11521_v26  ;;  %v11620_v61 = vmul.f32 %v11612_v43, %v11592_v46 }
 0x66f   : > { %v11621_v51 = vadd.f32 %v11617_v47, %v11427_v10  ;;  %v11623_v9 = vadd.f32 %v11619_v63, %v11429_v45  ;;  %v12376_v45 = vrot.slane %v16593_v48, %v20000_v33  ;;  %v12388_v47 = vrot.slane %v16593_v48, %v19999_v32  ;;  %v16596_v63 = vld [vmem:[%s19787_s10 + $0x7] ss:$8 sm:$0xf] }
 0x670   : > { %v11622_v40 = vadd.f32 %v11618_v27, %v11428_v5  ;;  %v11624_v8 = vadd.f32 %v11620_v61, %v11430_v11  ;;  %v11713_v6 = vpop.f32.mrb[114].mxu0  ;;  %v11784_v56 = vpop.f32.mrb[114].mxu1  ;;  %v12384_v5 = vrot.slane %v16593_v48, %v19998_v57 }
 0x671   : > { %v11811_v62 = vmul.f32 %v11794_v18, %v11713_v6  ;;  %v11813_v30 = vmul.f32 %v11802_v14, %v11784_v56  ;;  %v11715_v50 = vpop.f32.mrb[115].mxu0  ;;  %v11786_v34 = vpop.f32.mrb[115].mxu1  ;;  %v12574_v56 = vrot.slane %v16596_v63, %v20001_v25 }
 0x672   : > { %v11812_v59 = vmul.f32 %v11798_v4, %v11715_v50  ;;  %v11814_v38 = vmul.f32 %v11806_v44, %v11786_v34 }
 0x673   : > { %v11815_v16 = vadd.f32 %v11811_v62, %v11621_v51  ;;  %v11817_v3 = vadd.f32 %v11813_v30, %v11623_v9  ;;  %v12570_v9 = vrot.slane %v16596_v63, %v20000_v33  ;;  %v12582_v62 = vrot.slane %v16596_v63, %v19999_v32  ;;  %v16599_v30 = vld [vmem:[%s19787_s10 + $0x20] ss:$8 sm:$0xf] }
 0x674   : > { %v11816_v39 = vadd.f32 %v11812_v59, %v11622_v40  ;;  %v11818_v55 = vadd.f32 %v11814_v38, %v11624_v8  ;;  %v11907_v31 = vpop.f32.mrb[116].mxu0  ;;  %v11978_v21 = vpop.f32.mrb[116].mxu1  ;;  %v12578_v40 = vrot.slane %v16596_v63, %v19998_v57 }
 0x675   : > { %v12005_v52 = vmul.f32 %v11988_v37, %v11907_v31  ;;  %v12007_v28 = vmul.f32 %v11996_v58, %v11978_v21  ;;  %v11909_v17 = vpop.f32.mrb[117].mxu0  ;;  %v11980_v0 = vpop.f32.mrb[117].mxu1  ;;  %v12768_v21 = vrot.slane %v16599_v30, %v20001_v25 }
 0x676   : > { %v12006_v23 = vmul.f32 %v11992_v13, %v11909_v17  ;;  %v12008_v2 = vmul.f32 %v12000_v15, %v11980_v0 }
 0x677   : > { %v12009_v42 = vadd.f32 %v12005_v52, %v11815_v16  ;;  %v12011_v12 = vadd.f32 %v12007_v28, %v11817_v3  ;;  %v12764_v3 = vrot.slane %v16599_v30, %v20000_v33  ;;  %v12776_v52 = vrot.slane %v16599_v30, %v19999_v32  ;;  %v16602_v28 = vld [vmem:[%s19787_s10 + $0x21] ss:$8 sm:$0xf] }
 0x678   : > { %v12010_v60 = vadd.f32 %v12006_v23, %v11816_v39  ;;  %v12012_v1 = vadd.f32 %v12008_v2, %v11818_v55  ;;  %v12101_v53 = vpop.f32.mrb[118].mxu0  ;;  %v12172_v54 = vpop.f32.mrb[118].mxu1  ;;  %v12772_v39 = vrot.slane %v16599_v30, %v19998_v57 }
 0x679   : > { %v12199_v41 = vmul.f32 %v12182_v7, %v12101_v53  ;;  %v12201_v43 = vmul.f32 %v12190_v24, %v12172_v54  ;;  %v12103_v22 = vpop.f32.mrb[119].mxu0  ;;  %v12174_v10 = vpop.f32.mrb[119].mxu1  ;;  %v12962_v54 = vrot.slane %v16602_v28, %v20001_v25 }
 0x67a   : > { %v12200_v11 = vmul.f32 %v12186_v19, %v12103_v22  ;;  %v12202_v20 = vmul.f32 %v12194_v29, %v12174_v10 }
 0x67b   : > { %v12203_v26 = vadd.f32 %v12199_v41, %v12009_v42  ;;  %v12205_v46 = vadd.f32 %v12201_v43, %v12011_v12  ;;  %v12958_v12 = vrot.slane %v16602_v28, %v20000_v33  ;;  %v12970_v41 = vrot.slane %v16602_v28, %v19999_v32  ;;  %v16605_v43 = vld [vmem:[%s19787_s10 + $0x22] ss:$8 sm:$0xf] }
 0x67c   : > { %v12204_v18 = vadd.f32 %v12200_v11, %v12010_v60  ;;  %v12206_v14 = vadd.f32 %v12202_v20, %v12012_v1  ;;  %v12295_v27 = vpop.f32.mrb[120].mxu0  ;;  %v12366_v61 = vpop.f32.mrb[120].mxu1  ;;  %v12966_v60 = vrot.slane %v16602_v28, %v19998_v57 }
 0x67d   : > { %v12393_v4 = vmul.f32 %v12376_v45, %v12295_v27  ;;  %v12395_v44 = vmul.f32 %v12384_v5, %v12366_v61  ;;  %v12297_v35 = vpop.f32.mrb[121].mxu0  ;;  %v12368_v51 = vpop.f32.mrb[121].mxu1  ;;  %v13156_v61 = vrot.slane %v16605_v43, %v20001_v25 }
 0x67e   : > { %v12394_v8 = vmul.f32 %v12380_v36, %v12297_v35  ;;  %v12396_v6 = vmul.f32 %v12388_v47, %v12368_v51 }
 0x67f   : > { %v12397_v50 = vadd.f32 %v12393_v4, %v12203_v26  ;;  %v12399_v34 = vadd.f32 %v12395_v44, %v12205_v46  ;;  %v13152_v46 = vrot.slane %v16605_v43, %v20000_v33  ;;  %v13164_v4 = vrot.slane %v16605_v43, %v19999_v32  ;;  %v16608_v44 = vld [vmem:[%s19787_s10 + $0x23] ss:$8 sm:$0xf] }
 0x680   : > { %v12398_v37 = vadd.f32 %v12394_v8, %v12204_v18  ;;  %v12400_v58 = vadd.f32 %v12396_v6, %v12206_v14  ;;  %v12489_v59 = vpop.f32.mrb[122].mxu0  ;;  %v12560_v38 = vpop.f32.mrb[122].mxu1  ;;  %v13160_v18 = vrot.slane %v16605_v43, %v19998_v57 }
 0x681   : > { %v12587_v13 = vmul.f32 %v12570_v9, %v12489_v59  ;;  %v12589_v15 = vmul.f32 %v12578_v40, %v12560_v38  ;;  %v12491_v49 = vpop.f32.mrb[123].mxu0  ;;  %v12562_v16 = vpop.f32.mrb[123].mxu1  ;;  %v13350_v38 = vrot.slane %v16608_v44, %v20001_v25 }
 0x682   : > { %v12588_v55 = vmul.f32 %v12574_v56, %v12491_v49  ;;  %v12590_v31 = vmul.f32 %v12582_v62, %v12562_v16 }
 0x683   : > { %v12591_v17 = vadd.f32 %v12587_v13, %v12397_v50  ;;  %v12593_v0 = vadd.f32 %v12589_v15, %v12399_v34  ;;  %v13346_v34 = vrot.slane %v16608_v44, %v20000_v33  ;;  %v13358_v13 = vrot.slane %v16608_v44, %v19999_v32  ;;  %v16611_v15 = vld [vmem:[%s19787_s10 + $0x24] ss:$8 sm:$0xf] }
 0x684   : > { %v12592_v7 = vadd.f32 %v12588_v55, %v12398_v37  ;;  %v12594_v24 = vadd.f32 %v12590_v31, %v12400_v58  ;;  %v12683_v23 = vpop.f32.mrb[124].mxu0  ;;  %v12754_v2 = vpop.f32.mrb[124].mxu1  ;;  %v13354_v37 = vrot.slane %v16608_v44, %v19998_v57 }
 0x685   : > { %v12781_v19 = vmul.f32 %v12764_v3, %v12683_v23  ;;  %v12783_v29 = vmul.f32 %v12772_v39, %v12754_v2  ;;  %v12685_v48 = vpop.f32.mrb[125].mxu0  ;;  %v12756_v42 = vpop.f32.mrb[125].mxu1  ;;  %v13544_v2 = vrot.slane %v16611_v15, %v20001_v25 }
 0x686   : > { %v12782_v1 = vmul.f32 %v12768_v21, %v12685_v48  ;;  %v12784_v53 = vmul.f32 %v12776_v52, %v12756_v42 }
 0x687   : > { %v12785_v22 = vadd.f32 %v12781_v19, %v12591_v17  ;;  %v12787_v10 = vadd.f32 %v12783_v29, %v12593_v0  ;;  %v13540_v0 = vrot.slane %v16611_v15, %v20000_v33  ;;  %v13552_v19 = vrot.slane %v16611_v15, %v19999_v32 }
 0x688   : > { %v12786_v45 = vadd.f32 %v12782_v1, %v12592_v7  ;;  %v12788_v5 = vadd.f32 %v12784_v53, %v12594_v24  ;;  %v12877_v11 = vpop.f32.mrb[126].mxu0  ;;  %v12948_v20 = vpop.f32.mrb[126].mxu1  ;;  %v13548_v7 = vrot.slane %v16611_v15, %v19998_v57 }
 0x689   : > { %v12975_v36 = vmul.f32 %v12958_v12, %v12877_v11  ;;  %v12977_v47 = vmul.f32 %v12966_v60, %v12948_v20  ;;  %v12879_v63 = vpop.f32.mrb[127].mxu0  ;;  %v12950_v26 = vpop.f32.mrb[127].mxu1  ;;  %v16616_v11 = vld [vmem:[%s19787_s10 + $0x26] ss:$8 sm:$0xf] }
 0x68a   : > { %v12976_v14 = vmul.f32 %v12962_v54, %v12879_v63  ;;  %v12978_v27 = vmul.f32 %v12970_v41, %v12950_v26 }
 0x68b   : > { %v12979_v35 = vadd.f32 %v12975_v36, %v12785_v22  ;;  %v12981_v51 = vadd.f32 %v12977_v47, %v12787_v10 }
 0x68c   : > { %v12980_v9 = vadd.f32 %v12976_v14, %v12786_v45  ;;  %v12982_v40 = vadd.f32 %v12978_v27, %v12788_v5  ;;  %v13071_v8 = vpop.f32.mrb[128].mxu0  ;;  %v13142_v6 = vpop.f32.mrb[128].mxu1  ;;  %v13894_v27 = vrot.slane %v16616_v11, %v20000_v33 }
 0x68d   : > { %v13169_v56 = vmul.f32 %v13152_v46, %v13071_v8  ;;  %v13171_v62 = vmul.f32 %v13160_v18, %v13142_v6  ;;  %v13073_v30 = vpop.f32.mrb[129].mxu0  ;;  %v13144_v50 = vpop.f32.mrb[129].mxu1 }
 0x68e   : > { %v13170_v58 = vmul.f32 %v13156_v61, %v13073_v30  ;;  %v13172_v59 = vmul.f32 %v13164_v4, %v13144_v50  ;;  %v13902_v61 = vrot.slane %v16616_v11, %v19998_v57 }
 0x68f   : > { %v13173_v49 = vadd.f32 %v13169_v56, %v12979_v35  ;;  %v13175_v16 = vadd.f32 %v13171_v62, %v12981_v51  ;;  %v13898_v35 = vrot.slane %v16616_v11, %v20001_v25  ;;  %v13906_v51 = vrot.slane %v16616_v11, %v19999_v32 }
 0x690   : > { %v13174_v3 = vadd.f32 %v13170_v58, %v12980_v9  ;;  %v13176_v39 = vadd.f32 %v13172_v59, %v12982_v40  ;;  %v13265_v55 = vpop.f32.mrb[130].mxu0  ;;  %v13336_v31 = vpop.f32.mrb[130].mxu1  ;;  %v16619_v9 = vld [vmem:[%s19787_s10 + $0x27] ss:$8 sm:$0xf] }
 0x691   : > { %v13363_v21 = vmul.f32 %v13346_v34, %v13265_v55  ;;  %v13365_v52 = vmul.f32 %v13354_v37, %v13336_v31  ;;  %v13267_v28 = vpop.f32.mrb[131].mxu0  ;;  %v13338_v17 = vpop.f32.mrb[131].mxu1  ;;  %v14088_v50 = vrot.slane %v16619_v9, %v20000_v33  ;;  %v14096_v34 = vrot.slane %v16619_v9, %v19998_v57 }
 0x692   : > { %v13364_v24 = vmul.f32 %v13350_v38, %v13267_v28  ;;  %v13366_v23 = vmul.f32 %v13358_v13, %v13338_v17  ;;  %v14092_v59 = vrot.slane %v16619_v9, %v20001_v25  ;;  %v14100_v38 = vrot.slane %v16619_v9, %v19999_v32  ;;  %v16622_v13 = vld [vmem:[%s19787_s10 + $0x40] ss:$8 sm:$0xf] }
 0x693   : > { %v13367_v29 = vadd.f32 %v13363_v21, %v13173_v49  ;;  %v13369_v48 = vadd.f32 %v13365_v52, %v13175_v16  ;;  %v14282_v17 = vrot.slane %v16622_v13, %v20000_v33 }
 0x694   : > { %v13368_v42 = vadd.f32 %v13364_v24, %v13174_v3  ;;  %v13370_v12 = vadd.f32 %v13366_v23, %v13176_v39  ;;  %v13459_v60 = vpop.f32.mrb[132].mxu0  ;;  %v13530_v1 = vpop.f32.mrb[132].mxu1  ;;  %v14286_v23 = vrot.slane %v16622_v13, %v20001_v25 }
 0x695   : > { %v13557_v53 = vmul.f32 %v13540_v0, %v13459_v60  ;;  %v13559_v54 = vmul.f32 %v13548_v7, %v13530_v1  ;;  %v13461_v41 = vpop.f32.mrb[133].mxu0  ;;  %v13532_v43 = vpop.f32.mrb[133].mxu1  ;;  %v14290_v0 = vrot.slane %v16622_v13, %v19998_v57 }
 0x696   : > { %v13558_v22 = vmul.f32 %v13544_v2, %v13461_v41  ;;  %v13560_v10 = vmul.f32 %v13552_v19, %v13532_v43  ;;  %v14294_v2 = vrot.slane %v16622_v13, %v19999_v32  ;;  %v16625_v19 = vld [vmem:[%s19787_s10 + $0x41] ss:$8 sm:$0xf] }
 0x697   : > { %v13561_v45 = vadd.f32 %v13557_v53, %v13367_v29  ;;  %v13563_v5 = vadd.f32 %v13559_v54, %v13369_v48  ;;  %v14480_v11 = vrot.slane %v16625_v19, %v20001_v25 }
 0x698   : > { %v13562_v20 = vadd.f32 %v13558_v22, %v13368_v42  ;;  %v13564_v36 = vadd.f32 %v13560_v10, %v13370_v12  ;;  %v14476_v22 = vrot.slane %v16625_v19, %v20000_v33  ;;  %v14484_v10 = vrot.slane %v16625_v19, %v19998_v57 }
 0x699   : > { %v13635_v47 = vpop.f32.mrb[134].mxu0  ;;  %v13706_v63 = vpop.f32.mrb[134].mxu1 }
 0x69a   : > { %v13711_v26 = vadd.f32 %v13635_v47, %v13561_v45  ;;  %v13713_v46 = vadd.f32 %v13706_v63, %v13563_v5  ;;  %v13637_v18 = vpop.f32.mrb[135].mxu0  ;;  %v13708_v14 = vpop.f32.mrb[135].mxu1 }
 0x69b   : > { %v13712_v4 = vadd.f32 %v13637_v18, %v13562_v20  ;;  %v13714_v44 = vadd.f32 %v13708_v14, %v13564_v36  ;;  %v14488_v20 = vrot.slane %v16625_v19, %v19999_v32  ;;  %v16628_v36 = vld [vmem:[%s19787_s10 + $0x42] ss:$8 sm:$0xf] }
 0x69d   : > { %v13813_v40 = vpop.f32.mrb[136].mxu0  ;;  %v13884_v8 = vpop.f32.mrb[136].mxu1 }
 0x69e   : > { %v13911_v6 = vmul.f32 %v13894_v27, %v13813_v40  ;;  %v13913_v56 = vmul.f32 %v13902_v61, %v13884_v8  ;;  %v13815_v62 = vpop.f32.mrb[137].mxu0  ;;  %v13886_v30 = vpop.f32.mrb[137].mxu1  ;;  %v14674_v8 = vrot.slane %v16628_v36, %v20001_v25 }
 0x69f   : > { %v13912_v37 = vmul.f32 %v13898_v35, %v13815_v62  ;;  %v13914_v58 = vmul.f32 %v13906_v51, %v13886_v30  ;;  %v14670_v35 = vrot.slane %v16628_v36, %v20000_v33  ;;  %v14678_v51 = vrot.slane %v16628_v36, %v19998_v57 }
 0x6a0   : > { %v13915_v15 = vadd.f32 %v13911_v6, %v13711_v26  ;;  %v13917_v49 = vadd.f32 %v13913_v56, %v13713_v46  ;;  %v14682_v6 = vrot.slane %v16628_v36, %v19999_v32  ;;  %v16631_v56 = vld [vmem:[%s19787_s10 + $0x43] ss:$8 sm:$0xf] }
 0x6a1   : > { %v13916_v16 = vadd.f32 %v13912_v37, %v13712_v4  ;;  %v13918_v3 = vadd.f32 %v13914_v58, %v13714_v44  ;;  %v14007_v39 = vpop.f32.mrb[138].mxu0  ;;  %v14078_v55 = vpop.f32.mrb[138].mxu1 }
 0x6a2   : > { %v14105_v31 = vmul.f32 %v14088_v50, %v14007_v39  ;;  %v14107_v21 = vmul.f32 %v14096_v34, %v14078_v55  ;;  %v14009_v52 = vpop.f32.mrb[139].mxu0  ;;  %v14080_v28 = vpop.f32.mrb[139].mxu1  ;;  %v14868_v55 = vrot.slane %v16631_v56, %v20001_v25 }
 0x6a3   : > { %v14106_v7 = vmul.f32 %v14092_v59, %v14009_v52  ;;  %v14108_v24 = vmul.f32 %v14100_v38, %v14080_v28 }
 0x6a4   : > { %v14109_v29 = vadd.f32 %v14105_v31, %v13915_v15  ;;  %v14111_v48 = vadd.f32 %v14107_v21, %v13917_v49  ;;  %v14864_v49 = vrot.slane %v16631_v56, %v20000_v33  ;;  %v14876_v31 = vrot.slane %v16631_v56, %v19999_v32  ;;  %v16634_v21 = vld [vmem:[%s19787_s10 + $0x44] ss:$8 sm:$0xf] }
 0x6a5   : > { %v14110_v42 = vadd.f32 %v14106_v7, %v13916_v16  ;;  %v14112_v12 = vadd.f32 %v14108_v24, %v13918_v3  ;;  %v14201_v60 = vpop.f32.mrb[140].mxu0  ;;  %v14272_v1 = vpop.f32.mrb[140].mxu1  ;;  %v14872_v16 = vrot.slane %v16631_v56, %v19998_v57 }
 0x6a6   : > { %v14299_v53 = vmul.f32 %v14282_v17, %v14201_v60  ;;  %v14301_v54 = vmul.f32 %v14290_v0, %v14272_v1  ;;  %v14203_v41 = vpop.f32.mrb[141].mxu0  ;;  %v14274_v43 = vpop.f32.mrb[141].mxu1  ;;  %v15062_v1 = vrot.slane %v16634_v21, %v20001_v25 }
 0x6a7   : > { %v14300_v45 = vmul.f32 %v14286_v23, %v14203_v41  ;;  %v14302_v5 = vmul.f32 %v14294_v2, %v14274_v43 }
 0x6a8   : > { %v14303_v47 = vadd.f32 %v14299_v53, %v14109_v29  ;;  %v14305_v63 = vadd.f32 %v14301_v54, %v14111_v48  ;;  %v15058_v48 = vrot.slane %v16634_v21, %v20000_v33  ;;  %v15070_v53 = vrot.slane %v16634_v21, %v19999_v32  ;;  %v16637_v54 = vld [vmem:[%s19787_s10 + $0x45] ss:$8 sm:$0xf] }
 0x6a9   : > { %v14304_v26 = vadd.f32 %v14300_v45, %v14110_v42  ;;  %v14306_v46 = vadd.f32 %v14302_v5, %v14112_v12  ;;  %v14395_v18 = vpop.f32.mrb[142].mxu0  ;;  %v14466_v14 = vpop.f32.mrb[142].mxu1  ;;  %v15066_v42 = vrot.slane %v16634_v21, %v19998_v57 }
 0x6aa   : > { %v14493_v27 = vmul.f32 %v14476_v22, %v14395_v18  ;;  %v14495_v61 = vmul.f32 %v14484_v10, %v14466_v14  ;;  %v14397_v4 = vpop.f32.mrb[143].mxu0  ;;  %v14468_v44 = vpop.f32.mrb[143].mxu1  ;;  %v15256_v14 = vrot.slane %v16637_v54, %v20001_v25 }
 0x6ab   : > { %v14494_v9 = vmul.f32 %v14480_v11, %v14397_v4  ;;  %v14496_v40 = vmul.f32 %v14488_v20, %v14468_v44 }
 0x6ac   : > { %v14497_v62 = vadd.f32 %v14493_v27, %v14303_v47  ;;  %v14499_v30 = vadd.f32 %v14495_v61, %v14305_v63  ;;  %v15252_v63 = vrot.slane %v16637_v54, %v20000_v33  ;;  %v15264_v27 = vrot.slane %v16637_v54, %v19999_v32  ;;  %v16640_v61 = vld [vmem:[%s19787_s10 + $0x46] ss:$8 sm:$0xf] }
 0x6ad   : > { %v14498_v50 = vadd.f32 %v14494_v9, %v14304_v26  ;;  %v14500_v34 = vadd.f32 %v14496_v40, %v14306_v46  ;;  %v14589_v37 = vpop.f32.mrb[144].mxu0  ;;  %v14660_v58 = vpop.f32.mrb[144].mxu1  ;;  %v15260_v26 = vrot.slane %v16637_v54, %v19998_v57 }
 0x6ae   : > { %v14687_v59 = vmul.f32 %v14670_v35, %v14589_v37  ;;  %v14689_v38 = vmul.f32 %v14678_v51, %v14660_v58  ;;  %v14591_v13 = vpop.f32.mrb[145].mxu0  ;;  %v14662_v15 = vpop.f32.mrb[145].mxu1  ;;  %v15450_v58 = vrot.slane %v16640_v61, %v20001_v25 }
 0x6af   : > { %v14688_v3 = vmul.f32 %v14674_v8, %v14591_v13  ;;  %v14690_v39 = vmul.f32 %v14682_v6, %v14662_v15 }
 0x6b0   : > { %v14691_v52 = vadd.f32 %v14687_v59, %v14497_v62  ;;  %v14693_v28 = vadd.f32 %v14689_v38, %v14499_v30  ;;  %v15446_v30 = vrot.slane %v16640_v61, %v20000_v33  ;;  %v15458_v59 = vrot.slane %v16640_v61, %v19999_v32  ;;  %v16643_v38 = vld [vmem:[%s19787_s10 + $0x47] ss:$8 sm:$0xf] }
 0x6b1   : > { %v14692_v17 = vadd.f32 %v14688_v3, %v14498_v50  ;;  %v14694_v0 = vadd.f32 %v14690_v39, %v14500_v34  ;;  %v14783_v7 = vpop.f32.mrb[146].mxu0  ;;  %v14854_v24 = vpop.f32.mrb[146].mxu1  ;;  %v15454_v50 = vrot.slane %v16640_v61, %v19998_v57 }
 0x6b2   : > { %v14881_v23 = vmul.f32 %v14864_v49, %v14783_v7  ;;  %v14883_v2 = vmul.f32 %v14872_v16, %v14854_v24  ;;  %v14785_v19 = vpop.f32.mrb[147].mxu0  ;;  %v14856_v29 = vpop.f32.mrb[147].mxu1  ;;  %v15644_v24 = vrot.slane %v16643_v38, %v20001_v25 }
 0x6b3   : > { %v14882_v12 = vmul.f32 %v14868_v55, %v14785_v19  ;;  %v14884_v60 = vmul.f32 %v14876_v31, %v14856_v29 }
 0x6b4   : > { %v14885_v41 = vadd.f32 %v14881_v23, %v14691_v52  ;;  %v14887_v43 = vadd.f32 %v14883_v2, %v14693_v28  ;;  %v15640_v28 = vrot.slane %v16643_v38, %v20000_v33  ;;  %v15652_v23 = vrot.slane %v16643_v38, %v19999_v32  ;;  %v16646_v2 = vld [vmem:[%s19787_s10 + $0x60] ss:$8 sm:$0xf] }
 0x6b5   : > { %v14886_v22 = vadd.f32 %v14882_v12, %v14692_v17  ;;  %v14888_v10 = vadd.f32 %v14884_v60, %v14694_v0  ;;  %v14977_v45 = vpop.f32.mrb[148].mxu0  ;;  %v15048_v5 = vpop.f32.mrb[148].mxu1  ;;  %v15648_v17 = vrot.slane %v16643_v38, %v19998_v57 }
 0x6b6   : > { %v15075_v11 = vmul.f32 %v15058_v48, %v14977_v45  ;;  %v15077_v20 = vmul.f32 %v15066_v42, %v15048_v5  ;;  %v14979_v36 = vpop.f32.mrb[149].mxu0  ;;  %v15050_v47 = vpop.f32.mrb[149].mxu1  ;;  %v15838_v5 = vrot.slane %v16646_v2, %v20001_v25 }
 0x6b7   : > { %v15076_v46 = vmul.f32 %v15062_v1, %v14979_v36  ;;  %v15078_v18 = vmul.f32 %v15070_v53, %v15050_v47 }
 0x6b8   : > { %v15079_v4 = vadd.f32 %v15075_v11, %v14885_v41  ;;  %v15081_v44 = vadd.f32 %v15077_v20, %v14887_v43  ;;  %v15834_v43 = vrot.slane %v16646_v2, %v20000_v33  ;;  %v15846_v11 = vrot.slane %v16646_v2, %v19999_v32  ;;  %v16649_v20 = vld [vmem:[%s19787_s10 + $0x61] ss:$8 sm:$0xf] }
 0x6b9   : > { %v15080_v35 = vadd.f32 %v15076_v46, %v14886_v22  ;;  %v15082_v51 = vadd.f32 %v15078_v18, %v14888_v10  ;;  %v15171_v9 = vpop.f32.mrb[150].mxu0  ;;  %v15242_v40 = vpop.f32.mrb[150].mxu1  ;;  %v15842_v22 = vrot.slane %v16646_v2, %v19998_v57 }
 0x6ba   : > { %v15269_v8 = vmul.f32 %v15252_v63, %v15171_v9  ;;  %v15271_v6 = vmul.f32 %v15260_v26, %v15242_v40  ;;  %v15173_v56 = vpop.f32.mrb[151].mxu0  ;;  %v15244_v62 = vpop.f32.mrb[151].mxu1  ;;  %v16032_v40 = vrot.slane %v16649_v20, %v20001_v25 }
 0x6bb   : > { %v15270_v34 = vmul.f32 %v15256_v14, %v15173_v56  ;;  %v15272_v37 = vmul.f32 %v15264_v27, %v15244_v62 }
 0x6bc   : > { %v15273_v13 = vadd.f32 %v15269_v8, %v15079_v4  ;;  %v15275_v15 = vadd.f32 %v15271_v6, %v15081_v44  ;;  %v16028_v44 = vrot.slane %v16649_v20, %v20000_v33  ;;  %v16040_v8 = vrot.slane %v16649_v20, %v19999_v32  ;;  %v16652_v6 = vld [vmem:[%s19787_s10 + $0x62] ss:$8 sm:$0xf] }
 0x6bd   : > { %v15274_v49 = vadd.f32 %v15270_v34, %v15080_v35  ;;  %v15276_v16 = vadd.f32 %v15272_v37, %v15082_v51  ;;  %v15365_v3 = vpop.f32.mrb[152].mxu0  ;;  %v15436_v39 = vpop.f32.mrb[152].mxu1  ;;  %v16036_v35 = vrot.slane %v16649_v20, %v19998_v57 }
 0x6be   : > { %v15463_v55 = vmul.f32 %v15446_v30, %v15365_v3  ;;  %v15465_v31 = vmul.f32 %v15454_v50, %v15436_v39  ;;  %v15367_v21 = vpop.f32.mrb[153].mxu0  ;;  %v15438_v52 = vpop.f32.mrb[153].mxu1  ;;  %v16226_v3 = vrot.slane %v16652_v6, %v20001_v25 }
 0x6bf   : > { %v15464_v0 = vmul.f32 %v15450_v58, %v15367_v21  ;;  %v15466_v7 = vmul.f32 %v15458_v59, %v15438_v52 }
 0x6c0   : > { %v15467_v19 = vadd.f32 %v15463_v55, %v15273_v13  ;;  %v15469_v29 = vadd.f32 %v15465_v31, %v15275_v15  ;;  %v16222_v15 = vrot.slane %v16652_v6, %v20000_v33 }
 0x6c1   : > { %v15468_v48 = vadd.f32 %v15464_v0, %v15274_v49  ;;  %v15470_v42 = vadd.f32 %v15466_v7, %v15276_v16  ;;  %v15559_v12 = vpop.f32.mrb[154].mxu0  ;;  %v15630_v60 = vpop.f32.mrb[154].mxu1  ;;  %v16234_v7 = vrot.slane %v16652_v6, %v19999_v32 }
 0x6c2   : > { %v15657_v1 = vmul.f32 %v15640_v28, %v15559_v12  ;;  %v15659_v53 = vmul.f32 %v15648_v17, %v15630_v60  ;;  %v15561_v54 = vpop.f32.mrb[155].mxu0  ;;  %v15632_v41 = vpop.f32.mrb[155].mxu1  ;;  %v16230_v28 = vrot.slane %v16652_v6, %v19998_v57 }
 0x6c3   : > { %v15658_v10 = vmul.f32 %v15644_v24, %v15561_v54  ;;  %v15660_v45 = vmul.f32 %v15652_v23, %v15632_v41  ;;  %v16261_v60 = vpop.permute.xlu0 %16260 }
 0x6c4   : > { %v15661_v36 = vadd.f32 %v15657_v1, %v15467_v19  ;;  %v15663_v47 = vadd.f32 %v15659_v53, %v15469_v29  ;;  %v16251_v19 = vpop.permute.xlu1 %16250 }
 0x6c5   : > { %v15662_v63 = vadd.f32 %v15658_v10, %v15468_v48  ;;  %v15664_v26 = vadd.f32 %v15660_v45, %v15470_v42  ;;  %v15753_v46 = vpop.f32.mrb[156].mxu0  ;;  %v15824_v18 = vpop.f32.mrb[156].mxu1 }
 0x6c6   : > { %v15851_v14 = vmul.f32 %v15834_v43, %v15753_v46  ;;  %v15853_v27 = vmul.f32 %v15842_v22, %v15824_v18  ;;  %v15755_v61 = vpop.f32.mrb[157].mxu0  ;;  %v15826_v4 = vpop.f32.mrb[157].mxu1 }
 0x6c7   : > { %v15852_v51 = vmul.f32 %v15838_v5, %v15755_v61  ;;  %v15854_v9 = vmul.f32 %v15846_v11, %v15826_v4 }
 0x6c8   : > { %v15855_v56 = vadd.f32 %v15851_v14, %v15661_v36  ;;  %v15857_v62 = vadd.f32 %v15853_v27, %v15663_v47  ;;  %v16286_v27 = vld [vmem:[%s19788_s11] sm:$0xff] }
 0x6c9   : > { %v15856_v30 = vadd.f32 %v15852_v51, %v15662_v63  ;;  %v15858_v50 = vadd.f32 %v15854_v9, %v15664_v26  ;;  %v15947_v34 = vpop.f32.mrb[158].mxu0  ;;  %v16018_v37 = vpop.f32.mrb[158].mxu1 }
 0x6ca   : > { %v16045_v58 = vmul.f32 %v16028_v44, %v15947_v34  ;;  %v16047_v59 = vmul.f32 %v16036_v35, %v16018_v37  ;;  %v15949_v38 = vpop.f32.mrb[159].mxu0  ;;  %v16020_v13 = vpop.f32.mrb[159].mxu1  ;;  %v16301_v37 = vld [vmem:[%s20002_s18] sm:$0xff]  ;;  %s16735_s18 = scalar_lea.vmem %s16734_s27, 1024 }
 0x6cb   : > { %v16046_v49 = vmul.f32 %v16032_v40, %v15949_v38  ;;  %v16048_v16 = vmul.f32 %v16040_v8, %v16020_v13  ;;  %v16310_v13 = vld [vmem:[%s20005_s24] sm:$0xff]  ;;  %p16737_p1 = scmp.lt.s32.totalorder %s16735_s18, %s16729_s23 }
 0x6cc   : > { %v16049_v39 = vadd.f32 %v16045_v58, %v15855_v56  ;;  %v16051_v55 = vadd.f32 %v16047_v59, %v15857_v62  ;;  %v16296_v56 = vld [vmem:[%s19789_s12] sm:$0x1] }
 0x6cd   : > { %v16050_v31 = vadd.f32 %v16046_v49, %v15856_v30  ;;  %v16052_v21 = vadd.f32 %v16048_v16, %v15858_v50  ;;  %v16141_v52 = vpop.f32.mrb[160].mxu0  ;;  %p16738_p2 = por %p16737_p1, %p16736_p0 }
 0x6ce   : > { %v16239_v17 = vmul.f32 %v16222_v15, %v16141_v52  ;;  %v16143_v0 = vpop.f32.mrb[161].mxu0 }
 0x6cf   : > { %v16240_v24 = vmul.f32 %v16226_v3, %v16143_v0  ;;  %p16739_p3 = pnand %p16738_p2, %p16732_p13 }
 0x6d0   : > { %v16243_v23 = vadd.f32 %v16239_v17, %v16049_v39  ;;  %v16212_v2 = vpop.f32.mrb[160].mxu1  ;;  %v16725_v17 = vld [vmem:[%s20006_s13] sm:$0xff] }
 0x6d1   : > { %v16244_v29 = vadd.f32 %v16240_v24, %v16050_v31  ;;  %v16241_v48 = vmul.f32 %v16230_v28, %v16212_v2  ;;  %v16214_v42 = vpop.f32.mrb[161].mxu1 }
 0x6d2   : > { %v16253_v12 = vmul.f32 %v16251_v19, %v16243_v23  ;;  %v16242_v25 = vmul.f32 %v16234_v7, %v16214_v42  ;;  %v16726_v7 = vld [vmem:[%s20006_s13 + $0x8] sm:$0xff]  ;;  %v16727_v23 = vld [vmem:[%s20006_s13 + $0x10] sm:$0xff] }
 0x6d3   : > { %v16254_v1 = vmul.f32 %v16251_v19, %v16244_v29  ;;  %v16245_v53 = vadd.f32 %v16241_v48, %v16051_v55 }
 0x6d4   : > { %v16263_v54 = vadd.f32 %v16261_v60, %v16253_v12  ;;  %v16246_v41 = vadd.f32 %v16242_v25, %v16052_v21 }
 0x6d5   : > { %v16264_v43 = vadd.f32 %v16261_v60, %v16254_v1  ;;  %v16255_v57 = vmul.f32 %v16251_v19, %v16245_v53 }
 0x6d6   : > { %vm16267_vm0 = vcmp.gt.f32.partialorder %v16263_v54, 0.0  ;;  %v16271_v22 = vmul.f32 0.1, %v16263_v54  ;;  %v16256_v10 = vmul.f32 %v16251_v19, %v16246_v41  ;;  %v16728_v19 = vld [vmem:[%s20006_s13 + $0x18] sm:$0xff] }
 0x6d7   : > { %vm16268_vm1 = vcmp.gt.f32.partialorder %v16264_v43, 0.0  ;;  %v16272_v32 = vmul.f32 0.1, %v16264_v43  ;;  %v16265_v45 = vadd.f32 %v16261_v60, %v16255_v57 }
 0x6d8   : > { %v16266_v5 = vadd.f32 %v16261_v60, %v16256_v10  ;;  %v16275_v11 = vsel %vm16267_vm0, %v16263_v54, %v16271_v22 }
 0x6d9   : > { %v16273_v20 = vmul.f32 0.1, %v16265_v45  ;;  %vm16269_vm2 = vcmp.gt.f32.partialorder %v16265_v45, 0.0  ;;  %v16276_v36 = vsel %vm16268_vm1, %v16264_v43, %v16272_v32 }
 0x6da   : > { %vm16270_vm3 = vcmp.gt.f32.partialorder %v16266_v5, 0.0  ;;  %v16274_v47 = vmul.f32 0.1, %v16266_v5  ;;  %v16279_v63 = vadd.f32 %v16276_v36, %v16275_v11 }
 0x6db   : > { %v16277_v26 = vsel %vm16269_vm2, %v16265_v45, %v16273_v20 }
 0x6dc   : > { %v16278_v46 = vsel %vm16270_vm3, %v16266_v5, %v16274_v47  ;;  %v16280_v18 = vadd.f32 %v16279_v63, %v16277_v26 }
 0x6de   : > { %v16281_v14 = vadd.f32 %v16280_v18, %v16278_v46 }
 0x6e0   : > { %16282 = vadd.xlane.f32.xlu1 %v16281_v14 }
 0x76d   : > { %v16283_v61 = vpop.xlane.xlu1 %16282 }
 0x76e   : > { %v16285_v4 = vmul.f32 0.001953125, %v16283_v61 }
 0x770   : > { %v16287_v44 = vmul.f32 %v16286_v27, %v16285_v4 }
 0x772   : > { %v16289_v35 = vsel %vm16288_vm4, %v16287_v44, 0.0 }
 0x773   : > { %v16290_v51 = vrot.slane %v16289_v35, 4 }
 0x775   : > { %v16291_v9 = vadd.f32 %v16290_v51, %v16289_v35 }
 0x777   : > { %v16292_v40 = vrot.slane %v16291_v9, 2 }
 0x779   : > { %v16293_v8 = vadd.f32 %v16292_v40, %v16291_v9 }
 0x77b   : > { %v16294_v6 = vrot.slane %v16293_v8, 1 }
 0x77d   : > { %v16295_v62 = vadd.f32 %v16294_v6, %v16293_v8 }
 0x77f   : > { %v16297_v30 = vadd.f32 %v16296_v56, %v16295_v62 }
 0x781   : > { %vm16298_vm5 = vcmp.gt.f32.partialorder %v16297_v30, 0.0  ;;  %v16299_v50 = vmul.f32 0.1, %v16297_v30 }
 0x783   : > { %v16300_v34 = vsel %vm16298_vm5, %v16297_v30, %v16299_v50 }
 0x784   : > { %v16305_v58 = vrot.slane %v16300_v34, %v20000_v33 }
 0x786   : > { %v16306_v59 = vmul.f32 %v16305_v58, %v16301_v37 }
 0x788   : > { %v16307_v38 = vsel %vm16288_vm4, %v16306_v59, 0.0 }
 0x789   : > { %16308 = vadd.xlane.f32.xlu0 %v16307_v38 }
 0x816   : > { %v16309_v15 = vpop.xlane.xlu0 %16308 }
 0x817   : > { %v16311_v49 = vadd.f32 %v16310_v13, %v16309_v15 }
 0x819   : > { %v16653_v16 = vmul.f32 -1.442695, %v16311_v49 }
 0x81b   : > { %16721 = vpow2.f32 %v16653_v16 }
 0x825   : > { %v16722_v3 = vpop.eup %16721 }
 0x826   : > { %v16315_v39 = vadd.f32 1.0, %v16722_v3 }
 0x828   : > { %16723 = vrcp.f32 %v16315_v39 }
 0x832   : > { %v16724_v55 = vpop.eup %16723 }
 0x833   : > { %16320 = vperm.xlu0 %16719, %v16724_v55  }
 0x8b2   : > { %v16321_v33 = vpop.permute.xlu0 %16320 }
 0x8b3   : > { %v16323_v31 = vmul.f32 %v16321_v33, %v16275_v11  ;;  %v16324_v21 = vmul.f32 %v16321_v33, %v16276_v36  ;;  %v16325_v52 = vmul.f32 %v16321_v33, %v16277_v26  ;;  %v16326_v28 = vmul.f32 %v16321_v33, %v16278_v46 }
 0x8b5   : > { %v16327_v0 = vadd.f32 %v16725_v17, %v16323_v31  ;;  %v16328_v24 = vadd.f32 %v16726_v7, %v16324_v21  ;;  %v16329_v2 = vadd.f32 %v16727_v23, %v16325_v52  ;;  %v16330_v29 = vadd.f32 %v16728_v19, %v16326_v28 }
 0x8b7   : > { %16331 = vst [vmem:[%s487_s0] sm:$0xff] %v16327_v0  ;;  %16332 = vst [vmem:[%s487_s0 + $0x8] sm:$0xff] %v16328_v24 }
 0x8b8   : > { %16333 = vst [vmem:[%s487_s0 + $0x10] sm:$0xff] %v16329_v2  ;;  %16334 = vst [vmem:[%s487_s0 + $0x18] sm:$0xff] %v16330_v29 }
 0x8b9   : > { %16742 = shalt.err (!%p16739_p3)
}
 0x8ba   : > { %s16743_s25 = scalar_lea.hbm %s19735_s29, 512  ;;  %s16747_s28 = scalar_lea.hbm %s20008_s17, 1024 }
 0x8bb   : > { %p16744_p4 = scmp.ne.s32.totalorder %s19735_s29, %s16743_s25  ;;  %p16748_p9 = scmp.lt.u32.totalorder %s19735_s29, %s20008_s17 }
 0x8bc   : > { %p16749_p10 = scmp.lt.u32.totalorder %s16747_s28, %s16743_s25  ;;  %p16751_p12 = scmp.lt.u32.totalorder %s16743_s25, %s19735_s29 }
 0x8bd   : > { %p16745_p7 = pnand %p16744_p4, %p16931_p5 }
 0x8be   : > { %p16750_p11 = por %p16749_p10, %p16748_p9 }
 0x8bf   : > { %p16746_p8 = pneg %p16745_p7 }
 0x8c0   : > { %p16752_p13 = por %p16751_p12, %p16750_p11 }
 0x8c2   : > { %p16753_p0 = pnand %p16752_p13, %p16746_p8 }
 0x8c4   : > { %16756 = shalt.err (!%p16753_p0)
}
 0x8c5   : > { %16661 = dma.vmem_to_hbm [thread:$0]  (%p16931_p5), %s19737_s2, 512, %s19735_s29, %s16336_s16  }
 0x8c6 PF: > { %s20009_s19 = sld [smem:[#allocation9_spill]]  ;;  %s20010_s14 = sld [smem:[#allocation6_spill]] }
 0x8cc   : > { %p16667_p1 = scmp.ge.s32.totalorder %s20009_s19, 2  ;;  %s16362_s0 = sand.u32 1, %s20010_s14  }
 0x8cd   : > { %s16363_s20 = scalar_lea.sflag [#allocation4], %s16362_s0 }
 0x8ce   : > { %p16664_p2 = pnand %p16667_p1, %p16935_p6 }
 0x8d0   : > { %16774 = dma.done.wait (!%p16664_p2), %s16363_s20, 512  }
 0x8d1   : > { %16776 = vsyncadd (!%p16664_p2), %s16363_s20, 4294966784  ;;  %s20012_s21 = sld [smem:[#allocation11_spill]]  ;;  %s20013_s18 = sld [smem:[#allocation7_spill]] }
 0x8d2   : > { %s20014_s19 = sld [smem:[#allocation8_spill]]  ;;  %s20015_s20 = sld [smem:[#allocation12_spill]] }
 0x8d7   : > { %p25_p3 = scmp.ge.s32.totalorder %s20012_s21, 4  }
 0x8d9   :  { %27 = sbr.rel (!%p25_p3) target bundleno = 10 (0xa), region = 140 }
 0x8e0   :  { %16368 = vsyncpa [#allocation4], 1 }
 0x8e1   :  { %16370 = vsyncpa [#allocation4 + $0x1], 1 }

</bundles_post_ra>
